<compile_context>
chip_gen: v7x
topology: tpu7x:2x2x1
jax: 0.10.0
libtpu: 0.0.40
codegen_flags: <defaults>
</compile_context>

<pallas_src>
import jax
import jax.numpy as jnp
from jax.experimental import pallas as pl
from jax.experimental.pallas import tpu as pltpu


# ---------------------------------------------------------------------------
# Parameter init (same shapes as the PyTorch module, HWIO layout).
# ---------------------------------------------------------------------------
_LAYER_SPECS = [
    # name,   k, cin, cout, stride, padding
    ("conv1", 2,   3, 256, 2, 0),
    ("conv2", 2, 256, 256, 2, 0),
    ("conv3", 3, 256, 128, 1, 1),
    ("conv4", 2, 128, 256, 2, 0),
    ("conv5", 3, 256, 256, 1, 1),
    ("conv6", 3, 256, 128, 1, 1),
    ("conv7", 3, 128, 256, 1, 1),
    ("conv8", 1, 256,  64, 1, 0),   # csize = 64
]


def init_params(key):
    params = {}
    for name, k, cin, cout, _, _ in _LAYER_SPECS:
        key, wk, bk = jax.random.split(key, 3)
        fan_in = cin * k * k
        bound = 1.0 / (fan_in ** 0.5)  # nn.Conv2d default uniform bound
        w = jax.random.uniform(wk, (k, k, cin, cout), jnp.float32, -bound, bound)
        b = jax.random.uniform(bk, (cout,), jnp.float32, -bound, bound)
        params[name] = (w, b)
    return params


# ---------------------------------------------------------------------------
# Fused tower kernel (one invocation per batch element).
# ---------------------------------------------------------------------------
def _make_tower_kernel(M2, W2, PAD):
    """M2 = (H/4)*(W/4) rows of the quarter-resolution grid, W2 = W/4,
    PAD = 8-aligned halo row count of the padded row buffers."""
    F32, BF16 = jnp.float32, jnp.bfloat16

    def relu(v):
        return jnp.maximum(v, 0.0)

    def kernel(a1_ref, cmask_ref,
               w1, b1, w2, b2, w3, b3, w4, b4,
               w5, b5, w6, b6, w7, b7, w8, b8,
               out_ref, buf1, buf2, buf3):

        def col_mask(tap, sx):
            # Zero rows whose column index wraps across a row boundary when the
            # flat row index is shifted by +-1 column.
            if sx == -1:
                return tap * cmask_ref[0]
            if sx == 1:
                return tap * cmask_ref[1]
            return tap

        # Scratch persists across grid steps and the batch axis is "parallel",
        # so every step fully (re)initialises its halos.
        buf1[...] = jnp.zeros(buf1.shape, F32)
        buf2[...] = jnp.zeros(buf2.shape, F32)
        buf3[...] = jnp.zeros(buf3.shape, F32)

        # ---- conv1 (2x2 s2): one matmul on the parity-ordered patch matrix --
        s1 = relu(jnp.dot(a1_ref[...], w1[...],
                          preferred_element_type=F32) + b1[...])   # (4*M2, 256)
        for p in range(4):                                          # halo buffers
            buf1[p, PAD:PAD + M2, :] = s1[p * M2:(p + 1) * M2, :]

        # ---- conv2 (2x2 s2): taps are contiguous parity row blocks of s1 ----
        acc = jnp.zeros((M2, 256), F32)
        for p in range(4):
            acc += jnp.dot(s1[p * M2:(p + 1) * M2, :].astype(BF16), w2[p],
                           preferred_element_type=F32)
        skip_out1 = relu(acc + b2[...])                             # (M2, 256)

        # ---- conv3 (3x3 s1 p1) producing parity-decomposed output -----------
        r3 = []
        for qy in (0, 1):
            for qx in (0, 1):
                acc = jnp.zeros((M2, 128), F32)
                for dy in (-1, 0, 1):
                    for dx in (-1, 0, 1):
                        sy, ry = divmod(qy + dy, 2)   # source parity + coarse shift
                        sx, rx = divmod(qx + dx, 2)
                        t = sy * W2 + sx
                        tap = buf1[ry * 2 + rx, PAD + t:PAD + t + M2, :]
                        tap = col_mask(tap, sx)
                        acc += jnp.dot(tap.astype(BF16),
                                       w3[(dy + 1) * 3 + (dx + 1)],
                                       preferred_element_type=F32)
                r3.append(relu(acc + b3[...]))                      # (M2, 128)

        # ---- conv4 (2x2 s2) + residual (relu first, then add) ---------------
        acc = jnp.zeros((M2, 256), F32)
        for q in range(4):
            acc += jnp.dot(r3[q].astype(BF16), w4[q],
                           preferred_element_type=F32)
        skip_in2 = relu(acc + b4[...]) + skip_out1                  # (M2, 256)
        buf2[PAD:PAD + M2, :] = skip_in2

        # ---- generic 3x3 s1 p1 conv on the quarter-resolution grid ----------
        def conv3x3(src_ref, ww, bb, cout):
            a = jnp.zeros((M2, cout), F32)
            for dy in (-1, 0, 1):
                for dx in (-1, 0, 1):
                    t = dy * W2 + dx
                    tap = col_mask(src_ref[PAD + t:PAD + t + M2, :], dx)
                    a += jnp.dot(tap.astype(BF16),
                                 ww[(dy + 1) * 3 + (dx + 1)],
                                 preferred_element_type=F32)
            return a + bb[...]

        skip_out2 = relu(conv3x3(buf2, w5, b5, 256))
        r6 = relu(conv3x3(buf2, w6, b6, 128))
        buf3[PAD:PAD + M2, :] = r6
        r7 = relu(conv3x3(buf3, w7, b7, 256)) + skip_out2

        # ---- conv8 (1x1, Cout padded to 128 -> lane-dense store) ------------
        out = relu(jnp.dot(r7.astype(BF16), w8[...],
                           preferred_element_type=F32) + b8[...])
        out_ref[...] = out.astype(out_ref.dtype)

    return kernel


# ---------------------------------------------------------------------------
# Forward pass (accepts / returns NCHW like the PyTorch module).
# ---------------------------------------------------------------------------
def encoder_tower_forward(params, x_nchw):
    x = jnp.transpose(x_nchw, (0, 2, 3, 1)).astype(jnp.float32)     # NHWC
    N, H, W, C = x.shape
    assert C == 3 and H % 4 == 0 and W % 4 == 0, (N, C, H, W)
    H2, W2 = H // 4, W // 4
    M2 = H2 * W2
    PAD = ((W2 + 1 + 7) // 8) * 8            # 8-aligned halo row count
    PADM = M2 + 2 * PAD

    # conv1 patch matrix: parity-major space-to-depth of the input (bijective,
    # no read amplification).  Row (p=2*py+px)*M2 + i2*W2 + j2 holds the 2x2x3
    # patch of fine position (2*i2+py, 2*j2+px), flattened (ky, kx, c).
    xr = x.reshape(N, H2, 2, 2, W2, 2, 2, 3)          # (N, i2, py, ky, j2, px, kx, c)
    a1 = jnp.transpose(xr, (0, 2, 5, 1, 4, 3, 6, 7))  # (N, py, px, i2, j2, ky, kx, c)
    a1 = a1.reshape(N, 4 * M2, 12).astype(jnp.bfloat16)

    # Column-validity masks for the +-1 column shifts (tiny, precomputed).
    j2 = jnp.arange(M2, dtype=jnp.int32) % W2
    cmask = jnp.stack([(j2 >= 1), (j2 <= W2 - 2)]).astype(jnp.float32)
    cmask = cmask.reshape(2, M2, 1)

    # Weights -> bf16 tap stacks (HWIO reshaped), biases -> f32 rows.
    bf, f32 = jnp.bfloat16, jnp.float32
    w1, b1 = params["conv1"]; w2, b2 = params["conv2"]; w3, b3 = params["conv3"]
    w4, b4 = params["conv4"]; w5, b5 = params["conv5"]; w6, b6 = params["conv6"]
    w7, b7 = params["conv7"]; w8, b8 = params["conv8"]
    weight_args = (
        w1.reshape(12, 256).astype(bf),      b1.reshape(1, 256).astype(f32),
        w2.reshape(4, 256, 256).astype(bf),  b2.reshape(1, 256).astype(f32),
        w3.reshape(9, 256, 128).astype(bf),  b3.reshape(1, 128).astype(f32),
        w4.reshape(4, 128, 256).astype(bf),  b4.reshape(1, 256).astype(f32),
        w5.reshape(9, 256, 256).astype(bf),  b5.reshape(1, 256).astype(f32),
        w6.reshape(9, 256, 128).astype(bf),  b6.reshape(1, 128).astype(f32),
        w7.reshape(9, 128, 256).astype(bf),  b7.reshape(1, 256).astype(f32),
        jnp.pad(w8.reshape(256, 64), ((0, 0), (0, 64))).astype(bf),
        jnp.pad(b8.reshape(1, 64), ((0, 0), (0, 64))).astype(f32),
    )

    def full_spec(shape):
        r = len(shape)
        return pl.BlockSpec(shape, lambda n, r=r: (0,) * r)

    in_specs = [pl.BlockSpec((None, 4 * M2, 12), lambda n: (n, 0, 0)),
                full_spec((2, M2, 1))]
    in_specs += [full_spec(a.shape) for a in weight_args]

    out_spec = pl.BlockSpec((None, M2, 128), lambda n: (n, 0, 0))
    out_shape = jax.ShapeDtypeStruct((N, M2, 128), jnp.float32)

    scratch = [pltpu.VMEM((4, PADM, 256), jnp.float32),   # s1 parity row buffers
               pltpu.VMEM((PADM, 256), jnp.float32),      # skip_in2 row buffer
               pltpu.VMEM((PADM, 128), jnp.float32)]      # r6 row buffer

    M1 = 4 * M2
    flops = 2 * N * (M1 * 12 * 256 + M2 * 4 * 256 * 256 + M1 * 9 * 256 * 128
                     + M2 * 4 * 128 * 256 + M2 * 9 * 256 * 256
                     + M2 * 9 * 256 * 128 + M2 * 9 * 128 * 256 + M2 * 256 * 128)
    bytes_accessed = int(a1.size * 2 + cmask.size * 4 + N * M2 * 128 * 4
                         + sum(int(a.size) * a.dtype.itemsize for a in weight_args))

    out = pl.pallas_call(
        _make_tower_kernel(M2, W2, PAD),
        out_shape=out_shape,
        grid_spec=pltpu.PrefetchScalarGridSpec(
            num_scalar_prefetch=0,
            grid=(N,),
            in_specs=in_specs,
            out_specs=out_spec,
            scratch_shapes=scratch),
        compiler_params=pltpu.CompilerParams(
            dimension_semantics=("parallel",),
            vmem_limit_bytes=32 * 1024 * 1024),
        cost_estimate=pl.CostEstimate(flops=int(flops), transcendentals=0,
                                      bytes_accessed=bytes_accessed),
    )(a1, cmask, *weight_args)

    out = out[:, :, :64].reshape(N, H2, W2, 64)
    return jnp.transpose(out, (0, 3, 1, 2))               # NHWC -> NCHW


# ---------------------------------------------------------------------------
# Reference (lax.conv chain mirroring the kernel's bf16-operand / f32-acc math).
# ---------------------------------------------------------------------------
def _ref_conv(x, w, b, stride, padding):
    out = jax.lax.conv_general_dilated(
        x.astype(jnp.bfloat16), w.astype(jnp.bfloat16),
        window_strides=(stride, stride),
        padding=[(padding, padding), (padding, padding)],
        dimension_numbers=("NHWC", "HWIO", "NHWC"),
        preferred_element_type=jnp.float32)
    return out + b


def reference_forward(params, x_nchw):
    relu = lambda v: jnp.maximum(v, 0.0)
    x = jnp.transpose(x_nchw, (0, 2, 3, 1))
    skip_in = relu(_ref_conv(x, *params["conv1"], 2, 0))
    skip_out = relu(_ref_conv(skip_in, *params["conv2"], 2, 0))
    r = relu(_ref_conv(skip_in, *params["conv3"], 1, 1))
    skip_in = relu(_ref_conv(r, *params["conv4"], 2, 0)) + skip_out
    skip_out = relu(_ref_conv(skip_in, *params["conv5"], 1, 1))
    r = relu(_ref_conv(skip_in, *params["conv6"], 1, 1))
    r = relu(_ref_conv(r, *params["conv7"], 1, 1)) + skip_out
    r = relu(_ref_conv(r, *params["conv8"], 1, 0))
    return jnp.transpose(r, (0, 3, 1, 2))


if __name__ == "__main__":
    key = jax.random.PRNGKey(0)
    pkey, xkey = jax.random.split(key)
    params = init_params(pkey)

    # NCHW input, 3 channels, spatial divisible by 4 (two stride-2 stages).
    x = jax.random.normal(xkey, (2, 3, 16, 16), dtype=jnp.float32)

    fwd = jax.jit(encoder_tower_forward)
    out = jax.block_until_ready(fwd(params, x))
    assert out.shape == (2, 64, 4, 4), out.shape

    ref = jax.block_until_ready(reference_forward(params, x))
    max_err = float(jnp.max(jnp.abs(out - ref)))
    # bf16 MXU operands (both kernel and reference) -> ~1e-2 scale tolerance.
    assert jnp.allclose(out, ref, rtol=2e-2, atol=2e-2), max_err

    print("KERNEL_OK")
</pallas_src>

<mosaic_0001>
module attributes {stable_mosaic.version = 11 : i64} {
  func.func @kernel(%arg0: i32, %arg1: memref<1x64x12xbf16, #tpu.memory_space<vmem>>, %arg2: memref<2x16x1xf32, #tpu.memory_space<vmem>>, %arg3: memref<12x256xbf16, #tpu.memory_space<vmem>>, %arg4: memref<1x256xf32, #tpu.memory_space<vmem>>, %arg5: memref<4x256x256xbf16, #tpu.memory_space<vmem>>, %arg6: memref<1x256xf32, #tpu.memory_space<vmem>>, %arg7: memref<9x256x128xbf16, #tpu.memory_space<vmem>>, %arg8: memref<1x128xf32, #tpu.memory_space<vmem>>, %arg9: memref<4x128x256xbf16, #tpu.memory_space<vmem>>, %arg10: memref<1x256xf32, #tpu.memory_space<vmem>>, %arg11: memref<9x256x256xbf16, #tpu.memory_space<vmem>>, %arg12: memref<1x256xf32, #tpu.memory_space<vmem>>, %arg13: memref<9x256x128xbf16, #tpu.memory_space<vmem>>, %arg14: memref<1x128xf32, #tpu.memory_space<vmem>>, %arg15: memref<9x128x256xbf16, #tpu.memory_space<vmem>>, %arg16: memref<1x256xf32, #tpu.memory_space<vmem>>, %arg17: memref<256x128xbf16, #tpu.memory_space<vmem>>, %arg18: memref<1x128xf32, #tpu.memory_space<vmem>>, %arg19: memref<1x16x128xf32, #tpu.memory_space<vmem>>, %arg20: memref<4x32x256xf32, #tpu.memory_space<vmem>>, %arg21: memref<32x256xf32, #tpu.memory_space<vmem>>, %arg22: memref<32x128xf32, #tpu.memory_space<vmem>>) attributes {dimension_semantics = [#tpu.dimension_semantics<parallel>], iteration_bounds = array<i64: 2>, scalar_prefetch = 0 : i64, scratch_operands = 3 : i64, tpu.core_type = #tpu.core_type<tc>, window_params = [{transform_indices = @transform_0, window_bounds = array<i64: 1, 64, 12>}, {pipeline_mode = #tpu.pipeline_mode<synchronous>, transform_indices = @transform_1, window_bounds = array<i64: 2, 16, 1>}, {pipeline_mode = #tpu.pipeline_mode<synchronous>, transform_indices = @transform_2, window_bounds = array<i64: 12, 256>}, {pipeline_mode = #tpu.pipeline_mode<synchronous>, transform_indices = @transform_3, window_bounds = array<i64: 1, 256>}, {pipeline_mode = #tpu.pipeline_mode<synchronous>, transform_indices = @transform_4, window_bounds = array<i64: 4, 256, 256>}, {pipeline_mode = #tpu.pipeline_mode<synchronous>, transform_indices = @transform_5, window_bounds = array<i64: 1, 256>}, {pipeline_mode = #tpu.pipeline_mode<synchronous>, transform_indices = @transform_6, window_bounds = array<i64: 9, 256, 128>}, {pipeline_mode = #tpu.pipeline_mode<synchronous>, transform_indices = @transform_7, window_bounds = array<i64: 1, 128>}, {pipeline_mode = #tpu.pipeline_mode<synchronous>, transform_indices = @transform_8, window_bounds = array<i64: 4, 128, 256>}, {pipeline_mode = #tpu.pipeline_mode<synchronous>, transform_indices = @transform_9, window_bounds = array<i64: 1, 256>}, {pipeline_mode = #tpu.pipeline_mode<synchronous>, transform_indices = @transform_10, window_bounds = array<i64: 9, 256, 256>}, {pipeline_mode = #tpu.pipeline_mode<synchronous>, transform_indices = @transform_11, window_bounds = array<i64: 1, 256>}, {pipeline_mode = #tpu.pipeline_mode<synchronous>, transform_indices = @transform_12, window_bounds = array<i64: 9, 256, 128>}, {pipeline_mode = #tpu.pipeline_mode<synchronous>, transform_indices = @transform_13, window_bounds = array<i64: 1, 128>}, {pipeline_mode = #tpu.pipeline_mode<synchronous>, transform_indices = @transform_14, window_bounds = array<i64: 9, 128, 256>}, {pipeline_mode = #tpu.pipeline_mode<synchronous>, transform_indices = @transform_15, window_bounds = array<i64: 1, 256>}, {pipeline_mode = #tpu.pipeline_mode<synchronous>, transform_indices = @transform_16, window_bounds = array<i64: 256, 128>}, {pipeline_mode = #tpu.pipeline_mode<synchronous>, transform_indices = @transform_17, window_bounds = array<i64: 1, 128>}, {transform_indices = @transform_18, window_bounds = array<i64: 1, 16, 128>}]} {
    %cst = arith.constant 0.000000e+00 : f32
    %0 = vector.broadcast %cst : f32 to vector<4x32x256xf32>
    %c0 = arith.constant 0 : index
    %c0_0 = arith.constant 0 : index
    %c0_1 = arith.constant 0 : index
    %1 = vector.load %arg20[%c0, %c0_0, %c0_1] : memref<4x32x256xf32, #tpu.memory_space<vmem>>, vector<4x32x256xf32>
    tpu.vector_store %arg20[%c0, %c0_0, %c0_1], %0 {strides = array<i32>} : memref<4x32x256xf32, #tpu.memory_space<vmem>>, vector<4x32x256xf32>,
    %cst_2 = arith.constant 0.000000e+00 : f32
    %2 = vector.broadcast %cst_2 : f32 to vector<32x256xf32>
    %c0_3 = arith.constant 0 : index
    %c0_4 = arith.constant 0 : index
    %3 = vector.load %arg21[%c0_3, %c0_4] : memref<32x256xf32, #tpu.memory_space<vmem>>, vector<32x256xf32>
    tpu.vector_store %arg21[%c0_3, %c0_4], %2 {strides = array<i32>} : memref<32x256xf32, #tpu.memory_space<vmem>>, vector<32x256xf32>,
    %cst_5 = arith.constant 0.000000e+00 : f32
    %4 = vector.broadcast %cst_5 : f32 to vector<32x128xf32>
    %c0_6 = arith.constant 0 : index
    %c0_7 = arith.constant 0 : index
    %5 = vector.load %arg22[%c0_6, %c0_7] : memref<32x128xf32, #tpu.memory_space<vmem>>, vector<32x128xf32>
    tpu.vector_store %arg22[%c0_6, %c0_7], %4 {strides = array<i32>} : memref<32x128xf32, #tpu.memory_space<vmem>>, vector<32x128xf32>,
    %c0_8 = arith.constant 0 : index
    %c0_9 = arith.constant 0 : index
    %c0_10 = arith.constant 0 : index
    %6 = vector.load %arg1[%c0_8, %c0_9, %c0_10] : memref<1x64x12xbf16, #tpu.memory_space<vmem>>, vector<1x64x12xbf16>
    %7 = vector.shape_cast %6 : vector<1x64x12xbf16> to vector<64x12xbf16>
    %c0_11 = arith.constant 0 : index
    %c0_12 = arith.constant 0 : index
    %8 = vector.load %arg3[%c0_11, %c0_12] : memref<12x256xbf16, #tpu.memory_space<vmem>>, vector<12x256xbf16>
    %cst_13 = arith.constant dense<0.000000e+00> : vector<64x256xf32>
    %9 = tpu.matmul %7, %8, %cst_13 {dimension_numbers = #tpu.dot_dimension_numbers<[1], [0], [0], [1], [0, 0, 1, 1], [], []>} : vector<64x12xbf16>, vector<12x256xbf16>, vector<64x256xf32> -> vector<64x256xf32>
    %c0_14 = arith.constant 0 : index
    %c0_15 = arith.constant 0 : index
    %10 = vector.load %arg4[%c0_14, %c0_15] : memref<1x256xf32, #tpu.memory_space<vmem>>, vector<1x256xf32>
    %11 = vector.broadcast %10 : vector<1x256xf32> to vector<64x256xf32>
    %12 = arith.addf %9, %11 : vector<64x256xf32>
    %cst_16 = arith.constant 0.000000e+00 : f32
    %13 = vector.broadcast %cst_16 : f32 to vector<64x256xf32>
    %14 = arith.maximumf %12, %13 : vector<64x256xf32>
    %15 = vector.extract_strided_slice %14 {offsets = [0, 0], sizes = [16, 256], strides = [1, 1]} : vector<64x256xf32> to vector<16x256xf32>
    %c0_17 = arith.constant 0 : index
    %c8 = arith.constant 8 : index
    %c0_18 = arith.constant 0 : index
    %16 = vector.load %arg20[%c0_17, %c8, %c0_18] : memref<4x32x256xf32, #tpu.memory_space<vmem>>, vector<1x16x256xf32>
    %17 = vector.shape_cast %16 : vector<1x16x256xf32> to vector<16x256xf32>
    %18 = vector.shape_cast %15 : vector<16x256xf32> to vector<1x16x256xf32>
    tpu.vector_store %arg20[%c0_17, %c8, %c0_18], %18 {strides = array<i32>} : memref<4x32x256xf32, #tpu.memory_space<vmem>>, vector<1x16x256xf32>,
    %19 = vector.extract_strided_slice %14 {offsets = [16, 0], sizes = [16, 256], strides = [1, 1]} : vector<64x256xf32> to vector<16x256xf32>
    %c1 = arith.constant 1 : index
    %c8_19 = arith.constant 8 : index
    %c0_20 = arith.constant 0 : index
    %20 = vector.load %arg20[%c1, %c8_19, %c0_20] : memref<4x32x256xf32, #tpu.memory_space<vmem>>, vector<1x16x256xf32>
    %21 = vector.shape_cast %20 : vector<1x16x256xf32> to vector<16x256xf32>
    %22 = vector.shape_cast %19 : vector<16x256xf32> to vector<1x16x256xf32>
    tpu.vector_store %arg20[%c1, %c8_19, %c0_20], %22 {strides = array<i32>} : memref<4x32x256xf32, #tpu.memory_space<vmem>>, vector<1x16x256xf32>,
    %23 = vector.extract_strided_slice %14 {offsets = [32, 0], sizes = [16, 256], strides = [1, 1]} : vector<64x256xf32> to vector<16x256xf32>
    %c2 = arith.constant 2 : index
    %c8_21 = arith.constant 8 : index
    %c0_22 = arith.constant 0 : index
    %24 = vector.load %arg20[%c2, %c8_21, %c0_22] : memref<4x32x256xf32, #tpu.memory_space<vmem>>, vector<1x16x256xf32>
    %25 = vector.shape_cast %24 : vector<1x16x256xf32> to vector<16x256xf32>
    %26 = vector.shape_cast %23 : vector<16x256xf32> to vector<1x16x256xf32>
    tpu.vector_store %arg20[%c2, %c8_21, %c0_22], %26 {strides = array<i32>} : memref<4x32x256xf32, #tpu.memory_space<vmem>>, vector<1x16x256xf32>,
    %27 = vector.extract_strided_slice %14 {offsets = [48, 0], sizes = [16, 256], strides = [1, 1]} : vector<64x256xf32> to vector<16x256xf32>
    %c3 = arith.constant 3 : index
    %c8_23 = arith.constant 8 : index
    %c0_24 = arith.constant 0 : index
    %28 = vector.load %arg20[%c3, %c8_23, %c0_24] : memref<4x32x256xf32, #tpu.memory_space<vmem>>, vector<1x16x256xf32>
    %29 = vector.shape_cast %28 : vector<1x16x256xf32> to vector<16x256xf32>
    %30 = vector.shape_cast %27 : vector<16x256xf32> to vector<1x16x256xf32>
    tpu.vector_store %arg20[%c3, %c8_23, %c0_24], %30 {strides = array<i32>} : memref<4x32x256xf32, #tpu.memory_space<vmem>>, vector<1x16x256xf32>,
    %cst_25 = arith.constant 0.000000e+00 : f32
    %31 = vector.broadcast %cst_25 : f32 to vector<16x256xf32>
    %32 = vector.extract_strided_slice %14 {offsets = [0, 0], sizes = [16, 256], strides = [1, 1]} : vector<64x256xf32> to vector<16x256xf32>
    %33 = arith.truncf %32 : vector<16x256xf32> to vector<16x256xbf16>
    %c0_26 = arith.constant 0 : index
    %c0_27 = arith.constant 0 : index
    %c0_28 = arith.constant 0 : index
    %34 = vector.load %arg5[%c0_26, %c0_27, %c0_28] : memref<4x256x256xbf16, #tpu.memory_space<vmem>>, vector<1x256x256xbf16>
    %35 = vector.shape_cast %34 : vector<1x256x256xbf16> to vector<256x256xbf16>
    %cst_29 = arith.constant dense<0.000000e+00> : vector<16x256xf32>
    %36 = tpu.matmul %33, %35, %cst_29 {dimension_numbers = #tpu.dot_dimension_numbers<[1], [0], [0], [1], [0, 0, 1, 1], [], []>} : vector<16x256xbf16>, vector<256x256xbf16>, vector<16x256xf32> -> vector<16x256xf32>
    %37 = arith.addf %31, %36 : vector<16x256xf32>
    %38 = vector.extract_strided_slice %14 {offsets = [16, 0], sizes = [16, 256], strides = [1, 1]} : vector<64x256xf32> to vector<16x256xf32>
    %39 = arith.truncf %38 : vector<16x256xf32> to vector<16x256xbf16>
    %c1_30 = arith.constant 1 : index
    %c0_31 = arith.constant 0 : index
    %c0_32 = arith.constant 0 : index
    %40 = vector.load %arg5[%c1_30, %c0_31, %c0_32] : memref<4x256x256xbf16, #tpu.memory_space<vmem>>, vector<1x256x256xbf16>
    %41 = vector.shape_cast %40 : vector<1x256x256xbf16> to vector<256x256xbf16>
    %cst_33 = arith.constant dense<0.000000e+00> : vector<16x256xf32>
    %42 = tpu.matmul %39, %41, %cst_33 {dimension_numbers = #tpu.dot_dimension_numbers<[1], [0], [0], [1], [0, 0, 1, 1], [], []>} : vector<16x256xbf16>, vector<256x256xbf16>, vector<16x256xf32> -> vector<16x256xf32>
    %43 = arith.addf %37, %42 : vector<16x256xf32>
    %44 = vector.extract_strided_slice %14 {offsets = [32, 0], sizes = [16, 256], strides = [1, 1]} : vector<64x256xf32> to vector<16x256xf32>
    %45 = arith.truncf %44 : vector<16x256xf32> to vector<16x256xbf16>
    %c2_34 = arith.constant 2 : index
    %c0_35 = arith.constant 0 : index
    %c0_36 = arith.constant 0 : index
    %46 = vector.load %arg5[%c2_34, %c0_35, %c0_36] : memref<4x256x256xbf16, #tpu.memory_space<vmem>>, vector<1x256x256xbf16>
    %47 = vector.shape_cast %46 : vector<1x256x256xbf16> to vector<256x256xbf16>
    %cst_37 = arith.constant dense<0.000000e+00> : vector<16x256xf32>
    %48 = tpu.matmul %45, %47, %cst_37 {dimension_numbers = #tpu.dot_dimension_numbers<[1], [0], [0], [1], [0, 0, 1, 1], [], []>} : vector<16x256xbf16>, vector<256x256xbf16>, vector<16x256xf32> -> vector<16x256xf32>
    %49 = arith.addf %43, %48 : vector<16x256xf32>
    %50 = vector.extract_strided_slice %14 {offsets = [48, 0], sizes = [16, 256], strides = [1, 1]} : vector<64x256xf32> to vector<16x256xf32>
    %51 = arith.truncf %50 : vector<16x256xf32> to vector<16x256xbf16>
    %c3_38 = arith.constant 3 : index
    %c0_39 = arith.constant 0 : index
    %c0_40 = arith.constant 0 : index
    %52 = vector.load %arg5[%c3_38, %c0_39, %c0_40] : memref<4x256x256xbf16, #tpu.memory_space<vmem>>, vector<1x256x256xbf16>
    %53 = vector.shape_cast %52 : vector<1x256x256xbf16> to vector<256x256xbf16>
    %cst_41 = arith.constant dense<0.000000e+00> : vector<16x256xf32>
    %54 = tpu.matmul %51, %53, %cst_41 {dimension_numbers = #tpu.dot_dimension_numbers<[1], [0], [0], [1], [0, 0, 1, 1], [], []>} : vector<16x256xbf16>, vector<256x256xbf16>, vector<16x256xf32> -> vector<16x256xf32>
    %55 = arith.addf %49, %54 : vector<16x256xf32>
    %c0_42 = arith.constant 0 : index
    %c0_43 = arith.constant 0 : index
    %56 = vector.load %arg6[%c0_42, %c0_43] : memref<1x256xf32, #tpu.memory_space<vmem>>, vector<1x256xf32>
    %57 = vector.broadcast %56 : vector<1x256xf32> to vector<16x256xf32>
    %58 = arith.addf %55, %57 : vector<16x256xf32>
    %cst_44 = arith.constant 0.000000e+00 : f32
    %59 = vector.broadcast %cst_44 : f32 to vector<16x256xf32>
    %60 = arith.maximumf %58, %59 : vector<16x256xf32>
    %cst_45 = arith.constant 0.000000e+00 : f32
    %61 = vector.broadcast %cst_45 : f32 to vector<16x128xf32>
    %c3_46 = arith.constant 3 : index
    %c3_47 = arith.constant 3 : index
    %c0_48 = arith.constant 0 : index
    %62 = vector.load %arg20[%c3_46, %c3_47, %c0_48] : memref<4x32x256xf32, #tpu.memory_space<vmem>>, vector<1x16x256xf32>
    %63 = vector.shape_cast %62 : vector<1x16x256xf32> to vector<16x256xf32>
    %c0_49 = arith.constant 0 : index
    %c0_50 = arith.constant 0 : index
    %c0_51 = arith.constant 0 : index
    %64 = vector.load %arg2[%c0_49, %c0_50, %c0_51] : memref<2x16x1xf32, #tpu.memory_space<vmem>>, vector<1x16x1xf32>
    %65 = vector.shape_cast %64 : vector<1x16x1xf32> to vector<16x1xf32>
    %66 = vector.broadcast %65 : vector<16x1xf32> to vector<16x256xf32>
    %67 = arith.mulf %63, %66 : vector<16x256xf32>
    %68 = arith.truncf %67 : vector<16x256xf32> to vector<16x256xbf16>
    %c0_52 = arith.constant 0 : index
    %c0_53 = arith.constant 0 : index
    %c0_54 = arith.constant 0 : index
    %69 = vector.load %arg7[%c0_52, %c0_53, %c0_54] : memref<9x256x128xbf16, #tpu.memory_space<vmem>>, vector<1x256x128xbf16>
    %70 = vector.shape_cast %69 : vector<1x256x128xbf16> to vector<256x128xbf16>
    %cst_55 = arith.constant dense<0.000000e+00> : vector<16x128xf32>
    %71 = tpu.matmul %68, %70, %cst_55 {dimension_numbers = #tpu.dot_dimension_numbers<[1], [0], [0], [1], [0, 0, 1, 1], [], []>} : vector<16x256xbf16>, vector<256x128xbf16>, vector<16x128xf32> -> vector<16x128xf32>
    %72 = arith.addf %61, %71 : vector<16x128xf32>
    %c2_56 = arith.constant 2 : index
    %c4 = arith.constant 4 : index
    %c0_57 = arith.constant 0 : index
    %73 = vector.load %arg20[%c2_56, %c4, %c0_57] : memref<4x32x256xf32, #tpu.memory_space<vmem>>, vector<1x16x256xf32>
    %74 = vector.shape_cast %73 : vector<1x16x256xf32> to vector<16x256xf32>
    %75 = arith.truncf %74 : vector<16x256xf32> to vector<16x256xbf16>
    %c1_58 = arith.constant 1 : index
    %c0_59 = arith.constant 0 : index
    %c0_60 = arith.constant 0 : index
    %76 = vector.load %arg7[%c1_58, %c0_59, %c0_60] : memref<9x256x128xbf16, #tpu.memory_space<vmem>>, vector<1x256x128xbf16>
    %77 = vector.shape_cast %76 : vector<1x256x128xbf16> to vector<256x128xbf16>
    %cst_61 = arith.constant dense<0.000000e+00> : vector<16x128xf32>
    %78 = tpu.matmul %75, %77, %cst_61 {dimension_numbers = #tpu.dot_dimension_numbers<[1], [0], [0], [1], [0, 0, 1, 1], [], []>} : vector<16x256xbf16>, vector<256x128xbf16>, vector<16x128xf32> -> vector<16x128xf32>
    %79 = arith.addf %72, %78 : vector<16x128xf32>
    %c3_62 = arith.constant 3 : index
    %c4_63 = arith.constant 4 : index
    %c0_64 = arith.constant 0 : index
    %80 = vector.load %arg20[%c3_62, %c4_63, %c0_64] : memref<4x32x256xf32, #tpu.memory_space<vmem>>, vector<1x16x256xf32>
    %81 = vector.shape_cast %80 : vector<1x16x256xf32> to vector<16x256xf32>
    %82 = arith.truncf %81 : vector<16x256xf32> to vector<16x256xbf16>
    %c2_65 = arith.constant 2 : index
    %c0_66 = arith.constant 0 : index
    %c0_67 = arith.constant 0 : index
    %83 = vector.load %arg7[%c2_65, %c0_66, %c0_67] : memref<9x256x128xbf16, #tpu.memory_space<vmem>>, vector<1x256x128xbf16>
    %84 = vector.shape_cast %83 : vector<1x256x128xbf16> to vector<256x128xbf16>
    %cst_68 = arith.constant dense<0.000000e+00> : vector<16x128xf32>
    %85 = tpu.matmul %82, %84, %cst_68 {dimension_numbers = #tpu.dot_dimension_numbers<[1], [0], [0], [1], [0, 0, 1, 1], [], []>} : vector<16x256xbf16>, vector<256x128xbf16>, vector<16x128xf32> -> vector<16x128xf32>
    %86 = arith.addf %79, %85 : vector<16x128xf32>
    %c1_69 = arith.constant 1 : index
    %c7 = arith.constant 7 : index
    %c0_70 = arith.constant 0 : index
    %87 = vector.load %arg20[%c1_69, %c7, %c0_70] : memref<4x32x256xf32, #tpu.memory_space<vmem>>, vector<1x16x256xf32>
    %88 = vector.shape_cast %87 : vector<1x16x256xf32> to vector<16x256xf32>
    %c0_71 = arith.constant 0 : index
    %c0_72 = arith.constant 0 : index
    %c0_73 = arith.constant 0 : index
    %89 = vector.load %arg2[%c0_71, %c0_72, %c0_73] : memref<2x16x1xf32, #tpu.memory_space<vmem>>, vector<1x16x1xf32>
    %90 = vector.shape_cast %89 : vector<1x16x1xf32> to vector<16x1xf32>
    %91 = vector.broadcast %90 : vector<16x1xf32> to vector<16x256xf32>
    %92 = arith.mulf %88, %91 : vector<16x256xf32>
    %93 = arith.truncf %92 : vector<16x256xf32> to vector<16x256xbf16>
    %c3_74 = arith.constant 3 : index
    %c0_75 = arith.constant 0 : index
    %c0_76 = arith.constant 0 : index
    %94 = vector.load %arg7[%c3_74, %c0_75, %c0_76] : memref<9x256x128xbf16, #tpu.memory_space<vmem>>, vector<1x256x128xbf16>
    %95 = vector.shape_cast %94 : vector<1x256x128xbf16> to vector<256x128xbf16>
    %cst_77 = arith.constant dense<0.000000e+00> : vector<16x128xf32>
    %96 = tpu.matmul %93, %95, %cst_77 {dimension_numbers = #tpu.dot_dimension_numbers<[1], [0], [0], [1], [0, 0, 1, 1], [], []>} : vector<16x256xbf16>, vector<256x128xbf16>, vector<16x128xf32> -> vector<16x128xf32>
    %97 = arith.addf %86, %96 : vector<16x128xf32>
    %c0_78 = arith.constant 0 : index
    %c8_79 = arith.constant 8 : index
    %c0_80 = arith.constant 0 : index
    %98 = vector.load %arg20[%c0_78, %c8_79, %c0_80] : memref<4x32x256xf32, #tpu.memory_space<vmem>>, vector<1x16x256xf32>
    %99 = vector.shape_cast %98 : vector<1x16x256xf32> to vector<16x256xf32>
    %100 = arith.truncf %99 : vector<16x256xf32> to vector<16x256xbf16>
    %c4_81 = arith.constant 4 : index
    %c0_82 = arith.constant 0 : index
    %c0_83 = arith.constant 0 : index
    %101 = vector.load %arg7[%c4_81, %c0_82, %c0_83] : memref<9x256x128xbf16, #tpu.memory_space<vmem>>, vector<1x256x128xbf16>
    %102 = vector.shape_cast %101 : vector<1x256x128xbf16> to vector<256x128xbf16>
    %cst_84 = arith.constant dense<0.000000e+00> : vector<16x128xf32>
    %103 = tpu.matmul %100, %102, %cst_84 {dimension_numbers = #tpu.dot_dimension_numbers<[1], [0], [0], [1], [0, 0, 1, 1], [], []>} : vector<16x256xbf16>, vector<256x128xbf16>, vector<16x128xf32> -> vector<16x128xf32>
    %104 = arith.addf %97, %103 : vector<16x128xf32>
    %c1_85 = arith.constant 1 : index
    %c8_86 = arith.constant 8 : index
    %c0_87 = arith.constant 0 : index
    %105 = vector.load %arg20[%c1_85, %c8_86, %c0_87] : memref<4x32x256xf32, #tpu.memory_space<vmem>>, vector<1x16x256xf32>
    %106 = vector.shape_cast %105 : vector<1x16x256xf32> to vector<16x256xf32>
    %107 = arith.truncf %106 : vector<16x256xf32> to vector<16x256xbf16>
    %c5 = arith.constant 5 : index
    %c0_88 = arith.constant 0 : index
    %c0_89 = arith.constant 0 : index
    %108 = vector.load %arg7[%c5, %c0_88, %c0_89] : memref<9x256x128xbf16, #tpu.memory_space<vmem>>, vector<1x256x128xbf16>
    %109 = vector.shape_cast %108 : vector<1x256x128xbf16> to vector<256x128xbf16>
    %cst_90 = arith.constant dense<0.000000e+00> : vector<16x128xf32>
    %110 = tpu.matmul %107, %109, %cst_90 {dimension_numbers = #tpu.dot_dimension_numbers<[1], [0], [0], [1], [0, 0, 1, 1], [], []>} : vector<16x256xbf16>, vector<256x128xbf16>, vector<16x128xf32> -> vector<16x128xf32>
    %111 = arith.addf %104, %110 : vector<16x128xf32>
    %c3_91 = arith.constant 3 : index
    %c7_92 = arith.constant 7 : index
    %c0_93 = arith.constant 0 : index
    %112 = vector.load %arg20[%c3_91, %c7_92, %c0_93] : memref<4x32x256xf32, #tpu.memory_space<vmem>>, vector<1x16x256xf32>
    %113 = vector.shape_cast %112 : vector<1x16x256xf32> to vector<16x256xf32>
    %c0_94 = arith.constant 0 : index
    %c0_95 = arith.constant 0 : index
    %c0_96 = arith.constant 0 : index
    %114 = vector.load %arg2[%c0_94, %c0_95, %c0_96] : memref<2x16x1xf32, #tpu.memory_space<vmem>>, vector<1x16x1xf32>
    %115 = vector.shape_cast %114 : vector<1x16x1xf32> to vector<16x1xf32>
    %116 = vector.broadcast %115 : vector<16x1xf32> to vector<16x256xf32>
    %117 = arith.mulf %113, %116 : vector<16x256xf32>
    %118 = arith.truncf %117 : vector<16x256xf32> to vector<16x256xbf16>
    %c6 = arith.constant 6 : index
    %c0_97 = arith.constant 0 : index
    %c0_98 = arith.constant 0 : index
    %119 = vector.load %arg7[%c6, %c0_97, %c0_98] : memref<9x256x128xbf16, #tpu.memory_space<vmem>>, vector<1x256x128xbf16>
    %120 = vector.shape_cast %119 : vector<1x256x128xbf16> to vector<256x128xbf16>
    %cst_99 = arith.constant dense<0.000000e+00> : vector<16x128xf32>
    %121 = tpu.matmul %118, %120, %cst_99 {dimension_numbers = #tpu.dot_dimension_numbers<[1], [0], [0], [1], [0, 0, 1, 1], [], []>} : vector<16x256xbf16>, vector<256x128xbf16>, vector<16x128xf32> -> vector<16x128xf32>
    %122 = arith.addf %111, %121 : vector<16x128xf32>
    %c2_100 = arith.constant 2 : index
    %c8_101 = arith.constant 8 : index
    %c0_102 = arith.constant 0 : index
    %123 = vector.load %arg20[%c2_100, %c8_101, %c0_102] : memref<4x32x256xf32, #tpu.memory_space<vmem>>, vector<1x16x256xf32>
    %124 = vector.shape_cast %123 : vector<1x16x256xf32> to vector<16x256xf32>
    %125 = arith.truncf %124 : vector<16x256xf32> to vector<16x256xbf16>
    %c7_103 = arith.constant 7 : index
    %c0_104 = arith.constant 0 : index
    %c0_105 = arith.constant 0 : index
    %126 = vector.load %arg7[%c7_103, %c0_104, %c0_105] : memref<9x256x128xbf16, #tpu.memory_space<vmem>>, vector<1x256x128xbf16>
    %127 = vector.shape_cast %126 : vector<1x256x128xbf16> to vector<256x128xbf16>
    %cst_106 = arith.constant dense<0.000000e+00> : vector<16x128xf32>
    %128 = tpu.matmul %125, %127, %cst_106 {dimension_numbers = #tpu.dot_dimension_numbers<[1], [0], [0], [1], [0, 0, 1, 1], [], []>} : vector<16x256xbf16>, vector<256x128xbf16>, vector<16x128xf32> -> vector<16x128xf32>
    %129 = arith.addf %122, %128 : vector<16x128xf32>
    %c3_107 = arith.constant 3 : index
    %c8_108 = arith.constant 8 : index
    %c0_109 = arith.constant 0 : index
    %130 = vector.load %arg20[%c3_107, %c8_108, %c0_109] : memref<4x32x256xf32, #tpu.memory_space<vmem>>, vector<1x16x256xf32>
    %131 = vector.shape_cast %130 : vector<1x16x256xf32> to vector<16x256xf32>
    %132 = arith.truncf %131 : vector<16x256xf32> to vector<16x256xbf16>
    %c8_110 = arith.constant 8 : index
    %c0_111 = arith.constant 0 : index
    %c0_112 = arith.constant 0 : index
    %133 = vector.load %arg7[%c8_110, %c0_111, %c0_112] : memref<9x256x128xbf16, #tpu.memory_space<vmem>>, vector<1x256x128xbf16>
    %134 = vector.shape_cast %133 : vector<1x256x128xbf16> to vector<256x128xbf16>
    %cst_113 = arith.constant dense<0.000000e+00> : vector<16x128xf32>
    %135 = tpu.matmul %132, %134, %cst_113 {dimension_numbers = #tpu.dot_dimension_numbers<[1], [0], [0], [1], [0, 0, 1, 1], [], []>} : vector<16x256xbf16>, vector<256x128xbf16>, vector<16x128xf32> -> vector<16x128xf32>
    %136 = arith.addf %129, %135 : vector<16x128xf32>
    %c0_114 = arith.constant 0 : index
    %c0_115 = arith.constant 0 : index
    %137 = vector.load %arg8[%c0_114, %c0_115] : memref<1x128xf32, #tpu.memory_space<vmem>>, vector<1x128xf32>
    %138 = vector.broadcast %137 : vector<1x128xf32> to vector<16x128xf32>
    %139 = arith.addf %136, %138 : vector<16x128xf32>
    %cst_116 = arith.constant 0.000000e+00 : f32
    %140 = vector.broadcast %cst_116 : f32 to vector<16x128xf32>
    %141 = arith.maximumf %139, %140 : vector<16x128xf32>
    %cst_117 = arith.constant 0.000000e+00 : f32
    %142 = vector.broadcast %cst_117 : f32 to vector<16x128xf32>
    %c2_118 = arith.constant 2 : index
    %c4_119 = arith.constant 4 : index
    %c0_120 = arith.constant 0 : index
    %143 = vector.load %arg20[%c2_118, %c4_119, %c0_120] : memref<4x32x256xf32, #tpu.memory_space<vmem>>, vector<1x16x256xf32>
    %144 = vector.shape_cast %143 : vector<1x16x256xf32> to vector<16x256xf32>
    %145 = arith.truncf %144 : vector<16x256xf32> to vector<16x256xbf16>
    %c0_121 = arith.constant 0 : index
    %c0_122 = arith.constant 0 : index
    %c0_123 = arith.constant 0 : index
    %146 = vector.load %arg7[%c0_121, %c0_122, %c0_123] : memref<9x256x128xbf16, #tpu.memory_space<vmem>>, vector<1x256x128xbf16>
    %147 = vector.shape_cast %146 : vector<1x256x128xbf16> to vector<256x128xbf16>
    %cst_124 = arith.constant dense<0.000000e+00> : vector<16x128xf32>
    %148 = tpu.matmul %145, %147, %cst_124 {dimension_numbers = #tpu.dot_dimension_numbers<[1], [0], [0], [1], [0, 0, 1, 1], [], []>} : vector<16x256xbf16>, vector<256x128xbf16>, vector<16x128xf32> -> vector<16x128xf32>
    %149 = arith.addf %142, %148 : vector<16x128xf32>
    %c3_125 = arith.constant 3 : index
    %c4_126 = arith.constant 4 : index
    %c0_127 = arith.constant 0 : index
    %150 = vector.load %arg20[%c3_125, %c4_126, %c0_127] : memref<4x32x256xf32, #tpu.memory_space<vmem>>, vector<1x16x256xf32>
    %151 = vector.shape_cast %150 : vector<1x16x256xf32> to vector<16x256xf32>
    %152 = arith.truncf %151 : vector<16x256xf32> to vector<16x256xbf16>
    %c1_128 = arith.constant 1 : index
    %c0_129 = arith.constant 0 : index
    %c0_130 = arith.constant 0 : index
    %153 = vector.load %arg7[%c1_128, %c0_129, %c0_130] : memref<9x256x128xbf16, #tpu.memory_space<vmem>>, vector<1x256x128xbf16>
    %154 = vector.shape_cast %153 : vector<1x256x128xbf16> to vector<256x128xbf16>
    %cst_131 = arith.constant dense<0.000000e+00> : vector<16x128xf32>
    %155 = tpu.matmul %152, %154, %cst_131 {dimension_numbers = #tpu.dot_dimension_numbers<[1], [0], [0], [1], [0, 0, 1, 1], [], []>} : vector<16x256xbf16>, vector<256x128xbf16>, vector<16x128xf32> -> vector<16x128xf32>
    %156 = arith.addf %149, %155 : vector<16x128xf32>
    %c2_132 = arith.constant 2 : index
    %c5_133 = arith.constant 5 : index
    %c0_134 = arith.constant 0 : index
    %157 = vector.load %arg20[%c2_132, %c5_133, %c0_134] : memref<4x32x256xf32, #tpu.memory_space<vmem>>, vector<1x16x256xf32>
    %158 = vector.shape_cast %157 : vector<1x16x256xf32> to vector<16x256xf32>
    %c1_135 = arith.constant 1 : index
    %c0_136 = arith.constant 0 : index
    %c0_137 = arith.constant 0 : index
    %159 = vector.load %arg2[%c1_135, %c0_136, %c0_137] : memref<2x16x1xf32, #tpu.memory_space<vmem>>, vector<1x16x1xf32>
    %160 = vector.shape_cast %159 : vector<1x16x1xf32> to vector<16x1xf32>
    %161 = vector.broadcast %160 : vector<16x1xf32> to vector<16x256xf32>
    %162 = arith.mulf %158, %161 : vector<16x256xf32>
    %163 = arith.truncf %162 : vector<16x256xf32> to vector<16x256xbf16>
    %c2_138 = arith.constant 2 : index
    %c0_139 = arith.constant 0 : index
    %c0_140 = arith.constant 0 : index
    %164 = vector.load %arg7[%c2_138, %c0_139, %c0_140] : memref<9x256x128xbf16, #tpu.memory_space<vmem>>, vector<1x256x128xbf16>
    %165 = vector.shape_cast %164 : vector<1x256x128xbf16> to vector<256x128xbf16>
    %cst_141 = arith.constant dense<0.000000e+00> : vector<16x128xf32>
    %166 = tpu.matmul %163, %165, %cst_141 {dimension_numbers = #tpu.dot_dimension_numbers<[1], [0], [0], [1], [0, 0, 1, 1], [], []>} : vector<16x256xbf16>, vector<256x128xbf16>, vector<16x128xf32> -> vector<16x128xf32>
    %167 = arith.addf %156, %166 : vector<16x128xf32>
    %c0_142 = arith.constant 0 : index
    %c8_143 = arith.constant 8 : index
    %c0_144 = arith.constant 0 : index
    %168 = vector.load %arg20[%c0_142, %c8_143, %c0_144] : memref<4x32x256xf32, #tpu.memory_space<vmem>>, vector<1x16x256xf32>
    %169 = vector.shape_cast %168 : vector<1x16x256xf32> to vector<16x256xf32>
    %170 = arith.truncf %169 : vector<16x256xf32> to vector<16x256xbf16>
    %c3_145 = arith.constant 3 : index
    %c0_146 = arith.constant 0 : index
    %c0_147 = arith.constant 0 : index
    %171 = vector.load %arg7[%c3_145, %c0_146, %c0_147] : memref<9x256x128xbf16, #tpu.memory_space<vmem>>, vector<1x256x128xbf16>
    %172 = vector.shape_cast %171 : vector<1x256x128xbf16> to vector<256x128xbf16>
    %cst_148 = arith.constant dense<0.000000e+00> : vector<16x128xf32>
    %173 = tpu.matmul %170, %172, %cst_148 {dimension_numbers = #tpu.dot_dimension_numbers<[1], [0], [0], [1], [0, 0, 1, 1], [], []>} : vector<16x256xbf16>, vector<256x128xbf16>, vector<16x128xf32> -> vector<16x128xf32>
    %174 = arith.addf %167, %173 : vector<16x128xf32>
    %c1_149 = arith.constant 1 : index
    %c8_150 = arith.constant 8 : index
    %c0_151 = arith.constant 0 : index
    %175 = vector.load %arg20[%c1_149, %c8_150, %c0_151] : memref<4x32x256xf32, #tpu.memory_space<vmem>>, vector<1x16x256xf32>
    %176 = vector.shape_cast %175 : vector<1x16x256xf32> to vector<16x256xf32>
    %177 = arith.truncf %176 : vector<16x256xf32> to vector<16x256xbf16>
    %c4_152 = arith.constant 4 : index
    %c0_153 = arith.constant 0 : index
    %c0_154 = arith.constant 0 : index
    %178 = vector.load %arg7[%c4_152, %c0_153, %c0_154] : memref<9x256x128xbf16, #tpu.memory_space<vmem>>, vector<1x256x128xbf16>
    %179 = vector.shape_cast %178 : vector<1x256x128xbf16> to vector<256x128xbf16>
    %cst_155 = arith.constant dense<0.000000e+00> : vector<16x128xf32>
    %180 = tpu.matmul %177, %179, %cst_155 {dimension_numbers = #tpu.dot_dimension_numbers<[1], [0], [0], [1], [0, 0, 1, 1], [], []>} : vector<16x256xbf16>, vector<256x128xbf16>, vector<16x128xf32> -> vector<16x128xf32>
    %181 = arith.addf %174, %180 : vector<16x128xf32>
    %c0_156 = arith.constant 0 : index
    %c9 = arith.constant 9 : index
    %c0_157 = arith.constant 0 : index
    %182 = vector.load %arg20[%c0_156, %c9, %c0_157] : memref<4x32x256xf32, #tpu.memory_space<vmem>>, vector<1x16x256xf32>
    %183 = vector.shape_cast %182 : vector<1x16x256xf32> to vector<16x256xf32>
    %c1_158 = arith.constant 1 : index
    %c0_159 = arith.constant 0 : index
    %c0_160 = arith.constant 0 : index
    %184 = vector.load %arg2[%c1_158, %c0_159, %c0_160] : memref<2x16x1xf32, #tpu.memory_space<vmem>>, vector<1x16x1xf32>
    %185 = vector.shape_cast %184 : vector<1x16x1xf32> to vector<16x1xf32>
    %186 = vector.broadcast %185 : vector<16x1xf32> to vector<16x256xf32>
    %187 = arith.mulf %183, %186 : vector<16x256xf32>
    %188 = arith.truncf %187 : vector<16x256xf32> to vector<16x256xbf16>
    %c5_161 = arith.constant 5 : index
    %c0_162 = arith.constant 0 : index
    %c0_163 = arith.constant 0 : index
    %189 = vector.load %arg7[%c5_161, %c0_162, %c0_163] : memref<9x256x128xbf16, #tpu.memory_space<vmem>>, vector<1x256x128xbf16>
    %190 = vector.shape_cast %189 : vector<1x256x128xbf16> to vector<256x128xbf16>
    %cst_164 = arith.constant dense<0.000000e+00> : vector<16x128xf32>
    %191 = tpu.matmul %188, %190, %cst_164 {dimension_numbers = #tpu.dot_dimension_numbers<[1], [0], [0], [1], [0, 0, 1, 1], [], []>} : vector<16x256xbf16>, vector<256x128xbf16>, vector<16x128xf32> -> vector<16x128xf32>
    %192 = arith.addf %181, %191 : vector<16x128xf32>
    %c2_165 = arith.constant 2 : index
    %c8_166 = arith.constant 8 : index
    %c0_167 = arith.constant 0 : index
    %193 = vector.load %arg20[%c2_165, %c8_166, %c0_167] : memref<4x32x256xf32, #tpu.memory_space<vmem>>, vector<1x16x256xf32>
    %194 = vector.shape_cast %193 : vector<1x16x256xf32> to vector<16x256xf32>
    %195 = arith.truncf %194 : vector<16x256xf32> to vector<16x256xbf16>
    %c6_168 = arith.constant 6 : index
    %c0_169 = arith.constant 0 : index
    %c0_170 = arith.constant 0 : index
    %196 = vector.load %arg7[%c6_168, %c0_169, %c0_170] : memref<9x256x128xbf16, #tpu.memory_space<vmem>>, vector<1x256x128xbf16>
    %197 = vector.shape_cast %196 : vector<1x256x128xbf16> to vector<256x128xbf16>
    %cst_171 = arith.constant dense<0.000000e+00> : vector<16x128xf32>
    %198 = tpu.matmul %195, %197, %cst_171 {dimension_numbers = #tpu.dot_dimension_numbers<[1], [0], [0], [1], [0, 0, 1, 1], [], []>} : vector<16x256xbf16>, vector<256x128xbf16>, vector<16x128xf32> -> vector<16x128xf32>
    %199 = arith.addf %192, %198 : vector<16x128xf32>
    %c3_172 = arith.constant 3 : index
    %c8_173 = arith.constant 8 : index
    %c0_174 = arith.constant 0 : index
    %200 = vector.load %arg20[%c3_172, %c8_173, %c0_174] : memref<4x32x256xf32, #tpu.memory_space<vmem>>, vector<1x16x256xf32>
    %201 = vector.shape_cast %200 : vector<1x16x256xf32> to vector<16x256xf32>
    %202 = arith.truncf %201 : vector<16x256xf32> to vector<16x256xbf16>
    %c7_175 = arith.constant 7 : index
    %c0_176 = arith.constant 0 : index
    %c0_177 = arith.constant 0 : index
    %203 = vector.load %arg7[%c7_175, %c0_176, %c0_177] : memref<9x256x128xbf16, #tpu.memory_space<vmem>>, vector<1x256x128xbf16>
    %204 = vector.shape_cast %203 : vector<1x256x128xbf16> to vector<256x128xbf16>
    %cst_178 = arith.constant dense<0.000000e+00> : vector<16x128xf32>
    %205 = tpu.matmul %202, %204, %cst_178 {dimension_numbers = #tpu.dot_dimension_numbers<[1], [0], [0], [1], [0, 0, 1, 1], [], []>} : vector<16x256xbf16>, vector<256x128xbf16>, vector<16x128xf32> -> vector<16x128xf32>
    %206 = arith.addf %199, %205 : vector<16x128xf32>
    %c2_179 = arith.constant 2 : index
    %c9_180 = arith.constant 9 : index
    %c0_181 = arith.constant 0 : index
    %207 = vector.load %arg20[%c2_179, %c9_180, %c0_181] : memref<4x32x256xf32, #tpu.memory_space<vmem>>, vector<1x16x256xf32>
    %208 = vector.shape_cast %207 : vector<1x16x256xf32> to vector<16x256xf32>
    %c1_182 = arith.constant 1 : index
    %c0_183 = arith.constant 0 : index
    %c0_184 = arith.constant 0 : index
    %209 = vector.load %arg2[%c1_182, %c0_183, %c0_184] : memref<2x16x1xf32, #tpu.memory_space<vmem>>, vector<1x16x1xf32>
    %210 = vector.shape_cast %209 : vector<1x16x1xf32> to vector<16x1xf32>
    %211 = vector.broadcast %210 : vector<16x1xf32> to vector<16x256xf32>
    %212 = arith.mulf %208, %211 : vector<16x256xf32>
    %213 = arith.truncf %212 : vector<16x256xf32> to vector<16x256xbf16>
    %c8_185 = arith.constant 8 : index
    %c0_186 = arith.constant 0 : index
    %c0_187 = arith.constant 0 : index
    %214 = vector.load %arg7[%c8_185, %c0_186, %c0_187] : memref<9x256x128xbf16, #tpu.memory_space<vmem>>, vector<1x256x128xbf16>
    %215 = vector.shape_cast %214 : vector<1x256x128xbf16> to vector<256x128xbf16>
    %cst_188 = arith.constant dense<0.000000e+00> : vector<16x128xf32>
    %216 = tpu.matmul %213, %215, %cst_188 {dimension_numbers = #tpu.dot_dimension_numbers<[1], [0], [0], [1], [0, 0, 1, 1], [], []>} : vector<16x256xbf16>, vector<256x128xbf16>, vector<16x128xf32> -> vector<16x128xf32>
    %217 = arith.addf %206, %216 : vector<16x128xf32>
    %c0_189 = arith.constant 0 : index
    %c0_190 = arith.constant 0 : index
    %218 = vector.load %arg8[%c0_189, %c0_190] : memref<1x128xf32, #tpu.memory_space<vmem>>, vector<1x128xf32>
    %219 = vector.broadcast %218 : vector<1x128xf32> to vector<16x128xf32>
    %220 = arith.addf %217, %219 : vector<16x128xf32>
    %cst_191 = arith.constant 0.000000e+00 : f32
    %221 = vector.broadcast %cst_191 : f32 to vector<16x128xf32>
    %222 = arith.maximumf %220, %221 : vector<16x128xf32>
    %cst_192 = arith.constant 0.000000e+00 : f32
    %223 = vector.broadcast %cst_192 : f32 to vector<16x128xf32>
    %c1_193 = arith.constant 1 : index
    %c7_194 = arith.constant 7 : index
    %c0_195 = arith.constant 0 : index
    %224 = vector.load %arg20[%c1_193, %c7_194, %c0_195] : memref<4x32x256xf32, #tpu.memory_space<vmem>>, vector<1x16x256xf32>
    %225 = vector.shape_cast %224 : vector<1x16x256xf32> to vector<16x256xf32>
    %c0_196 = arith.constant 0 : index
    %c0_197 = arith.constant 0 : index
    %c0_198 = arith.constant 0 : index
    %226 = vector.load %arg2[%c0_196, %c0_197, %c0_198] : memref<2x16x1xf32, #tpu.memory_space<vmem>>, vector<1x16x1xf32>
    %227 = vector.shape_cast %226 : vector<1x16x1xf32> to vector<16x1xf32>
    %228 = vector.broadcast %227 : vector<16x1xf32> to vector<16x256xf32>
    %229 = arith.mulf %225, %228 : vector<16x256xf32>
    %230 = arith.truncf %229 : vector<16x256xf32> to vector<16x256xbf16>
    %c0_199 = arith.constant 0 : index
    %c0_200 = arith.constant 0 : index
    %c0_201 = arith.constant 0 : index
    %231 = vector.load %arg7[%c0_199, %c0_200, %c0_201] : memref<9x256x128xbf16, #tpu.memory_space<vmem>>, vector<1x256x128xbf16>
    %232 = vector.shape_cast %231 : vector<1x256x128xbf16> to vector<256x128xbf16>
    %cst_202 = arith.constant dense<0.000000e+00> : vector<16x128xf32>
    %233 = tpu.matmul %230, %232, %cst_202 {dimension_numbers = #tpu.dot_dimension_numbers<[1], [0], [0], [1], [0, 0, 1, 1], [], []>} : vector<16x256xbf16>, vector<256x128xbf16>, vector<16x128xf32> -> vector<16x128xf32>
    %234 = arith.addf %223, %233 : vector<16x128xf32>
    %c0_203 = arith.constant 0 : index
    %c8_204 = arith.constant 8 : index
    %c0_205 = arith.constant 0 : index
    %235 = vector.load %arg20[%c0_203, %c8_204, %c0_205] : memref<4x32x256xf32, #tpu.memory_space<vmem>>, vector<1x16x256xf32>
    %236 = vector.shape_cast %235 : vector<1x16x256xf32> to vector<16x256xf32>
    %237 = arith.truncf %236 : vector<16x256xf32> to vector<16x256xbf16>
    %c1_206 = arith.constant 1 : index
    %c0_207 = arith.constant 0 : index
    %c0_208 = arith.constant 0 : index
    %238 = vector.load %arg7[%c1_206, %c0_207, %c0_208] : memref<9x256x128xbf16, #tpu.memory_space<vmem>>, vector<1x256x128xbf16>
    %239 = vector.shape_cast %238 : vector<1x256x128xbf16> to vector<256x128xbf16>
    %cst_209 = arith.constant dense<0.000000e+00> : vector<16x128xf32>
    %240 = tpu.matmul %237, %239, %cst_209 {dimension_numbers = #tpu.dot_dimension_numbers<[1], [0], [0], [1], [0, 0, 1, 1], [], []>} : vector<16x256xbf16>, vector<256x128xbf16>, vector<16x128xf32> -> vector<16x128xf32>
    %241 = arith.addf %234, %240 : vector<16x128xf32>
    %c1_210 = arith.constant 1 : index
    %c8_211 = arith.constant 8 : index
    %c0_212 = arith.constant 0 : index
    %242 = vector.load %arg20[%c1_210, %c8_211, %c0_212] : memref<4x32x256xf32, #tpu.memory_space<vmem>>, vector<1x16x256xf32>
    %243 = vector.shape_cast %242 : vector<1x16x256xf32> to vector<16x256xf32>
    %244 = arith.truncf %243 : vector<16x256xf32> to vector<16x256xbf16>
    %c2_213 = arith.constant 2 : index
    %c0_214 = arith.constant 0 : index
    %c0_215 = arith.constant 0 : index
    %245 = vector.load %arg7[%c2_213, %c0_214, %c0_215] : memref<9x256x128xbf16, #tpu.memory_space<vmem>>, vector<1x256x128xbf16>
    %246 = vector.shape_cast %245 : vector<1x256x128xbf16> to vector<256x128xbf16>
    %cst_216 = arith.constant dense<0.000000e+00> : vector<16x128xf32>
    %247 = tpu.matmul %244, %246, %cst_216 {dimension_numbers = #tpu.dot_dimension_numbers<[1], [0], [0], [1], [0, 0, 1, 1], [], []>} : vector<16x256xbf16>, vector<256x128xbf16>, vector<16x128xf32> -> vector<16x128xf32>
    %248 = arith.addf %241, %247 : vector<16x128xf32>
    %c3_217 = arith.constant 3 : index
    %c7_218 = arith.constant 7 : index
    %c0_219 = arith.constant 0 : index
    %249 = vector.load %arg20[%c3_217, %c7_218, %c0_219] : memref<4x32x256xf32, #tpu.memory_space<vmem>>, vector<1x16x256xf32>
    %250 = vector.shape_cast %249 : vector<1x16x256xf32> to vector<16x256xf32>
    %c0_220 = arith.constant 0 : index
    %c0_221 = arith.constant 0 : index
    %c0_222 = arith.constant 0 : index
    %251 = vector.load %arg2[%c0_220, %c0_221, %c0_222] : memref<2x16x1xf32, #tpu.memory_space<vmem>>, vector<1x16x1xf32>
    %252 = vector.shape_cast %251 : vector<1x16x1xf32> to vector<16x1xf32>
    %253 = vector.broadcast %252 : vector<16x1xf32> to vector<16x256xf32>
    %254 = arith.mulf %250, %253 : vector<16x256xf32>
    %255 = arith.truncf %254 : vector<16x256xf32> to vector<16x256xbf16>
    %c3_223 = arith.constant 3 : index
    %c0_224 = arith.constant 0 : index
    %c0_225 = arith.constant 0 : index
    %256 = vector.load %arg7[%c3_223, %c0_224, %c0_225] : memref<9x256x128xbf16, #tpu.memory_space<vmem>>, vector<1x256x128xbf16>
    %257 = vector.shape_cast %256 : vector<1x256x128xbf16> to vector<256x128xbf16>
    %cst_226 = arith.constant dense<0.000000e+00> : vector<16x128xf32>
    %258 = tpu.matmul %255, %257, %cst_226 {dimension_numbers = #tpu.dot_dimension_numbers<[1], [0], [0], [1], [0, 0, 1, 1], [], []>} : vector<16x256xbf16>, vector<256x128xbf16>, vector<16x128xf32> -> vector<16x128xf32>
    %259 = arith.addf %248, %258 : vector<16x128xf32>
    %c2_227 = arith.constant 2 : index
    %c8_228 = arith.constant 8 : index
    %c0_229 = arith.constant 0 : index
    %260 = vector.load %arg20[%c2_227, %c8_228, %c0_229] : memref<4x32x256xf32, #tpu.memory_space<vmem>>, vector<1x16x256xf32>
    %261 = vector.shape_cast %260 : vector<1x16x256xf32> to vector<16x256xf32>
    %262 = arith.truncf %261 : vector<16x256xf32> to vector<16x256xbf16>
    %c4_230 = arith.constant 4 : index
    %c0_231 = arith.constant 0 : index
    %c0_232 = arith.constant 0 : index
    %263 = vector.load %arg7[%c4_230, %c0_231, %c0_232] : memref<9x256x128xbf16, #tpu.memory_space<vmem>>, vector<1x256x128xbf16>
    %264 = vector.shape_cast %263 : vector<1x256x128xbf16> to vector<256x128xbf16>
    %cst_233 = arith.constant dense<0.000000e+00> : vector<16x128xf32>
    %265 = tpu.matmul %262, %264, %cst_233 {dimension_numbers = #tpu.dot_dimension_numbers<[1], [0], [0], [1], [0, 0, 1, 1], [], []>} : vector<16x256xbf16>, vector<256x128xbf16>, vector<16x128xf32> -> vector<16x128xf32>
    %266 = arith.addf %259, %265 : vector<16x128xf32>
    %c3_234 = arith.constant 3 : index
    %c8_235 = arith.constant 8 : index
    %c0_236 = arith.constant 0 : index
    %267 = vector.load %arg20[%c3_234, %c8_235, %c0_236] : memref<4x32x256xf32, #tpu.memory_space<vmem>>, vector<1x16x256xf32>
    %268 = vector.shape_cast %267 : vector<1x16x256xf32> to vector<16x256xf32>
    %269 = arith.truncf %268 : vector<16x256xf32> to vector<16x256xbf16>
    %c5_237 = arith.constant 5 : index
    %c0_238 = arith.constant 0 : index
    %c0_239 = arith.constant 0 : index
    %270 = vector.load %arg7[%c5_237, %c0_238, %c0_239] : memref<9x256x128xbf16, #tpu.memory_space<vmem>>, vector<1x256x128xbf16>
    %271 = vector.shape_cast %270 : vector<1x256x128xbf16> to vector<256x128xbf16>
    %cst_240 = arith.constant dense<0.000000e+00> : vector<16x128xf32>
    %272 = tpu.matmul %269, %271, %cst_240 {dimension_numbers = #tpu.dot_dimension_numbers<[1], [0], [0], [1], [0, 0, 1, 1], [], []>} : vector<16x256xbf16>, vector<256x128xbf16>, vector<16x128xf32> -> vector<16x128xf32>
    %273 = arith.addf %266, %272 : vector<16x128xf32>
    %c1_241 = arith.constant 1 : index
    %c11 = arith.constant 11 : index
    %c0_242 = arith.constant 0 : index
    %274 = vector.load %arg20[%c1_241, %c11, %c0_242] : memref<4x32x256xf32, #tpu.memory_space<vmem>>, vector<1x16x256xf32>
    %275 = vector.shape_cast %274 : vector<1x16x256xf32> to vector<16x256xf32>
    %c0_243 = arith.constant 0 : index
    %c0_244 = arith.constant 0 : index
    %c0_245 = arith.constant 0 : index
    %276 = vector.load %arg2[%c0_243, %c0_244, %c0_245] : memref<2x16x1xf32, #tpu.memory_space<vmem>>, vector<1x16x1xf32>
    %277 = vector.shape_cast %276 : vector<1x16x1xf32> to vector<16x1xf32>
    %278 = vector.broadcast %277 : vector<16x1xf32> to vector<16x256xf32>
    %279 = arith.mulf %275, %278 : vector<16x256xf32>
    %280 = arith.truncf %279 : vector<16x256xf32> to vector<16x256xbf16>
    %c6_246 = arith.constant 6 : index
    %c0_247 = arith.constant 0 : index
    %c0_248 = arith.constant 0 : index
    %281 = vector.load %arg7[%c6_246, %c0_247, %c0_248] : memref<9x256x128xbf16, #tpu.memory_space<vmem>>, vector<1x256x128xbf16>
    %282 = vector.shape_cast %281 : vector<1x256x128xbf16> to vector<256x128xbf16>
    %cst_249 = arith.constant dense<0.000000e+00> : vector<16x128xf32>
    %283 = tpu.matmul %280, %282, %cst_249 {dimension_numbers = #tpu.dot_dimension_numbers<[1], [0], [0], [1], [0, 0, 1, 1], [], []>} : vector<16x256xbf16>, vector<256x128xbf16>, vector<16x128xf32> -> vector<16x128xf32>
    %284 = arith.addf %273, %283 : vector<16x128xf32>
    %c0_250 = arith.constant 0 : index
    %c12 = arith.constant 12 : index
    %c0_251 = arith.constant 0 : index
    %285 = vector.load %arg20[%c0_250, %c12, %c0_251] : memref<4x32x256xf32, #tpu.memory_space<vmem>>, vector<1x16x256xf32>
    %286 = vector.shape_cast %285 : vector<1x16x256xf32> to vector<16x256xf32>
    %287 = arith.truncf %286 : vector<16x256xf32> to vector<16x256xbf16>
    %c7_252 = arith.constant 7 : index
    %c0_253 = arith.constant 0 : index
    %c0_254 = arith.constant 0 : index
    %288 = vector.load %arg7[%c7_252, %c0_253, %c0_254] : memref<9x256x128xbf16, #tpu.memory_space<vmem>>, vector<1x256x128xbf16>
    %289 = vector.shape_cast %288 : vector<1x256x128xbf16> to vector<256x128xbf16>
    %cst_255 = arith.constant dense<0.000000e+00> : vector<16x128xf32>
    %290 = tpu.matmul %287, %289, %cst_255 {dimension_numbers = #tpu.dot_dimension_numbers<[1], [0], [0], [1], [0, 0, 1, 1], [], []>} : vector<16x256xbf16>, vector<256x128xbf16>, vector<16x128xf32> -> vector<16x128xf32>
    %291 = arith.addf %284, %290 : vector<16x128xf32>
    %c1_256 = arith.constant 1 : index
    %c12_257 = arith.constant 12 : index
    %c0_258 = arith.constant 0 : index
    %292 = vector.load %arg20[%c1_256, %c12_257, %c0_258] : memref<4x32x256xf32, #tpu.memory_space<vmem>>, vector<1x16x256xf32>
    %293 = vector.shape_cast %292 : vector<1x16x256xf32> to vector<16x256xf32>
    %294 = arith.truncf %293 : vector<16x256xf32> to vector<16x256xbf16>
    %c8_259 = arith.constant 8 : index
    %c0_260 = arith.constant 0 : index
    %c0_261 = arith.constant 0 : index
    %295 = vector.load %arg7[%c8_259, %c0_260, %c0_261] : memref<9x256x128xbf16, #tpu.memory_space<vmem>>, vector<1x256x128xbf16>
    %296 = vector.shape_cast %295 : vector<1x256x128xbf16> to vector<256x128xbf16>
    %cst_262 = arith.constant dense<0.000000e+00> : vector<16x128xf32>
    %297 = tpu.matmul %294, %296, %cst_262 {dimension_numbers = #tpu.dot_dimension_numbers<[1], [0], [0], [1], [0, 0, 1, 1], [], []>} : vector<16x256xbf16>, vector<256x128xbf16>, vector<16x128xf32> -> vector<16x128xf32>
    %298 = arith.addf %291, %297 : vector<16x128xf32>
    %c0_263 = arith.constant 0 : index
    %c0_264 = arith.constant 0 : index
    %299 = vector.load %arg8[%c0_263, %c0_264] : memref<1x128xf32, #tpu.memory_space<vmem>>, vector<1x128xf32>
    %300 = vector.broadcast %299 : vector<1x128xf32> to vector<16x128xf32>
    %301 = arith.addf %298, %300 : vector<16x128xf32>
    %cst_265 = arith.constant 0.000000e+00 : f32
    %302 = vector.broadcast %cst_265 : f32 to vector<16x128xf32>
    %303 = arith.maximumf %301, %302 : vector<16x128xf32>
    %cst_266 = arith.constant 0.000000e+00 : f32
    %304 = vector.broadcast %cst_266 : f32 to vector<16x128xf32>
    %c0_267 = arith.constant 0 : index
    %c8_268 = arith.constant 8 : index
    %c0_269 = arith.constant 0 : index
    %305 = vector.load %arg20[%c0_267, %c8_268, %c0_269] : memref<4x32x256xf32, #tpu.memory_space<vmem>>, vector<1x16x256xf32>
    %306 = vector.shape_cast %305 : vector<1x16x256xf32> to vector<16x256xf32>
    %307 = arith.truncf %306 : vector<16x256xf32> to vector<16x256xbf16>
    %c0_270 = arith.constant 0 : index
    %c0_271 = arith.constant 0 : index
    %c0_272 = arith.constant 0 : index
    %308 = vector.load %arg7[%c0_270, %c0_271, %c0_272] : memref<9x256x128xbf16, #tpu.memory_space<vmem>>, vector<1x256x128xbf16>
    %309 = vector.shape_cast %308 : vector<1x256x128xbf16> to vector<256x128xbf16>
    %cst_273 = arith.constant dense<0.000000e+00> : vector<16x128xf32>
    %310 = tpu.matmul %307, %309, %cst_273 {dimension_numbers = #tpu.dot_dimension_numbers<[1], [0], [0], [1], [0, 0, 1, 1], [], []>} : vector<16x256xbf16>, vector<256x128xbf16>, vector<16x128xf32> -> vector<16x128xf32>
    %311 = arith.addf %304, %310 : vector<16x128xf32>
    %c1_274 = arith.constant 1 : index
    %c8_275 = arith.constant 8 : index
    %c0_276 = arith.constant 0 : index
    %312 = vector.load %arg20[%c1_274, %c8_275, %c0_276] : memref<4x32x256xf32, #tpu.memory_space<vmem>>, vector<1x16x256xf32>
    %313 = vector.shape_cast %312 : vector<1x16x256xf32> to vector<16x256xf32>
    %314 = arith.truncf %313 : vector<16x256xf32> to vector<16x256xbf16>
    %c1_277 = arith.constant 1 : index
    %c0_278 = arith.constant 0 : index
    %c0_279 = arith.constant 0 : index
    %315 = vector.load %arg7[%c1_277, %c0_278, %c0_279] : memref<9x256x128xbf16, #tpu.memory_space<vmem>>, vector<1x256x128xbf16>
    %316 = vector.shape_cast %315 : vector<1x256x128xbf16> to vector<256x128xbf16>
    %cst_280 = arith.constant dense<0.000000e+00> : vector<16x128xf32>
    %317 = tpu.matmul %314, %316, %cst_280 {dimension_numbers = #tpu.dot_dimension_numbers<[1], [0], [0], [1], [0, 0, 1, 1], [], []>} : vector<16x256xbf16>, vector<256x128xbf16>, vector<16x128xf32> -> vector<16x128xf32>
    %318 = arith.addf %311, %317 : vector<16x128xf32>
    %c0_281 = arith.constant 0 : index
    %c9_282 = arith.constant 9 : index
    %c0_283 = arith.constant 0 : index
    %319 = vector.load %arg20[%c0_281, %c9_282, %c0_283] : memref<4x32x256xf32, #tpu.memory_space<vmem>>, vector<1x16x256xf32>
    %320 = vector.shape_cast %319 : vector<1x16x256xf32> to vector<16x256xf32>
    %c1_284 = arith.constant 1 : index
    %c0_285 = arith.constant 0 : index
    %c0_286 = arith.constant 0 : index
    %321 = vector.load %arg2[%c1_284, %c0_285, %c0_286] : memref<2x16x1xf32, #tpu.memory_space<vmem>>, vector<1x16x1xf32>
    %322 = vector.shape_cast %321 : vector<1x16x1xf32> to vector<16x1xf32>
    %323 = vector.broadcast %322 : vector<16x1xf32> to vector<16x256xf32>
    %324 = arith.mulf %320, %323 : vector<16x256xf32>
    %325 = arith.truncf %324 : vector<16x256xf32> to vector<16x256xbf16>
    %c2_287 = arith.constant 2 : index
    %c0_288 = arith.constant 0 : index
    %c0_289 = arith.constant 0 : index
    %326 = vector.load %arg7[%c2_287, %c0_288, %c0_289] : memref<9x256x128xbf16, #tpu.memory_space<vmem>>, vector<1x256x128xbf16>
    %327 = vector.shape_cast %326 : vector<1x256x128xbf16> to vector<256x128xbf16>
    %cst_290 = arith.constant dense<0.000000e+00> : vector<16x128xf32>
    %328 = tpu.matmul %325, %327, %cst_290 {dimension_numbers = #tpu.dot_dimension_numbers<[1], [0], [0], [1], [0, 0, 1, 1], [], []>} : vector<16x256xbf16>, vector<256x128xbf16>, vector<16x128xf32> -> vector<16x128xf32>
    %329 = arith.addf %318, %328 : vector<16x128xf32>
    %c2_291 = arith.constant 2 : index
    %c8_292 = arith.constant 8 : index
    %c0_293 = arith.constant 0 : index
    %330 = vector.load %arg20[%c2_291, %c8_292, %c0_293] : memref<4x32x256xf32, #tpu.memory_space<vmem>>, vector<1x16x256xf32>
    %331 = vector.shape_cast %330 : vector<1x16x256xf32> to vector<16x256xf32>
    %332 = arith.truncf %331 : vector<16x256xf32> to vector<16x256xbf16>
    %c3_294 = arith.constant 3 : index
    %c0_295 = arith.constant 0 : index
    %c0_296 = arith.constant 0 : index
    %333 = vector.load %arg7[%c3_294, %c0_295, %c0_296] : memref<9x256x128xbf16, #tpu.memory_space<vmem>>, vector<1x256x128xbf16>
    %334 = vector.shape_cast %333 : vector<1x256x128xbf16> to vector<256x128xbf16>
    %cst_297 = arith.constant dense<0.000000e+00> : vector<16x128xf32>
    %335 = tpu.matmul %332, %334, %cst_297 {dimension_numbers = #tpu.dot_dimension_numbers<[1], [0], [0], [1], [0, 0, 1, 1], [], []>} : vector<16x256xbf16>, vector<256x128xbf16>, vector<16x128xf32> -> vector<16x128xf32>
    %336 = arith.addf %329, %335 : vector<16x128xf32>
    %c3_298 = arith.constant 3 : index
    %c8_299 = arith.constant 8 : index
    %c0_300 = arith.constant 0 : index
    %337 = vector.load %arg20[%c3_298, %c8_299, %c0_300] : memref<4x32x256xf32, #tpu.memory_space<vmem>>, vector<1x16x256xf32>
    %338 = vector.shape_cast %337 : vector<1x16x256xf32> to vector<16x256xf32>
    %339 = arith.truncf %338 : vector<16x256xf32> to vector<16x256xbf16>
    %c4_301 = arith.constant 4 : index
    %c0_302 = arith.constant 0 : index
    %c0_303 = arith.constant 0 : index
    %340 = vector.load %arg7[%c4_301, %c0_302, %c0_303] : memref<9x256x128xbf16, #tpu.memory_space<vmem>>, vector<1x256x128xbf16>
    %341 = vector.shape_cast %340 : vector<1x256x128xbf16> to vector<256x128xbf16>
    %cst_304 = arith.constant dense<0.000000e+00> : vector<16x128xf32>
    %342 = tpu.matmul %339, %341, %cst_304 {dimension_numbers = #tpu.dot_dimension_numbers<[1], [0], [0], [1], [0, 0, 1, 1], [], []>} : vector<16x256xbf16>, vector<256x128xbf16>, vector<16x128xf32> -> vector<16x128xf32>
    %343 = arith.addf %336, %342 : vector<16x128xf32>
    %c2_305 = arith.constant 2 : index
    %c9_306 = arith.constant 9 : index
    %c0_307 = arith.constant 0 : index
    %344 = vector.load %arg20[%c2_305, %c9_306, %c0_307] : memref<4x32x256xf32, #tpu.memory_space<vmem>>, vector<1x16x256xf32>
    %345 = vector.shape_cast %344 : vector<1x16x256xf32> to vector<16x256xf32>
    %c1_308 = arith.constant 1 : index
    %c0_309 = arith.constant 0 : index
    %c0_310 = arith.constant 0 : index
    %346 = vector.load %arg2[%c1_308, %c0_309, %c0_310] : memref<2x16x1xf32, #tpu.memory_space<vmem>>, vector<1x16x1xf32>
    %347 = vector.shape_cast %346 : vector<1x16x1xf32> to vector<16x1xf32>
    %348 = vector.broadcast %347 : vector<16x1xf32> to vector<16x256xf32>
    %349 = arith.mulf %345, %348 : vector<16x256xf32>
    %350 = arith.truncf %349 : vector<16x256xf32> to vector<16x256xbf16>
    %c5_311 = arith.constant 5 : index
    %c0_312 = arith.constant 0 : index
    %c0_313 = arith.constant 0 : index
    %351 = vector.load %arg7[%c5_311, %c0_312, %c0_313] : memref<9x256x128xbf16, #tpu.memory_space<vmem>>, vector<1x256x128xbf16>
    %352 = vector.shape_cast %351 : vector<1x256x128xbf16> to vector<256x128xbf16>
    %cst_314 = arith.constant dense<0.000000e+00> : vector<16x128xf32>
    %353 = tpu.matmul %350, %352, %cst_314 {dimension_numbers = #tpu.dot_dimension_numbers<[1], [0], [0], [1], [0, 0, 1, 1], [], []>} : vector<16x256xbf16>, vector<256x128xbf16>, vector<16x128xf32> -> vector<16x128xf32>
    %354 = arith.addf %343, %353 : vector<16x128xf32>
    %c0_315 = arith.constant 0 : index
    %c12_316 = arith.constant 12 : index
    %c0_317 = arith.constant 0 : index
    %355 = vector.load %arg20[%c0_315, %c12_316, %c0_317] : memref<4x32x256xf32, #tpu.memory_space<vmem>>, vector<1x16x256xf32>
    %356 = vector.shape_cast %355 : vector<1x16x256xf32> to vector<16x256xf32>
    %357 = arith.truncf %356 : vector<16x256xf32> to vector<16x256xbf16>
    %c6_318 = arith.constant 6 : index
    %c0_319 = arith.constant 0 : index
    %c0_320 = arith.constant 0 : index
    %358 = vector.load %arg7[%c6_318, %c0_319, %c0_320] : memref<9x256x128xbf16, #tpu.memory_space<vmem>>, vector<1x256x128xbf16>
    %359 = vector.shape_cast %358 : vector<1x256x128xbf16> to vector<256x128xbf16>
    %cst_321 = arith.constant dense<0.000000e+00> : vector<16x128xf32>
    %360 = tpu.matmul %357, %359, %cst_321 {dimension_numbers = #tpu.dot_dimension_numbers<[1], [0], [0], [1], [0, 0, 1, 1], [], []>} : vector<16x256xbf16>, vector<256x128xbf16>, vector<16x128xf32> -> vector<16x128xf32>
    %361 = arith.addf %354, %360 : vector<16x128xf32>
    %c1_322 = arith.constant 1 : index
    %c12_323 = arith.constant 12 : index
    %c0_324 = arith.constant 0 : index
    %362 = vector.load %arg20[%c1_322, %c12_323, %c0_324] : memref<4x32x256xf32, #tpu.memory_space<vmem>>, vector<1x16x256xf32>
    %363 = vector.shape_cast %362 : vector<1x16x256xf32> to vector<16x256xf32>
    %364 = arith.truncf %363 : vector<16x256xf32> to vector<16x256xbf16>
    %c7_325 = arith.constant 7 : index
    %c0_326 = arith.constant 0 : index
    %c0_327 = arith.constant 0 : index
    %365 = vector.load %arg7[%c7_325, %c0_326, %c0_327] : memref<9x256x128xbf16, #tpu.memory_space<vmem>>, vector<1x256x128xbf16>
    %366 = vector.shape_cast %365 : vector<1x256x128xbf16> to vector<256x128xbf16>
    %cst_328 = arith.constant dense<0.000000e+00> : vector<16x128xf32>
    %367 = tpu.matmul %364, %366, %cst_328 {dimension_numbers = #tpu.dot_dimension_numbers<[1], [0], [0], [1], [0, 0, 1, 1], [], []>} : vector<16x256xbf16>, vector<256x128xbf16>, vector<16x128xf32> -> vector<16x128xf32>
    %368 = arith.addf %361, %367 : vector<16x128xf32>
    %c0_329 = arith.constant 0 : index
    %c13 = arith.constant 13 : index
    %c0_330 = arith.constant 0 : index
    %369 = vector.load %arg20[%c0_329, %c13, %c0_330] : memref<4x32x256xf32, #tpu.memory_space<vmem>>, vector<1x16x256xf32>
    %370 = vector.shape_cast %369 : vector<1x16x256xf32> to vector<16x256xf32>
    %c1_331 = arith.constant 1 : index
    %c0_332 = arith.constant 0 : index
    %c0_333 = arith.constant 0 : index
    %371 = vector.load %arg2[%c1_331, %c0_332, %c0_333] : memref<2x16x1xf32, #tpu.memory_space<vmem>>, vector<1x16x1xf32>
    %372 = vector.shape_cast %371 : vector<1x16x1xf32> to vector<16x1xf32>
    %373 = vector.broadcast %372 : vector<16x1xf32> to vector<16x256xf32>
    %374 = arith.mulf %370, %373 : vector<16x256xf32>
    %375 = arith.truncf %374 : vector<16x256xf32> to vector<16x256xbf16>
    %c8_334 = arith.constant 8 : index
    %c0_335 = arith.constant 0 : index
    %c0_336 = arith.constant 0 : index
    %376 = vector.load %arg7[%c8_334, %c0_335, %c0_336] : memref<9x256x128xbf16, #tpu.memory_space<vmem>>, vector<1x256x128xbf16>
    %377 = vector.shape_cast %376 : vector<1x256x128xbf16> to vector<256x128xbf16>
    %cst_337 = arith.constant dense<0.000000e+00> : vector<16x128xf32>
    %378 = tpu.matmul %375, %377, %cst_337 {dimension_numbers = #tpu.dot_dimension_numbers<[1], [0], [0], [1], [0, 0, 1, 1], [], []>} : vector<16x256xbf16>, vector<256x128xbf16>, vector<16x128xf32> -> vector<16x128xf32>
    %379 = arith.addf %368, %378 : vector<16x128xf32>
    %c0_338 = arith.constant 0 : index
    %c0_339 = arith.constant 0 : index
    %380 = vector.load %arg8[%c0_338, %c0_339] : memref<1x128xf32, #tpu.memory_space<vmem>>, vector<1x128xf32>
    %381 = vector.broadcast %380 : vector<1x128xf32> to vector<16x128xf32>
    %382 = arith.addf %379, %381 : vector<16x128xf32>
    %cst_340 = arith.constant 0.000000e+00 : f32
    %383 = vector.broadcast %cst_340 : f32 to vector<16x128xf32>
    %384 = arith.maximumf %382, %383 : vector<16x128xf32>
    %cst_341 = arith.constant 0.000000e+00 : f32
    %385 = vector.broadcast %cst_341 : f32 to vector<16x256xf32>
    %386 = arith.truncf %141 : vector<16x128xf32> to vector<16x128xbf16>
    %c0_342 = arith.constant 0 : index
    %c0_343 = arith.constant 0 : index
    %c0_344 = arith.constant 0 : index
    %387 = vector.load %arg9[%c0_342, %c0_343, %c0_344] : memref<4x128x256xbf16, #tpu.memory_space<vmem>>, vector<1x128x256xbf16>
    %388 = vector.shape_cast %387 : vector<1x128x256xbf16> to vector<128x256xbf16>
    %cst_345 = arith.constant dense<0.000000e+00> : vector<16x256xf32>
    %389 = tpu.matmul %386, %388, %cst_345 {dimension_numbers = #tpu.dot_dimension_numbers<[1], [0], [0], [1], [0, 0, 1, 1], [], []>} : vector<16x128xbf16>, vector<128x256xbf16>, vector<16x256xf32> -> vector<16x256xf32>
    %390 = arith.addf %385, %389 : vector<16x256xf32>
    %391 = arith.truncf %222 : vector<16x128xf32> to vector<16x128xbf16>
    %c1_346 = arith.constant 1 : index
    %c0_347 = arith.constant 0 : index
    %c0_348 = arith.constant 0 : index
    %392 = vector.load %arg9[%c1_346, %c0_347, %c0_348] : memref<4x128x256xbf16, #tpu.memory_space<vmem>>, vector<1x128x256xbf16>
    %393 = vector.shape_cast %392 : vector<1x128x256xbf16> to vector<128x256xbf16>
    %cst_349 = arith.constant dense<0.000000e+00> : vector<16x256xf32>
    %394 = tpu.matmul %391, %393, %cst_349 {dimension_numbers = #tpu.dot_dimension_numbers<[1], [0], [0], [1], [0, 0, 1, 1], [], []>} : vector<16x128xbf16>, vector<128x256xbf16>, vector<16x256xf32> -> vector<16x256xf32>
    %395 = arith.addf %390, %394 : vector<16x256xf32>
    %396 = arith.truncf %303 : vector<16x128xf32> to vector<16x128xbf16>
    %c2_350 = arith.constant 2 : index
    %c0_351 = arith.constant 0 : index
    %c0_352 = arith.constant 0 : index
    %397 = vector.load %arg9[%c2_350, %c0_351, %c0_352] : memref<4x128x256xbf16, #tpu.memory_space<vmem>>, vector<1x128x256xbf16>
    %398 = vector.shape_cast %397 : vector<1x128x256xbf16> to vector<128x256xbf16>
    %cst_353 = arith.constant dense<0.000000e+00> : vector<16x256xf32>
    %399 = tpu.matmul %396, %398, %cst_353 {dimension_numbers = #tpu.dot_dimension_numbers<[1], [0], [0], [1], [0, 0, 1, 1], [], []>} : vector<16x128xbf16>, vector<128x256xbf16>, vector<16x256xf32> -> vector<16x256xf32>
    %400 = arith.addf %395, %399 : vector<16x256xf32>
    %401 = arith.truncf %384 : vector<16x128xf32> to vector<16x128xbf16>
    %c3_354 = arith.constant 3 : index
    %c0_355 = arith.constant 0 : index
    %c0_356 = arith.constant 0 : index
    %402 = vector.load %arg9[%c3_354, %c0_355, %c0_356] : memref<4x128x256xbf16, #tpu.memory_space<vmem>>, vector<1x128x256xbf16>
    %403 = vector.shape_cast %402 : vector<1x128x256xbf16> to vector<128x256xbf16>
    %cst_357 = arith.constant dense<0.000000e+00> : vector<16x256xf32>
    %404 = tpu.matmul %401, %403, %cst_357 {dimension_numbers = #tpu.dot_dimension_numbers<[1], [0], [0], [1], [0, 0, 1, 1], [], []>} : vector<16x128xbf16>, vector<128x256xbf16>, vector<16x256xf32> -> vector<16x256xf32>
    %405 = arith.addf %400, %404 : vector<16x256xf32>
    %c0_358 = arith.constant 0 : index
    %c0_359 = arith.constant 0 : index
    %406 = vector.load %arg10[%c0_358, %c0_359] : memref<1x256xf32, #tpu.memory_space<vmem>>, vector<1x256xf32>
    %407 = vector.broadcast %406 : vector<1x256xf32> to vector<16x256xf32>
    %408 = arith.addf %405, %407 : vector<16x256xf32>
    %cst_360 = arith.constant 0.000000e+00 : f32
    %409 = vector.broadcast %cst_360 : f32 to vector<16x256xf32>
    %410 = arith.maximumf %408, %409 : vector<16x256xf32>
    %411 = arith.addf %410, %60 : vector<16x256xf32>
    %c8_361 = arith.constant 8 : index
    %c0_362 = arith.constant 0 : index
    %412 = vector.load %arg21[%c8_361, %c0_362] : memref<32x256xf32, #tpu.memory_space<vmem>>, vector<16x256xf32>
    tpu.vector_store %arg21[%c8_361, %c0_362], %411 {strides = array<i32>} : memref<32x256xf32, #tpu.memory_space<vmem>>, vector<16x256xf32>,
    %cst_363 = arith.constant 0.000000e+00 : f32
    %413 = vector.broadcast %cst_363 : f32 to vector<16x256xf32>
    %c3_364 = arith.constant 3 : index
    %c0_365 = arith.constant 0 : index
    %414 = vector.load %arg21[%c3_364, %c0_365] : memref<32x256xf32, #tpu.memory_space<vmem>>, vector<16x256xf32>
    %c0_366 = arith.constant 0 : index
    %c0_367 = arith.constant 0 : index
    %c0_368 = arith.constant 0 : index
    %415 = vector.load %arg2[%c0_366, %c0_367, %c0_368] : memref<2x16x1xf32, #tpu.memory_space<vmem>>, vector<1x16x1xf32>
    %416 = vector.shape_cast %415 : vector<1x16x1xf32> to vector<16x1xf32>
    %417 = vector.broadcast %416 : vector<16x1xf32> to vector<16x256xf32>
    %418 = arith.mulf %414, %417 : vector<16x256xf32>
    %419 = arith.truncf %418 : vector<16x256xf32> to vector<16x256xbf16>
    %c0_369 = arith.constant 0 : index
    %c0_370 = arith.constant 0 : index
    %c0_371 = arith.constant 0 : index
    %420 = vector.load %arg11[%c0_369, %c0_370, %c0_371] : memref<9x256x256xbf16, #tpu.memory_space<vmem>>, vector<1x256x256xbf16>
    %421 = vector.shape_cast %420 : vector<1x256x256xbf16> to vector<256x256xbf16>
    %cst_372 = arith.constant dense<0.000000e+00> : vector<16x256xf32>
    %422 = tpu.matmul %419, %421, %cst_372 {dimension_numbers = #tpu.dot_dimension_numbers<[1], [0], [0], [1], [0, 0, 1, 1], [], []>} : vector<16x256xbf16>, vector<256x256xbf16>, vector<16x256xf32> -> vector<16x256xf32>
    %423 = arith.addf %413, %422 : vector<16x256xf32>
    %c4_373 = arith.constant 4 : index
    %c0_374 = arith.constant 0 : index
    %424 = vector.load %arg21[%c4_373, %c0_374] : memref<32x256xf32, #tpu.memory_space<vmem>>, vector<16x256xf32>
    %425 = arith.truncf %424 : vector<16x256xf32> to vector<16x256xbf16>
    %c1_375 = arith.constant 1 : index
    %c0_376 = arith.constant 0 : index
    %c0_377 = arith.constant 0 : index
    %426 = vector.load %arg11[%c1_375, %c0_376, %c0_377] : memref<9x256x256xbf16, #tpu.memory_space<vmem>>, vector<1x256x256xbf16>
    %427 = vector.shape_cast %426 : vector<1x256x256xbf16> to vector<256x256xbf16>
    %cst_378 = arith.constant dense<0.000000e+00> : vector<16x256xf32>
    %428 = tpu.matmul %425, %427, %cst_378 {dimension_numbers = #tpu.dot_dimension_numbers<[1], [0], [0], [1], [0, 0, 1, 1], [], []>} : vector<16x256xbf16>, vector<256x256xbf16>, vector<16x256xf32> -> vector<16x256xf32>
    %429 = arith.addf %423, %428 : vector<16x256xf32>
    %c5_379 = arith.constant 5 : index
    %c0_380 = arith.constant 0 : index
    %430 = vector.load %arg21[%c5_379, %c0_380] : memref<32x256xf32, #tpu.memory_space<vmem>>, vector<16x256xf32>
    %c1_381 = arith.constant 1 : index
    %c0_382 = arith.constant 0 : index
    %c0_383 = arith.constant 0 : index
    %431 = vector.load %arg2[%c1_381, %c0_382, %c0_383] : memref<2x16x1xf32, #tpu.memory_space<vmem>>, vector<1x16x1xf32>
    %432 = vector.shape_cast %431 : vector<1x16x1xf32> to vector<16x1xf32>
    %433 = vector.broadcast %432 : vector<16x1xf32> to vector<16x256xf32>
    %434 = arith.mulf %430, %433 : vector<16x256xf32>
    %435 = arith.truncf %434 : vector<16x256xf32> to vector<16x256xbf16>
    %c2_384 = arith.constant 2 : index
    %c0_385 = arith.constant 0 : index
    %c0_386 = arith.constant 0 : index
    %436 = vector.load %arg11[%c2_384, %c0_385, %c0_386] : memref<9x256x256xbf16, #tpu.memory_space<vmem>>, vector<1x256x256xbf16>
    %437 = vector.shape_cast %436 : vector<1x256x256xbf16> to vector<256x256xbf16>
    %cst_387 = arith.constant dense<0.000000e+00> : vector<16x256xf32>
    %438 = tpu.matmul %435, %437, %cst_387 {dimension_numbers = #tpu.dot_dimension_numbers<[1], [0], [0], [1], [0, 0, 1, 1], [], []>} : vector<16x256xbf16>, vector<256x256xbf16>, vector<16x256xf32> -> vector<16x256xf32>
    %439 = arith.addf %429, %438 : vector<16x256xf32>
    %c7_388 = arith.constant 7 : index
    %c0_389 = arith.constant 0 : index
    %440 = vector.load %arg21[%c7_388, %c0_389] : memref<32x256xf32, #tpu.memory_space<vmem>>, vector<16x256xf32>
    %c0_390 = arith.constant 0 : index
    %c0_391 = arith.constant 0 : index
    %c0_392 = arith.constant 0 : index
    %441 = vector.load %arg2[%c0_390, %c0_391, %c0_392] : memref<2x16x1xf32, #tpu.memory_space<vmem>>, vector<1x16x1xf32>
    %442 = vector.shape_cast %441 : vector<1x16x1xf32> to vector<16x1xf32>
    %443 = vector.broadcast %442 : vector<16x1xf32> to vector<16x256xf32>
    %444 = arith.mulf %440, %443 : vector<16x256xf32>
    %445 = arith.truncf %444 : vector<16x256xf32> to vector<16x256xbf16>
    %c3_393 = arith.constant 3 : index
    %c0_394 = arith.constant 0 : index
    %c0_395 = arith.constant 0 : index
    %446 = vector.load %arg11[%c3_393, %c0_394, %c0_395] : memref<9x256x256xbf16, #tpu.memory_space<vmem>>, vector<1x256x256xbf16>
    %447 = vector.shape_cast %446 : vector<1x256x256xbf16> to vector<256x256xbf16>
    %cst_396 = arith.constant dense<0.000000e+00> : vector<16x256xf32>
    %448 = tpu.matmul %445, %447, %cst_396 {dimension_numbers = #tpu.dot_dimension_numbers<[1], [0], [0], [1], [0, 0, 1, 1], [], []>} : vector<16x256xbf16>, vector<256x256xbf16>, vector<16x256xf32> -> vector<16x256xf32>
    %449 = arith.addf %439, %448 : vector<16x256xf32>
    %c8_397 = arith.constant 8 : index
    %c0_398 = arith.constant 0 : index
    %450 = vector.load %arg21[%c8_397, %c0_398] : memref<32x256xf32, #tpu.memory_space<vmem>>, vector<16x256xf32>
    %451 = arith.truncf %450 : vector<16x256xf32> to vector<16x256xbf16>
    %c4_399 = arith.constant 4 : index
    %c0_400 = arith.constant 0 : index
    %c0_401 = arith.constant 0 : index
    %452 = vector.load %arg11[%c4_399, %c0_400, %c0_401] : memref<9x256x256xbf16, #tpu.memory_space<vmem>>, vector<1x256x256xbf16>
    %453 = vector.shape_cast %452 : vector<1x256x256xbf16> to vector<256x256xbf16>
    %cst_402 = arith.constant dense<0.000000e+00> : vector<16x256xf32>
    %454 = tpu.matmul %451, %453, %cst_402 {dimension_numbers = #tpu.dot_dimension_numbers<[1], [0], [0], [1], [0, 0, 1, 1], [], []>} : vector<16x256xbf16>, vector<256x256xbf16>, vector<16x256xf32> -> vector<16x256xf32>
    %455 = arith.addf %449, %454 : vector<16x256xf32>
    %c9_403 = arith.constant 9 : index
    %c0_404 = arith.constant 0 : index
    %456 = vector.load %arg21[%c9_403, %c0_404] : memref<32x256xf32, #tpu.memory_space<vmem>>, vector<16x256xf32>
    %c1_405 = arith.constant 1 : index
    %c0_406 = arith.constant 0 : index
    %c0_407 = arith.constant 0 : index
    %457 = vector.load %arg2[%c1_405, %c0_406, %c0_407] : memref<2x16x1xf32, #tpu.memory_space<vmem>>, vector<1x16x1xf32>
    %458 = vector.shape_cast %457 : vector<1x16x1xf32> to vector<16x1xf32>
    %459 = vector.broadcast %458 : vector<16x1xf32> to vector<16x256xf32>
    %460 = arith.mulf %456, %459 : vector<16x256xf32>
    %461 = arith.truncf %460 : vector<16x256xf32> to vector<16x256xbf16>
    %c5_408 = arith.constant 5 : index
    %c0_409 = arith.constant 0 : index
    %c0_410 = arith.constant 0 : index
    %462 = vector.load %arg11[%c5_408, %c0_409, %c0_410] : memref<9x256x256xbf16, #tpu.memory_space<vmem>>, vector<1x256x256xbf16>
    %463 = vector.shape_cast %462 : vector<1x256x256xbf16> to vector<256x256xbf16>
    %cst_411 = arith.constant dense<0.000000e+00> : vector<16x256xf32>
    %464 = tpu.matmul %461, %463, %cst_411 {dimension_numbers = #tpu.dot_dimension_numbers<[1], [0], [0], [1], [0, 0, 1, 1], [], []>} : vector<16x256xbf16>, vector<256x256xbf16>, vector<16x256xf32> -> vector<16x256xf32>
    %465 = arith.addf %455, %464 : vector<16x256xf32>
    %c11_412 = arith.constant 11 : index
    %c0_413 = arith.constant 0 : index
    %466 = vector.load %arg21[%c11_412, %c0_413] : memref<32x256xf32, #tpu.memory_space<vmem>>, vector<16x256xf32>
    %c0_414 = arith.constant 0 : index
    %c0_415 = arith.constant 0 : index
    %c0_416 = arith.constant 0 : index
    %467 = vector.load %arg2[%c0_414, %c0_415, %c0_416] : memref<2x16x1xf32, #tpu.memory_space<vmem>>, vector<1x16x1xf32>
    %468 = vector.shape_cast %467 : vector<1x16x1xf32> to vector<16x1xf32>
    %469 = vector.broadcast %468 : vector<16x1xf32> to vector<16x256xf32>
    %470 = arith.mulf %466, %469 : vector<16x256xf32>
    %471 = arith.truncf %470 : vector<16x256xf32> to vector<16x256xbf16>
    %c6_417 = arith.constant 6 : index
    %c0_418 = arith.constant 0 : index
    %c0_419 = arith.constant 0 : index
    %472 = vector.load %arg11[%c6_417, %c0_418, %c0_419] : memref<9x256x256xbf16, #tpu.memory_space<vmem>>, vector<1x256x256xbf16>
    %473 = vector.shape_cast %472 : vector<1x256x256xbf16> to vector<256x256xbf16>
    %cst_420 = arith.constant dense<0.000000e+00> : vector<16x256xf32>
    %474 = tpu.matmul %471, %473, %cst_420 {dimension_numbers = #tpu.dot_dimension_numbers<[1], [0], [0], [1], [0, 0, 1, 1], [], []>} : vector<16x256xbf16>, vector<256x256xbf16>, vector<16x256xf32> -> vector<16x256xf32>
    %475 = arith.addf %465, %474 : vector<16x256xf32>
    %c12_421 = arith.constant 12 : index
    %c0_422 = arith.constant 0 : index
    %476 = vector.load %arg21[%c12_421, %c0_422] : memref<32x256xf32, #tpu.memory_space<vmem>>, vector<16x256xf32>
    %477 = arith.truncf %476 : vector<16x256xf32> to vector<16x256xbf16>
    %c7_423 = arith.constant 7 : index
    %c0_424 = arith.constant 0 : index
    %c0_425 = arith.constant 0 : index
    %478 = vector.load %arg11[%c7_423, %c0_424, %c0_425] : memref<9x256x256xbf16, #tpu.memory_space<vmem>>, vector<1x256x256xbf16>
    %479 = vector.shape_cast %478 : vector<1x256x256xbf16> to vector<256x256xbf16>
    %cst_426 = arith.constant dense<0.000000e+00> : vector<16x256xf32>
    %480 = tpu.matmul %477, %479, %cst_426 {dimension_numbers = #tpu.dot_dimension_numbers<[1], [0], [0], [1], [0, 0, 1, 1], [], []>} : vector<16x256xbf16>, vector<256x256xbf16>, vector<16x256xf32> -> vector<16x256xf32>
    %481 = arith.addf %475, %480 : vector<16x256xf32>
    %c13_427 = arith.constant 13 : index
    %c0_428 = arith.constant 0 : index
    %482 = vector.load %arg21[%c13_427, %c0_428] : memref<32x256xf32, #tpu.memory_space<vmem>>, vector<16x256xf32>
    %c1_429 = arith.constant 1 : index
    %c0_430 = arith.constant 0 : index
    %c0_431 = arith.constant 0 : index
    %483 = vector.load %arg2[%c1_429, %c0_430, %c0_431] : memref<2x16x1xf32, #tpu.memory_space<vmem>>, vector<1x16x1xf32>
    %484 = vector.shape_cast %483 : vector<1x16x1xf32> to vector<16x1xf32>
    %485 = vector.broadcast %484 : vector<16x1xf32> to vector<16x256xf32>
    %486 = arith.mulf %482, %485 : vector<16x256xf32>
    %487 = arith.truncf %486 : vector<16x256xf32> to vector<16x256xbf16>
    %c8_432 = arith.constant 8 : index
    %c0_433 = arith.constant 0 : index
    %c0_434 = arith.constant 0 : index
    %488 = vector.load %arg11[%c8_432, %c0_433, %c0_434] : memref<9x256x256xbf16, #tpu.memory_space<vmem>>, vector<1x256x256xbf16>
    %489 = vector.shape_cast %488 : vector<1x256x256xbf16> to vector<256x256xbf16>
    %cst_435 = arith.constant dense<0.000000e+00> : vector<16x256xf32>
    %490 = tpu.matmul %487, %489, %cst_435 {dimension_numbers = #tpu.dot_dimension_numbers<[1], [0], [0], [1], [0, 0, 1, 1], [], []>} : vector<16x256xbf16>, vector<256x256xbf16>, vector<16x256xf32> -> vector<16x256xf32>
    %491 = arith.addf %481, %490 : vector<16x256xf32>
    %c0_436 = arith.constant 0 : index
    %c0_437 = arith.constant 0 : index
    %492 = vector.load %arg12[%c0_436, %c0_437] : memref<1x256xf32, #tpu.memory_space<vmem>>, vector<1x256xf32>
    %493 = vector.broadcast %492 : vector<1x256xf32> to vector<16x256xf32>
    %494 = arith.addf %491, %493 : vector<16x256xf32>
    %cst_438 = arith.constant 0.000000e+00 : f32
    %495 = vector.broadcast %cst_438 : f32 to vector<16x256xf32>
    %496 = arith.maximumf %494, %495 : vector<16x256xf32>
    %cst_439 = arith.constant 0.000000e+00 : f32
    %497 = vector.broadcast %cst_439 : f32 to vector<16x128xf32>
    %c3_440 = arith.constant 3 : index
    %c0_441 = arith.constant 0 : index
    %498 = vector.load %arg21[%c3_440, %c0_441] : memref<32x256xf32, #tpu.memory_space<vmem>>, vector<16x256xf32>
    %c0_442 = arith.constant 0 : index
    %c0_443 = arith.constant 0 : index
    %c0_444 = arith.constant 0 : index
    %499 = vector.load %arg2[%c0_442, %c0_443, %c0_444] : memref<2x16x1xf32, #tpu.memory_space<vmem>>, vector<1x16x1xf32>
    %500 = vector.shape_cast %499 : vector<1x16x1xf32> to vector<16x1xf32>
    %501 = vector.broadcast %500 : vector<16x1xf32> to vector<16x256xf32>
    %502 = arith.mulf %498, %501 : vector<16x256xf32>
    %503 = arith.truncf %502 : vector<16x256xf32> to vector<16x256xbf16>
    %c0_445 = arith.constant 0 : index
    %c0_446 = arith.constant 0 : index
    %c0_447 = arith.constant 0 : index
    %504 = vector.load %arg13[%c0_445, %c0_446, %c0_447] : memref<9x256x128xbf16, #tpu.memory_space<vmem>>, vector<1x256x128xbf16>
    %505 = vector.shape_cast %504 : vector<1x256x128xbf16> to vector<256x128xbf16>
    %cst_448 = arith.constant dense<0.000000e+00> : vector<16x128xf32>
    %506 = tpu.matmul %503, %505, %cst_448 {dimension_numbers = #tpu.dot_dimension_numbers<[1], [0], [0], [1], [0, 0, 1, 1], [], []>} : vector<16x256xbf16>, vector<256x128xbf16>, vector<16x128xf32> -> vector<16x128xf32>
    %507 = arith.addf %497, %506 : vector<16x128xf32>
    %c4_449 = arith.constant 4 : index
    %c0_450 = arith.constant 0 : index
    %508 = vector.load %arg21[%c4_449, %c0_450] : memref<32x256xf32, #tpu.memory_space<vmem>>, vector<16x256xf32>
    %509 = arith.truncf %508 : vector<16x256xf32> to vector<16x256xbf16>
    %c1_451 = arith.constant 1 : index
    %c0_452 = arith.constant 0 : index
    %c0_453 = arith.constant 0 : index
    %510 = vector.load %arg13[%c1_451, %c0_452, %c0_453] : memref<9x256x128xbf16, #tpu.memory_space<vmem>>, vector<1x256x128xbf16>
    %511 = vector.shape_cast %510 : vector<1x256x128xbf16> to vector<256x128xbf16>
    %cst_454 = arith.constant dense<0.000000e+00> : vector<16x128xf32>
    %512 = tpu.matmul %509, %511, %cst_454 {dimension_numbers = #tpu.dot_dimension_numbers<[1], [0], [0], [1], [0, 0, 1, 1], [], []>} : vector<16x256xbf16>, vector<256x128xbf16>, vector<16x128xf32> -> vector<16x128xf32>
    %513 = arith.addf %507, %512 : vector<16x128xf32>
    %c5_455 = arith.constant 5 : index
    %c0_456 = arith.constant 0 : index
    %514 = vector.load %arg21[%c5_455, %c0_456] : memref<32x256xf32, #tpu.memory_space<vmem>>, vector<16x256xf32>
    %c1_457 = arith.constant 1 : index
    %c0_458 = arith.constant 0 : index
    %c0_459 = arith.constant 0 : index
    %515 = vector.load %arg2[%c1_457, %c0_458, %c0_459] : memref<2x16x1xf32, #tpu.memory_space<vmem>>, vector<1x16x1xf32>
    %516 = vector.shape_cast %515 : vector<1x16x1xf32> to vector<16x1xf32>
    %517 = vector.broadcast %516 : vector<16x1xf32> to vector<16x256xf32>
    %518 = arith.mulf %514, %517 : vector<16x256xf32>
    %519 = arith.truncf %518 : vector<16x256xf32> to vector<16x256xbf16>
    %c2_460 = arith.constant 2 : index
    %c0_461 = arith.constant 0 : index
    %c0_462 = arith.constant 0 : index
    %520 = vector.load %arg13[%c2_460, %c0_461, %c0_462] : memref<9x256x128xbf16, #tpu.memory_space<vmem>>, vector<1x256x128xbf16>
    %521 = vector.shape_cast %520 : vector<1x256x128xbf16> to vector<256x128xbf16>
    %cst_463 = arith.constant dense<0.000000e+00> : vector<16x128xf32>
    %522 = tpu.matmul %519, %521, %cst_463 {dimension_numbers = #tpu.dot_dimension_numbers<[1], [0], [0], [1], [0, 0, 1, 1], [], []>} : vector<16x256xbf16>, vector<256x128xbf16>, vector<16x128xf32> -> vector<16x128xf32>
    %523 = arith.addf %513, %522 : vector<16x128xf32>
    %c7_464 = arith.constant 7 : index
    %c0_465 = arith.constant 0 : index
    %524 = vector.load %arg21[%c7_464, %c0_465] : memref<32x256xf32, #tpu.memory_space<vmem>>, vector<16x256xf32>
    %c0_466 = arith.constant 0 : index
    %c0_467 = arith.constant 0 : index
    %c0_468 = arith.constant 0 : index
    %525 = vector.load %arg2[%c0_466, %c0_467, %c0_468] : memref<2x16x1xf32, #tpu.memory_space<vmem>>, vector<1x16x1xf32>
    %526 = vector.shape_cast %525 : vector<1x16x1xf32> to vector<16x1xf32>
    %527 = vector.broadcast %526 : vector<16x1xf32> to vector<16x256xf32>
    %528 = arith.mulf %524, %527 : vector<16x256xf32>
    %529 = arith.truncf %528 : vector<16x256xf32> to vector<16x256xbf16>
    %c3_469 = arith.constant 3 : index
    %c0_470 = arith.constant 0 : index
    %c0_471 = arith.constant 0 : index
    %530 = vector.load %arg13[%c3_469, %c0_470, %c0_471] : memref<9x256x128xbf16, #tpu.memory_space<vmem>>, vector<1x256x128xbf16>
    %531 = vector.shape_cast %530 : vector<1x256x128xbf16> to vector<256x128xbf16>
    %cst_472 = arith.constant dense<0.000000e+00> : vector<16x128xf32>
    %532 = tpu.matmul %529, %531, %cst_472 {dimension_numbers = #tpu.dot_dimension_numbers<[1], [0], [0], [1], [0, 0, 1, 1], [], []>} : vector<16x256xbf16>, vector<256x128xbf16>, vector<16x128xf32> -> vector<16x128xf32>
    %533 = arith.addf %523, %532 : vector<16x128xf32>
    %c8_473 = arith.constant 8 : index
    %c0_474 = arith.constant 0 : index
    %534 = vector.load %arg21[%c8_473, %c0_474] : memref<32x256xf32, #tpu.memory_space<vmem>>, vector<16x256xf32>
    %535 = arith.truncf %534 : vector<16x256xf32> to vector<16x256xbf16>
    %c4_475 = arith.constant 4 : index
    %c0_476 = arith.constant 0 : index
    %c0_477 = arith.constant 0 : index
    %536 = vector.load %arg13[%c4_475, %c0_476, %c0_477] : memref<9x256x128xbf16, #tpu.memory_space<vmem>>, vector<1x256x128xbf16>
    %537 = vector.shape_cast %536 : vector<1x256x128xbf16> to vector<256x128xbf16>
    %cst_478 = arith.constant dense<0.000000e+00> : vector<16x128xf32>
    %538 = tpu.matmul %535, %537, %cst_478 {dimension_numbers = #tpu.dot_dimension_numbers<[1], [0], [0], [1], [0, 0, 1, 1], [], []>} : vector<16x256xbf16>, vector<256x128xbf16>, vector<16x128xf32> -> vector<16x128xf32>
    %539 = arith.addf %533, %538 : vector<16x128xf32>
    %c9_479 = arith.constant 9 : index
    %c0_480 = arith.constant 0 : index
    %540 = vector.load %arg21[%c9_479, %c0_480] : memref<32x256xf32, #tpu.memory_space<vmem>>, vector<16x256xf32>
    %c1_481 = arith.constant 1 : index
    %c0_482 = arith.constant 0 : index
    %c0_483 = arith.constant 0 : index
    %541 = vector.load %arg2[%c1_481, %c0_482, %c0_483] : memref<2x16x1xf32, #tpu.memory_space<vmem>>, vector<1x16x1xf32>
    %542 = vector.shape_cast %541 : vector<1x16x1xf32> to vector<16x1xf32>
    %543 = vector.broadcast %542 : vector<16x1xf32> to vector<16x256xf32>
    %544 = arith.mulf %540, %543 : vector<16x256xf32>
    %545 = arith.truncf %544 : vector<16x256xf32> to vector<16x256xbf16>
    %c5_484 = arith.constant 5 : index
    %c0_485 = arith.constant 0 : index
    %c0_486 = arith.constant 0 : index
    %546 = vector.load %arg13[%c5_484, %c0_485, %c0_486] : memref<9x256x128xbf16, #tpu.memory_space<vmem>>, vector<1x256x128xbf16>
    %547 = vector.shape_cast %546 : vector<1x256x128xbf16> to vector<256x128xbf16>
    %cst_487 = arith.constant dense<0.000000e+00> : vector<16x128xf32>
    %548 = tpu.matmul %545, %547, %cst_487 {dimension_numbers = #tpu.dot_dimension_numbers<[1], [0], [0], [1], [0, 0, 1, 1], [], []>} : vector<16x256xbf16>, vector<256x128xbf16>, vector<16x128xf32> -> vector<16x128xf32>
    %549 = arith.addf %539, %548 : vector<16x128xf32>
    %c11_488 = arith.constant 11 : index
    %c0_489 = arith.constant 0 : index
    %550 = vector.load %arg21[%c11_488, %c0_489] : memref<32x256xf32, #tpu.memory_space<vmem>>, vector<16x256xf32>
    %c0_490 = arith.constant 0 : index
    %c0_491 = arith.constant 0 : index
    %c0_492 = arith.constant 0 : index
    %551 = vector.load %arg2[%c0_490, %c0_491, %c0_492] : memref<2x16x1xf32, #tpu.memory_space<vmem>>, vector<1x16x1xf32>
    %552 = vector.shape_cast %551 : vector<1x16x1xf32> to vector<16x1xf32>
    %553 = vector.broadcast %552 : vector<16x1xf32> to vector<16x256xf32>
    %554 = arith.mulf %550, %553 : vector<16x256xf32>
    %555 = arith.truncf %554 : vector<16x256xf32> to vector<16x256xbf16>
    %c6_493 = arith.constant 6 : index
    %c0_494 = arith.constant 0 : index
    %c0_495 = arith.constant 0 : index
    %556 = vector.load %arg13[%c6_493, %c0_494, %c0_495] : memref<9x256x128xbf16, #tpu.memory_space<vmem>>, vector<1x256x128xbf16>
    %557 = vector.shape_cast %556 : vector<1x256x128xbf16> to vector<256x128xbf16>
    %cst_496 = arith.constant dense<0.000000e+00> : vector<16x128xf32>
    %558 = tpu.matmul %555, %557, %cst_496 {dimension_numbers = #tpu.dot_dimension_numbers<[1], [0], [0], [1], [0, 0, 1, 1], [], []>} : vector<16x256xbf16>, vector<256x128xbf16>, vector<16x128xf32> -> vector<16x128xf32>
    %559 = arith.addf %549, %558 : vector<16x128xf32>
    %c12_497 = arith.constant 12 : index
    %c0_498 = arith.constant 0 : index
    %560 = vector.load %arg21[%c12_497, %c0_498] : memref<32x256xf32, #tpu.memory_space<vmem>>, vector<16x256xf32>
    %561 = arith.truncf %560 : vector<16x256xf32> to vector<16x256xbf16>
    %c7_499 = arith.constant 7 : index
    %c0_500 = arith.constant 0 : index
    %c0_501 = arith.constant 0 : index
    %562 = vector.load %arg13[%c7_499, %c0_500, %c0_501] : memref<9x256x128xbf16, #tpu.memory_space<vmem>>, vector<1x256x128xbf16>
    %563 = vector.shape_cast %562 : vector<1x256x128xbf16> to vector<256x128xbf16>
    %cst_502 = arith.constant dense<0.000000e+00> : vector<16x128xf32>
    %564 = tpu.matmul %561, %563, %cst_502 {dimension_numbers = #tpu.dot_dimension_numbers<[1], [0], [0], [1], [0, 0, 1, 1], [], []>} : vector<16x256xbf16>, vector<256x128xbf16>, vector<16x128xf32> -> vector<16x128xf32>
    %565 = arith.addf %559, %564 : vector<16x128xf32>
    %c13_503 = arith.constant 13 : index
    %c0_504 = arith.constant 0 : index
    %566 = vector.load %arg21[%c13_503, %c0_504] : memref<32x256xf32, #tpu.memory_space<vmem>>, vector<16x256xf32>
    %c1_505 = arith.constant 1 : index
    %c0_506 = arith.constant 0 : index
    %c0_507 = arith.constant 0 : index
    %567 = vector.load %arg2[%c1_505, %c0_506, %c0_507] : memref<2x16x1xf32, #tpu.memory_space<vmem>>, vector<1x16x1xf32>
    %568 = vector.shape_cast %567 : vector<1x16x1xf32> to vector<16x1xf32>
    %569 = vector.broadcast %568 : vector<16x1xf32> to vector<16x256xf32>
    %570 = arith.mulf %566, %569 : vector<16x256xf32>
    %571 = arith.truncf %570 : vector<16x256xf32> to vector<16x256xbf16>
    %c8_508 = arith.constant 8 : index
    %c0_509 = arith.constant 0 : index
    %c0_510 = arith.constant 0 : index
    %572 = vector.load %arg13[%c8_508, %c0_509, %c0_510] : memref<9x256x128xbf16, #tpu.memory_space<vmem>>, vector<1x256x128xbf16>
    %573 = vector.shape_cast %572 : vector<1x256x128xbf16> to vector<256x128xbf16>
    %cst_511 = arith.constant dense<0.000000e+00> : vector<16x128xf32>
    %574 = tpu.matmul %571, %573, %cst_511 {dimension_numbers = #tpu.dot_dimension_numbers<[1], [0], [0], [1], [0, 0, 1, 1], [], []>} : vector<16x256xbf16>, vector<256x128xbf16>, vector<16x128xf32> -> vector<16x128xf32>
    %575 = arith.addf %565, %574 : vector<16x128xf32>
    %c0_512 = arith.constant 0 : index
    %c0_513 = arith.constant 0 : index
    %576 = vector.load %arg14[%c0_512, %c0_513] : memref<1x128xf32, #tpu.memory_space<vmem>>, vector<1x128xf32>
    %577 = vector.broadcast %576 : vector<1x128xf32> to vector<16x128xf32>
    %578 = arith.addf %575, %577 : vector<16x128xf32>
    %cst_514 = arith.constant 0.000000e+00 : f32
    %579 = vector.broadcast %cst_514 : f32 to vector<16x128xf32>
    %580 = arith.maximumf %578, %579 : vector<16x128xf32>
    %c8_515 = arith.constant 8 : index
    %c0_516 = arith.constant 0 : index
    %581 = vector.load %arg22[%c8_515, %c0_516] : memref<32x128xf32, #tpu.memory_space<vmem>>, vector<16x128xf32>
    tpu.vector_store %arg22[%c8_515, %c0_516], %580 {strides = array<i32>} : memref<32x128xf32, #tpu.memory_space<vmem>>, vector<16x128xf32>,
    %cst_517 = arith.constant 0.000000e+00 : f32
    %582 = vector.broadcast %cst_517 : f32 to vector<16x256xf32>
    %c3_518 = arith.constant 3 : index
    %c0_519 = arith.constant 0 : index
    %583 = vector.load %arg22[%c3_518, %c0_519] : memref<32x128xf32, #tpu.memory_space<vmem>>, vector<16x128xf32>
    %c0_520 = arith.constant 0 : index
    %c0_521 = arith.constant 0 : index
    %c0_522 = arith.constant 0 : index
    %584 = vector.load %arg2[%c0_520, %c0_521, %c0_522] : memref<2x16x1xf32, #tpu.memory_space<vmem>>, vector<1x16x1xf32>
    %585 = vector.shape_cast %584 : vector<1x16x1xf32> to vector<16x1xf32>
    %586 = vector.broadcast %585 : vector<16x1xf32> to vector<16x128xf32>
    %587 = arith.mulf %583, %586 : vector<16x128xf32>
    %588 = arith.truncf %587 : vector<16x128xf32> to vector<16x128xbf16>
    %c0_523 = arith.constant 0 : index
    %c0_524 = arith.constant 0 : index
    %c0_525 = arith.constant 0 : index
    %589 = vector.load %arg15[%c0_523, %c0_524, %c0_525] : memref<9x128x256xbf16, #tpu.memory_space<vmem>>, vector<1x128x256xbf16>
    %590 = vector.shape_cast %589 : vector<1x128x256xbf16> to vector<128x256xbf16>
    %cst_526 = arith.constant dense<0.000000e+00> : vector<16x256xf32>
    %591 = tpu.matmul %588, %590, %cst_526 {dimension_numbers = #tpu.dot_dimension_numbers<[1], [0], [0], [1], [0, 0, 1, 1], [], []>} : vector<16x128xbf16>, vector<128x256xbf16>, vector<16x256xf32> -> vector<16x256xf32>
    %592 = arith.addf %582, %591 : vector<16x256xf32>
    %c4_527 = arith.constant 4 : index
    %c0_528 = arith.constant 0 : index
    %593 = vector.load %arg22[%c4_527, %c0_528] : memref<32x128xf32, #tpu.memory_space<vmem>>, vector<16x128xf32>
    %594 = arith.truncf %593 : vector<16x128xf32> to vector<16x128xbf16>
    %c1_529 = arith.constant 1 : index
    %c0_530 = arith.constant 0 : index
    %c0_531 = arith.constant 0 : index
    %595 = vector.load %arg15[%c1_529, %c0_530, %c0_531] : memref<9x128x256xbf16, #tpu.memory_space<vmem>>, vector<1x128x256xbf16>
    %596 = vector.shape_cast %595 : vector<1x128x256xbf16> to vector<128x256xbf16>
    %cst_532 = arith.constant dense<0.000000e+00> : vector<16x256xf32>
    %597 = tpu.matmul %594, %596, %cst_532 {dimension_numbers = #tpu.dot_dimension_numbers<[1], [0], [0], [1], [0, 0, 1, 1], [], []>} : vector<16x128xbf16>, vector<128x256xbf16>, vector<16x256xf32> -> vector<16x256xf32>
    %598 = arith.addf %592, %597 : vector<16x256xf32>
    %c5_533 = arith.constant 5 : index
    %c0_534 = arith.constant 0 : index
    %599 = vector.load %arg22[%c5_533, %c0_534] : memref<32x128xf32, #tpu.memory_space<vmem>>, vector<16x128xf32>
    %c1_535 = arith.constant 1 : index
    %c0_536 = arith.constant 0 : index
    %c0_537 = arith.constant 0 : index
    %600 = vector.load %arg2[%c1_535, %c0_536, %c0_537] : memref<2x16x1xf32, #tpu.memory_space<vmem>>, vector<1x16x1xf32>
    %601 = vector.shape_cast %600 : vector<1x16x1xf32> to vector<16x1xf32>
    %602 = vector.broadcast %601 : vector<16x1xf32> to vector<16x128xf32>
    %603 = arith.mulf %599, %602 : vector<16x128xf32>
    %604 = arith.truncf %603 : vector<16x128xf32> to vector<16x128xbf16>
    %c2_538 = arith.constant 2 : index
    %c0_539 = arith.constant 0 : index
    %c0_540 = arith.constant 0 : index
    %605 = vector.load %arg15[%c2_538, %c0_539, %c0_540] : memref<9x128x256xbf16, #tpu.memory_space<vmem>>, vector<1x128x256xbf16>
    %606 = vector.shape_cast %605 : vector<1x128x256xbf16> to vector<128x256xbf16>
    %cst_541 = arith.constant dense<0.000000e+00> : vector<16x256xf32>
    %607 = tpu.matmul %604, %606, %cst_541 {dimension_numbers = #tpu.dot_dimension_numbers<[1], [0], [0], [1], [0, 0, 1, 1], [], []>} : vector<16x128xbf16>, vector<128x256xbf16>, vector<16x256xf32> -> vector<16x256xf32>
    %608 = arith.addf %598, %607 : vector<16x256xf32>
    %c7_542 = arith.constant 7 : index
    %c0_543 = arith.constant 0 : index
    %609 = vector.load %arg22[%c7_542, %c0_543] : memref<32x128xf32, #tpu.memory_space<vmem>>, vector<16x128xf32>
    %c0_544 = arith.constant 0 : index
    %c0_545 = arith.constant 0 : index
    %c0_546 = arith.constant 0 : index
    %610 = vector.load %arg2[%c0_544, %c0_545, %c0_546] : memref<2x16x1xf32, #tpu.memory_space<vmem>>, vector<1x16x1xf32>
    %611 = vector.shape_cast %610 : vector<1x16x1xf32> to vector<16x1xf32>
    %612 = vector.broadcast %611 : vector<16x1xf32> to vector<16x128xf32>
    %613 = arith.mulf %609, %612 : vector<16x128xf32>
    %614 = arith.truncf %613 : vector<16x128xf32> to vector<16x128xbf16>
    %c3_547 = arith.constant 3 : index
    %c0_548 = arith.constant 0 : index
    %c0_549 = arith.constant 0 : index
    %615 = vector.load %arg15[%c3_547, %c0_548, %c0_549] : memref<9x128x256xbf16, #tpu.memory_space<vmem>>, vector<1x128x256xbf16>
    %616 = vector.shape_cast %615 : vector<1x128x256xbf16> to vector<128x256xbf16>
    %cst_550 = arith.constant dense<0.000000e+00> : vector<16x256xf32>
    %617 = tpu.matmul %614, %616, %cst_550 {dimension_numbers = #tpu.dot_dimension_numbers<[1], [0], [0], [1], [0, 0, 1, 1], [], []>} : vector<16x128xbf16>, vector<128x256xbf16>, vector<16x256xf32> -> vector<16x256xf32>
    %618 = arith.addf %608, %617 : vector<16x256xf32>
    %c8_551 = arith.constant 8 : index
    %c0_552 = arith.constant 0 : index
    %619 = vector.load %arg22[%c8_551, %c0_552] : memref<32x128xf32, #tpu.memory_space<vmem>>, vector<16x128xf32>
    %620 = arith.truncf %619 : vector<16x128xf32> to vector<16x128xbf16>
    %c4_553 = arith.constant 4 : index
    %c0_554 = arith.constant 0 : index
    %c0_555 = arith.constant 0 : index
    %621 = vector.load %arg15[%c4_553, %c0_554, %c0_555] : memref<9x128x256xbf16, #tpu.memory_space<vmem>>, vector<1x128x256xbf16>
    %622 = vector.shape_cast %621 : vector<1x128x256xbf16> to vector<128x256xbf16>
    %cst_556 = arith.constant dense<0.000000e+00> : vector<16x256xf32>
    %623 = tpu.matmul %620, %622, %cst_556 {dimension_numbers = #tpu.dot_dimension_numbers<[1], [0], [0], [1], [0, 0, 1, 1], [], []>} : vector<16x128xbf16>, vector<128x256xbf16>, vector<16x256xf32> -> vector<16x256xf32>
    %624 = arith.addf %618, %623 : vector<16x256xf32>
    %c9_557 = arith.constant 9 : index
    %c0_558 = arith.constant 0 : index
    %625 = vector.load %arg22[%c9_557, %c0_558] : memref<32x128xf32, #tpu.memory_space<vmem>>, vector<16x128xf32>
    %c1_559 = arith.constant 1 : index
    %c0_560 = arith.constant 0 : index
    %c0_561 = arith.constant 0 : index
    %626 = vector.load %arg2[%c1_559, %c0_560, %c0_561] : memref<2x16x1xf32, #tpu.memory_space<vmem>>, vector<1x16x1xf32>
    %627 = vector.shape_cast %626 : vector<1x16x1xf32> to vector<16x1xf32>
    %628 = vector.broadcast %627 : vector<16x1xf32> to vector<16x128xf32>
    %629 = arith.mulf %625, %628 : vector<16x128xf32>
    %630 = arith.truncf %629 : vector<16x128xf32> to vector<16x128xbf16>
    %c5_562 = arith.constant 5 : index
    %c0_563 = arith.constant 0 : index
    %c0_564 = arith.constant 0 : index
    %631 = vector.load %arg15[%c5_562, %c0_563, %c0_564] : memref<9x128x256xbf16, #tpu.memory_space<vmem>>, vector<1x128x256xbf16>
    %632 = vector.shape_cast %631 : vector<1x128x256xbf16> to vector<128x256xbf16>
    %cst_565 = arith.constant dense<0.000000e+00> : vector<16x256xf32>
    %633 = tpu.matmul %630, %632, %cst_565 {dimension_numbers = #tpu.dot_dimension_numbers<[1], [0], [0], [1], [0, 0, 1, 1], [], []>} : vector<16x128xbf16>, vector<128x256xbf16>, vector<16x256xf32> -> vector<16x256xf32>
    %634 = arith.addf %624, %633 : vector<16x256xf32>
    %c11_566 = arith.constant 11 : index
    %c0_567 = arith.constant 0 : index
    %635 = vector.load %arg22[%c11_566, %c0_567] : memref<32x128xf32, #tpu.memory_space<vmem>>, vector<16x128xf32>
    %c0_568 = arith.constant 0 : index
    %c0_569 = arith.constant 0 : index
    %c0_570 = arith.constant 0 : index
    %636 = vector.load %arg2[%c0_568, %c0_569, %c0_570] : memref<2x16x1xf32, #tpu.memory_space<vmem>>, vector<1x16x1xf32>
    %637 = vector.shape_cast %636 : vector<1x16x1xf32> to vector<16x1xf32>
    %638 = vector.broadcast %637 : vector<16x1xf32> to vector<16x128xf32>
    %639 = arith.mulf %635, %638 : vector<16x128xf32>
    %640 = arith.truncf %639 : vector<16x128xf32> to vector<16x128xbf16>
    %c6_571 = arith.constant 6 : index
    %c0_572 = arith.constant 0 : index
    %c0_573 = arith.constant 0 : index
    %641 = vector.load %arg15[%c6_571, %c0_572, %c0_573] : memref<9x128x256xbf16, #tpu.memory_space<vmem>>, vector<1x128x256xbf16>
    %642 = vector.shape_cast %641 : vector<1x128x256xbf16> to vector<128x256xbf16>
    %cst_574 = arith.constant dense<0.000000e+00> : vector<16x256xf32>
    %643 = tpu.matmul %640, %642, %cst_574 {dimension_numbers = #tpu.dot_dimension_numbers<[1], [0], [0], [1], [0, 0, 1, 1], [], []>} : vector<16x128xbf16>, vector<128x256xbf16>, vector<16x256xf32> -> vector<16x256xf32>
    %644 = arith.addf %634, %643 : vector<16x256xf32>
    %c12_575 = arith.constant 12 : index
    %c0_576 = arith.constant 0 : index
    %645 = vector.load %arg22[%c12_575, %c0_576] : memref<32x128xf32, #tpu.memory_space<vmem>>, vector<16x128xf32>
    %646 = arith.truncf %645 : vector<16x128xf32> to vector<16x128xbf16>
    %c7_577 = arith.constant 7 : index
    %c0_578 = arith.constant 0 : index
    %c0_579 = arith.constant 0 : index
    %647 = vector.load %arg15[%c7_577, %c0_578, %c0_579] : memref<9x128x256xbf16, #tpu.memory_space<vmem>>, vector<1x128x256xbf16>
    %648 = vector.shape_cast %647 : vector<1x128x256xbf16> to vector<128x256xbf16>
    %cst_580 = arith.constant dense<0.000000e+00> : vector<16x256xf32>
    %649 = tpu.matmul %646, %648, %cst_580 {dimension_numbers = #tpu.dot_dimension_numbers<[1], [0], [0], [1], [0, 0, 1, 1], [], []>} : vector<16x128xbf16>, vector<128x256xbf16>, vector<16x256xf32> -> vector<16x256xf32>
    %650 = arith.addf %644, %649 : vector<16x256xf32>
    %c13_581 = arith.constant 13 : index
    %c0_582 = arith.constant 0 : index
    %651 = vector.load %arg22[%c13_581, %c0_582] : memref<32x128xf32, #tpu.memory_space<vmem>>, vector<16x128xf32>
    %c1_583 = arith.constant 1 : index
    %c0_584 = arith.constant 0 : index
    %c0_585 = arith.constant 0 : index
    %652 = vector.load %arg2[%c1_583, %c0_584, %c0_585] : memref<2x16x1xf32, #tpu.memory_space<vmem>>, vector<1x16x1xf32>
    %653 = vector.shape_cast %652 : vector<1x16x1xf32> to vector<16x1xf32>
    %654 = vector.broadcast %653 : vector<16x1xf32> to vector<16x128xf32>
    %655 = arith.mulf %651, %654 : vector<16x128xf32>
    %656 = arith.truncf %655 : vector<16x128xf32> to vector<16x128xbf16>
    %c8_586 = arith.constant 8 : index
    %c0_587 = arith.constant 0 : index
    %c0_588 = arith.constant 0 : index
    %657 = vector.load %arg15[%c8_586, %c0_587, %c0_588] : memref<9x128x256xbf16, #tpu.memory_space<vmem>>, vector<1x128x256xbf16>
    %658 = vector.shape_cast %657 : vector<1x128x256xbf16> to vector<128x256xbf16>
    %cst_589 = arith.constant dense<0.000000e+00> : vector<16x256xf32>
    %659 = tpu.matmul %656, %658, %cst_589 {dimension_numbers = #tpu.dot_dimension_numbers<[1], [0], [0], [1], [0, 0, 1, 1], [], []>} : vector<16x128xbf16>, vector<128x256xbf16>, vector<16x256xf32> -> vector<16x256xf32>
    %660 = arith.addf %650, %659 : vector<16x256xf32>
    %c0_590 = arith.constant 0 : index
    %c0_591 = arith.constant 0 : index
    %661 = vector.load %arg16[%c0_590, %c0_591] : memref<1x256xf32, #tpu.memory_space<vmem>>, vector<1x256xf32>
    %662 = vector.broadcast %661 : vector<1x256xf32> to vector<16x256xf32>
    %663 = arith.addf %660, %662 : vector<16x256xf32>
    %cst_592 = arith.constant 0.000000e+00 : f32
    %664 = vector.broadcast %cst_592 : f32 to vector<16x256xf32>
    %665 = arith.maximumf %663, %664 : vector<16x256xf32>
    %666 = arith.addf %665, %496 : vector<16x256xf32>
    %667 = arith.truncf %666 : vector<16x256xf32> to vector<16x256xbf16>
    %c0_593 = arith.constant 0 : index
    %c0_594 = arith.constant 0 : index
    %668 = vector.load %arg17[%c0_593, %c0_594] : memref<256x128xbf16, #tpu.memory_space<vmem>>, vector<256x128xbf16>
    %cst_595 = arith.constant dense<0.000000e+00> : vector<16x128xf32>
    %669 = tpu.matmul %667, %668, %cst_595 {dimension_numbers = #tpu.dot_dimension_numbers<[1], [0], [0], [1], [0, 0, 1, 1], [], []>} : vector<16x256xbf16>, vector<256x128xbf16>, vector<16x128xf32> -> vector<16x128xf32>
    %c0_596 = arith.constant 0 : index
    %c0_597 = arith.constant 0 : index
    %670 = vector.load %arg18[%c0_596, %c0_597] : memref<1x128xf32, #tpu.memory_space<vmem>>, vector<1x128xf32>
    %671 = vector.broadcast %670 : vector<1x128xf32> to vector<16x128xf32>
    %672 = arith.addf %669, %671 : vector<16x128xf32>
    %cst_598 = arith.constant 0.000000e+00 : f32
    %673 = vector.broadcast %cst_598 : f32 to vector<16x128xf32>
    %674 = arith.maximumf %672, %673 : vector<16x128xf32>
    %c0_599 = arith.constant 0 : index
    %c0_600 = arith.constant 0 : index
    %c0_601 = arith.constant 0 : index
    %675 = vector.load %arg19[%c0_599, %c0_600, %c0_601] : memref<1x16x128xf32, #tpu.memory_space<vmem>>, vector<1x16x128xf32>
    %676 = vector.shape_cast %675 : vector<1x16x128xf32> to vector<16x128xf32>
    %677 = vector.shape_cast %674 : vector<16x128xf32> to vector<1x16x128xf32>
    tpu.vector_store %arg19[%c0_599, %c0_600, %c0_601], %677 {strides = array<i32>} : memref<1x16x128xf32, #tpu.memory_space<vmem>>, vector<1x16x128xf32>,
    return
  }
  func.func @transform_0(%arg0: i32) -> (i32, i32, i32) {
    %c0_i32 = arith.constant 0 : i32
    %c0_i32_0 = arith.constant 0 : i32
    %c0_i32_1 = arith.constant 0 : i32
    return %arg0, %c0_i32, %c0_i32_0 : i32, i32, i32
  }
  func.func @transform_1(%arg0: i32) -> (i32, i32, i32) {
    %c0_i32 = arith.constant 0 : i32
    %c0_i32_0 = arith.constant 0 : i32
    %c0_i32_1 = arith.constant 0 : i32
    %c0_i32_2 = arith.constant 0 : i32
    return %c0_i32, %c0_i32_0, %c0_i32_1 : i32, i32, i32
  }
  func.func @transform_2(%arg0: i32) -> (i32, i32) {
    %c0_i32 = arith.constant 0 : i32
    %c0_i32_0 = arith.constant 0 : i32
    %c0_i32_1 = arith.constant 0 : i32
    return %c0_i32, %c0_i32_0 : i32, i32
  }
  func.func @transform_3(%arg0: i32) -> (i32, i32) {
    %c0_i32 = arith.constant 0 : i32
    %c0_i32_0 = arith.constant 0 : i32
    %c0_i32_1 = arith.constant 0 : i32
    return %c0_i32, %c0_i32_0 : i32, i32
  }
  func.func @transform_4(%arg0: i32) -> (i32, i32, i32) {
    %c0_i32 = arith.constant 0 : i32
    %c0_i32_0 = arith.constant 0 : i32
    %c0_i32_1 = arith.constant 0 : i32
    %c0_i32_2 = arith.constant 0 : i32
    return %c0_i32, %c0_i32_0, %c0_i32_1 : i32, i32, i32
  }
  func.func @transform_5(%arg0: i32) -> (i32, i32) {
    %c0_i32 = arith.constant 0 : i32
    %c0_i32_0 = arith.constant 0 : i32
    %c0_i32_1 = arith.constant 0 : i32
    return %c0_i32, %c0_i32_0 : i32, i32
  }
  func.func @transform_6(%arg0: i32) -> (i32, i32, i32) {
    %c0_i32 = arith.constant 0 : i32
    %c0_i32_0 = arith.constant 0 : i32
    %c0_i32_1 = arith.constant 0 : i32
    %c0_i32_2 = arith.constant 0 : i32
    return %c0_i32, %c0_i32_0, %c0_i32_1 : i32, i32, i32
  }
  func.func @transform_7(%arg0: i32) -> (i32, i32) {
    %c0_i32 = arith.constant 0 : i32
    %c0_i32_0 = arith.constant 0 : i32
    %c0_i32_1 = arith.constant 0 : i32
    return %c0_i32, %c0_i32_0 : i32, i32
  }
  func.func @transform_8(%arg0: i32) -> (i32, i32, i32) {
    %c0_i32 = arith.constant 0 : i32
    %c0_i32_0 = arith.constant 0 : i32
    %c0_i32_1 = arith.constant 0 : i32
    %c0_i32_2 = arith.constant 0 : i32
    return %c0_i32, %c0_i32_0, %c0_i32_1 : i32, i32, i32
  }
  func.func @transform_9(%arg0: i32) -> (i32, i32) {
    %c0_i32 = arith.constant 0 : i32
    %c0_i32_0 = arith.constant 0 : i32
    %c0_i32_1 = arith.constant 0 : i32
    return %c0_i32, %c0_i32_0 : i32, i32
  }
  func.func @transform_10(%arg0: i32) -> (i32, i32, i32) {
    %c0_i32 = arith.constant 0 : i32
    %c0_i32_0 = arith.constant 0 : i32
    %c0_i32_1 = arith.constant 0 : i32
    %c0_i32_2 = arith.constant 0 : i32
    return %c0_i32, %c0_i32_0, %c0_i32_1 : i32, i32, i32
  }
  func.func @transform_11(%arg0: i32) -> (i32, i32) {
    %c0_i32 = arith.constant 0 : i32
    %c0_i32_0 = arith.constant 0 : i32
    %c0_i32_1 = arith.constant 0 : i32
    return %c0_i32, %c0_i32_0 : i32, i32
  }
  func.func @transform_12(%arg0: i32) -> (i32, i32, i32) {
    %c0_i32 = arith.constant 0 : i32
    %c0_i32_0 = arith.constant 0 : i32
    %c0_i32_1 = arith.constant 0 : i32
    %c0_i32_2 = arith.constant 0 : i32
    return %c0_i32, %c0_i32_0, %c0_i32_1 : i32, i32, i32
  }
  func.func @transform_13(%arg0: i32) -> (i32, i32) {
    %c0_i32 = arith.constant 0 : i32
    %c0_i32_0 = arith.constant 0 : i32
    %c0_i32_1 = arith.constant 0 : i32
    return %c0_i32, %c0_i32_0 : i32, i32
  }
  func.func @transform_14(%arg0: i32) -> (i32, i32, i32) {
    %c0_i32 = arith.constant 0 : i32
    %c0_i32_0 = arith.constant 0 : i32
    %c0_i32_1 = arith.constant 0 : i32
    %c0_i32_2 = arith.constant 0 : i32
    return %c0_i32, %c0_i32_0, %c0_i32_1 : i32, i32, i32
  }
  func.func @transform_15(%arg0: i32) -> (i32, i32) {
    %c0_i32 = arith.constant 0 : i32
    %c0_i32_0 = arith.constant 0 : i32
    %c0_i32_1 = arith.constant 0 : i32
    return %c0_i32, %c0_i32_0 : i32, i32
  }
  func.func @transform_16(%arg0: i32) -> (i32, i32) {
    %c0_i32 = arith.constant 0 : i32
    %c0_i32_0 = arith.constant 0 : i32
    %c0_i32_1 = arith.constant 0 : i32
    return %c0_i32, %c0_i32_0 : i32, i32
  }
  func.func @transform_17(%arg0: i32) -> (i32, i32) {
    %c0_i32 = arith.constant 0 : i32
    %c0_i32_0 = arith.constant 0 : i32
    %c0_i32_1 = arith.constant 0 : i32
    return %c0_i32, %c0_i32_0 : i32, i32
  }
  func.func @transform_18(%arg0: i32) -> (i32, i32, i32) {
    %c0_i32 = arith.constant 0 : i32
    %c0_i32_0 = arith.constant 0 : i32
    %c0_i32_1 = arith.constant 0 : i32
    return %arg0, %c0_i32, %c0_i32_0 : i32, i32, i32
  }
}

</mosaic_0001>

<bundles_post_ra>
// kernel: encoder_tower_forward.1
= control target key start
LH: loop header
LB: loop body
LE: loop exit
PB: predicated region body
PF: predicated region fallthrough
CT: control target
= control target key end

     0   :  { %s21451_s0 = inlined_call_operand.vmem [shape: bf16[2,64,12], index: 0, kind: input, shape index: {}]   ;;  %s21452_s1 = inlined_call_operand.vmem [shape: f32[2,16,1], index: 1, kind: input, shape index: {}]   ;;  %s21453_s2 = inlined_call_operand.vmem [shape: bf16[12,256], index: 2, kind: input, shape index: {}]   ;;  %s21454_s3 = inlined_call_operand.vmem [shape: f32[1,256], index: 3, kind: input, shape index: {}]   ;;  %s21455_s4 = inlined_call_operand.vmem [shape: bf16[4,256,256], index: 4, kind: input, shape index: {}]   ;;  %s21456_s5 = inlined_call_operand.vmem [shape: f32[1,256], index: 5, kind: input, shape index: {}]   ;;  %s21457_s6 = inlined_call_operand.vmem [shape: bf16[9,256,128], index: 6, kind: input, shape index: {}]   ;;  %s21458_s7 = inlined_call_operand.vmem [shape: f32[1,128], index: 7, kind: input, shape index: {}]   ;;  %s21459_s8 = inlined_call_operand.vmem [shape: bf16[4,128,256], index: 8, kind: input, shape index: {}]   ;;  %s21460_s9 = inlined_call_operand.vmem [shape: f32[1,256], index: 9, kind: input, shape index: {}]   ;;  %s21461_s10 = inlined_call_operand.vmem [shape: bf16[9,256,256], index: 10, kind: input, shape index: {}]   ;;  %s21462_s11 = inlined_call_operand.vmem [shape: f32[1,256], index: 11, kind: input, shape index: {}]   ;;  %s21463_s12 = inlined_call_operand.vmem [shape: bf16[9,256,128], index: 12, kind: input, shape index: {}]   ;;  %s21464_s13 = inlined_call_operand.vmem [shape: f32[1,128], index: 13, kind: input, shape index: {}]   ;;  %s21465_s14 = inlined_call_operand.vmem [shape: bf16[9,128,256], index: 14, kind: input, shape index: {}]   ;;  %s21466_s15 = inlined_call_operand.vmem [shape: f32[1,256], index: 15, kind: input, shape index: {}]   ;;  %s21467_s16 = inlined_call_operand.vmem [shape: bf16[256,128], index: 16, kind: input, shape index: {}]   ;;  %s21468_s17 = inlined_call_operand.vmem [shape: f32[1,128], index: 17, kind: input, shape index: {}]   ;;  %s21469_s18 = inlined_call_operand.hbm [shape: f32[2,16,128], index: 18, kind: output, shape index: {}]  }
   0x1   :  { %21515 = sst [smem:[#allocation42_spill]] %s21451_s0 }
   0x2   :  { %21516 = sst [smem:[#allocation43_spill]] %s21452_s1 }
   0x3   :  { %21517 = sst [smem:[#allocation44_spill]] %s21453_s2 }
   0x4   :  { %21518 = sst [smem:[#allocation45_spill]] %s21469_s18 }
   0x5   :  { %23 = vsyncpa [#allocation6], 0 }
   0x6   :  { %25 = vsyncpa [#allocation6 + $0x1], 0  ;;  %s16207_s27 = smov 0   ;;  %s16209_s28 = smov 0  }
   0x7   :  { %s16211_s29 = smov 0   ;;  %s16213_s30 = smov 0  }
   0x8 LB: > { %21519 = sst [smem:[#allocation8_spill]] %s16093_s27  ;;  %s16228_s0 = sadd.s32 4294967295, %s16105_s30   ;;  %s16105_s30 = sphi %s16213_s30, %s21602_s30   ;;  %s16101_s29 = sphi %s16211_s29, %s21604_s29   ;;  %s16097_s28 = sphi %s16209_s28, %s21606_s28   ;;  %s16093_s27 = sphi %s16207_s27, %s21605_s27  }
   0x9   : > { %21520 = sst [smem:[#allocation9_spill]] %s16101_s29  ;;  %s11375_s19 = sadd.s32 4294967294, %s16105_s30  }
   0xa   : > { %21521 = sst [smem:[#allocation10_spill]] %s16105_s30  ;;  %s16232_s1 = sadd.s32 1, %s16105_s30  }
   0xb   : > { %21522 = sst [smem:[#allocation11_spill]] %s16232_s1  ;;  %s421_s20 = sadd.s32 1, %s16101_s29 }
   0xc   : > { %s418_s21 = ssub.s32 %s16105_s30, %s16232_s1  ;;  %p431_p0 = scmp.ne.s32.totalorder %s16101_s29, %s16097_s28 }
   0xd   : > { %p419_p1 = scmp.eq.s32.totalorder %s418_s21, 0  ;;  %p432_p2 = scmp.eq.s32.totalorder %s16228_s0, 1 }
   0xe   : > { %p437_p3 = scmp.ne.s32.totalorder %s16097_s28, %s16093_s27  ;;  %p438_p4 = scmp.eq.s32.totalorder %s11375_s19, 1 }
   0xf   : > { %s16243_s22 = scalar_select %p419_p1, %s16101_s29, %s421_s20  }
  0x10   : > { %p16245_p5 = por %p432_p2, %p431_p0  ;;  %p16249_p6 = por %p438_p4, %p437_p3 }
  0x11   : > { %21523 = sst [smem:[#allocation12_spill]] %s16243_s22  ;;  %p11378_p7 = scmp.ge.s32.totalorder %s16105_s30, 1 }
  0x12   : > { %s21524_s2 = scalar_select %p16245_p5, 1, 0 }
  0x13   : > { %s21526_s23 = scalar_select %p16249_p6, 1, 0 }
  0x14   : > { %21525 = sst [smem:[#allocation13_spill]] %s21524_s2  ;;  %p515_p8 = scmp.lt.s32.totalorder %s16105_s30, 3 }
  0x15   : > { %21527 = sst [smem:[#allocation14_spill]] %s21526_s23 }
  0x16   : > { %p516_p9 = pnand %p11378_p7, %p515_p8 }
  0x18   : > { %519 = sbr.rel (%p516_p9) target bundleno = 2661 (0xa65), region = 92 }
  0x1f   : > { %s21528_s26 = sld [smem:[#allocation44_spill]]  ;;  %vm682_vm0 = vcmask 1045504   ;;  %p569_p10 = scmp.lt.s32.totalorder %s16228_s0, 1  ;;  %v21482_v2 = vmov 0   ;;  %v16108_v7 = vmov 0.0   ;;  %vm669_vm1 = vcmask 97280  }
  0x20   : > { %721 = vmatprep.mubr.bf16.mxu0 %v21482_v2  ;;  %s21529_s29 = sld [smem:[#allocation43_spill]]  ;;  %14521 = vset.pattern.permute.xlu1 %v21482_v2  ;;  %581 = vst [vmem:[#allocation2 + $0x30] sm:$0xff] %v16108_v7  ;;  %582 = vst [vmem:[#allocation2 + $0x38] sm:$0xff] %v16108_v7  ;;  %v14529_v8 = vld [vmem:[%s21455_s4 + $0x104] ss:$8 sps:$4 sm:$0xff]   ;;  %s21531_s2 = sld [smem:[#allocation42_spill]] }
  0x21   : > { %s16276_s19 = scalar_select %p569_p10, %s16228_s0, 1  ;;  %14520 = vset.pattern.permute.xlu0 %v21482_v2  ;;  %583 = vst [vmem:[#allocation2 + $0x40] sm:$0xff] %v16108_v7  ;;  %584 = vst [vmem:[#allocation2 + $0x48] sm:$0xff] %v16108_v7  ;;  %v14531_v9 = vld [vmem:[%s21455_s4 + $0x100] ss:$8 sps:$4 sm:$0xff]   ;;  %1026 = vmatprep.subr.bf16.mxu1 %v14529_v8  ;;  %v14578_v47 = vld [vmem:[%s21457_s6 + $0xd0] sm:$0xff]  }
  0x22   : > { %589 = vst [vmem:[#allocation2 + $0x70] sm:$0xff] %v16108_v7  ;;  %590 = vst [vmem:[#allocation2 + $0x78] sm:$0xff] %v16108_v7  ;;  %v14532_v11 = vld [vmem:[%s21455_s4 + $0x114] ss:$8 sps:$4 sm:$0xff]   ;;  %v14534_v12 = vld [vmem:[%s21455_s4 + $0x110] ss:$8 sps:$4 sm:$0xff]   ;;  %1027 = vmatpush1.bf16.msra.mxu1 %v14531_v9 }
  0x23   : > { %591 = vst [vmem:[#allocation2 + $0x80] sm:$0xff] %v16108_v7  ;;  %592 = vst [vmem:[#allocation2 + $0x88] sm:$0xff] %v16108_v7  ;;  %s13375_s24 = sshll.u32 %s16276_s19, 5  ;;  %1028 = vmatprep.subr.bf16.mxu1 %v14532_v11  ;;  %v14535_v14 = vld [vmem:[%s21455_s4 + $0x124] ss:$8 sps:$4 sm:$0xff]   ;;  %v14581_v49 = vld [vmem:[%s21457_s6 + $0x90] sm:$0xff]   ;;  %v631_v11 = vlaneseq }
  0x24   : > { %597 = vst [vmem:[#allocation2 + $0xb0] sm:$0xff] %v16108_v7  ;;  %598 = vst [vmem:[#allocation2 + $0xb8] sm:$0xff] %v16108_v7  ;;  %v14537_v15 = vld [vmem:[%s21455_s4 + $0x120] ss:$8 sps:$4 sm:$0xff]   ;;  %v14538_v16 = vld [vmem:[%s21455_s4 + $0x134] ss:$8 sps:$4 sm:$0xff]  }
  0x25   : > { %v14522_v0 = vld [vmem:[%s21528_s26 + $0x4] ss:$8 sps:$4 sm:$0x3f]   ;;  %v14524_v1 = vld [vmem:[%s21528_s26] ss:$8 sps:$4 sm:$0x3f]  }
  0x26   : > { %11388 = vmatprep.subr.msk.bf16.mxu0 %vm682_vm0, %v14522_v0  ;;  %s21530_s1 = smov %s21529_s29  ;;  %v16267_v3 = vld [vmem:[%s21529_s29 + $0x10] sm:$0xff]  ;;  %v684_v5 = vsel %vm682_vm0, %v14524_v1, 0  ;;  %599 = vst [vmem:[#allocation2 + $0xc0] sm:$0xff] %v16108_v7  ;;  %600 = vst [vmem:[#allocation2 + $0xc8] sm:$0xff] %v16108_v7  ;;  %s16301_s29 = scalar_lea.vmem %s21531_s2, %s13375_s24  ;;  %1029 = vmatpush1.bf16.msra.mxu1 %v14534_v12  ;;  %v14541_v19 = vld [vmem:[%s21455_s4 + $0x144] ss:$8 sps:$4 sm:$0xff]  }
  0x27   : > { %v16272_v4 = vld [vmem:[%s21530_s1] sm:$0xff]  ;;  %v12019_v6 = vld [vmem:[%s21530_s1 + $0x18] sm:$0xff]  ;;  %607 = vst [vmem:[#allocation3] sm:$0xff] %v16108_v7  ;;  %608 = vst [vmem:[#allocation3 + $0x8] sm:$0xff] %v16108_v7  ;;  %690 = vmatpush1.bf16.msra.mxu0 %v684_v5  ;;  %3662 = vperm.xlu1 %14521, %v16267_v3   ;;  %vm3857_vm2 = vcmask 1040384   ;;  %v632_v12 = vshrl.u32 %v631_v11, 7 }
  0x28   : > { %613 = vst [vmem:[#allocation3 + $0x30] sm:$0xff] %v16108_v7  ;;  %614 = vst [vmem:[#allocation3 + $0x38] sm:$0xff] %v16108_v7  ;;  %1786 = vperm.xlu0 %14520, %v16272_v4   ;;  %v1783_v10 = vld [vmem:[%s21530_s1 + $0x8] sm:$0xff]  ;;  %v14525_v13 = vld [vmem:[%s16301_s29] sm:$0xff]   ;;  %1030 = vmatprep.subr.bf16.mxu1 %v14535_v14  ;;  %vm3668_vm3 = vcmask 1044480   ;;  %vm1792_vm4 = vcmask 1042432  }
  0x29   : > { %615 = vst [vmem:[#allocation4] sm:$0xff] %v16108_v7  ;;  %618 = vst [vmem:[#allocation4 + $0x18] sm:$0xff] %v16108_v7  ;;  %v14526_v17 = vld [vmem:[%s16301_s29 + $0x8] sm:$0xff]   ;;  %v14540_v18 = vld [vmem:[%s21455_s4 + $0x130] ss:$8 sps:$4 sm:$0xff]   ;;  %v16489_v14 = vsub.s32 0, %v632_v12 }
  0x2a   : > { %11389 = vmatmul.mubr.msk.bf16.vlgmr.msra.gmra.mrb[0].mxu0 %vm669_vm1, %v14525_v13  ;;  %1031 = vmatpush1.bf16.msra.mxu1 %v14537_v15  ;;  %v14543_v20 = vld [vmem:[%s21455_s4 + $0x140] ss:$8 sps:$4 sm:$0xff]   ;;  %v14544_v21 = vld [vmem:[%s21455_s4 + $0x154] ss:$8 sps:$4 sm:$0xff]   ;;  %v14546_v23 = vld [vmem:[%s21455_s4 + $0x150] ss:$8 sps:$4 sm:$0xff]  }
  0x2b   : > { %3666 = vperm.xlu1 %14521, %v12019_v6   ;;  %731 = vmatprep.mubr.bf16.mxu0 %v21482_v2  ;;  %v14527_v22 = vld [vmem:[%s16301_s29 + $0x10] sm:$0xff]   ;;  %v14547_v24 = vld [vmem:[%s21455_s4 + $0x164] ss:$8 sps:$4 sm:$0xff]   ;;  %v14549_v25 = vld [vmem:[%s21455_s4 + $0x160] ss:$8 sps:$4 sm:$0xff]   ;;  %21539 = vst [vmem:[#allocation22_spill] sm:$0xff] %v16489_v14 }
  0x2c   : > { %1790 = vperm.xlu0 %14520, %v1783_v10   ;;  %1032 = vmatprep.subr.bf16.mxu1 %v14538_v16  ;;  %v14550_v26 = vld [vmem:[%s21455_s4 + $0x174] ss:$8 sps:$4 sm:$0xff]   ;;  %v14552_v28 = vld [vmem:[%s21455_s4 + $0x170] ss:$8 sps:$4 sm:$0xff]   ;;  %v14553_v29 = vld [vmem:[%s21455_s4 + $0x184] ss:$8 sps:$4 sm:$0xff]  }
  0x2d   : > { %v14528_v27 = vld [vmem:[%s16301_s29 + $0x18] sm:$0xff]   ;;  %v14555_v30 = vld [vmem:[%s21455_s4 + $0x180] ss:$8 sps:$4 sm:$0xff]   ;;  %v14559_v33 = vld [vmem:[%s21455_s4 + $0x1a4] ss:$8 sps:$4 sm:$0xff]   ;;  %v16491_v15 = vsub.s32 1, %v632_v12 }
  0x2e   : > { %1033 = vmatpush1.bf16.msra.mxu1 %v14540_v18  ;;  %v14556_v31 = vld [vmem:[%s21455_s4 + $0x194] ss:$8 sps:$4 sm:$0xff]   ;;  %v14558_v32 = vld [vmem:[%s21455_s4 + $0x190] ss:$8 sps:$4 sm:$0xff]   ;;  %v14561_v34 = vld [vmem:[%s21455_s4 + $0x1a0] ss:$8 sps:$4 sm:$0xff]  }
  0x2f   : > { %5648 = vperm.xlu1 %14521, %v1783_v10   ;;  %1034 = vmatprep.subr.bf16.mxu1 %v14541_v19  ;;  %v14562_v35 = vld [vmem:[%s21455_s4 + $0x1b4] ss:$8 sps:$4 sm:$0xff]   ;;  %v14564_v36 = vld [vmem:[%s21455_s4 + $0x1b0] ss:$8 sps:$4 sm:$0xff]   ;;  %v14565_v37 = vld [vmem:[%s21455_s4 + $0x1c4] ss:$8 sps:$4 sm:$0xff]  }
  0x30   : > { %5644 = vperm.xlu0 %14520, %v16272_v4   ;;  %v14567_v38 = vld [vmem:[%s21455_s4 + $0x1c0] ss:$8 sps:$4 sm:$0xff]   ;;  %v14569_v40 = vld [vmem:[%s21455_s4 + $0x1d4] ss:$8 sps:$4 sm:$0xff]   ;;  %v14572_v42 = vld [vmem:[%s21455_s4 + $0x1d0] ss:$8 sps:$4 sm:$0xff]  }
  0x31   : > { %v14568_v39 = vld [vmem:[%s21457_s6 + $0xc0] sm:$0xff]   ;;  %v14573_v43 = vld [vmem:[%s21457_s6 + $0xc8] sm:$0xff]   ;;  %v14579_v48 = vld [vmem:[%s21455_s4 + $0x1f4] ss:$8 sps:$4 sm:$0xff]   ;;  %21540 = vst [vmem:[#allocation23_spill] sm:$0xff] %v16491_v15  ;;  %vm2406_vm5 = vcmask 1046528  }
  0x32   : > { %11390 = vmatmul.mubr.msk.bf16.gmra.mrb[4].mxu0 %vm669_vm1, %v14526_v17  ;;  %1035 = vmatpush1.bf16.msra.mxu1 %v14543_v20  ;;  %v14571_v41 = vld [vmem:[%s21457_s6 + $0x80] sm:$0xff]   ;;  %v14576_v45 = vld [vmem:[%s21457_s6 + $0x88] sm:$0xff]   ;;  %v14582_v50 = vld [vmem:[%s21455_s4 + $0x1f0] ss:$8 sps:$4 sm:$0xff]   ;;  %vm2034_vm6 = vsmask.f32 6400 }
  0x33   : > { %6205 = vperm.xlu1 %14521, %v12019_v6   ;;  %741 = vmatprep.mubr.bf16.mxu0 %v21482_v2  ;;  %v14574_v44 = vld [vmem:[%s21455_s4 + $0x1e4] ss:$8 sps:$4 sm:$0xff]   ;;  %v14577_v46 = vld [vmem:[%s21455_s4 + $0x1e0] ss:$8 sps:$4 sm:$0xff]   ;;  %v14583_v51 = vld [vmem:[%s21457_s6 + $0xd8] sm:$0xff]   ;;  %s566_s25 = sand.u32 1, %s16097_s28  }
  0x34   : > { %6201 = vperm.xlu0 %14520, %v16267_v3   ;;  %1036 = vmatprep.subr.bf16.mxu1 %v14544_v21  ;;  %v14586_v52 = vld [vmem:[%s21455_s4 + $0x4] ss:$8 sps:$4 sm:$0xff]   ;;  %v14587_v53 = vld [vmem:[%s21457_s6 + $0x98] sm:$0xff]   ;;  %v14598_v58 = vld [vmem:[%s21457_s6 + $0xf0] sm:$0xff]   ;;  %vm3874_vm7 = vsmask.f32 7424 }
  0x35   : > { %13377 = vmatprep.subr.bf16.mxu0 %v14568_v39  ;;  %v14588_v54 = vld [vmem:[%s21457_s6 + $0xe0] sm:$0xff]   ;;  %v14593_v56 = vld [vmem:[%s21457_s6 + $0xe8] sm:$0xff]   ;;  %v14602_v59 = vld [vmem:[%s21457_s6 + $0xb0] sm:$0xff]   ;;  %vm2456_vm8 = vsmask.f32 4352  ;;  %s11379_s20 = sshll.u32 %s566_s25, 4 }
  0x36   : > { %1037 = vmatpush1.bf16.msra.mxu1 %v14546_v23  ;;  %13378 = vmatpush3.bf16.msra.mxu0 %v14571_v41  ;;  %v14592_v55 = vld [vmem:[%s21457_s6 + $0xa0] sm:$0xff]   ;;  %v14597_v57 = vld [vmem:[%s21457_s6 + $0xa8] sm:$0xff]   ;;  %v14603_v60 = vld [vmem:[%s21457_s6 + $0xf8] sm:$0xff]   ;;  %vm3685_vm9 = vsmask.f32 5376  ;;  %s568_s27 = scalar_lea.vmem [#allocation5], %s11379_s20 }
  0x37   : > { %1038 = vmatprep.subr.bf16.mxu1 %v14547_v24  ;;  %13379 = vmatprep.subr.bf16.mxu0 %v14573_v43  ;;  %v14607_v61 = vld [vmem:[%s21457_s6 + $0xb8] sm:$0xff]   ;;  %v14608_v62 = vld [vmem:[%s21457_s6 + $0x40] sm:$0xff]   ;;  %s11313_s18 = sshll.u32 %s568_s27, 4  ;;  %s13376_s30 = sshll.u32 %s16228_s0, 8  ;;  %s21403_s18 = int_to_ptr.vmem [resolvable:$true] %s11313_s18 }
  0x38   : > { %9749 = vperm.xlu0 %14520, %v16272_v4   ;;  %v629_v13 = vld [vmem:[%s21454_s3] sm:$0x3]  ;;  %s21598_s23 = sld [smem:[#allocation45_spill]]  ;;  %s21410_s24 = scalar_lea.sflag [#allocation6], %s566_s25 }
  0x39   : > { %v16494_v16 = vrot.slane %v629_v13, %v16489_v14  ;;  %v16497_v17 = vrot.slane %v629_v13, %v16491_v15  ;;  %v14589_v13 = vld [vmem:[%s21455_s4 + $0x10] ss:$8 sps:$4 sm:$0xff]   ;;  %s16043_s20 = scalar_lea.vmem %s21403_s18, 256  ;;  %s16109_s0 = smov [#allocation5]  }
  0x3a   : > { %11391 = vmatmul.mubr.msk.bf16.gmra.mrb[8].mxu0 %vm669_vm1, %v14527_v22  ;;  %1039 = vmatpush1.bf16.msra.mxu1 %v14549_v25  ;;  %v17584_v15 = vld [vmem:[%s21457_s6 + $0x478] sm:$0xff]   ;;  %p16044_p11 = scmp.ne.s32.totalorder %s21403_s18, %s16043_s20  ;;  %s16047_s19 = sshll.u32 %s16109_s0, 4  ;;  %s16048_s19 = int_to_ptr.vmem [resolvable:$false] %s16047_s19 }
  0x3b   : > { %751 = vmatprep.mubr.bf16.mxu0 %v21482_v2  ;;  %1040 = vmatprep.subr.bf16.mxu1 %v14550_v26  ;;  %v15799_v2 = vld [vmem:[%s21457_s6 + $0x1a0] sm:$0xff]   ;;  %21552 = vst [vmem:[#allocation35_spill] sm:$0xff] %v17584_v15  ;;  %s16049_s22 = scalar_lea.vmem %s16048_s19, 512  ;;  %p16050_p0 = scmp.lt.s32.totalorder %s21403_s18, %s16048_s19 }
  0x3c   : > { %10048 = vperm.xlu0 %14520, %v16267_v3   ;;  %13380 = vmatpush3.bf16.msra.mxu0 %v14576_v45  ;;  %p16045_p12 = pnand %p16044_p11, %p16245_p5  ;;  %p16051_p1 = scmp.lt.s32.totalorder %s16049_s22, %s16043_s20 }
  0x3d   : > { %13381 = vmatprep.subr.bf16.mxu0 %v14578_v47 }
  0x3e   : > { %1041 = vmatpush1.bf16.msra.mxu1 %v14552_v28  ;;  %s21408_s21 = scalar_lea.hbm %s21598_s23, %s13376_s30  ;;  %p16046_p13 = pneg %p16045_p12 }
  0x3f   : > { %1042 = vmatprep.subr.bf16.mxu1 %v14553_v29  ;;  %p16052_p2 = por %p16051_p1, %p16050_p0 }
  0x40   : > { %13382 = vmatpush3.bf16.msra.mxu0 %v14581_v49 }
  0x41   : > { %13383 = vmatprep.subr.bf16.mxu0 %v14583_v51  ;;  %v14584_v51 = vld [vmem:[%s21455_s4] ss:$8 sps:$4 sm:$0xff]   ;;  %p16053_p3 = pnand %p16052_p2, %p16046_p13 }
  0x42   : > { %11392 = vmatmul.mubr.msk.bf16.gmra.mrb[12].mxu0 %vm669_vm1, %v14528_v27  ;;  %1043 = vmatpush1.bf16.msra.mxu1 %v14555_v30 }
  0x43   : > { %1044 = vmatprep.subr.bf16.mxu1 %v14556_v31 }
  0x44   : > { %13384 = vmatpush3.bf16.msra.mxu0 %v14587_v53 }
  0x45   : > { %13385 = vmatprep.subr.bf16.mxu0 %v14588_v54 }
  0x46   : > { %1045 = vmatpush1.bf16.msra.mxu1 %v14558_v32 }
  0x47   : > { %1046 = vmatprep.subr.bf16.mxu1 %v14559_v33 }
  0x48   : > { %13386 = vmatpush3.bf16.msra.mxu0 %v14592_v55 }
  0x49   : > { %13387 = vmatprep.subr.bf16.mxu0 %v14593_v56 }
  0x4a   : > { %1047 = vmatpush1.bf16.msra.mxu1 %v14561_v34 }
  0x4b   : > { %1048 = vmatprep.subr.bf16.mxu1 %v14562_v35 }
  0x4c   : > { %13388 = vmatpush3.bf16.msra.mxu0 %v14597_v57 }
  0x4d   : > { %13389 = vmatprep.subr.bf16.mxu0 %v14598_v58 }
  0x4e   : > { %1049 = vmatpush1.bf16.msra.mxu1 %v14564_v36 }
  0x4f   : > { %1050 = vmatprep.subr.bf16.mxu1 %v14565_v37 }
  0x50   : > { %13390 = vmatpush3.bf16.msra.mxu0 %v14602_v59 }
  0x51   : > { %13391 = vmatprep.subr.bf16.mxu0 %v14603_v60 }
  0x52   : > { %1051 = vmatpush1.bf16.msra.mxu1 %v14567_v38 }
  0x53   : > { %1052 = vmatprep.subr.bf16.mxu1 %v14569_v40 }
  0x54   : > { %13392 = vmatpush3.bf16.msra.mxu0 %v14607_v61 }
  0x55   : > { %13399 = vmatprep.subr.bf16.mxu0 %v14608_v62 }
  0x56   : > { %1053 = vmatpush1.bf16.msra.mxu1 %v14572_v42 }
  0x57   : > { %1054 = vmatprep.subr.bf16.mxu1 %v14574_v44 }
  0x5a   : > { %1055 = vmatpush1.bf16.msra.mxu1 %v14577_v46 }
  0x5b   : > { %1056 = vmatprep.subr.bf16.mxu1 %v14579_v48 }
  0x5e   : > { %1057 = vmatpush1.bf16.msra.mxu1 %v14582_v50 }
  0x5f   : > { %1229 = vmatprep.subr.bf16.mxu1 %v14586_v52  ;;  %v14591_v52 = vld [vmem:[%s21455_s4 + $0x14] ss:$8 sps:$4 sm:$0xff]  }
  0xa6   : > { %v16459_v63 = vpop.permute.xlu1 %3662 }
  0xa7   : > { %v16461_v0 = vpop.permute.xlu0 %1786  ;;  %v16507_v35 = vrot.slane %v16459_v63, 3 }
  0xaa   : > { %v16463_v1 = vpop.permute.xlu1 %3666 }
  0xab   : > { %v16465_v3 = vpop.permute.xlu0 %1790  ;;  %v16512_v40 = vrot.slane %v16463_v1, 3 }
  0xad   : > { %v16518_v47 = vsel %vm3668_vm3, %v16507_v35, %v16512_v40 }
  0xae   : > { %v16467_v4 = vpop.permute.xlu1 %5648 }
  0xaf   : > { %21532 = vst [vmem:[#allocation15_spill] sm:$0xff] %v16467_v4  ;;  %v16469_v5 = vpop.permute.xlu0 %5644  ;;  %v17579_v4 = vld [vmem:[%s21457_s6 + $0x430] sm:$0xff]  }
  0xb0   : > { %21533 = vst [vmem:[#allocation16_spill] sm:$0xff] %v16469_v5  ;;  %21551 = vst [vmem:[#allocation34_spill] sm:$0xff] %v17579_v4 }
  0xb2   : > { %v16471_v6 = vpop.permute.xlu1 %6205 }
  0xb3   : > { %21534 = vst [vmem:[#allocation17_spill] sm:$0xff] %v16471_v6  ;;  %v16473_v7 = vpop.permute.xlu0 %6201  ;;  %v16476_v8 = vrot.slane %v16471_v6, 7  ;;  %v15808_v6 = vld [vmem:[%s21457_s6 + $0x1b8] sm:$0xff]  }
  0xb4   : > { %21535 = vst [vmem:[#allocation18_spill] sm:$0xff] %v16473_v7  ;;  %v16479_v9 = vrot.slane %v16473_v7, 7  ;;  %v15813_v7 = vld [vmem:[%s21457_s6 + $0x2d0] sm:$0xff]  }
  0xb5   : > { %21536 = vst [vmem:[#allocation19_spill] sm:$0xff] %v16476_v8 }
  0xb6   : > { %21537 = vst [vmem:[#allocation20_spill] sm:$0xff] %v16479_v9  ;;  %v16484_v10 = vsel %vm3857_vm2, %v16479_v9, %v16476_v8 }
  0xb7   : > { %21538 = vst [vmem:[#allocation21_spill] sm:$0xff] %v16484_v10 }
  0xfd   : > { %v723_v18 = vpop.f32.mrb[0].mxu0 }
  0xfe   : > { %v724_v19 = vadd.f32 %v723_v18, %v16494_v16  ;;  %v725_v20 = vpop.f32.mrb[1].mxu0 }
  0xff   : > { %v726_v21 = vadd.f32 %v725_v20, %v16497_v17  ;;  %v727_v22 = vpop.f32.mrb[2].mxu0 }
 0x100   : > { %v762_v23 = vmax.f32 %v724_v19, 0.0  ;;  %v728_v24 = vadd.f32 %v727_v22, %v16494_v16  ;;  %v729_v25 = vpop.f32.mrb[3].mxu0  ;;  %v14596_v19 = vld [vmem:[%s21455_s4 + $0x24] ss:$8 sps:$4 sm:$0xff]  }
 0x101   : > { %v763_v26 = vmax.f32 %v726_v21, 0.0  ;;  %v730_v27 = vadd.f32 %v729_v25, %v16497_v17  ;;  %v16558_v25 = vrot.slane %v16461_v0, 5 }
 0x102   : > { %778 = vst [vmem:[#allocation2 + $0x10] sm:$0xff] %v762_v23  ;;  %v764_v28 = vmax.f32 %v728_v24, 0.0 }
 0x103   : > { %779 = vst [vmem:[#allocation2 + $0x18] sm:$0xff] %v763_v26  ;;  %v765_v29 = vmax.f32 %v730_v27, 0.0  ;;  %v14601_v27 = vld [vmem:[%s21455_s4 + $0x34] ss:$8 sps:$4 sm:$0xff]  }
 0x104   : > { %780 = vst [vmem:[#allocation2 + $0x20] sm:$0xff] %v764_v28  ;;  %v16503_v30 = vpack.c.bf16 %v764_v28, %v762_v23  ;;  %v14594_v23 = vld [vmem:[%s21455_s4 + $0x20] ss:$8 sps:$4 sm:$0xff]  }
 0x105   : > { %781 = vst [vmem:[#allocation2 + $0x28] sm:$0xff] %v765_v29  ;;  %v798_v31 = vpack.c.bf16 %v765_v29, %v763_v26  ;;  %v733_v32 = vpop.f32.mrb[4].mxu0  ;;  %v16561_v26 = vrot.slane %v16465_v3, 5 }
 0x106   : > { %v734_v33 = vadd.f32 %v733_v32, %v16494_v16  ;;  %v735_v34 = vpop.f32.mrb[5].mxu0 }
 0x107   : > { %v736_v36 = vadd.f32 %v735_v34, %v16497_v17  ;;  %v737_v37 = vpop.f32.mrb[6].mxu0  ;;  %v1842_v34 = vld [vmem:[#allocation2 + $0x88] sm:$0xf0] }
 0x108   : > { %v766_v38 = vmax.f32 %v734_v33, 0.0  ;;  %v738_v39 = vadd.f32 %v737_v37, %v16494_v16  ;;  %v739_v41 = vpop.f32.mrb[7].mxu0 }
 0x109   : > { %v767_v42 = vmax.f32 %v736_v36, 0.0  ;;  %v740_v43 = vadd.f32 %v739_v41, %v16497_v17 }
 0x10a   : > { %783 = vst [vmem:[#allocation2 + $0x50] sm:$0xff] %v766_v38  ;;  %v768_v44 = vmax.f32 %v738_v39, 0.0  ;;  %v14599_v39 = vld [vmem:[%s21455_s4 + $0x30] ss:$8 sps:$4 sm:$0xff]  }
 0x10b   : > { %784 = vst [vmem:[#allocation2 + $0x58] sm:$0xff] %v767_v42  ;;  %v769_v45 = vmax.f32 %v740_v43, 0.0  ;;  %v2634_v53 = vld [vmem:[#allocation2 + $0x20] sm:$0xff] }
 0x10c   : > { %785 = vst [vmem:[#allocation2 + $0x60] sm:$0xff] %v768_v44  ;;  %v831_v46 = vpack.c.bf16 %v768_v44, %v766_v38  ;;  %v2635_v48 = vld [vmem:[#allocation2 + $0x28] sm:$0xff]  ;;  %v16535_v62 = vmul.f32 %v16518_v47, %v2634_v53  ;;  %v16580_v44 = vsel %vm1792_vm4, %v16558_v25, %v16561_v26 }
 0x10d   : > { %786 = vst [vmem:[#allocation2 + $0x68] sm:$0xff] %v769_v45  ;;  %v743_v49 = vpop.f32.mrb[8].mxu0  ;;  %v832_v50 = vpack.c.bf16 %v769_v45, %v767_v42  ;;  %v16529_v58 = vmul.f32 %v16518_v47, %v2635_v48  ;;  %v1777_v38 = vld [vmem:[#allocation2 + $0xc8] sm:$0xf8]  ;;  %v1841_v42 = vld [vmem:[#allocation2 + $0x80] sm:$0xf0] }
 0x10e   : > { %v744_v54 = vadd.f32 %v743_v49, %v16494_v16  ;;  %v745_v55 = vpop.f32.mrb[9].mxu0  ;;  %21542 = vst [vmem:[#allocation25_spill] sm:$0xff] %v16535_v62  ;;  %v3851_v62 = vld [vmem:[#allocation2 + $0x10] sm:$0xfe] }
 0x10f   : > { %v746_v56 = vadd.f32 %v745_v55, %v16497_v17  ;;  %v747_v57 = vpop.f32.mrb[10].mxu0  ;;  %1058 = vmatprep.mubr.bf16.mxu1 %v832_v50  ;;  %21541 = vst [vmem:[#allocation24_spill] sm:$0xff] %v16529_v58  ;;  %v14604_v55 = vld [vmem:[%s21455_s4 + $0x40] ss:$8 sps:$4 sm:$0xff]  }
 0x110   : > { %v16531_v59 = vmax.f32 %v744_v54, 0.0  ;;  %v748_v60 = vadd.f32 %v747_v57, %v16494_v16  ;;  %v749_v61 = vpop.f32.mrb[11].mxu0  ;;  %1059 = vmatmul.mubr.bf16.vlgmr.msra.gmra.mrb[0].mxu1 %v831_v46 }
 0x111   : > { %v16537_v11 = vmax.f32 %v746_v56, 0.0  ;;  %v750_v12 = vadd.f32 %v749_v61, %v16497_v17  ;;  %1230 = vmatpush1.bf16.msra.mxu1 %v14584_v51  ;;  %1261 = vmatprep.mubr.bf16.mxu1 %v798_v31  ;;  %v14611_v61 = vld [vmem:[%s21455_s4 + $0x54] ss:$8 sps:$4 sm:$0xff]  }
 0x112   : > { %788 = vst [vmem:[#allocation2 + $0x90] sm:$0xff] %v16531_v59  ;;  %v772_v18 = vmax.f32 %v748_v60, 0.0  ;;  %1231 = vmatprep.subr.bf16.mxu1 %v14591_v52  ;;  %v1847_v52 = vpack.c.bf16 %v16531_v59, %v1841_v42  ;;  %v16602_v60 = vrot.slane %v16461_v0, 1  ;;  %v14612_v0 = vld [vmem:[%s21457_s6] sm:$0xff]  }
 0x113   : > { %789 = vst [vmem:[#allocation2 + $0x98] sm:$0xff] %v16537_v11  ;;  %v773_v20 = vmax.f32 %v750_v12, 0.0  ;;  %v1848_v46 = vpack.c.bf16 %v16537_v11, %v1842_v34  ;;  %v14614_v42 = vld [vmem:[%s21455_s4 + $0x60] ss:$8 sps:$4 sm:$0xff]  }
 0x114   : > { %790 = vst [vmem:[#allocation2 + $0xa0] sm:$0xff] %v772_v18  ;;  %v16549_v21 = vpack.c.bf16 %v772_v18, %v16531_v59  ;;  %v16605_v59 = vrot.slane %v16465_v3, 1  ;;  %v14609_v18 = vld [vmem:[%s21455_s4 + $0x50] ss:$8 sps:$4 sm:$0xff]   ;;  %v14613_v3 = vld [vmem:[%s21457_s6 + $0x48] sm:$0xff]  }
 0x115   : > { %791 = vst [vmem:[#allocation2 + $0xa8] sm:$0xff] %v773_v20  ;;  %v16552_v22 = vpack.c.bf16 %v773_v20, %v16537_v11  ;;  %1232 = vmatpush1.bf16.msra.mxu1 %v14589_v13  ;;  %v753_v24 = vpop.f32.mrb[12].mxu0  ;;  %v1892_v12 = vrot.slane %v1848_v46, 2  ;;  %v2987_v20 = vld [vmem:[#allocation2 + $0xc8] sm:$0x80] }
 0x116   : > { %1233 = vmatprep.subr.bf16.mxu1 %v14596_v19  ;;  %v754_v28 = vadd.f32 %v753_v24, %v16494_v16  ;;  %v755_v29 = vpop.f32.mrb[13].mxu0  ;;  %v14616_v24 = vld [vmem:[%s21455_s4 + $0x64] ss:$8 sps:$4 sm:$0xff]  }
 0x117   : > { %v756_v31 = vadd.f32 %v755_v29, %v16497_v17  ;;  %v757_v32 = vpop.f32.mrb[14].mxu0  ;;  %v16632_v29 = vsel %vm2406_vm5, %v16602_v60, %v16605_v59 }
 0x118   : > { %v16568_v33 = vmax.f32 %v754_v28, 0.0  ;;  %v758_v36 = vadd.f32 %v757_v32, %v16494_v16  ;;  %v759_v37 = vpop.f32.mrb[15].mxu0  ;;  %v14606_v16 = vld [vmem:[%s21455_s4 + $0x44] ss:$8 sps:$4 sm:$0xff]  }
 0x119   : > { %1234 = vmatpush1.bf16.msra.mxu1 %v14594_v23  ;;  %v16574_v41 = vmax.f32 %v756_v31, 0.0  ;;  %v760_v43 = vadd.f32 %v759_v37, %v16497_v17  ;;  %v1800_v17 = vmul.f32 %v16558_v25, %v1777_v38  ;;  %v1889_v23 = vrot.slane %v1847_v52, 2  ;;  %v14617_v37 = vld [vmem:[%s21457_s6 + $0x8] sm:$0xff]  }
 0x11a   : > { %1235 = vmatprep.subr.bf16.mxu1 %v14601_v27  ;;  %793 = vst [vmem:[#allocation2 + $0xd0] sm:$0xff] %v16568_v33  ;;  %v776_v45 = vmax.f32 %v758_v36, 0.0  ;;  %v2991_v31 = vmul.f32 %v2987_v20, %v16602_v60 }
 0x11b   : > { %794 = vst [vmem:[#allocation2 + $0xd8] sm:$0xff] %v16574_v41  ;;  %v1845_v48 = vld [vmem:[#allocation2 + $0xa0] sm:$0xf]  ;;  %v777_v49 = vmax.f32 %v760_v43, 0.0  ;;  %v1802_v50 = vmul.f32 %v16580_v44, %v16574_v41  ;;  %v2993_v36 = vmul.f32 %v16632_v29, %v16574_v41  ;;  %v14618_v43 = vld [vmem:[%s21457_s6 + $0x50] sm:$0xff]  }
 0x11c   : > { %v1846_v51 = vld [vmem:[#allocation2 + $0xa8] sm:$0xf]  ;;  %v1849_v53 = vpack.c.bf16 %v1845_v48, %v1845_v48  ;;  %795 = vst [vmem:[#allocation2 + $0xe0] sm:$0xff] %v776_v45  ;;  %v16593_v54 = vpack.c.bf16 %v776_v45, %v16568_v33  ;;  %v14621_v45 = vld [vmem:[%s21455_s4 + $0x74] ss:$8 sps:$4 sm:$0xff]   ;;  %v15801_v8 = vld [vmem:[#allocation2 + $0xa0] sm:$0xff] }
 0x11d   : > { %1236 = vmatpush1.bf16.msra.mxu1 %v14599_v39  ;;  %v1850_v56 = vpack.c.bf16 %v1846_v51, %v1846_v51  ;;  %796 = vst [vmem:[#allocation2 + $0xe8] sm:$0xff] %v777_v49  ;;  %v16599_v57 = vpack.c.bf16 %v777_v49, %v16574_v41  ;;  %v1806_v19 = vpack.c.bf16 %v1802_v50, %v1800_v17  ;;  %v2986_v39 = vld [vmem:[#allocation2 + $0xc0] sm:$0x80] }
 0x11e   : > { %1237 = vmatprep.subr.bf16.mxu1 %v14606_v16  ;;  %v1890_v11 = vrot.slane %v1849_v53, 2  ;;  %v16651_v46 = vpack.c.bf16 %v2993_v36, %v2991_v31  ;;  %v2992_v50 = vmul.f32 %v16632_v29, %v16568_v33  ;;  %v1776_v51 = vld [vmem:[#allocation2 + $0xc0] sm:$0xf8]  ;;  %v2990_v52 = vmul.f32 %v2986_v39, %v16602_v60  ;;  %v14622_v53 = vld [vmem:[%s21457_s6 + $0x10] sm:$0xff]  }
 0x11f   : > { %v1893_v13 = vrot.slane %v1850_v56, 2  ;;  %v2053_v32 = vshrl.u32 %v1806_v19, 16  ;;  %v2056_v34 = vshll.u32 %v1806_v19, 16  ;;  %v14623_v56 = vld [vmem:[%s21457_s6 + $0x58] sm:$0xff]   ;;  %v14628_v31 = vld [vmem:[%s21457_s6 + $0x60] sm:$0xff]  }
 0x120   : > { %v16627_v28 = vsel %vm682_vm0, %v1889_v23, %v1890_v11  ;;  %v14631_v36 = vld [vmem:[%s21455_s4 + $0x94] ss:$8 sps:$4 sm:$0xff]   ;;  %v14632_v39 = vld [vmem:[%s21457_s6 + $0x20] sm:$0xff]  }
 0x121   : > { %1238 = vmatpush1.bf16.msra.mxu1 %v14604_v55  ;;  %v16623_v27 = vsel %vm682_vm0, %v1892_v12, %v1893_v13  ;;  %v2055_v49 = vrot.slane %v2053_v32, 1  ;;  %v2058_v17 = vrot.slane %v2056_v34, 2  ;;  %v14619_v55 = vld [vmem:[%s21455_s4 + $0x70] ss:$8 sps:$4 sm:$0xff]   ;;  %v14626_v12 = vld [vmem:[%s21455_s4 + $0x84] ss:$8 sps:$4 sm:$0xff]   ;;  %v1801_v34 = vmul.f32 %v16580_v44, %v16568_v33 }
 0x122   : > { %2025 = vmatprep.mubr.bf16.mxu0 %v16623_v27  ;;  %1239 = vmatprep.subr.bf16.mxu1 %v14611_v61  ;;  %v14627_v13 = vld [vmem:[%s21457_s6 + $0x18] sm:$0xff]  }
 0x123   : > { %2026 = vmatmul.mubr.bf16.vlgmr.msra.gmra.mrb[16].mxu0 %v16627_v28  ;;  %v2059_v19 = vor.u32 %v2058_v17, %v2055_v49  ;;  %v4035_v17 = vld [vmem:[#allocation2 + $0xb8] sm:$0x1] }
 0x124   : > { %13400 = vmatpush3.bf16.msra.mxu0 %v14612_v0  ;;  %v1781_v38 = vld [vmem:[#allocation2 + $0xe8] sm:$0x7]  ;;  %v16671_v0 = vpack.c.bf16 %v2992_v50, %v2990_v52  ;;  %v16703_v50 = vrot.slane %v16459_v63, 7  ;;  %v14638_v63 = vld [vmem:[%s21457_s6 + $0x70] sm:$0xff]  }
 0x125   : > { %1240 = vmatpush1.bf16.msra.mxu1 %v14609_v18  ;;  %13401 = vmatprep.subr.bf16.mxu0 %v14613_v3  ;;  %v1804_v16 = vmul.f32 %v16561_v26, %v1781_v38  ;;  %v1780_v18 = vld [vmem:[#allocation2 + $0xe0] sm:$0x7]  ;;  %v1799_v3 = vmul.f32 %v16558_v25, %v1776_v51  ;;  %v16706_v51 = vrot.slane %v16463_v1, 7  ;;  %v3209_v1 = vld [vmem:[#allocation2 + $0xa8] sm:$0xff] }
 0x126   : > { %1241 = vmatprep.subr.bf16.mxu1 %v14616_v24  ;;  %v14624_v24 = vld [vmem:[%s21455_s4 + $0x80] ss:$8 sps:$4 sm:$0xff]  }
 0x127   : > { %v1808_v48 = vpack.c.bf16 %v1804_v16, %v1804_v16  ;;  %v14636_v16 = vld [vmem:[%s21455_s4 + $0xa4] ss:$8 sps:$4 sm:$0xff]   ;;  %v14634_v52 = vld [vmem:[%s21455_s4 + $0xa0] ss:$8 sps:$4 sm:$0xff]  }
 0x128   : > { %13402 = vmatpush3.bf16.msra.mxu0 %v14617_v37  ;;  %v1803_v37 = vmul.f32 %v16561_v26, %v1780_v18 }
 0x129   : > { %1242 = vmatpush1.bf16.msra.mxu1 %v14614_v42  ;;  %13403 = vmatprep.subr.bf16.mxu0 %v14618_v43  ;;  %v2061_v61 = vshrl.u32 %v1808_v48, 16  ;;  %v2064_v11 = vshll.u32 %v1808_v48, 16  ;;  %v14629_v42 = vld [vmem:[%s21455_s4 + $0x90] ss:$8 sps:$4 sm:$0xff]   ;;  %v14633_v43 = vld [vmem:[%s21457_s6 + $0x68] sm:$0xff]  }
 0x12a   : > { %1243 = vmatprep.subr.bf16.mxu1 %v14621_v45  ;;  %v1805_v45 = vpack.c.bf16 %v1801_v34, %v1799_v3  ;;  %v14637_v48 = vld [vmem:[%s21457_s6 + $0x28] sm:$0xff]   ;;  %v1807_v49 = vpack.c.bf16 %v1803_v37, %v1803_v37  ;;  %v14639_v3 = vld [vmem:[%s21455_s4 + $0xb0] ss:$8 sps:$4 sm:$0xff]  }
 0x12b   : > { %v2063_v20 = vrot.slane %v2061_v61, 1  ;;  %v2066_v23 = vrot.slane %v2064_v11, 2  ;;  %v4031_v11 = vld [vmem:[#allocation2 + $0x98] sm:$0xfe] }
 0x12c   : > { %13404 = vmatpush3.bf16.msra.mxu0 %v14622_v53  ;;  %v4034_v53 = vld [vmem:[#allocation2 + $0xb0] sm:$0x1]  ;;  %v2039_v61 = vshll.u32 %v1805_v45, 16  ;;  %v2044_v18 = vshrl.u32 %v1807_v49, 16  ;;  %v14643_v34 = vld [vmem:[%s21457_s6 + $0x78] sm:$0xff]  }
 0x12d   : > { %1244 = vmatpush1.bf16.msra.mxu1 %v14619_v55  ;;  %13405 = vmatprep.subr.bf16.mxu0 %v14623_v56  ;;  %v2067_v32 = vor.u32 %v2066_v23, %v2063_v20  ;;  %v14641_v55 = vld [vmem:[%s21455_s4 + $0xb4] ss:$8 sps:$4 sm:$0xff]   ;;  %v2036_v56 = vshrl.u32 %v1805_v45, 16  ;;  %v2209_v20 = vld [vmem:[#allocation2 + $0xc8] sm:$0xf0]  ;;  %v16724_v23 = vsel %vm3857_vm2, %v16703_v50, %v16706_v51 }
 0x12e   : > { %1245 = vmatprep.subr.bf16.mxu1 %v14626_v12  ;;  %v4041_v12 = vmul.f32 %v4035_v17, %v16706_v51 }
 0x12f   : > { %v2068_v38 = vsel %vm2034_vm6, %v2059_v19, %v2067_v32  ;;  %v2047_v19 = vshll.u32 %v1807_v49, 16  ;;  %v4040_v32 = vmul.f32 %v4034_v53, %v16706_v51  ;;  %v2038_v37 = vrot.slane %v2036_v56, 1  ;;  %v14647_v53 = vld [vmem:[%s21457_s6 + $0x38] sm:$0xff]  }
 0x130   : > { %13406 = vmatpush3.bf16.msra.mxu0 %v14627_v13  ;;  %2199 = vmatprep.mubr.bf16.mxu0 %v2068_v38  ;;  %v14642_v13 = vld [vmem:[%s21457_s6 + $0x30] sm:$0xff]   ;;  %v2041_v38 = vrot.slane %v2039_v61, 2  ;;  %v2213_v49 = vpack.c.bf16 %v16574_v41, %v2209_v20  ;;  %v14648_v41 = vld [vmem:[%s21457_s6 + $0x140] sm:$0xff]  }
 0x131   : > { %1246 = vmatpush1.bf16.msra.mxu1 %v14624_v24  ;;  %13407 = vmatprep.subr.bf16.mxu0 %v14628_v31  ;;  %v2211_v24 = vld [vmem:[#allocation2 + $0xe8] sm:$0xf]  ;;  %v4039_v31 = vmul.f32 %v16724_v23, %v3209_v1  ;;  %v2049_v45 = vrot.slane %v2047_v19, 2  ;;  %v4044_v56 = vpack.c.bf16 %v4040_v32, %v4040_v32 }
 0x132   : > { %1247 = vmatprep.subr.bf16.mxu1 %v14631_v36  ;;  %v14646_v36 = vld [vmem:[%s21455_s4 + $0xc4] ss:$8 sps:$4 sm:$0xff]   ;;  %v2215_v17 = vpack.c.bf16 %v2211_v24, %v2211_v24  ;;  %v2256_v19 = vrot.slane %v2213_v49, 2 }
 0x133   : > { %v4054_v32 = vshll.u32 %v4044_v56, 16 }
 0x134   : > { %13408 = vmatpush3.bf16.msra.mxu0 %v14632_v39  ;;  %v3208_v39 = vld [vmem:[#allocation2 + $0xa0] sm:$0xff]  ;;  %v2257_v20 = vrot.slane %v2215_v17, 2 }
 0x135   : > { %1248 = vmatpush1.bf16.msra.mxu1 %v14629_v42  ;;  %13409 = vmatprep.subr.bf16.mxu0 %v14633_v43  ;;  %v4037_v42 = vmul.f32 %v4031_v11, %v16703_v50  ;;  %v4045_v43 = vpack.c.bf16 %v4041_v12, %v4041_v12  ;;  %v2042_v11 = vor.u32 %v2041_v38, %v2038_v37 }
 0x136   : > { %1249 = vmatprep.subr.bf16.mxu1 %v14636_v16  ;;  %v2046_v16 = vrot.slane %v2044_v18, 1  ;;  %v14649_v18 = vld [vmem:[%s21455_s4 + $0xd0] ss:$8 sps:$4 sm:$0xff]  }
 0x137   : > { %v4066_v61 = vshll.u32 %v4045_v43, 16 }
 0x138   : > { %13410 = vmatpush3.bf16.msra.mxu0 %v14637_v48  ;;  %v4030_v48 = vld [vmem:[#allocation2 + $0x90] sm:$0xfe]  ;;  %v2050_v12 = vor.u32 %v2049_v45, %v2046_v16  ;;  %v16767_v16 = vsel %vm682_vm0, %v2256_v19, %v2257_v20  ;;  %v14657_v45 = vld [vmem:[%s21457_s6 + $0x108] sm:$0xff]  }
 0x139   : > { %1250 = vmatpush1.bf16.msra.mxu1 %v14634_v52  ;;  %13411 = vmatprep.subr.bf16.mxu0 %v14638_v63  ;;  %v4043_v52 = vpack.c.bf16 %v4039_v31, %v4037_v42  ;;  %v4038_v63 = vmul.f32 %v16724_v23, %v3208_v39  ;;  %v4036_v1 = vmul.f32 %v4030_v48, %v16703_v50  ;;  %v14652_v31 = vld [vmem:[%s21457_s6 + $0x100] sm:$0xff]   ;;  %v4068_v38 = vrot.slane %v4066_v61, 1  ;;  %v14662_v61 = vld [vmem:[%s21457_s6 + $0x110] sm:$0xff]   ;;  %v2405_v19 = vld [vmem:[#allocation2 + $0x68] sm:$0x7f] }
 0x13a   : > { %1251 = vmatprep.subr.bf16.mxu1 %v14641_v55  ;;  %v14644_v55 = vld [vmem:[%s21455_s4 + $0xc0] ss:$8 sps:$4 sm:$0xff]   ;;  %v2051_v39 = vsel %vm2034_vm6, %v2042_v11, %v2050_v12  ;;  %v14656_v42 = vld [vmem:[%s21455_s4 + $0xe4] ss:$8 sps:$4 sm:$0xff]   ;;  %v14659_v11 = vld [vmem:[%s21455_s4 + $0xf0] ss:$8 sps:$4 sm:$0xff]  }
 0x13b   : > { %v4042_v24 = vpack.c.bf16 %v4038_v63, %v4036_v1  ;;  %v14658_v63 = vld [vmem:[%s21457_s6 + $0x150] sm:$0xff]   ;;  %v14663_v12 = vld [vmem:[%s21457_s6 + $0x158] sm:$0xff]   ;;  %v14664_v20 = vld [vmem:[%s21455_s4 + $0x200] ss:$8 sps:$4 sm:$0xff]  }
 0x13c   : > { %13412 = vmatpush3.bf16.msra.mxu0 %v14642_v13  ;;  %v14651_v13 = vld [vmem:[%s21455_s4 + $0xd4] ss:$8 sps:$4 sm:$0xff]  }
 0x13d   : > { %1252 = vmatpush1.bf16.msra.mxu1 %v14639_v3  ;;  %13413 = vmatprep.subr.bf16.mxu0 %v14643_v34  ;;  %v4061_v3 = vshll.u32 %v4043_v52, 16  ;;  %v14653_v34 = vld [vmem:[%s21457_s6 + $0x148] sm:$0xff]   ;;  %v4049_v43 = vshll.u32 %v4042_v24, 16  ;;  %v4047_v49 = vshrl.u32 %v4042_v24, 16  ;;  %v14671_v24 = vld [vmem:[%s21455_s4 + $0x214] ss:$8 sps:$4 sm:$0xff]  }
 0x13e   : > { %1253 = vmatprep.subr.bf16.mxu1 %v14646_v36  ;;  %v4059_v36 = vshrl.u32 %v4043_v52, 16  ;;  %v4056_v52 = vrot.slane %v4054_v32, 1  ;;  %v9746_v32 = vld [vmem:[%s21530_s1 + $0x8] sm:$0xff] }
 0x13f   : > { %v4063_v37 = vrot.slane %v4061_v3, 1  ;;  %v4051_v17 = vrot.slane %v4049_v43, 1  ;;  %v14668_v3 = vld [vmem:[%s21457_s6 + $0x160] sm:$0xff]   ;;  %9754 = vperm.xlu1 %14521, %v9746_v32  }
 0x140   : > { %13414 = vmatpush3.bf16.msra.mxu0 %v14647_v53  ;;  %v14654_v53 = vld [vmem:[%s21455_s4 + $0xe0] ss:$8 sps:$4 sm:$0xff]  }
 0x141   : > { %1254 = vmatpush1.bf16.msra.mxu1 %v14644_v55  ;;  %13421 = vmatprep.subr.bf16.mxu0 %v14648_v41  ;;  %v4064_v48 = vor.u32 %v4063_v37, %v4059_v36  ;;  %v14661_v55 = vld [vmem:[%s21455_s4 + $0xf4] ss:$8 sps:$4 sm:$0xff]   ;;  %v4052_v41 = vor.u32 %v4051_v17, %v4047_v49  ;;  %v2418_v36 = vmul.f32 %v16605_v59, %v2405_v19  ;;  %v14669_v37 = vld [vmem:[%s21455_s4 + $0x210] ss:$8 sps:$4 sm:$0xff]   ;;  %v14674_v49 = vld [vmem:[%s21455_s4 + $0x220] ss:$8 sps:$4 sm:$0xff]  }
 0x142   : > { %1255 = vmatprep.subr.bf16.mxu1 %v14651_v13  ;;  %v14666_v13 = vld [vmem:[%s21455_s4 + $0x204] ss:$8 sps:$4 sm:$0xff]   ;;  %v14678_v17 = vld [vmem:[%s21457_s6 + $0x170] sm:$0xff]  }
 0x143   : > { %2200 = vmatmul.mubr.bf16.vlgmr.msra.gmra.mrb[20].mxu0 %v2051_v39  ;;  %v16780_v56 = vsel %vm3874_vm7, %v4064_v48, %v4068_v38  ;;  %v16789_v1 = vsel %vm3874_vm7, %v4052_v41, %v4056_v52  ;;  %v14672_v38 = vld [vmem:[%s21457_s6 + $0x120] sm:$0xff]   ;;  %v13128_v39 = vld [vmem:[%s21530_s1 + $0x18] sm:$0xff] }
 0x144   : > { %13422 = vmatpush3.bf16.msra.mxu0 %v14652_v31  ;;  %2389 = vmatprep.mubr.bf16.mxu0 %v16767_v16  ;;  %21543 = vst [vmem:[#allocation26_spill] sm:$0xff] %v16789_v1  ;;  %v2401_v31 = vld [vmem:[#allocation2 + $0x48] sm:$0x80]  ;;  %v2208_v52 = vld [vmem:[#allocation2 + $0xc0] sm:$0xf0] }
 0x145   : > { %1256 = vmatpush1.bf16.msra.mxu1 %v14649_v18  ;;  %13423 = vmatprep.subr.bf16.mxu0 %v14653_v34  ;;  %v14667_v18 = vld [vmem:[%s21457_s6 + $0x118] sm:$0xff]   ;;  %v2414_v43 = vmul.f32 %v16602_v60, %v2401_v31  ;;  %v14676_v48 = vld [vmem:[%s21455_s4 + $0x224] ss:$8 sps:$4 sm:$0xff]   ;;  %v2212_v19 = vpack.c.bf16 %v16568_v33, %v2208_v52 }
 0x146   : > { %1257 = vmatprep.subr.bf16.mxu1 %v14656_v42  ;;  %v16815_v34 = vld [vmem:[#allocation2 + $0x58] sm:$0xff]  ;;  %v14673_v42 = vld [vmem:[%s21457_s6 + $0x168] sm:$0xff]   ;;  %10053 = vperm.xlu1 %14521, %v13128_v39  }
 0x147   : > { %v14687_v31 = vld [vmem:[%s21457_s6 + $0x138] sm:$0xff]   ;;  %v2253_v39 = vrot.slane %v2212_v19, 2  ;;  %v14706_v19 = vld [vmem:[%s21455_s4 + $0x284] ss:$8 sps:$4 sm:$0xff]  }
 0x148   : > { %13424 = vmatpush3.bf16.msra.mxu0 %v14657_v45  ;;  %v2422_v45 = vpack.c.bf16 %v2418_v36, %v2418_v36  ;;  %v14691_v33 = vld [vmem:[%s21455_s4 + $0x254] ss:$8 sps:$4 sm:$0xff]  }
 0x149   : > { %1258 = vmatpush1.bf16.msra.mxu1 %v14654_v53  ;;  %13425 = vmatprep.subr.bf16.mxu0 %v14658_v63  ;;  %v14681_v53 = vld [vmem:[%s21455_s4 + $0x234] ss:$8 sps:$4 sm:$0xff]   ;;  %v2210_v63 = vld [vmem:[#allocation2 + $0xe0] sm:$0xf] }
 0x14a   : > { %1259 = vmatprep.subr.bf16.mxu1 %v14661_v55  ;;  %v2483_v41 = vshrl.u32 %v2422_v45, 16 }
 0x14c   : > { %13426 = vmatpush3.bf16.msra.mxu0 %v14662_v61  ;;  %v14682_v61 = vld [vmem:[%s21457_s6 + $0x130] sm:$0xff]   ;;  %v2485_v32 = vrot.slane %v2483_v41, 3  ;;  %v14697_v41 = vld [vmem:[%s21457_s6 + $0x188] sm:$0xff]  }
 0x14d   : > { %1260 = vmatpush1.bf16.msra.mxu1 %v14659_v11  ;;  %13427 = vmatprep.subr.bf16.mxu0 %v14663_v12  ;;  %v2486_v11 = vshll.u32 %v2422_v45, 16  ;;  %v14679_v12 = vld [vmem:[%s21455_s4 + $0x230] ss:$8 sps:$4 sm:$0xff]   ;;  %v14692_v45 = vld [vmem:[%s21457_s6 + $0x180] sm:$0xff]  }
 0x14e   : > { %1467 = vmatprep.subr.bf16.mxu1 %v14666_v13  ;;  %v14683_v13 = vld [vmem:[%s21457_s6 + $0x178] sm:$0xff]  }
 0x14f   : > { %v2488_v36 = vrot.slane %v2486_v11, 4  ;;  %v14701_v11 = vld [vmem:[%s21455_s4 + $0x274] ss:$8 sps:$4 sm:$0xff]  }
 0x150   : > { %1262 = vmatmul.mubr.bf16.vlgmr.msra.gmra.mrb[0].mxu1 %v16503_v30  ;;  %13428 = vmatpush3.bf16.msra.mxu0 %v14667_v18  ;;  %v2416_v30 = vmul.f32 %v16632_v29, %v16815_v34  ;;  %v14686_v18 = vld [vmem:[%s21455_s4 + $0x244] ss:$8 sps:$4 sm:$0xff]  }
 0x151   : > { %1468 = vmatpush1.bf16.msra.mxu1 %v14664_v20  ;;  %1499 = vmatprep.mubr.bf16.mxu1 %v16552_v22  ;;  %v14677_v22 = vld [vmem:[%s21457_s6 + $0x128] sm:$0xff]   ;;  %v2214_v20 = vpack.c.bf16 %v2210_v63, %v2210_v63 }
 0x152   : > { %13429 = vmatprep.subr.bf16.mxu0 %v14668_v3  ;;  %1469 = vmatprep.subr.bf16.mxu1 %v14671_v24  ;;  %v2420_v55 = vpack.c.bf16 %v2416_v30, %v2414_v43 }
 0x154   : > { %13430 = vmatpush3.bf16.msra.mxu0 %v14672_v38  ;;  %v2475_v3 = vshrl.u32 %v2420_v55, 16  ;;  %v2478_v24 = vshll.u32 %v2420_v55, 16  ;;  %v14688_v38 = vld [vmem:[%s21457_s6 + $0x1c0] sm:$0xff]  }
 0x155   : > { %1470 = vmatpush1.bf16.msra.mxu1 %v14669_v37  ;;  %13431 = vmatprep.subr.bf16.mxu0 %v14673_v42  ;;  %v14684_v37 = vld [vmem:[%s21455_s4 + $0x240] ss:$8 sps:$4 sm:$0xff]   ;;  %v2254_v42 = vrot.slane %v2214_v20, 2 }
 0x156   : > { %1471 = vmatprep.subr.bf16.mxu1 %v14676_v48  ;;  %v2477_v43 = vrot.slane %v2475_v3, 3  ;;  %v2480_v30 = vrot.slane %v2478_v24, 4  ;;  %v14689_v48 = vld [vmem:[%s21455_s4 + $0x250] ss:$8 sps:$4 sm:$0xff]   ;;  %v14694_v55 = vld [vmem:[%s21455_s4 + $0x260] ss:$8 sps:$4 sm:$0xff]  }
 0x157   : > { %v2404_v20 = vld [vmem:[#allocation2 + $0x60] sm:$0x7f]  ;;  %v14707_v3 = vld [vmem:[%s21457_s6 + $0x198] sm:$0xff]   ;;  %v2400_v24 = vld [vmem:[#allocation2 + $0x40] sm:$0x80] }
 0x158   : > { %13432 = vmatpush3.bf16.msra.mxu0 %v14677_v22  ;;  %v2489_v22 = vor.u32 %v2488_v36, %v2485_v32  ;;  %v2481_v52 = vor.u32 %v2480_v30, %v2477_v43  ;;  %v14708_v32 = vld [vmem:[%s21457_s6 + $0x1e0] sm:$0xff]   ;;  %v14711_v36 = vld [vmem:[%s21455_s4 + $0x294] ss:$8 sps:$4 sm:$0xff]   ;;  %v2413_v43 = vmul.f32 %v16602_v60, %v2400_v24 }
 0x159   : > { %1472 = vmatpush1.bf16.msra.mxu1 %v14674_v49  ;;  %13433 = vmatprep.subr.bf16.mxu0 %v14678_v17  ;;  %v14693_v49 = vld [vmem:[%s21457_s6 + $0x1c8] sm:$0xff]  }
 0x15a   : > { %1473 = vmatprep.subr.bf16.mxu1 %v14681_v53  ;;  %v14696_v17 = vld [vmem:[%s21455_s4 + $0x264] ss:$8 sps:$4 sm:$0xff]   ;;  %v16888_v53 = vsel %vm682_vm0, %v2253_v39, %v2254_v42  ;;  %v16892_v63 = vsel %vm2456_vm8, %v2481_v52, %v2489_v22  ;;  %v14709_v39 = vld [vmem:[%s21455_s4 + $0x290] ss:$8 sps:$4 sm:$0xff]   ;;  %v14714_v60 = vld [vmem:[%s21455_s4 + $0x2a0] ss:$8 sps:$4 sm:$0xff]  }
 0x15b   : > { %21544 = vst [vmem:[#allocation27_spill] sm:$0xff] %v16892_v63  ;;  %v14713_v42 = vld [vmem:[%s21457_s6 + $0x1e8] sm:$0xff]   ;;  %v14722_v52 = vld [vmem:[%s21457_s6 + $0x1b0] sm:$0xff]  }
 0x15c   : > { %13434 = vmatpush3.bf16.msra.mxu0 %v14682_v61  ;;  %v14698_v61 = vld [vmem:[%s21457_s6 + $0x1d0] sm:$0xff]   ;;  %v14724_v24 = vld [vmem:[%s21455_s4 + $0x2c0] ss:$8 sps:$4 sm:$0xff]  }
 0x15d   : > { %1474 = vmatpush1.bf16.msra.mxu1 %v14679_v12  ;;  %13435 = vmatprep.subr.bf16.mxu0 %v14683_v13  ;;  %v14702_v12 = vld [vmem:[%s21457_s6 + $0x190] sm:$0xff]  }
 0x15e   : > { %1475 = vmatprep.subr.bf16.mxu1 %v14686_v18  ;;  %v14699_v13 = vld [vmem:[%s21455_s4 + $0x270] ss:$8 sps:$4 sm:$0xff]  }
 0x15f   : > { %v14703_v18 = vld [vmem:[%s21457_s6 + $0x1d8] sm:$0xff]  }
 0x160   : > { %13436 = vmatpush3.bf16.msra.mxu0 %v14687_v31  ;;  %v14704_v31 = vld [vmem:[%s21455_s4 + $0x280] ss:$8 sps:$4 sm:$0xff]  }
 0x161   : > { %1476 = vmatpush1.bf16.msra.mxu1 %v14684_v37  ;;  %13443 = vmatprep.subr.bf16.mxu0 %v14688_v38  ;;  %v16931_v37 = vld [vmem:[#allocation2 + $0x50] sm:$0xff]  ;;  %v14712_v38 = vld [vmem:[%s21457_s6 + $0x1a0] sm:$0xff]  }
 0x162   : > { %1477 = vmatprep.subr.bf16.mxu1 %v14691_v33  ;;  %v2417_v33 = vmul.f32 %v16605_v59, %v2404_v20  ;;  %v2415_v30 = vmul.f32 %v16632_v29, %v16931_v37  ;;  %v14718_v29 = vld [vmem:[%s21457_s6 + $0x1f0] sm:$0xff]  }
 0x163   : > { %2390 = vmatmul.mubr.bf16.vlgmr.msra.gmra.mrb[24].mxu0 %v16888_v53 }
 0x164   : > { %13444 = vmatpush3.bf16.msra.mxu0 %v14692_v45  ;;  %2621 = vmatprep.mubr.bf16.mxu0 %v16892_v63  ;;  %v14716_v45 = vld [vmem:[%s21455_s4 + $0x2a4] ss:$8 sps:$4 sm:$0xff]   ;;  %v2421_v22 = vpack.c.bf16 %v2417_v33, %v2417_v33 }
 0x165   : > { %1478 = vmatpush1.bf16.msra.mxu1 %v14689_v48  ;;  %13445 = vmatprep.subr.bf16.mxu0 %v14693_v49  ;;  %v14717_v48 = vld [vmem:[%s21457_s6 + $0x1a8] sm:$0xff]   ;;  %v14721_v49 = vld [vmem:[%s21455_s4 + $0x2b4] ss:$8 sps:$4 sm:$0xff]  }
 0x166   : > { %1479 = vmatprep.subr.bf16.mxu1 %v14696_v17  ;;  %v2419_v17 = vpack.c.bf16 %v2415_v30, %v2413_v43  ;;  %v2633_v43 = vld [vmem:[#allocation2 + $0x18] sm:$0xff]  ;;  %v14733_v30 = vld [vmem:[%s21457_s6 + $0x248] sm:$0xff]  }
 0x168   : > { %13446 = vmatpush3.bf16.msra.mxu0 %v14697_v41  ;;  %v2469_v41 = vshll.u32 %v2421_v22, 16 }
 0x169   : > { %1480 = vmatpush1.bf16.msra.mxu1 %v14694_v55  ;;  %13447 = vmatprep.subr.bf16.mxu0 %v14698_v61  ;;  %v2466_v55 = vshrl.u32 %v2421_v22, 16  ;;  %v14719_v61 = vld [vmem:[%s21455_s4 + $0x2b0] ss:$8 sps:$4 sm:$0xff]  }
 0x16a   : > { %1481 = vmatprep.subr.bf16.mxu1 %v14701_v11  ;;  %v14723_v11 = vld [vmem:[%s21457_s6 + $0x1f8] sm:$0xff]  }
 0x16b   : > { %v2468_v20 = vrot.slane %v2466_v55, 3  ;;  %v14741_v55 = vld [vmem:[%s21455_s4 + $0x2f4] ss:$8 sps:$4 sm:$0xff]  }
 0x16c   : > { %13448 = vmatpush3.bf16.msra.mxu0 %v14702_v12  ;;  %v14726_v12 = vld [vmem:[%s21455_s4 + $0x2c4] ss:$8 sps:$4 sm:$0xff]  }
 0x16d   : > { %1482 = vmatpush1.bf16.msra.mxu1 %v14699_v13  ;;  %13449 = vmatprep.subr.bf16.mxu0 %v14703_v18  ;;  %v2458_v13 = vshrl.u32 %v2419_v17, 16  ;;  %v2461_v18 = vshll.u32 %v2419_v17, 16  ;;  %v14737_v17 = vld [vmem:[%s21457_s6 + $0x208] sm:$0xff]  }
 0x16e   : > { %1483 = vmatprep.subr.bf16.mxu1 %v14706_v19  ;;  %v14727_v19 = vld [vmem:[%s21457_s6 + $0x1b8] sm:$0xff]  }
 0x170   : > { %13450 = vmatpush3.bf16.msra.mxu0 %v14707_v3  ;;  %v2471_v3 = vrot.slane %v2469_v41, 4  ;;  %v14742_v41 = vld [vmem:[%s21457_s6 + $0x210] sm:$0xff]  }
 0x171   : > { %1484 = vmatpush1.bf16.msra.mxu1 %v14704_v31  ;;  %13451 = vmatprep.subr.bf16.mxu0 %v14708_v32  ;;  %v2460_v31 = vrot.slane %v2458_v13, 3  ;;  %v2463_v32 = vrot.slane %v2461_v18, 4  ;;  %v14747_v13 = vld [vmem:[%s21457_s6 + $0x218] sm:$0xff]   ;;  %v14744_v18 = vld [vmem:[%s21455_s4 + $0x300] ss:$8 sps:$4 sm:$0xff]  }
 0x172   : > { %1485 = vmatprep.subr.bf16.mxu1 %v14711_v36  ;;  %v14728_v36 = vld [vmem:[%s21457_s6 + $0x240] sm:$0xff]   ;;  %v2472_v33 = vor.u32 %v2471_v3, %v2468_v20  ;;  %v14751_v20 = vld [vmem:[%s21455_s4 + $0x314] ss:$8 sps:$4 sm:$0xff]  }
 0x173   : > { %v14752_v3 = vld [vmem:[%s21457_s6 + $0x220] sm:$0xff]  }
 0x174   : > { %13452 = vmatpush3.bf16.msra.mxu0 %v14712_v38  ;;  %v14731_v38 = vld [vmem:[%s21455_s4 + $0x2d4] ss:$8 sps:$4 sm:$0xff]  }
 0x175   : > { %1486 = vmatpush1.bf16.msra.mxu1 %v14709_v39  ;;  %13453 = vmatprep.subr.bf16.mxu0 %v14713_v42  ;;  %v14732_v39 = vld [vmem:[%s21457_s6 + $0x200] sm:$0xff]   ;;  %v14729_v42 = vld [vmem:[%s21455_s4 + $0x2d0] ss:$8 sps:$4 sm:$0xff]  }
 0x176   : > { %1487 = vmatprep.subr.bf16.mxu1 %v14716_v45  ;;  %v2464_v45 = vor.u32 %v2463_v32, %v2460_v31  ;;  %v14753_v31 = vld [vmem:[%s21457_s6 + $0x268] sm:$0xff]  }
 0x177   : > { %v14756_v32 = vld [vmem:[%s21455_s4 + $0x324] ss:$8 sps:$4 sm:$0xff]  }
 0x178   : > { %13454 = vmatpush3.bf16.msra.mxu0 %v14717_v48  ;;  %v14736_v48 = vld [vmem:[%s21455_s4 + $0x2e4] ss:$8 sps:$4 sm:$0xff]   ;;  %v16998_v22 = vsel %vm2456_vm8, %v2464_v45, %v2472_v33  ;;  %v14762_v33 = vld [vmem:[%s21457_s6 + $0x230] sm:$0xff]   ;;  %v14767_v45 = vld [vmem:[%s21457_s6 + $0x238] sm:$0xff]  }
 0x179   : > { %1488 = vmatpush1.bf16.msra.mxu1 %v14714_v60  ;;  %13455 = vmatprep.subr.bf16.mxu0 %v14718_v29  ;;  %21545 = vst [vmem:[#allocation28_spill] sm:$0xff] %v16998_v22  ;;  %v15769_v60 = vld [vmem:[#allocation2 + $0x28] sm:$0xff] }
 0x17a   : > { %1489 = vmatprep.subr.bf16.mxu1 %v14721_v49  ;;  %v17000_v29 = vpack.c.bf16 %v15769_v60, %v2633_v43  ;;  %v14734_v49 = vld [vmem:[%s21455_s4 + $0x2e0] ss:$8 sps:$4 sm:$0xff]   ;;  %v14766_v43 = vld [vmem:[%s21455_s4 + $0x344] ss:$8 sps:$4 sm:$0xff]   ;;  %v14771_v60 = vld [vmem:[%s21455_s4 + $0x354] ss:$8 sps:$4 sm:$0xff]  }
 0x17c   : > { %13456 = vmatpush3.bf16.msra.mxu0 %v14722_v52  ;;  %v14738_v52 = vld [vmem:[%s21457_s6 + $0x250] sm:$0xff]  }
 0x17d   : > { %1490 = vmatpush1.bf16.msra.mxu1 %v14719_v61  ;;  %13457 = vmatprep.subr.bf16.mxu0 %v14723_v11  ;;  %v14739_v61 = vld [vmem:[%s21455_s4 + $0x2f0] ss:$8 sps:$4 sm:$0xff]  }
 0x17e   : > { %1491 = vmatprep.subr.bf16.mxu1 %v14726_v12  ;;  %v14743_v11 = vld [vmem:[%s21457_s6 + $0x258] sm:$0xff]   ;;  %v14746_v12 = vld [vmem:[%s21455_s4 + $0x304] ss:$8 sps:$4 sm:$0xff]  }
 0x180   : > { %13458 = vmatpush3.bf16.msra.mxu0 %v14727_v19  ;;  %v14748_v19 = vld [vmem:[%s21457_s6 + $0x260] sm:$0xff]  }
 0x181   : > { %1492 = vmatpush1.bf16.msra.mxu1 %v14724_v24  ;;  %13465 = vmatprep.subr.bf16.mxu0 %v14728_v36  ;;  %v14749_v24 = vld [vmem:[%s21455_s4 + $0x310] ss:$8 sps:$4 sm:$0xff]   ;;  %v14757_v36 = vld [vmem:[%s21457_s6 + $0x228] sm:$0xff]  }
 0x182   : > { %1493 = vmatprep.subr.bf16.mxu1 %v14731_v38  ;;  %v14754_v38 = vld [vmem:[%s21455_s4 + $0x320] ss:$8 sps:$4 sm:$0xff]  }
 0x183   : > { %2622 = vmatmul.mubr.bf16.vlgmr.msra.gmra.mrb[28].mxu0 %v16998_v22  ;;  %v15816_v22 = vld [vmem:[#allocation2 + $0x20] sm:$0xff] }
 0x184   : > { %13466 = vmatpush3.bf16.msra.mxu0 %v14732_v39  ;;  %2799 = vmatprep.mubr.bf16.mxu0 %v17000_v29  ;;  %v14759_v39 = vld [vmem:[%s21455_s4 + $0x330] ss:$8 sps:$4 sm:$0xff]  }
 0x185   : > { %1494 = vmatpush1.bf16.msra.mxu1 %v14729_v42  ;;  %13467 = vmatprep.subr.bf16.mxu0 %v14733_v30  ;;  %v14763_v42 = vld [vmem:[%s21457_s6 + $0x278] sm:$0xff]   ;;  %v14764_v30 = vld [vmem:[%s21455_s4 + $0x340] ss:$8 sps:$4 sm:$0xff]  }
 0x186   : > { %1495 = vmatprep.subr.bf16.mxu1 %v14736_v48  ;;  %v14768_v48 = vld [vmem:[%s21457_s6 + $0x2c0] sm:$0xff]  }
 0x188   : > { %13468 = vmatpush3.bf16.msra.mxu0 %v14737_v17  ;;  %v2632_v17 = vld [vmem:[#allocation2 + $0x10] sm:$0xff] }
 0x189   : > { %1496 = vmatpush1.bf16.msra.mxu1 %v14734_v49  ;;  %13469 = vmatprep.subr.bf16.mxu0 %v14738_v52  ;;  %v2811_v49 = vld [vmem:[#allocation2 + $0x68] sm:$0xff]  ;;  %v14772_v52 = vld [vmem:[%s21457_s6 + $0x280] sm:$0xff]  }
 0x18a   : > { %1497 = vmatprep.subr.bf16.mxu1 %v14741_v55  ;;  %v14769_v55 = vld [vmem:[%s21455_s4 + $0x350] ss:$8 sps:$4 sm:$0xff]  }
 0x18c   : > { %13470 = vmatpush3.bf16.msra.mxu0 %v14742_v41  ;;  %v14773_v41 = vld [vmem:[%s21457_s6 + $0x2c8] sm:$0xff]  }
 0x18d   : > { %1498 = vmatpush1.bf16.msra.mxu1 %v14739_v61  ;;  %13471 = vmatprep.subr.bf16.mxu0 %v14743_v11  ;;  %v14776_v61 = vld [vmem:[%s21455_s4 + $0x364] ss:$8 sps:$4 sm:$0xff]  }
 0x18e   : > { %1709 = vmatprep.subr.bf16.mxu1 %v14746_v12  ;;  %v15770_v11 = vld [vmem:[#allocation2 + $0x20] sm:$0xff] }
 0x18f   : > { %v17102_v12 = vpack.c.bf16 %v15770_v11, %v2632_v17  ;;  %v14798_v17 = vld [vmem:[%s21457_s6 + $0x2f0] sm:$0xff]  }
 0x190   : > { %1500 = vmatmul.mubr.bf16.vlgmr.msra.gmra.mrb[0].mxu1 %v16549_v21  ;;  %13472 = vmatpush3.bf16.msra.mxu0 %v14747_v13  ;;  %v14758_v21 = vld [vmem:[%s21457_s6 + $0x270] sm:$0xff]   ;;  %v17105_v13 = vpack.c.bf16 %v2811_v49, %v16815_v34  ;;  %v14794_v49 = vld [vmem:[%s21455_s4 + $0x3a0] ss:$8 sps:$4 sm:$0xff]  }
 0x191   : > { %1710 = vmatpush1.bf16.msra.mxu1 %v14744_v18  ;;  %1741 = vmatprep.mubr.bf16.mxu1 %v16599_v57  ;;  %v14761_v57 = vld [vmem:[%s21455_s4 + $0x334] ss:$8 sps:$4 sm:$0xff]   ;;  %v14777_v18 = vld [vmem:[%s21457_s6 + $0x288] sm:$0xff]  }
 0x192   : > { %13473 = vmatprep.subr.bf16.mxu0 %v14748_v19  ;;  %1711 = vmatprep.subr.bf16.mxu1 %v14751_v20  ;;  %v14774_v19 = vld [vmem:[%s21455_s4 + $0x360] ss:$8 sps:$4 sm:$0xff]   ;;  %v14778_v20 = vld [vmem:[%s21457_s6 + $0x2d0] sm:$0xff]  }
 0x193   : > { %v14781_v34 = vld [vmem:[%s21455_s4 + $0x374] ss:$8 sps:$4 sm:$0xff]  }
 0x194   : > { %13474 = vmatpush3.bf16.msra.mxu0 %v14752_v3  ;;  %v14782_v3 = vld [vmem:[%s21457_s6 + $0x290] sm:$0xff]  }
 0x195   : > { %1712 = vmatpush1.bf16.msra.mxu1 %v14749_v24  ;;  %13475 = vmatprep.subr.bf16.mxu0 %v14753_v31  ;;  %v14779_v24 = vld [vmem:[%s21455_s4 + $0x370] ss:$8 sps:$4 sm:$0xff]  }
 0x196   : > { %1713 = vmatprep.subr.bf16.mxu1 %v14756_v32  ;;  %v14783_v31 = vld [vmem:[%s21457_s6 + $0x2d8] sm:$0xff]   ;;  %v14786_v32 = vld [vmem:[%s21455_s4 + $0x384] ss:$8 sps:$4 sm:$0xff]  }
 0x198   : > { %13476 = vmatpush3.bf16.msra.mxu0 %v14757_v36  ;;  %v2989_v36 = vld [vmem:[#allocation2 + $0xe8] sm:$0x7f] }
 0x199   : > { %1714 = vmatpush1.bf16.msra.mxu1 %v14754_v38  ;;  %13477 = vmatprep.subr.bf16.mxu0 %v14758_v21  ;;  %v14787_v38 = vld [vmem:[%s21457_s6 + $0x298] sm:$0xff]   ;;  %v14784_v21 = vld [vmem:[%s21455_s4 + $0x380] ss:$8 sps:$4 sm:$0xff]  }
 0x19a   : > { %1715 = vmatprep.subr.bf16.mxu1 %v14761_v57  ;;  %v14788_v57 = vld [vmem:[%s21457_s6 + $0x2e0] sm:$0xff]  }
 0x19c   : > { %13478 = vmatpush3.bf16.msra.mxu0 %v14762_v33  ;;  %v14791_v33 = vld [vmem:[%s21455_s4 + $0x394] ss:$8 sps:$4 sm:$0xff]  }
 0x19d   : > { %1716 = vmatpush1.bf16.msra.mxu1 %v14759_v39  ;;  %13479 = vmatprep.subr.bf16.mxu0 %v14763_v42  ;;  %v14792_v39 = vld [vmem:[%s21457_s6 + $0x2a0] sm:$0xff]   ;;  %v2995_v42 = vmul.f32 %v2989_v36, %v16605_v59 }
 0x19e   : > { %1717 = vmatprep.subr.bf16.mxu1 %v14766_v43  ;;  %v14789_v43 = vld [vmem:[%s21455_s4 + $0x390] ss:$8 sps:$4 sm:$0xff]   ;;  %v14804_v36 = vld [vmem:[%s21455_s4 + $0x3c0] ss:$8 sps:$4 sm:$0xff]  }
 0x1a0   : > { %13480 = vmatpush3.bf16.msra.mxu0 %v14767_v45  ;;  %v14796_v45 = vld [vmem:[%s21455_s4 + $0x3a4] ss:$8 sps:$4 sm:$0xff]  }
 0x1a1   : > { %1718 = vmatpush1.bf16.msra.mxu1 %v14764_v30  ;;  %13487 = vmatprep.subr.bf16.mxu0 %v14768_v48  ;;  %v14793_v30 = vld [vmem:[%s21457_s6 + $0x2e8] sm:$0xff]  }
 0x1a2   : > { %1719 = vmatprep.subr.bf16.mxu1 %v14771_v60  ;;  %v14797_v48 = vld [vmem:[%s21457_s6 + $0x2a8] sm:$0xff]   ;;  %v2999_v60 = vpack.c.bf16 %v2995_v42, %v2995_v42 }
 0x1a3   : > { %2800 = vmatmul.mubr.bf16.vlgmr.msra.gmra.mrb[32].mxu0 %v17102_v12 }
 0x1a4   : > { %13488 = vmatpush3.bf16.msra.mxu0 %v14772_v52  ;;  %2975 = vmatprep.mubr.bf16.mxu0 %v17105_v13  ;;  %v14801_v52 = vld [vmem:[%s21455_s4 + $0x3b4] ss:$8 sps:$4 sm:$0xff]   ;;  %v3059_v11 = vshrl.u32 %v2999_v60, 16 }
 0x1a5   : > { %1720 = vmatpush1.bf16.msra.mxu1 %v14769_v55  ;;  %13489 = vmatprep.subr.bf16.mxu0 %v14773_v41  ;;  %v3051_v55 = vshrl.u32 %v16651_v46, 16  ;;  %v3054_v41 = vshll.u32 %v16651_v46, 16  ;;  %v14806_v46 = vld [vmem:[%s21455_s4 + $0x3c4] ss:$8 sps:$4 sm:$0xff]  }
 0x1a6   : > { %1721 = vmatprep.subr.bf16.mxu1 %v14776_v61  ;;  %v14802_v61 = vld [vmem:[%s21457_s6 + $0x2b0] sm:$0xff]  }
 0x1a8   : > { %13490 = vmatpush3.bf16.msra.mxu0 %v14777_v18  ;;  %v3062_v18 = vshll.u32 %v2999_v60, 16  ;;  %v14817_v60 = vld [vmem:[%s21457_s6 + $0x308] sm:$0xff]  }
 0x1a9   : > { %1722 = vmatpush1.bf16.msra.mxu1 %v14774_v19  ;;  %13491 = vmatprep.subr.bf16.mxu0 %v14778_v20  ;;  %v14799_v19 = vld [vmem:[%s21455_s4 + $0x3b0] ss:$8 sps:$4 sm:$0xff]  }
 0x1aa   : > { %1723 = vmatprep.subr.bf16.mxu1 %v14781_v34  ;;  %v14803_v20 = vld [vmem:[%s21457_s6 + $0x2f8] sm:$0xff]   ;;  %v3053_v34 = vrot.slane %v3051_v55, 3  ;;  %v14822_v55 = vld [vmem:[%s21457_s6 + $0x310] sm:$0xff]  }
 0x1ac   : > { %13492 = vmatpush3.bf16.msra.mxu0 %v14782_v3  ;;  %v3056_v3 = vrot.slane %v3054_v41, 4  ;;  %v14819_v41 = vld [vmem:[%s21455_s4 + $0x3f0] ss:$8 sps:$4 sm:$0xff]  }
 0x1ad   : > { %1724 = vmatpush1.bf16.msra.mxu1 %v14779_v24  ;;  %13493 = vmatprep.subr.bf16.mxu0 %v14783_v31  ;;  %v14807_v24 = vld [vmem:[%s21457_s6 + $0x2b8] sm:$0xff]   ;;  %v3061_v31 = vrot.slane %v3059_v11, 3  ;;  %v2988_v11 = vld [vmem:[#allocation2 + $0xe0] sm:$0x7f] }
 0x1ae   : > { %1725 = vmatprep.subr.bf16.mxu1 %v14786_v32  ;;  %v3064_v32 = vrot.slane %v3062_v18, 4  ;;  %v3057_v42 = vor.u32 %v3056_v3, %v3053_v34  ;;  %v14824_v18 = vld [vmem:[%s21457_s6 + $0x318] sm:$0xff]   ;;  %v2994_v34 = vmul.f32 %v2988_v11, %v16605_v59  ;;  %v14827_v3 = vld [vmem:[%s21457_s6 + $0x368] sm:$0xff]  }
 0x1af   : > { %v14828_v59 = vld [vmem:[%s21457_s6 + $0x328] sm:$0xff]  }
 0x1b0   : > { %13494 = vmatpush3.bf16.msra.mxu0 %v14787_v38  ;;  %v14808_v38 = vld [vmem:[%s21457_s6 + $0x340] sm:$0xff]  }
 0x1b1   : > { %1726 = vmatpush1.bf16.msra.mxu1 %v14784_v21  ;;  %13495 = vmatprep.subr.bf16.mxu0 %v14788_v57  ;;  %v2810_v21 = vld [vmem:[#allocation2 + $0x60] sm:$0xff]  ;;  %v14811_v57 = vld [vmem:[%s21455_s4 + $0x3d4] ss:$8 sps:$4 sm:$0xff]  }
 0x1b2   : > { %1727 = vmatprep.subr.bf16.mxu1 %v14791_v33  ;;  %v14812_v33 = vld [vmem:[%s21457_s6 + $0x300] sm:$0xff]  }
 0x1b4   : > { %13496 = vmatpush3.bf16.msra.mxu0 %v14792_v39  ;;  %v14809_v39 = vld [vmem:[%s21455_s4 + $0x3d0] ss:$8 sps:$4 sm:$0xff]  }
 0x1b5   : > { %1728 = vmatpush1.bf16.msra.mxu1 %v14789_v43  ;;  %13497 = vmatprep.subr.bf16.mxu0 %v14793_v30  ;;  %v3065_v43 = vor.u32 %v3064_v32, %v3061_v31  ;;  %v14813_v30 = vld [vmem:[%s21457_s6 + $0x348] sm:$0xff]   ;;  %v2998_v32 = vpack.c.bf16 %v2994_v34, %v2994_v34  ;;  %v17318_v34 = vld [vmem:[#allocation2 + $0x98] sm:$0xff] }
 0x1b6   : > { %1729 = vmatprep.subr.bf16.mxu1 %v14796_v45  ;;  %v14816_v45 = vld [vmem:[%s21455_s4 + $0x3e4] ss:$8 sps:$4 sm:$0xff]  }
 0x1b7   : > { %v15773_v31 = vld [vmem:[%s21457_s6 + $0x48] sm:$0xff]  }
 0x1b8   : > { %13498 = vmatpush3.bf16.msra.mxu0 %v14797_v48  ;;  %v17209_v48 = vpack.c.bf16 %v2810_v21, %v16931_v37  ;;  %v14818_v37 = vld [vmem:[%s21457_s6 + $0x350] sm:$0xff]  }
 0x1b9   : > { %1730 = vmatpush1.bf16.msra.mxu1 %v14794_v49  ;;  %13499 = vmatprep.subr.bf16.mxu0 %v14798_v17  ;;  %v17216_v49 = vsel %vm2456_vm8, %v3057_v42, %v3065_v43  ;;  %v14814_v17 = vld [vmem:[%s21455_s4 + $0x3e0] ss:$8 sps:$4 sm:$0xff]   ;;  %v15775_v21 = vld [vmem:[%s21457_s6 + $0x50] sm:$0xff]  }
 0x1ba   : > { %1731 = vmatprep.subr.bf16.mxu1 %v14801_v52  ;;  %21546 = vst [vmem:[#allocation29_spill] sm:$0xff] %v17216_v49  ;;  %v14821_v52 = vld [vmem:[%s21455_s4 + $0x3f4] ss:$8 sps:$4 sm:$0xff]  }
 0x1bc   : > { %13500 = vmatpush3.bf16.msra.mxu0 %v14802_v61  ;;  %v14823_v61 = vld [vmem:[%s21457_s6 + $0x358] sm:$0xff]  }
 0x1bd   : > { %1732 = vmatpush1.bf16.msra.mxu1 %v14799_v19  ;;  %13501 = vmatprep.subr.bf16.mxu0 %v14803_v20  ;;  %v14825_v19 = vld [vmem:[%s21457_s6 + $0x360] sm:$0xff]  }
 0x1be   : > { %1733 = vmatprep.subr.bf16.mxu1 %v14806_v46  ;;  %v15771_v20 = vld [vmem:[%s21457_s6 + $0x40] sm:$0xff]  }
 0x1bf   : > { %v14826_v46 = vld [vmem:[%s21457_s6 + $0x320] sm:$0xff]  }
 0x1c0   : > { %13502 = vmatpush3.bf16.msra.mxu0 %v14807_v24  ;;  %v15772_v24 = vld [vmem:[%s21457_s6] sm:$0xff]  }
 0x1c1   : > { %1734 = vmatpush1.bf16.msra.mxu1 %v14804_v36  ;;  %13509 = vmatprep.subr.bf16.mxu0 %v14808_v38  ;;  %v3034_v36 = vshrl.u32 %v16671_v0, 16  ;;  %v15774_v38 = vld [vmem:[%s21457_s6 + $0x8] sm:$0xff]  }
 0x1c2   : > { %1735 = vmatprep.subr.bf16.mxu1 %v14811_v57  ;;  %v14830_v57 = vld [vmem:[%s21457_s6 + $0x330] sm:$0xff]  }
 0x1c3   : > { %2976 = vmatmul.mubr.bf16.vlgmr.msra.gmra.mrb[36].mxu0 %v17209_v48  ;;  %v3036_v42 = vrot.slane %v3034_v36, 3  ;;  %v15785_v36 = vld [vmem:[%s21457_s6 + $0x70] sm:$0xff]  }
 0x1c4   : > { %13510 = vmatpush3.bf16.msra.mxu0 %v14812_v33  ;;  %3197 = vmatprep.mubr.bf16.mxu0 %v17216_v49  ;;  %v3042_v33 = vshrl.u32 %v2998_v32, 16  ;;  %v3855_v49 = vld [vmem:[#allocation2 + $0x30] sm:$0x1] }
 0x1c5   : > { %1736 = vmatpush1.bf16.msra.mxu1 %v14809_v39  ;;  %13511 = vmatprep.subr.bf16.mxu0 %v14813_v30  ;;  %v3045_v39 = vshll.u32 %v2998_v32, 16  ;;  %v15776_v30 = vld [vmem:[%s21457_s6 + $0x10] sm:$0xff]  }
 0x1c6   : > { %1737 = vmatprep.subr.bf16.mxu1 %v14816_v45  ;;  %v15777_v45 = vld [vmem:[%s21457_s6 + $0x58] sm:$0xff]   ;;  %v17335_v32 = vld [vmem:[%s21457_s6 + $0x3d0] sm:$0xff]  }
 0x1c8   : > { %13512 = vmatpush3.bf16.msra.mxu0 %v14817_v60  ;;  %v14832_v60 = vld [vmem:[%s21457_s6 + $0x338] sm:$0xff]  }
 0x1c9   : > { %1738 = vmatpush1.bf16.msra.mxu1 %v14814_v17  ;;  %13513 = vmatprep.subr.bf16.mxu0 %v14818_v37  ;;  %v3044_v17 = vrot.slane %v3042_v33, 3  ;;  %v3047_v37 = vrot.slane %v3045_v39, 4  ;;  %v17367_v33 = vld [vmem:[%s21457_s6 + $0x398] sm:$0xff]   ;;  %v17373_v39 = vld [vmem:[%s21457_s6 + $0x3e0] sm:$0xff]  }
 0x1ca   : > { %1739 = vmatprep.subr.bf16.mxu1 %v14821_v52  ;;  %v17293_v52 = vld [vmem:[%s21457_s6 + $0x3c0] sm:$0xff]  }
 0x1cb   : > { %v3048_v11 = vor.u32 %v3047_v37, %v3044_v17  ;;  %v17405_v17 = vld [vmem:[%s21457_s6 + $0x3a8] sm:$0xff]  }
 0x1cc   : > { %13514 = vmatpush3.bf16.msra.mxu0 %v14822_v55  ;;  %v15778_v55 = vld [vmem:[%s21457_s6 + $0x18] sm:$0xff]   ;;  %v15792_v37 = vld [vmem:[%s21457_s6 + $0x188] sm:$0xff]  }
 0x1cd   : > { %1740 = vmatpush1.bf16.msra.mxu1 %v14819_v41  ;;  %13515 = vmatprep.subr.bf16.mxu0 %v14823_v61  ;;  %v15779_v41 = vld [vmem:[%s21457_s6 + $0x60] sm:$0xff]  }
 0x1ce   : > { %13597 = vmatprep.subr.bf16.mxu1 %v15771_v20  ;;  %v15780_v20 = vld [vmem:[%s21457_s6 + $0x20] sm:$0xff]  }
 0x1d0   : > { %1742 = vmatmul.mubr.bf16.vlgmr.msra.gmra.mrb[0].mxu1 %v16593_v54  ;;  %13516 = vmatpush3.bf16.msra.mxu0 %v14824_v18  ;;  %v14829_v54 = vld [vmem:[%s21457_s6 + $0x370] sm:$0xff]   ;;  %v17304_v18 = vld [vmem:[%s21457_s6 + $0x380] sm:$0xff]  }
 0x1d1   : > { %13598 = vmatpush3.bf16.msra.mxu1 %v15772_v24  ;;  %3644 = vmatprep.mubr.bf16.mxu1 %v16623_v27  ;;  %v3037_v27 = vshll.u32 %v16671_v0, 16  ;;  %v14831_v0 = vld [vmem:[%s21457_s6 + $0x378] sm:$0xff]  }
 0x1d2   : > { %13517 = vmatprep.subr.bf16.mxu0 %v14825_v19  ;;  %13599 = vmatprep.subr.bf16.mxu1 %v15773_v31  ;;  %v17309_v19 = vld [vmem:[%s21457_s6 + $0x3c8] sm:$0xff]  }
 0x1d3   : > { %v3039_v43 = vrot.slane %v3037_v27, 4  ;;  %v15783_v31 = vld [vmem:[%s21457_s6 + $0x68] sm:$0xff]   ;;  %v17349_v27 = vld [vmem:[%s21457_s6 + $0x390] sm:$0xff]  }
 0x1d4   : > { %13518 = vmatpush3.bf16.msra.mxu0 %v14826_v46 }
 0x1d5   : > { %13600 = vmatpush3.bf16.msra.mxu1 %v15774_v38  ;;  %13519 = vmatprep.subr.bf16.mxu0 %v14827_v3  ;;  %v3040_v61 = vor.u32 %v3039_v43, %v3036_v42  ;;  %v15782_v3 = vld [vmem:[#allocation2 + $0xa8] sm:$0xff]  ;;  %v17354_v38 = vld [vmem:[%s21457_s6 + $0x3d8] sm:$0xff]   ;;  %v15789_v42 = vld [vmem:[%s21457_s6 + $0x1c0] sm:$0xff]  }
 0x1d6   : > { %13601 = vmatprep.subr.bf16.mxu1 %v15775_v21  ;;  %v17321_v24 = vpack.c.bf16 %v15782_v3, %v17318_v34  ;;  %v15786_v21 = vld [vmem:[%s21457_s6 + $0x30] sm:$0xff]   ;;  %v17385_v43 = vld [vmem:[%s21457_s6 + $0x3a0] sm:$0xff]  }
 0x1d7   : > { %v17316_v46 = vsel %vm2456_vm8, %v3040_v61, %v3048_v11  ;;  %v17423_v61 = vld [vmem:[%s21457_s6 + $0x3b0] sm:$0xff]  }
 0x1d8   : > { %13520 = vmatpush3.bf16.msra.mxu0 %v14828_v59  ;;  %21547 = vst [vmem:[#allocation30_spill] sm:$0xff] %v17316_v46  ;;  %v17329_v59 = vld [vmem:[%s21457_s6 + $0x388] sm:$0xff]  }
 0x1d9   : > { %13602 = vmatpush3.bf16.msra.mxu1 %v15776_v30  ;;  %13521 = vmatprep.subr.bf16.mxu0 %v14829_v54  ;;  %v15784_v54 = vld [vmem:[%s21457_s6 + $0x28] sm:$0xff]  }
 0x1da   : > { %13603 = vmatprep.subr.bf16.mxu1 %v15777_v45  ;;  %v17390_v30 = vld [vmem:[%s21457_s6 + $0x3e8] sm:$0xff]   ;;  %v15790_v45 = vld [vmem:[%s21457_s6 + $0x180] sm:$0xff]  }
 0x1dc   : > { %13522 = vmatpush3.bf16.msra.mxu0 %v14830_v57  ;;  %v15787_v57 = vld [vmem:[%s21457_s6 + $0x78] sm:$0xff]  }
 0x1dd   : > { %13604 = vmatpush3.bf16.msra.mxu1 %v15778_v55  ;;  %13523 = vmatprep.subr.bf16.mxu0 %v14831_v0  ;;  %v15788_v0 = vld [vmem:[%s21457_s6 + $0x38] sm:$0xff]  }
 0x1de   : > { %13605 = vmatprep.subr.bf16.mxu1 %v15779_v41  ;;  %v15793_v41 = vld [vmem:[%s21457_s6 + $0x1d0] sm:$0xff]  }
 0x1e0   : > { %13524 = vmatpush3.bf16.msra.mxu0 %v14832_v60  ;;  %v15791_v60 = vld [vmem:[%s21457_s6 + $0x1c8] sm:$0xff]  }
 0x1e1   : > { %13606 = vmatpush3.bf16.msra.mxu1 %v15780_v20  ;;  %13531 = vmatprep.subr.bf16.mxu0 %v17293_v52  ;;  %v17428_v20 = vld [vmem:[%s21457_s6 + $0x3f8] sm:$0xff]  }
 0x1e2   : > { %13607 = vmatprep.subr.bf16.mxu1 %v15783_v31 }
 0x1e3   : > { %3198 = vmatmul.mubr.bf16.vlgmr.msra.gmra.mrb[40].mxu0 %v17316_v46 }
 0x1e4   : > { %13532 = vmatpush3.bf16.msra.mxu0 %v17304_v18  ;;  %3373 = vmatprep.mubr.bf16.mxu0 %v17321_v24 }
 0x1e5   : > { %13608 = vmatpush3.bf16.msra.mxu1 %v15784_v54  ;;  %13533 = vmatprep.subr.bf16.mxu0 %v17309_v19  ;;  %v15794_v54 = vld [vmem:[%s21457_s6 + $0x190] sm:$0xff]  }
 0x1e6   : > { %13609 = vmatprep.subr.bf16.mxu1 %v15785_v36 }
 0x1e8   : > { %13534 = vmatpush3.bf16.msra.mxu0 %v17329_v59 }
 0x1e9   : > { %13610 = vmatpush3.bf16.msra.mxu1 %v15786_v21  ;;  %13535 = vmatprep.subr.bf16.mxu0 %v17335_v32  ;;  %v3852_v21 = vld [vmem:[#allocation2 + $0x18] sm:$0xfe] }
 0x1ea   : > { %13611 = vmatprep.subr.bf16.mxu1 %v15787_v57 }
 0x1ec   : > { %13536 = vmatpush3.bf16.msra.mxu0 %v17349_v27 }
 0x1ed   : > { %13612 = vmatpush3.bf16.msra.mxu1 %v15788_v0  ;;  %13537 = vmatprep.subr.bf16.mxu0 %v17354_v38  ;;  %v15795_v0 = vld [vmem:[%s21457_s6 + $0x1d8] sm:$0xff]  }
 0x1ee   : > { %13641 = vmatprep.subr.bf16.mxu1 %v15789_v42  ;;  %v17445_v42 = vld [vmem:[%s21457_s6 + $0x3b8] sm:$0xff]  }
 0x1f0   : > { %13538 = vmatpush3.bf16.msra.mxu0 %v17367_v33  ;;  %3645 = vmatmul.mubr.bf16.vlgmr.msra.gmra.mrb[4].mxu1 %v16627_v28  ;;  %v17410_v28 = vld [vmem:[%s21457_s6 + $0x3f0] sm:$0xff]  }
 0x1f1   : > { %13642 = vmatpush3.bf16.msra.mxu1 %v15790_v45  ;;  %3797 = vmatprep.mubr.bf16.mxu1 %v17000_v29  ;;  %v14849_v45 = vld [vmem:[%s21457_s6 + $0x440] sm:$0xff]  }
 0x1f2   : > { %13539 = vmatprep.subr.bf16.mxu0 %v17373_v39  ;;  %13643 = vmatprep.subr.bf16.mxu1 %v15791_v60  ;;  %v3856_v60 = vld [vmem:[#allocation2 + $0x38] sm:$0x1] }
 0x1f4   : > { %13540 = vmatpush3.bf16.msra.mxu0 %v17385_v43 }
 0x1f5   : > { %13644 = vmatpush3.bf16.msra.mxu1 %v15792_v37  ;;  %13541 = vmatprep.subr.bf16.mxu0 %v17390_v30  ;;  %v15796_v37 = vld [vmem:[#allocation2 + $0x28] sm:$0xff] }
 0x1f6   : > { %v13393_v55 = vpop.f32.mrb[16].mxu0  ;;  %13645 = vmatprep.subr.bf16.mxu1 %v15793_v41  ;;  %v15797_v41 = vld [vmem:[%s21457_s6 + $0x198] sm:$0xff]  }
 0x1f7   : > { %v13394_v11 = vpop.f32.mrb[17].mxu0 }
 0x1f8   : > { %v17430_v3 = vadd.f32 %v13394_v11, %v13393_v55  ;;  %13542 = vmatpush3.bf16.msra.mxu0 %v17405_v17  ;;  %v13396_v31 = vpop.f32.mrb[18].mxu0  ;;  %v3867_v55 = vmul.f32 %v15796_v37, %v16724_v23  ;;  %v3385_v11 = vld [vmem:[#allocation2 + $0xe8] sm:$0xff]  ;;  %v3869_v37 = vmul.f32 %v16706_v51, %v3856_v60 }
 0x1f9   : > { %13646 = vmatpush3.bf16.msra.mxu1 %v15794_v54  ;;  %v13397_v36 = vpop.f32.mrb[19].mxu0  ;;  %13543 = vmatprep.subr.bf16.mxu0 %v17410_v28  ;;  %v14850_v54 = vld [vmem:[%s21457_s6 + $0x400] sm:$0xff]   ;;  %v15803_v60 = vld [vmem:[%s21457_s6 + $0x1e8] sm:$0xff]  }
 0x1fa   : > { %v17437_v57 = vadd.f32 %v13397_v36, %v13396_v31  ;;  %13647 = vmatprep.subr.bf16.mxu1 %v15795_v0  ;;  %v15798_v31 = vld [vmem:[%s21457_s6 + $0x1e0] sm:$0xff]   ;;  %v3865_v36 = vmul.f32 %v16703_v50, %v3852_v21  ;;  %v14851_v0 = vld [vmem:[%s21457_s6 + $0x448] sm:$0xff]   ;;  %v15802_v21 = vld [vmem:[#allocation2 + $0xd8] sm:$0xff] }
 0x1fb   : > { %v17476_v9 = vpack.c.bf16 %v3385_v11, %v15802_v21  ;;  %v15804_v11 = vld [vmem:[%s21457_s6 + $0x1a8] sm:$0xff]   ;;  %v17502_v21 = vld [vmem:[%s21457_s6 + $0x410] sm:$0xff]  }
 0x1fc   : > { %13544 = vmatpush3.bf16.msra.mxu0 %v17423_v61 }
 0x1fd   : > { %13648 = vmatpush3.bf16.msra.mxu1 %v15797_v41  ;;  %13545 = vmatprep.subr.bf16.mxu0 %v17428_v20  ;;  %v3871_v41 = vpack.c.bf16 %v3867_v55, %v3865_v36  ;;  %21548 = vst [vmem:[#allocation31_spill] sm:$0xff] %v17476_v9  ;;  %v17484_v55 = vld [vmem:[%s21457_s6 + $0x408] sm:$0xff]   ;;  %v15805_v36 = vld [vmem:[%s21457_s6 + $0x1f0] sm:$0xff]  }
 0x1fe   : > { %13649 = vmatprep.subr.bf16.mxu1 %v15798_v31  ;;  %v17471_v31 = vld [vmem:[#allocation2 + $0x90] sm:$0xff] }
 0x1ff   : > { %v17474_v10 = vpack.c.bf16 %v15801_v8, %v17471_v31  ;;  %v3873_v8 = vpack.c.bf16 %v3869_v37, %v3869_v37 }
 0x200   : > { %13546 = vmatpush3.bf16.msra.mxu0 %v17445_v42 }
 0x201   : > { %13650 = vmatpush3.bf16.msra.mxu1 %v15799_v2  ;;  %13553 = vmatprep.subr.bf16.mxu0 %v14849_v45  ;;  %v17490_v2 = vld [vmem:[%s21457_s6 + $0x450] sm:$0xff]   ;;  %v3890_v45 = vshll.u32 %v3871_v41, 16  ;;  %v3895_v37 = vshll.u32 %v3873_v8, 16  ;;  %v17520_v8 = vld [vmem:[%s21457_s6 + $0x418] sm:$0xff]  }
 0x202   : > { %13651 = vmatprep.subr.bf16.mxu1 %v15803_v60  ;;  %v15806_v60 = vld [vmem:[%s21457_s6 + $0x1b0] sm:$0xff]  }
 0x203   : > { %3374 = vmatmul.mubr.bf16.vlgmr.msra.gmra.mrb[44].mxu0 %v17474_v10 }
 0x204   : > { %13554 = vmatpush3.bf16.msra.mxu0 %v14850_v54  ;;  %3549 = vmatprep.mubr.bf16.mxu0 %v17476_v9  ;;  %v3892_v54 = vrot.slane %v3890_v45, 1  ;;  %v3888_v45 = vshrl.u32 %v3871_v41, 16  ;;  %v17533_v41 = vld [vmem:[%s21457_s6 + $0x460] sm:$0xff]  }
 0x205   : > { %13652 = vmatpush3.bf16.msra.mxu1 %v15804_v11  ;;  %13555 = vmatprep.subr.bf16.mxu0 %v14851_v0  ;;  %v17512_v0 = vld [vmem:[%s21457_s6 + $0x458] sm:$0xff]  }
 0x206   : > { %13653 = vmatprep.subr.bf16.mxu1 %v15805_v36  ;;  %v15807_v11 = vld [vmem:[%s21457_s6 + $0x1f8] sm:$0xff]   ;;  %v3893_v36 = vor.u32 %v3892_v54, %v3888_v45  ;;  %v17552_v45 = vld [vmem:[%s21457_s6 + $0x468] sm:$0xff]  }
 0x208   : > { %13556 = vmatpush3.bf16.msra.mxu0 %v17484_v55 }
 0x209   : > { %13654 = vmatpush3.bf16.msra.mxu1 %v15806_v60  ;;  %13557 = vmatprep.subr.bf16.mxu0 %v17490_v2  ;;  %v3897_v60 = vrot.slane %v3895_v37, 1  ;;  %v15810_v37 = vld [vmem:[%s21457_s6 + $0x280] sm:$0xff]  }
 0x20a   : > { %13655 = vmatprep.subr.bf16.mxu1 %v15807_v11  ;;  %v15809_v11 = vld [vmem:[%s21457_s6 + $0x2c0] sm:$0xff]  }
 0x20b   : > { %v17538_v54 = vsel %vm3874_vm7, %v3893_v36, %v3897_v60  ;;  %v15811_v36 = vld [vmem:[%s21457_s6 + $0x2c8] sm:$0xff]  }
 0x20c   : > { %13558 = vmatpush3.bf16.msra.mxu0 %v17502_v21  ;;  %21549 = vst [vmem:[#allocation32_spill] sm:$0xff] %v17538_v54  ;;  %v17561_v60 = vld [vmem:[%s21457_s6 + $0x428] sm:$0xff]  }
 0x20d   : > { %13656 = vmatpush3.bf16.msra.mxu1 %v15808_v6  ;;  %13559 = vmatprep.subr.bf16.mxu0 %v17512_v0  ;;  %v17543_v6 = vld [vmem:[%s21457_s6 + $0x420] sm:$0xff]  }
 0x20e   : > { %13685 = vmatprep.subr.bf16.mxu1 %v15809_v11  ;;  %v17566_v11 = vld [vmem:[%s21457_s6 + $0x470] sm:$0xff]  }
 0x20f   : > { %21550 = vst [vmem:[#allocation33_spill] sm:$0xff] %v17566_v11 }
 0x210   : > { %13560 = vmatpush3.bf16.msra.mxu0 %v17520_v8  ;;  %3798 = vmatmul.mubr.bf16.vlgmr.msra.gmra.mrb[8].mxu1 %v17102_v12 }
 0x211   : > { %13686 = vmatpush3.bf16.msra.mxu1 %v15810_v37  ;;  %3933 = vmatprep.mubr.bf16.mxu1 %v17538_v54  ;;  %v15812_v37 = vld [vmem:[%s21457_s6 + $0x288] sm:$0xff]  }
 0x212   : > { %13561 = vmatprep.subr.bf16.mxu0 %v17533_v41  ;;  %13687 = vmatprep.subr.bf16.mxu1 %v15811_v36 }
 0x214   : > { %13562 = vmatpush3.bf16.msra.mxu0 %v17543_v6 }
 0x215   : > { %13688 = vmatpush3.bf16.msra.mxu1 %v15812_v37  ;;  %13563 = vmatprep.subr.bf16.mxu0 %v17552_v45 }
 0x216   : > { %v13415_v36 = vpop.f32.mrb[20].mxu0  ;;  %13689 = vmatprep.subr.bf16.mxu1 %v15813_v7  ;;  %v15814_v7 = vld [vmem:[%s21457_s6 + $0x290] sm:$0xff]  }
 0x217   : > { %v13416_v5 = vpop.f32.mrb[21].mxu0 }
 0x218   : > { %v13417_v37 = vadd.f32 %v13416_v5, %v13415_v36  ;;  %v13418_v14 = vpop.f32.mrb[22].mxu0  ;;  %13564 = vmatpush3.bf16.msra.mxu0 %v17561_v60  ;;  %v15815_v5 = vld [vmem:[%s21457_s6 + $0x2d8] sm:$0xff]  }
 0x219   : > { %v13419_v58 = vpop.f32.mrb[23].mxu0  ;;  %13690 = vmatpush3.bf16.msra.mxu1 %v15814_v7  ;;  %13565 = vmatprep.subr.bf16.mxu0 %v17566_v11  ;;  %v17600_v36 = vld [vmem:[%s21457_s6 + $0x438] sm:$0xff]   ;;  %v3866_v7 = vmul.f32 %v15816_v22, %v16724_v23  ;;  %v3868_v23 = vmul.f32 %v16706_v51, %v3855_v49 }
 0x21a   : > { %v17592_v54 = vadd.f32 %v13417_v37, %v17430_v3  ;;  %v13420_v46 = vadd.f32 %v13419_v58, %v13418_v14  ;;  %13691 = vmatprep.subr.bf16.mxu1 %v15815_v5  ;;  %21553 = vst [vmem:[#allocation36_spill] sm:$0xff] %v17600_v36  ;;  %v3384_v14 = vld [vmem:[#allocation2 + $0xe0] sm:$0xff]  ;;  %v15817_v58 = vld [vmem:[%s21457_s6 + $0x298] sm:$0xff]   ;;  %v3864_v3 = vmul.f32 %v16703_v50, %v3851_v62  ;;  %v15822_v50 = vld [vmem:[%s21457_s6 + $0x2e8] sm:$0xff]  }
 0x21b   : > { %v15818_v37 = vld [vmem:[%s21457_s6 + $0x2e0] sm:$0xff]   ;;  %v3872_v51 = vpack.c.bf16 %v3868_v23, %v3868_v23 }
 0x21c   : > { %v17604_v63 = vadd.f32 %v13420_v46, %v17437_v57  ;;  %13566 = vmatpush3.bf16.msra.mxu0 %v17579_v4  ;;  %v3870_v22 = vpack.c.bf16 %v3866_v7, %v3864_v3  ;;  %v15819_v46 = vld [vmem:[%s21457_s6 + $0x2a0] sm:$0xff]   ;;  %v15820_v57 = vld [vmem:[#allocation2 + $0xd0] sm:$0xff] }
 0x21d   : > { %13692 = vmatpush3.bf16.msra.mxu1 %v15817_v58  ;;  %13567 = vmatprep.subr.bf16.mxu0 %v17584_v15  ;;  %v17620_v5 = vpack.c.bf16 %v3384_v14, %v15820_v57  ;;  %v17625_v62 = vld [vmem:[%s21457_s6 + $0xc0] sm:$0xff]   ;;  %v15824_v14 = vld [vmem:[%s21457_s6 + $0x2a8] sm:$0xff]   ;;  %v15826_v3 = vld [vmem:[%s21457_s6 + $0x2f0] sm:$0xff]  }
 0x21e   : > { %13693 = vmatprep.subr.bf16.mxu1 %v15818_v37  ;;  %v3878_v49 = vshll.u32 %v3870_v22, 16  ;;  %v17635_v7 = vld [vmem:[%s21457_s6 + $0x80] sm:$0xff]   ;;  %v17645_v58 = vld [vmem:[%s21457_s6 + $0xc8] sm:$0xff]   ;;  %v17675_v15 = vld [vmem:[%s21457_s6 + $0x90] sm:$0xff]  }
 0x21f   : > { %v3654_v37 = vld [vmem:[#allocation2 + $0x88] sm:$0xe0] }
 0x220   : > { %13568 = vmatpush3.bf16.msra.mxu0 %v17600_v36  ;;  %v3880_v23 = vrot.slane %v3878_v49, 1  ;;  %v17654_v57 = vld [vmem:[%s21457_s6 + $0x88] sm:$0xff]   ;;  %v15830_v49 = vld [vmem:[%s21457_s6 + $0x2f8] sm:$0xff]  }
 0x221   : > { %13694 = vmatpush3.bf16.msra.mxu1 %v15819_v46  ;;  %13575 = vmatprep.subr.bf16.mxu0 %v17625_v62  ;;  %v3656_v46 = vld [vmem:[#allocation2 + $0xa8] sm:$0x1f] }
 0x222   : > { %13695 = vmatprep.subr.bf16.mxu1 %v15822_v50  ;;  %v15828_v50 = vld [vmem:[%s21457_s6 + $0x2b0] sm:$0xff]  }
 0x223   : > { %3550 = vmatmul.mubr.bf16.vlgmr.msra.gmra.mrb[48].mxu0 %v17620_v5 }
 0x224   : > { %13576 = vmatpush3.bf16.msra.mxu0 %v17635_v7  ;;  %3603 = vmatprep.mubr.bf16.mxu0 %v16767_v16  ;;  %v3883_v16 = vshll.u32 %v3872_v51, 16  ;;  %v3876_v51 = vshrl.u32 %v3870_v22, 16  ;;  %v3680_v22 = vmul.f32 %v16512_v40, %v3656_v46 }
 0x225   : > { %13696 = vmatpush3.bf16.msra.mxu1 %v15824_v14  ;;  %13577 = vmatprep.subr.bf16.mxu0 %v17645_v58  ;;  %v17663_v14 = vld [vmem:[%s21457_s6 + $0xd0] sm:$0xff]  }
 0x226   : > { %13697 = vmatprep.subr.bf16.mxu1 %v15826_v3  ;;  %v3678_v3 = vmul.f32 %v17318_v34, %v16518_v47  ;;  %v3881_v1 = vor.u32 %v3880_v23, %v3876_v51  ;;  %v3885_v36 = vrot.slane %v3883_v16, 1  ;;  %v17685_v34 = vld [vmem:[%s21457_s6 + $0xd8] sm:$0xff]   ;;  %v3684_v46 = vpack.c.bf16 %v3680_v22, %v3680_v22 }
 0x227   : > { %v17695_v16 = vld [vmem:[%s21457_s6 + $0x98] sm:$0xff]  }
 0x228   : > { %13578 = vmatpush3.bf16.msra.mxu0 %v17654_v57  ;;  %v3712_v51 = vshrl.u32 %v3684_v46, 16 }
 0x229   : > { %13698 = vmatpush3.bf16.msra.mxu1 %v15828_v50  ;;  %13579 = vmatprep.subr.bf16.mxu0 %v17663_v14  ;;  %v3676_v50 = vmul.f32 %v16507_v35, %v3654_v37  ;;  %v17690_v37 = vsel %vm3874_vm7, %v3881_v1, %v3885_v36  ;;  %v17704_v1 = vld [vmem:[%s21457_s6 + $0xe0] sm:$0xff]  }
 0x22a   : > { %13699 = vmatprep.subr.bf16.mxu1 %v15830_v49  ;;  %v15832_v49 = vld [vmem:[%s21457_s6 + $0x2b8] sm:$0xff]   ;;  %21554 = vst [vmem:[#allocation37_spill] sm:$0xff] %v17690_v37  ;;  %v17711_v36 = vld [vmem:[%s21457_s6 + $0xa0] sm:$0xff]   ;;  %v3714_v4 = vrot.slane %v3712_v51, 2 }
 0x22b   : > { %v3682_v23 = vpack.c.bf16 %v3678_v3, %v3676_v50  ;;  %v17718_v3 = vld [vmem:[%s21457_s6 + $0xe8] sm:$0xff]   ;;  %v17819_v51 = vld [vmem:[%s21457_s6 + $0x118] sm:$0xff]  }
 0x22c   : > { %13580 = vmatpush3.bf16.msra.mxu0 %v17675_v15 }
 0x22d   : > { %13700 = vmatpush3.bf16.msra.mxu1 %v15832_v49  ;;  %13581 = vmatprep.subr.bf16.mxu0 %v17685_v34 }
 0x22e   : > { %13729 = vmatprep.subr.bf16.mxu1 %v17293_v52  ;;  %v3704_v52 = vshrl.u32 %v3682_v23, 16 }
 0x230   : > { %13582 = vmatpush3.bf16.msra.mxu0 %v17695_v16  ;;  %3934 = vmatmul.mubr.bf16.vlgmr.msra.gmra.mrb[12].mxu1 %v17690_v37  ;;  %v3706_v49 = vrot.slane %v3704_v52, 2 }
 0x231   : > { %13730 = vmatpush3.bf16.msra.mxu1 %v17304_v18  ;;  %4019 = vmatprep.mubr.bf16.mxu1 %v17476_v9  ;;  %v3707_v18 = vshll.u32 %v3682_v23, 16  ;;  %v17725_v23 = vld [vmem:[%s21457_s6 + $0xa8] sm:$0xff]  }
 0x232   : > { %13583 = vmatprep.subr.bf16.mxu0 %v17704_v1  ;;  %13731 = vmatprep.subr.bf16.mxu1 %v17309_v19  ;;  %v3715_v19 = vshll.u32 %v3684_v46, 16 }
 0x234   : > { %13584 = vmatpush3.bf16.msra.mxu0 %v17711_v36  ;;  %v3717_v46 = vrot.slane %v3715_v19, 3 }
 0x235   : > { %13732 = vmatpush3.bf16.msra.mxu1 %v17329_v59  ;;  %13585 = vmatprep.subr.bf16.mxu0 %v17718_v3  ;;  %v3709_v59 = vrot.slane %v3707_v18, 3 }
 0x236   : > { %v13437_v50 = vpop.f32.mrb[24].mxu0  ;;  %13733 = vmatprep.subr.bf16.mxu1 %v17335_v32  ;;  %v17732_v32 = vld [vmem:[%s21457_s6 + $0xf0] sm:$0xff]  }
 0x237   : > { %v13438_v22 = vpop.f32.mrb[25].mxu0 }
 0x238   : > { %v13439_v37 = vadd.f32 %v13438_v22, %v13437_v50  ;;  %v13440_v9 = vpop.f32.mrb[26].mxu0  ;;  %13586 = vmatpush3.bf16.msra.mxu0 %v17725_v23  ;;  %v17837_v22 = vld [vmem:[%s21457_s6 + $0x120] sm:$0xff]  }
 0x239   : > { %v13441_v11 = vpop.f32.mrb[27].mxu0  ;;  %13734 = vmatpush3.bf16.msra.mxu1 %v17349_v27  ;;  %13587 = vmatprep.subr.bf16.mxu0 %v17732_v32  ;;  %v17745_v27 = vld [vmem:[%s21457_s6 + $0xb0] sm:$0xff]  }
 0x23a   : > { %v17736_v52 = vadd.f32 %v13439_v37, %v17592_v54  ;;  %v13442_v50 = vadd.f32 %v13441_v11, %v13440_v9  ;;  %13735 = vmatprep.subr.bf16.mxu1 %v17354_v38  ;;  %v17752_v54 = vld [vmem:[%s21457_s6 + $0xf8] sm:$0xff]   ;;  %v3718_v9 = vor.u32 %v3717_v46, %v3714_v4  ;;  %v17766_v38 = vld [vmem:[%s21457_s6 + $0x140] sm:$0xff]  }
 0x23b   : > { %v3653_v11 = vld [vmem:[#allocation2 + $0x80] sm:$0xe0] }
 0x23c   : > { %v17740_v18 = vadd.f32 %v13442_v50, %v17604_v63  ;;  %13588 = vmatpush3.bf16.msra.mxu0 %v17745_v27  ;;  %v17759_v63 = vld [vmem:[%s21457_s6 + $0xb8] sm:$0xff]   ;;  %v3675_v37 = vmul.f32 %v16507_v35, %v3653_v11 }
 0x23d   : > { %13736 = vmatpush3.bf16.msra.mxu1 %v17367_v33  ;;  %13589 = vmatprep.subr.bf16.mxu0 %v17752_v54  ;;  %v3710_v33 = vor.u32 %v3709_v59, %v3706_v49 }
 0x23e   : > { %13737 = vmatprep.subr.bf16.mxu1 %v17373_v39  ;;  %v17775_v39 = vld [vmem:[%s21457_s6 + $0x100] sm:$0xff]  }
 0x23f   : > { %v3719_v4 = vsel %vm3685_vm9, %v3710_v33, %v3718_v9  ;;  %v17851_v9 = vld [vmem:[%s21457_s6 + $0x128] sm:$0xff]  }
 0x240   : > { %13590 = vmatpush3.bf16.msra.mxu0 %v17759_v63 }
 0x241   : > { %13738 = vmatpush3.bf16.msra.mxu1 %v17385_v43  ;;  %13619 = vmatprep.subr.bf16.mxu0 %v17766_v38  ;;  %v17782_v43 = vld [vmem:[%s21457_s6 + $0x148] sm:$0xff]  }
 0x242   : > { %13739 = vmatprep.subr.bf16.mxu1 %v17390_v30  ;;  %v17796_v30 = vld [vmem:[%s21457_s6 + $0x150] sm:$0xff]  }
 0x243   : > { %3604 = vmatmul.mubr.bf16.vlgmr.msra.gmra.mrb[52].mxu0 %v16888_v53  ;;  %v17789_v53 = vld [vmem:[%s21457_s6 + $0x108] sm:$0xff]  }
 0x244   : > { %13620 = vmatpush3.bf16.msra.mxu0 %v17775_v39  ;;  %3754 = vmatprep.mubr.bf16.mxu0 %v3719_v4 }
 0x245   : > { %13740 = vmatpush3.bf16.msra.mxu1 %v17405_v17  ;;  %13621 = vmatprep.subr.bf16.mxu0 %v17782_v43  ;;  %v3655_v17 = vld [vmem:[#allocation2 + $0xa0] sm:$0x1f] }
 0x246   : > { %13741 = vmatprep.subr.bf16.mxu1 %v17410_v28  ;;  %v17803_v28 = vld [vmem:[%s21457_s6 + $0x110] sm:$0xff]  }
 0x248   : > { %13622 = vmatpush3.bf16.msra.mxu0 %v17789_v53 }
 0x249   : > { %13742 = vmatpush3.bf16.msra.mxu1 %v17423_v61  ;;  %13623 = vmatprep.subr.bf16.mxu0 %v17796_v30  ;;  %v17810_v61 = vld [vmem:[%s21457_s6 + $0x158] sm:$0xff]  }
 0x24a   : > { %13743 = vmatprep.subr.bf16.mxu1 %v17428_v20  ;;  %v3679_v20 = vmul.f32 %v16512_v40, %v3655_v17 }
 0x24c   : > { %13624 = vmatpush3.bf16.msra.mxu0 %v17803_v28  ;;  %v3683_v19 = vpack.c.bf16 %v3679_v20, %v3679_v20 }
 0x24d   : > { %13744 = vmatpush3.bf16.msra.mxu1 %v17445_v42  ;;  %13625 = vmatprep.subr.bf16.mxu0 %v17810_v61  ;;  %v3677_v42 = vmul.f32 %v17471_v31, %v16518_v47  ;;  %v17844_v31 = vld [vmem:[%s21457_s6 + $0x168] sm:$0xff]  }
 0x24e   : > { %13773 = vmatprep.subr.bf16.mxu1 %v17625_v62  ;;  %v17830_v62 = vld [vmem:[%s21457_s6 + $0x160] sm:$0xff]   ;;  %v3698_v49 = vshll.u32 %v3683_v19, 16 }
 0x24f   : > { %v3681_v47 = vpack.c.bf16 %v3677_v42, %v3675_v37 }
 0x250   : > { %13626 = vmatpush3.bf16.msra.mxu0 %v17819_v51  ;;  %4020 = vmatmul.mubr.bf16.vlgmr.msra.gmra.mrb[16].mxu1 %v17620_v5  ;;  %v3700_v37 = vrot.slane %v3698_v49, 3 }
 0x251   : > { %13774 = vmatpush3.bf16.msra.mxu1 %v17635_v7  ;;  %4151 = vmatprep.mubr.bf16.mxu1 %v17000_v29  ;;  %v3690_v33 = vshll.u32 %v3681_v47, 16 }
 0x252   : > { %13627 = vmatprep.subr.bf16.mxu0 %v17830_v62  ;;  %13775 = vmatprep.subr.bf16.mxu1 %v17645_v58  ;;  %v3695_v58 = vshrl.u32 %v3683_v19, 16 }
 0x254   : > { %13628 = vmatpush3.bf16.msra.mxu0 %v17837_v22  ;;  %v3697_v20 = vrot.slane %v3695_v58, 2  ;;  %v17900_v58 = vld [vmem:[%s21457_s6 + $0x200] sm:$0xff]  }
 0x255   : > { %13776 = vmatpush3.bf16.msra.mxu1 %v17654_v57  ;;  %13629 = vmatprep.subr.bf16.mxu0 %v17844_v31  ;;  %v3687_v57 = vshrl.u32 %v3681_v47, 16  ;;  %v3692_v47 = vrot.slane %v3690_v33, 3 }
 0x256   : > { %v13459_v7 = vpop.f32.mrb[28].mxu0  ;;  %13777 = vmatprep.subr.bf16.mxu1 %v17663_v14  ;;  %v17858_v14 = vld [vmem:[%s21457_s6 + $0x170] sm:$0xff]  }
 0x257   : > { %v13460_v59 = vpop.f32.mrb[29].mxu0  ;;  %v3689_v19 = vrot.slane %v3687_v57, 2  ;;  %v17980_v57 = vld [vmem:[%s21457_s6 + $0x270] sm:$0xff]  }
 0x258   : > { %v13461_v46 = vadd.f32 %v13460_v59, %v13459_v7  ;;  %v13462_v50 = vpop.f32.mrb[30].mxu0  ;;  %13630 = vmatpush3.bf16.msra.mxu0 %v17851_v9 }
 0x259   : > { %v13463_v4 = vpop.f32.mrb[31].mxu0  ;;  %13778 = vmatpush3.bf16.msra.mxu1 %v17675_v15  ;;  %13631 = vmatprep.subr.bf16.mxu0 %v17858_v14  ;;  %v17871_v15 = vld [vmem:[%s21457_s6 + $0x130] sm:$0xff]   ;;  %v3693_v7 = vor.u32 %v3692_v47, %v3689_v19 }
 0x25a   : > { %v17862_v17 = vadd.f32 %v13461_v46, %v17736_v52  ;;  %v13464_v11 = vadd.f32 %v13463_v4, %v13462_v50  ;;  %13779 = vmatprep.subr.bf16.mxu1 %v17685_v34  ;;  %v17878_v34 = vld [vmem:[%s21457_s6 + $0x178] sm:$0xff]   ;;  %v3701_v52 = vor.u32 %v3700_v37, %v3697_v20  ;;  %v17973_v50 = vld [vmem:[%s21457_s6 + $0x228] sm:$0xff]   ;;  %v18072_v37 = vld [vmem:[%s21457_s6 + $0x360] sm:$0xff]  }
 0x25b   : > { %v18063_v20 = vld [vmem:[%s21457_s6 + $0x318] sm:$0xff]  }
 0x25c   : > { %v17866_v42 = vadd.f32 %v13464_v11, %v17740_v18  ;;  %13632 = vmatpush3.bf16.msra.mxu0 %v17871_v15  ;;  %v17885_v18 = vld [vmem:[%s21457_s6 + $0x138] sm:$0xff]   ;;  %v17991_v11 = vld [vmem:[%s21457_s6 + $0x230] sm:$0xff]  }
 0x25d   : > { %13780 = vmatpush3.bf16.msra.mxu1 %v17695_v16  ;;  %13633 = vmatprep.subr.bf16.mxu0 %v17878_v34  ;;  %v17892_v16 = vld [vmem:[%s21457_s6 + $0x240] sm:$0xff]  }
 0x25e   : > { %13781 = vmatprep.subr.bf16.mxu1 %v17704_v1  ;;  %v3702_v1 = vsel %vm3685_vm9, %v3693_v7, %v3701_v52 }
 0x260   : > { %13634 = vmatpush3.bf16.msra.mxu0 %v17885_v18 }
 0x261   : > { %13782 = vmatpush3.bf16.msra.mxu1 %v17711_v36  ;;  %13663 = vmatprep.subr.bf16.mxu0 %v17892_v16  ;;  %v17908_v36 = vld [vmem:[%s21457_s6 + $0x248] sm:$0xff]  }
 0x262   : > { %13783 = vmatprep.subr.bf16.mxu1 %v17718_v3  ;;  %v17915_v3 = vld [vmem:[%s21457_s6 + $0x208] sm:$0xff]  }
 0x263   : > { %3755 = vmatmul.mubr.bf16.vlgmr.msra.gmra.mrb[56].mxu0 %v3702_v1  ;;  %v18103_v1 = vld [vmem:[#allocation2 + $0x68] sm:$0xff] }
 0x264   : > { %13664 = vmatpush3.bf16.msra.mxu0 %v17900_v58  ;;  %3840 = vmatprep.mubr.bf16.mxu0 %v17105_v13 }
 0x265   : > { %13784 = vmatpush3.bf16.msra.mxu1 %v17725_v23  ;;  %13665 = vmatprep.subr.bf16.mxu0 %v17908_v36  ;;  %v17922_v23 = vld [vmem:[%s21457_s6 + $0x250] sm:$0xff]  }
 0x266   : > { %13785 = vmatprep.subr.bf16.mxu1 %v17732_v32  ;;  %v17929_v32 = vld [vmem:[%s21457_s6 + $0x210] sm:$0xff]  }
 0x268   : > { %13666 = vmatpush3.bf16.msra.mxu0 %v17915_v3 }
 0x269   : > { %13786 = vmatpush3.bf16.msra.mxu1 %v17745_v27  ;;  %13667 = vmatprep.subr.bf16.mxu0 %v17922_v23  ;;  %v17936_v27 = vld [vmem:[%s21457_s6 + $0x258] sm:$0xff]  }
 0x26a   : > { %13787 = vmatprep.subr.bf16.mxu1 %v17752_v54  ;;  %v17943_v54 = vld [vmem:[%s21457_s6 + $0x218] sm:$0xff]  }
 0x26c   : > { %13668 = vmatpush3.bf16.msra.mxu0 %v17929_v32 }
 0x26d   : > { %13788 = vmatpush3.bf16.msra.mxu1 %v17759_v63  ;;  %13669 = vmatprep.subr.bf16.mxu0 %v17936_v27  ;;  %v17952_v63 = vld [vmem:[%s21457_s6 + $0x260] sm:$0xff]  }
 0x26e   : > { %13817 = vmatprep.subr.bf16.mxu1 %v17766_v38  ;;  %v17959_v38 = vld [vmem:[%s21457_s6 + $0x220] sm:$0xff]  }
 0x270   : > { %13670 = vmatpush3.bf16.msra.mxu0 %v17943_v54  ;;  %4152 = vmatmul.mubr.bf16.vlgmr.msra.gmra.mrb[20].mxu1 %v17102_v12 }
 0x271   : > { %13818 = vmatpush3.bf16.msra.mxu1 %v17775_v39  ;;  %4233 = vmatprep.mubr.bf16.mxu1 %v17105_v13  ;;  %v17966_v39 = vld [vmem:[%s21457_s6 + $0x268] sm:$0xff]  }
 0x272   : > { %13671 = vmatprep.subr.bf16.mxu0 %v17952_v63  ;;  %13819 = vmatprep.subr.bf16.mxu1 %v17782_v43 }
 0x274   : > { %13672 = vmatpush3.bf16.msra.mxu0 %v17959_v38 }
 0x275   : > { %13820 = vmatpush3.bf16.msra.mxu1 %v17789_v53  ;;  %13673 = vmatprep.subr.bf16.mxu0 %v17966_v39 }
 0x276   : > { %v13481_v49 = vpop.f32.mrb[32].mxu0  ;;  %13821 = vmatprep.subr.bf16.mxu1 %v17796_v30 }
 0x277   : > { %v13482_v43 = vpop.f32.mrb[33].mxu0 }
 0x278   : > { %v13483_v59 = vadd.f32 %v13482_v43, %v13481_v49  ;;  %v13484_v46 = vpop.f32.mrb[34].mxu0  ;;  %13674 = vmatpush3.bf16.msra.mxu0 %v17973_v50  ;;  %v4382_v43 = vmul.f32 %v18103_v1, %v16580_v44 }
 0x279   : > { %v13485_v53 = vpop.f32.mrb[35].mxu0  ;;  %13822 = vmatpush3.bf16.msra.mxu1 %v17803_v28  ;;  %13675 = vmatprep.subr.bf16.mxu0 %v17980_v57  ;;  %v17998_v28 = vld [vmem:[%s21457_s6 + $0x278] sm:$0xff]  }
 0x27a   : > { %v2808_v30 = vadd.f32 %v13483_v59, %v17862_v17  ;;  %v13486_v33 = vadd.f32 %v13485_v53, %v13484_v46  ;;  %13823 = vmatprep.subr.bf16.mxu1 %v17810_v61  ;;  %v18005_v61 = vld [vmem:[%s21457_s6 + $0x238] sm:$0xff]  }
 0x27b   : > { %v18056_v17 = vld [vmem:[%s21457_s6 + $0x358] sm:$0xff]  }
 0x27c   : > { %v17986_v4 = vadd.f32 %v13486_v33, %v17866_v42  ;;  %13676 = vmatpush3.bf16.msra.mxu0 %v17991_v11  ;;  %v18079_v42 = vld [vmem:[%s21457_s6 + $0x320] sm:$0xff]   ;;  %v18132_v53 = vld [vmem:[%s21457_s6 + $0x338] sm:$0xff]  }
 0x27d   : > { %13824 = vmatpush3.bf16.msra.mxu1 %v17819_v51  ;;  %13677 = vmatprep.subr.bf16.mxu0 %v17998_v28  ;;  %v18012_v51 = vld [vmem:[%s21457_s6 + $0x340] sm:$0xff]  }
 0x27e   : > { %13825 = vmatprep.subr.bf16.mxu1 %v17830_v62  ;;  %v18020_v62 = vld [vmem:[%s21457_s6 + $0x300] sm:$0xff]  }
 0x27f   : > { %v18139_v33 = vld [vmem:[%s21457_s6 + $0x440] sm:$0xff]  }
 0x280   : > { %13678 = vmatpush3.bf16.msra.mxu0 %v18005_v61 }
 0x281   : > { %13826 = vmatpush3.bf16.msra.mxu1 %v17837_v22  ;;  %13707 = vmatprep.subr.bf16.mxu0 %v18012_v51  ;;  %v18028_v22 = vld [vmem:[%s21457_s6 + $0x348] sm:$0xff]  }
 0x282   : > { %13827 = vmatprep.subr.bf16.mxu1 %v17844_v31  ;;  %v18035_v31 = vld [vmem:[%s21457_s6 + $0x308] sm:$0xff]  }
 0x283   : > { %3841 = vmatmul.mubr.bf16.vlgmr.msra.gmra.mrb[60].mxu0 %v17209_v48 }
 0x284   : > { %13708 = vmatpush3.bf16.msra.mxu0 %v18020_v62  ;;  %3976 = vmatprep.mubr.bf16.mxu0 %v17321_v24 }
 0x285   : > { %13828 = vmatpush3.bf16.msra.mxu1 %v17851_v9  ;;  %13709 = vmatprep.subr.bf16.mxu0 %v18028_v22  ;;  %v18042_v9 = vld [vmem:[%s21457_s6 + $0x350] sm:$0xff]  }
 0x286   : > { %13829 = vmatprep.subr.bf16.mxu1 %v17858_v14  ;;  %v18049_v14 = vld [vmem:[%s21457_s6 + $0x310] sm:$0xff]  }
 0x288   : > { %13710 = vmatpush3.bf16.msra.mxu0 %v18035_v31 }
 0x289   : > { %13830 = vmatpush3.bf16.msra.mxu1 %v17871_v15  ;;  %13711 = vmatprep.subr.bf16.mxu0 %v18042_v9  ;;  %v18086_v15 = vld [vmem:[%s21457_s6 + $0x368] sm:$0xff]  }
 0x28a   : > { %13831 = vmatprep.subr.bf16.mxu1 %v17878_v34 }
 0x28c   : > { %13712 = vmatpush3.bf16.msra.mxu0 %v18049_v14 }
 0x28d   : > { %13832 = vmatpush3.bf16.msra.mxu1 %v17885_v18  ;;  %13713 = vmatprep.subr.bf16.mxu0 %v18056_v17  ;;  %v18093_v18 = vld [vmem:[%s21457_s6 + $0x328] sm:$0xff]  }
 0x28e   : > { %13861 = vmatprep.subr.bf16.mxu1 %v17892_v16  ;;  %v18100_v16 = vld [vmem:[%s21457_s6 + $0x370] sm:$0xff]  }
 0x290   : > { %13714 = vmatpush3.bf16.msra.mxu0 %v18063_v20  ;;  %4234 = vmatmul.mubr.bf16.vlgmr.msra.gmra.mrb[24].mxu1 %v17209_v48 }
 0x291   : > { %13862 = vmatpush3.bf16.msra.mxu1 %v17900_v58  ;;  %4319 = vmatprep.mubr.bf16.mxu1 %v17321_v24  ;;  %v4378_v58 = vld [vmem:[#allocation2 + $0x78] sm:$0x7] }
 0x292   : > { %13715 = vmatprep.subr.bf16.mxu0 %v18072_v37  ;;  %13863 = vmatprep.subr.bf16.mxu1 %v17908_v36  ;;  %v4384_v59 = vmul.f32 %v4378_v58, %v16561_v26 }
 0x294   : > { %13716 = vmatpush3.bf16.msra.mxu0 %v18079_v42 }
 0x295   : > { %13864 = vmatpush3.bf16.msra.mxu1 %v17915_v3  ;;  %13717 = vmatprep.subr.bf16.mxu0 %v18086_v15 }
 0x296   : > { %v13503_v19 = vpop.f32.mrb[36].mxu0  ;;  %13865 = vmatprep.subr.bf16.mxu1 %v17922_v23  ;;  %v4374_v23 = vld [vmem:[#allocation2 + $0x58] sm:$0xf8] }
 0x297   : > { %v13504_v47 = vpop.f32.mrb[37].mxu0  ;;  %v4380_v46 = vmul.f32 %v4374_v23, %v16558_v25 }
 0x298   : > { %v13505_v34 = vadd.f32 %v13504_v47, %v13503_v19  ;;  %v13506_v52 = vpop.f32.mrb[38].mxu0  ;;  %13718 = vmatpush3.bf16.msra.mxu0 %v18093_v18  ;;  %v18151_v19 = vld [vmem:[%s21457_s6 + $0x400] sm:$0xff]  }
 0x299   : > { %v13507_v7 = vpop.f32.mrb[39].mxu0  ;;  %13866 = vmatpush3.bf16.msra.mxu1 %v17929_v32  ;;  %13719 = vmatprep.subr.bf16.mxu0 %v18100_v16  ;;  %v18114_v32 = vld [vmem:[%s21457_s6 + $0x330] sm:$0xff]  }
 0x29a   : > { %v18105_v36 = vadd.f32 %v13505_v34, %v2808_v30  ;;  %v13508_v3 = vadd.f32 %v13507_v7, %v13506_v52  ;;  %13867 = vmatprep.subr.bf16.mxu1 %v17936_v27  ;;  %v18124_v27 = vld [vmem:[%s21457_s6 + $0x378] sm:$0xff]   ;;  %v4386_v30 = vpack.c.bf16 %v4382_v43, %v4380_v46  ;;  %v18161_v7 = vld [vmem:[%s21457_s6 + $0x448] sm:$0xff]  }
 0x29c   : > { %v18109_v49 = vadd.f32 %v13508_v3, %v17986_v4  ;;  %13720 = vmatpush3.bf16.msra.mxu0 %v18114_v32  ;;  %v4410_v47 = vshll.u32 %v4386_v30, 16 }
 0x29d   : > { %13868 = vmatpush3.bf16.msra.mxu1 %v17943_v54  ;;  %13721 = vmatprep.subr.bf16.mxu0 %v18124_v27  ;;  %v4388_v54 = vpack.c.bf16 %v4384_v59, %v4384_v59 }
 0x29e   : > { %13869 = vmatprep.subr.bf16.mxu1 %v17952_v63  ;;  %v4412_v23 = vrot.slane %v4410_v47, 2 }
 0x29f   : > { %v4415_v34 = vshrl.u32 %v4388_v54, 16  ;;  %v4418_v52 = vshll.u32 %v4388_v54, 16 }
 0x2a0   : > { %13722 = vmatpush3.bf16.msra.mxu0 %v18132_v53 }
 0x2a1   : > { %13870 = vmatpush3.bf16.msra.mxu1 %v17959_v38  ;;  %13751 = vmatprep.subr.bf16.mxu0 %v18139_v33  ;;  %v4407_v38 = vshrl.u32 %v4386_v30, 16  ;;  %v4417_v43 = vrot.slane %v4415_v34, 1  ;;  %v4420_v59 = vrot.slane %v4418_v52, 2  ;;  %v18228_v34 = vld [vmem:[%s21457_s6 + $0x48] sm:$0xff]   ;;  %v4534_v52 = vld [vmem:[#allocation2 + $0x78] sm:$0xf] }
 0x2a2   : > { %13871 = vmatprep.subr.bf16.mxu1 %v17966_v39 }
 0x2a3   : > { %v18143_v63 = vpop.f32.mrb[0].mxu1  ;;  %3977 = vmatmul.mubr.bf16.vlgmr.msra.gmra.mrb[64].mxu0 %v17474_v10  ;;  %v4409_v3 = vrot.slane %v4407_v38, 1  ;;  %v4421_v46 = vor.u32 %v4420_v59, %v4417_v43  ;;  %v21564_v38 = vld [vmem:[#allocation27_spill] sm:$0xff] }
 0x2a4   : > { %21555 = vst [vmem:[#allocation38_spill] sm:$0xff] %v18143_v63  ;;  %v18146_v4 = vpop.f32.mrb[1].mxu1  ;;  %13752 = vmatpush3.bf16.msra.mxu0 %v18151_v19  ;;  %4104 = vmatprep.mubr.bf16.mxu0 %v16780_v56  ;;  %v15952_v63 = vld [vmem:[#allocation2 + $0x28] sm:$0xff] }
 0x2a5   : > { %21556 = vst [vmem:[#allocation39_spill] sm:$0xff] %v18146_v4  ;;  %v18155_v39 = vpop.f32.mrb[2].mxu1  ;;  %13872 = vmatpush3.bf16.msra.mxu1 %v17973_v50  ;;  %13753 = vmatprep.subr.bf16.mxu0 %v18161_v7  ;;  %v4413_v50 = vor.u32 %v4412_v23, %v4409_v3 }
 0x2a6   : > { %21557 = vst [vmem:[#allocation40_spill] sm:$0xff] %v18155_v39  ;;  %v18164_v58 = vpop.f32.mrb[3].mxu1  ;;  %13873 = vmatprep.subr.bf16.mxu1 %v17980_v57 }
 0x2a7   : > { %21558 = vst [vmem:[#allocation41_spill] sm:$0xff] %v18164_v58 }
 0x2a8   : > { %13754 = vmatpush3.bf16.msra.mxu0 %v17484_v55  ;;  %v4422_v55 = vsel %vm2034_vm6, %v4413_v50, %v4421_v46 }
 0x2a9   : > { %13874 = vmatpush3.bf16.msra.mxu1 %v17991_v11  ;;  %13755 = vmatprep.subr.bf16.mxu0 %v17490_v2  ;;  %v18186_v11 = vld [vmem:[#allocation2 + $0x60] sm:$0xff] }
 0x2aa   : > { %13875 = vmatprep.subr.bf16.mxu1 %v17998_v28  ;;  %v21559_v28 = vld [vmem:[#allocation33_spill] sm:$0xff] }
 0x2ac   : > { %13756 = vmatpush3.bf16.msra.mxu0 %v17502_v21 }
 0x2ad   : > { %13876 = vmatpush3.bf16.msra.mxu1 %v18005_v61  ;;  %13757 = vmatprep.subr.bf16.mxu0 %v17512_v0  ;;  %v4377_v0 = vld [vmem:[#allocation2 + $0x70] sm:$0x7] }
 0x2ae   : > { %13905 = vmatprep.subr.bf16.mxu1 %v18012_v51  ;;  %v4383_v51 = vmul.f32 %v4377_v0, %v16561_v26  ;;  %v18210_v26 = vld [vmem:[%s21457_s6 + $0x40] sm:$0xff]  }
 0x2b0   : > { %13758 = vmatpush3.bf16.msra.mxu0 %v17520_v8  ;;  %4320 = vmatmul.mubr.bf16.vlgmr.msra.gmra.mrb[28].mxu1 %v17474_v10 }
 0x2b1   : > { %13906 = vmatpush3.bf16.msra.mxu1 %v18020_v62  ;;  %4457 = vmatprep.mubr.bf16.mxu1 %v4422_v55  ;;  %v4381_v62 = vmul.f32 %v18186_v11, %v16580_v44  ;;  %v4532_v55 = vld [vmem:[#allocation2 + $0x58] sm:$0xf0] }
 0x2b2   : > { %13759 = vmatprep.subr.bf16.mxu0 %v17533_v41  ;;  %13907 = vmatprep.subr.bf16.mxu1 %v18028_v22  ;;  %v21560_v22 = vld [vmem:[#allocation34_spill] sm:$0xff] }
 0x2b4   : > { %13760 = vmatpush3.bf16.msra.mxu0 %v17543_v6  ;;  %v4373_v6 = vld [vmem:[#allocation2 + $0x50] sm:$0xf8] }
 0x2b5   : > { %13908 = vmatpush3.bf16.msra.mxu1 %v18035_v31  ;;  %13761 = vmatprep.subr.bf16.mxu0 %v17552_v45  ;;  %v4379_v31 = vmul.f32 %v4373_v6, %v16558_v25  ;;  %v18285_v6 = vld [vmem:[%s21457_s6 + $0x20] sm:$0xff]  }
 0x2b6   : > { %v13525_v2 = vpop.f32.mrb[40].mxu0  ;;  %13909 = vmatprep.subr.bf16.mxu1 %v18042_v9  ;;  %v21561_v9 = vld [vmem:[#allocation35_spill] sm:$0xff] }
 0x2b7   : > { %v13526_v21 = vpop.f32.mrb[41].mxu0 }
 0x2b8   : > { %v13527_v8 = vadd.f32 %v13526_v21, %v13525_v2  ;;  %v13528_v57 = vpop.f32.mrb[42].mxu0  ;;  %13762 = vmatpush3.bf16.msra.mxu0 %v17561_v60  ;;  %v4536_v2 = vpack.c.bf16 %v18103_v1, %v4532_v55  ;;  %v4538_v21 = vpack.c.bf16 %v4534_v52, %v4534_v52  ;;  %v18375_v52 = vld [vmem:[%s21457_s6 + $0x1c0] sm:$0xff]   ;;  %v21566_v55 = vld [vmem:[#allocation29_spill] sm:$0xff] }
 0x2b9   : > { %v13529_v41 = vpop.f32.mrb[43].mxu0  ;;  %13910 = vmatpush3.bf16.msra.mxu1 %v18049_v14  ;;  %13763 = vmatprep.subr.bf16.mxu0 %v21559_v28  ;;  %v4387_v14 = vpack.c.bf16 %v4383_v51, %v4383_v51  ;;  %v18267_v28 = vld [vmem:[%s21457_s6 + $0x18] sm:$0xff]   ;;  %v18303_v51 = vld [vmem:[%s21457_s6 + $0x450] sm:$0xff]  }
 0x2ba   : > { %v18191_v61 = vadd.f32 %v13527_v8, %v18105_v36  ;;  %v13530_v45 = vadd.f32 %v13529_v41, %v13528_v57  ;;  %13911 = vmatprep.subr.bf16.mxu1 %v18056_v17  ;;  %v4385_v17 = vpack.c.bf16 %v4381_v62, %v4379_v31  ;;  %v21562_v36 = vld [vmem:[#allocation36_spill] sm:$0xff]  ;;  %v18252_v57 = vld [vmem:[%s21457_s6 + $0x10] sm:$0xff]   ;;  %v4546_v1 = vrot.slane %v4536_v2, 2  ;;  %v18259_v41 = vld [vmem:[%s21457_s6 + $0x58] sm:$0xff]  }
 0x2bb   : > { %v4398_v25 = vshrl.u32 %v4387_v14, 16  ;;  %v4401_v30 = vshll.u32 %v4387_v14, 16  ;;  %v4533_v2 = vld [vmem:[#allocation2 + $0x70] sm:$0xf] }
 0x2bc   : > { %v18198_v60 = vadd.f32 %v13530_v45, %v18109_v49  ;;  %13764 = vmatpush3.bf16.msra.mxu0 %v21560_v22  ;;  %v4393_v49 = vshll.u32 %v4385_v17, 16  ;;  %v18297_v45 = vld [vmem:[%s21457_s6 + $0x68] sm:$0xff]  }
 0x2bd   : > { %13912 = vmatpush3.bf16.msra.mxu1 %v18063_v20  ;;  %13765 = vmatprep.subr.bf16.mxu0 %v21561_v9  ;;  %v21563_v20 = vld [vmem:[#allocation26_spill] sm:$0xff]  ;;  %v4400_v23 = vrot.slane %v4398_v25, 1  ;;  %v4403_v46 = vrot.slane %v4401_v30, 2  ;;  %v18309_v9 = vld [vmem:[%s21457_s6 + $0x28] sm:$0xff]   ;;  %v18339_v30 = vld [vmem:[%s21457_s6 + $0x30] sm:$0xff]  }
 0x2be   : > { %13913 = vmatprep.subr.bf16.mxu1 %v18072_v37  ;;  %v4390_v37 = vshrl.u32 %v4385_v17, 16  ;;  %v4395_v50 = vrot.slane %v4393_v49, 2  ;;  %v18315_v17 = vld [vmem:[%s21457_s6 + $0x410] sm:$0xff]  }
 0x2bf   : > { %v4404_v8 = vor.u32 %v4403_v46, %v4400_v23  ;;  %v18388_v46 = vld [vmem:[%s21457_s6 + $0x180] sm:$0xff]  }
 0x2c0   : > { %13766 = vmatpush3.bf16.msra.mxu0 %v21562_v36  ;;  %v4392_v59 = vrot.slane %v4390_v37, 1  ;;  %v18321_v36 = vld [vmem:[%s21457_s6 + $0x70] sm:$0xff]   ;;  %v18330_v37 = vld [vmem:[%s21457_s6 + $0x458] sm:$0xff]  }
 0x2c1   : > { %13914 = vmatpush3.bf16.msra.mxu1 %v18079_v42  ;;  %13795 = vmatprep.subr.bf16.mxu0 %v18210_v26  ;;  %v18218_v42 = vld [vmem:[%s21457_s6] sm:$0xff]  }
 0x2c2   : > { %13915 = vmatprep.subr.bf16.mxu1 %v18086_v15  ;;  %v4396_v0 = vor.u32 %v4395_v50, %v4392_v59  ;;  %v21565_v59 = vld [vmem:[#allocation28_spill] sm:$0xff] }
 0x2c3   : > { %v13613_v44 = vpop.f32.mrb[4].mxu1  ;;  %4105 = vmatmul.mubr.bf16.vlgmr.msra.gmra.mrb[68].mxu0 %v21563_v20 }
 0x2c4   : > { %v13614_v54 = vpop.f32.mrb[5].mxu1  ;;  %13796 = vmatpush3.bf16.msra.mxu0 %v18218_v42  ;;  %4192 = vmatprep.mubr.bf16.mxu0 %v21564_v38  ;;  %v18363_v38 = vld [vmem:[%s21457_s6 + $0x38] sm:$0xff]  }
 0x2c5   : > { %v18222_v47 = vadd.f32 %v13614_v54, %v13613_v44  ;;  %v13616_v15 = vpop.f32.mrb[6].mxu1  ;;  %13916 = vmatpush3.bf16.msra.mxu1 %v18093_v18  ;;  %13797 = vmatprep.subr.bf16.mxu0 %v18228_v34  ;;  %v18237_v18 = vld [vmem:[%s21457_s6 + $0x8] sm:$0xff]   ;;  %v18351_v54 = vld [vmem:[%s21457_s6 + $0x78] sm:$0xff]  }
 0x2c6   : > { %v13617_v3 = vpop.f32.mrb[7].mxu1  ;;  %13917 = vmatprep.subr.bf16.mxu1 %v18100_v16  ;;  %v18245_v16 = vld [vmem:[%s21457_s6 + $0x50] sm:$0xff]  }
 0x2c7   : > { %v18232_v43 = vadd.f32 %v13617_v3, %v13616_v15  ;;  %v18369_v15 = vld [vmem:[%s21457_s6 + $0x420] sm:$0xff]   ;;  %v18381_v3 = vld [vmem:[%s21457_s6 + $0x468] sm:$0xff]  }
 0x2c8   : > { %13798 = vmatpush3.bf16.msra.mxu0 %v18237_v18 }
 0x2c9   : > { %13918 = vmatpush3.bf16.msra.mxu1 %v18114_v32  ;;  %13799 = vmatprep.subr.bf16.mxu0 %v18245_v16  ;;  %v4547_v32 = vrot.slane %v4538_v21, 2 }
 0x2ca   : > { %13919 = vmatprep.subr.bf16.mxu1 %v18124_v27  ;;  %v4405_v27 = vsel %vm2034_vm6, %v4396_v0, %v4404_v8  ;;  %v18397_v8 = vld [vmem:[%s21457_s6 + $0x428] sm:$0xff]  }
 0x2cb   : > { %21567 = vst [vmem:[#allocation33_spill] sm:$0xff] %v18397_v8 }
 0x2cc   : > { %13800 = vmatpush3.bf16.msra.mxu0 %v18252_v57 }
 0x2cd   : > { %13920 = vmatpush3.bf16.msra.mxu1 %v18132_v53  ;;  %13801 = vmatprep.subr.bf16.mxu0 %v18259_v41  ;;  %v18271_v53 = vsel %vm682_vm0, %v4546_v1, %v4547_v32  ;;  %v18403_v1 = vld [vmem:[%s21457_s6 + $0x1c8] sm:$0xff]  }
 0x2ce   : > { %13949 = vmatprep.subr.bf16.mxu1 %v18139_v33  ;;  %v18278_v33 = vld [vmem:[%s21457_s6 + $0x60] sm:$0xff]  }
 0x2d0   : > { %13802 = vmatpush3.bf16.msra.mxu0 %v18267_v28  ;;  %4458 = vmatmul.mubr.bf16.vlgmr.msra.gmra.mrb[32].mxu1 %v4405_v27  ;;  %v18409_v27 = vld [vmem:[%s21457_s6 + $0x470] sm:$0xff]  }
 0x2d1   : > { %13950 = vmatpush3.bf16.msra.mxu1 %v18151_v19  ;;  %4583 = vmatprep.mubr.bf16.mxu1 %v18271_v53  ;;  %v18291_v19 = vld [vmem:[%s21457_s6 + $0x408] sm:$0xff]   ;;  %21568 = vst [vmem:[#allocation34_spill] sm:$0xff] %v18409_v27 }
 0x2d2   : > { %13803 = vmatprep.subr.bf16.mxu0 %v18278_v33  ;;  %13951 = vmatprep.subr.bf16.mxu1 %v18161_v7 }
 0x2d4   : > { %13804 = vmatpush3.bf16.msra.mxu0 %v18285_v6 }
 0x2d5   : > { %13952 = vmatpush3.bf16.msra.mxu1 %v18291_v19  ;;  %13805 = vmatprep.subr.bf16.mxu0 %v18297_v45 }
 0x2d6   : > { %v13547_v7 = vpop.f32.mrb[44].mxu0  ;;  %13953 = vmatprep.subr.bf16.mxu1 %v18303_v51 }
 0x2d7   : > { %v13548_v62 = vpop.f32.mrb[45].mxu0 }
 0x2d8   : > { %v13549_v22 = vadd.f32 %v13548_v62, %v13547_v7  ;;  %v13550_v31 = vpop.f32.mrb[46].mxu0  ;;  %13806 = vmatpush3.bf16.msra.mxu0 %v18309_v9  ;;  %v4531_v7 = vld [vmem:[#allocation2 + $0x50] sm:$0xf0] }
 0x2d9   : > { %v13551_v14 = vpop.f32.mrb[47].mxu0  ;;  %13954 = vmatpush3.bf16.msra.mxu1 %v18315_v17  ;;  %13807 = vmatprep.subr.bf16.mxu0 %v18321_v36 }
 0x2da   : > { %v18325_v25 = vadd.f32 %v13549_v22, %v18191_v61  ;;  %v13552_v44 = vadd.f32 %v13551_v14, %v13550_v31  ;;  %13955 = vmatprep.subr.bf16.mxu1 %v18330_v37  ;;  %v18345_v61 = vld [vmem:[%s21457_s6 + $0x418] sm:$0xff]   ;;  %v4535_v22 = vpack.c.bf16 %v18186_v11, %v4531_v7  ;;  %v4537_v31 = vpack.c.bf16 %v4533_v2, %v4533_v2  ;;  %v18418_v14 = vld [vmem:[%s21457_s6 + $0x188] sm:$0xff]  }
 0x2db   : > { %v18436_v11 = vld [vmem:[%s21457_s6 + $0x478] sm:$0xff]  }
 0x2dc   : > { %v18334_v49 = vadd.f32 %v13552_v44, %v18198_v60  ;;  %13808 = vmatpush3.bf16.msra.mxu0 %v18339_v30  ;;  %v18357_v60 = vld [vmem:[%s21457_s6 + $0x460] sm:$0xff]   ;;  %v18424_v44 = vld [vmem:[%s21457_s6 + $0x430] sm:$0xff]   ;;  %21570 = vst [vmem:[#allocation36_spill] sm:$0xff] %v18436_v11  ;;  %v18448_v2 = vld [vmem:[%s21457_s6 + $0x438] sm:$0xff]  }
 0x2dd   : > { %13956 = vmatpush3.bf16.msra.mxu1 %v18345_v61  ;;  %13809 = vmatprep.subr.bf16.mxu0 %v18351_v54  ;;  %21569 = vst [vmem:[#allocation35_spill] sm:$0xff] %v18424_v44  ;;  %21571 = vst [vmem:[#allocation26_spill] sm:$0xff] %v18448_v2  ;;  %v18464_v7 = vld [vmem:[%s21457_s6 + $0x198] sm:$0xff]  }
 0x2de   : > { %13957 = vmatprep.subr.bf16.mxu1 %v18357_v60 }
 0x2e0   : > { %13810 = vmatpush3.bf16.msra.mxu0 %v18363_v38 }
 0x2e1   : > { %13958 = vmatpush3.bf16.msra.mxu1 %v18369_v15  ;;  %13839 = vmatprep.subr.bf16.mxu0 %v18375_v52 }
 0x2e2   : > { %13959 = vmatprep.subr.bf16.mxu1 %v18381_v3 }
 0x2e3   : > { %v13657_v23 = vpop.f32.mrb[8].mxu1  ;;  %4193 = vmatmul.mubr.bf16.vlgmr.msra.gmra.mrb[72].mxu0 %v21565_v59  ;;  %v4543_v59 = vrot.slane %v4535_v22, 2  ;;  %v18480_v22 = vld [vmem:[%s21457_s6 + $0x1a0] sm:$0xff]  }
 0x2e4   : > { %v13658_v50 = vpop.f32.mrb[9].mxu1  ;;  %13840 = vmatpush3.bf16.msra.mxu0 %v18388_v46  ;;  %4276 = vmatprep.mubr.bf16.mxu0 %v21566_v55  ;;  %v18442_v55 = vld [vmem:[%s21457_s6 + $0x190] sm:$0xff]  }
 0x2e5   : > { %v18392_v21 = vadd.f32 %v13658_v50, %v13657_v23  ;;  %v13660_v0 = vpop.f32.mrb[10].mxu1  ;;  %13960 = vmatpush3.bf16.msra.mxu1 %v18397_v8  ;;  %13841 = vmatprep.subr.bf16.mxu0 %v18403_v1  ;;  %v18430_v23 = vld [vmem:[%s21457_s6 + $0x1d0] sm:$0xff]   ;;  %v4544_v50 = vrot.slane %v4537_v31, 2 }
 0x2e6   : > { %v13661_v32 = vpop.f32.mrb[11].mxu1  ;;  %13961 = vmatprep.subr.bf16.mxu1 %v18409_v27 }
 0x2e7   : > { %v18412_v62 = vadd.f32 %v13661_v32, %v13660_v0  ;;  %v18454_v0 = vld [vmem:[%s21457_s6 + $0x1d8] sm:$0xff]   ;;  %v18459_v32 = vsel %vm682_vm0, %v4543_v59, %v4544_v50  ;;  %v18494_v50 = vld [vmem:[%s21457_s6 + $0x1a8] sm:$0xff]  }
 0x2e8   : > { %13842 = vmatpush3.bf16.msra.mxu0 %v18418_v14 }
 0x2e9   : > { %13962 = vmatpush3.bf16.msra.mxu1 %v18424_v44  ;;  %13843 = vmatprep.subr.bf16.mxu0 %v18430_v23 }
 0x2ea   : > { %13963 = vmatprep.subr.bf16.mxu1 %v18436_v11 }
 0x2ec   : > { %13844 = vmatpush3.bf16.msra.mxu0 %v18442_v55 }
 0x2ed   : > { %13964 = vmatpush3.bf16.msra.mxu1 %v18448_v2  ;;  %13845 = vmatprep.subr.bf16.mxu0 %v18454_v0 }
 0x2ee   : > { %13993 = vmatprep.subr.bf16.mxu1 %v18210_v26  ;;  %v18473_v26 = vld [vmem:[%s21457_s6 + $0x1e0] sm:$0xff]  }
 0x2f0   : > { %13846 = vmatpush3.bf16.msra.mxu0 %v18464_v7  ;;  %4584 = vmatmul.mubr.bf16.vlgmr.msra.gmra.mrb[36].mxu1 %v18459_v32 }
 0x2f1   : > { %13994 = vmatpush3.bf16.msra.mxu1 %v18218_v42  ;;  %4671 = vmatprep.mubr.bf16.mxu1 %v17000_v29  ;;  %v18487_v29 = vld [vmem:[%s21457_s6 + $0x1e8] sm:$0xff]  }
 0x2f2   : > { %13847 = vmatprep.subr.bf16.mxu0 %v18473_v26  ;;  %13995 = vmatprep.subr.bf16.mxu1 %v18228_v34 }
 0x2f4   : > { %13848 = vmatpush3.bf16.msra.mxu0 %v18480_v22 }
 0x2f5   : > { %13996 = vmatpush3.bf16.msra.mxu1 %v18237_v18  ;;  %13849 = vmatprep.subr.bf16.mxu0 %v18487_v29  ;;  %v18500_v18 = vld [vmem:[%s21458_s7] ss:$0 sm:$0xff] }
 0x2f6   : > { %v13569_v42 = vpop.f32.mrb[48].mxu0  ;;  %13997 = vmatprep.subr.bf16.mxu1 %v18245_v16  ;;  %v18506_v16 = vld [vmem:[%s21457_s6 + $0x1f0] sm:$0xff]  }
 0x2f7   : > { %v13570_v34 = vpop.f32.mrb[49].mxu0 }
 0x2f8   : > { %v13571_v31 = vadd.f32 %v13570_v34, %v13569_v42  ;;  %v13572_v59 = vpop.f32.mrb[50].mxu0  ;;  %13850 = vmatpush3.bf16.msra.mxu0 %v18494_v50 }
 0x2f9   : > { %v13573_v58 = vpop.f32.mrb[51].mxu0  ;;  %13998 = vmatpush3.bf16.msra.mxu1 %v18252_v57  ;;  %13851 = vmatprep.subr.bf16.mxu0 %v18506_v16  ;;  %v18516_v57 = vld [vmem:[%s21457_s6 + $0x1b0] sm:$0xff]  }
 0x2fa   : > { %v3558_v42 = vadd.f32 %v13571_v31, %v18325_v25  ;;  %v13574_v34 = vadd.f32 %v13573_v58, %v13572_v59  ;;  %13999 = vmatprep.subr.bf16.mxu1 %v18259_v41  ;;  %v18523_v25 = vld [vmem:[%s21457_s6 + $0x1f8] sm:$0xff]  }
 0x2fb   : > { %v18531_v31 = vld [vmem:[%s21457_s6 + $0x1b8] sm:$0xff]  }
 0x2fc   : > { %v3567_v39 = vadd.f32 %v18500_v18, %v3558_v42  ;;  %v3559_v4 = vadd.f32 %v13574_v34, %v18334_v49  ;;  %13852 = vmatpush3.bf16.msra.mxu0 %v18516_v57  ;;  %v18548_v42 = vld [vmem:[%s21457_s6 + $0x280] sm:$0xff]  }
 0x2fd   : > { %14000 = vmatpush3.bf16.msra.mxu1 %v18267_v28  ;;  %13853 = vmatprep.subr.bf16.mxu0 %v18523_v25  ;;  %v18538_v28 = vld [vmem:[%s21457_s6 + $0x2c0] sm:$0xff]  }
 0x2fe   : > { %v3568_v58 = vadd.f32 %v18500_v18, %v3559_v4  ;;  %14001 = vmatprep.subr.bf16.mxu1 %v18278_v33  ;;  %v3569_v41 = vmax.f32 %v3567_v39, 0.0  ;;  %v21572_v33 = vld [vmem:[#allocation30_spill] sm:$0xff] }
 0x300   : > { %v3570_v49 = vmax.f32 %v3568_v58, 0.0  ;;  %13854 = vmatpush3.bf16.msra.mxu0 %v18531_v31 }
 0x301   : > { %14002 = vmatpush3.bf16.msra.mxu1 %v18285_v6  ;;  %13883 = vmatprep.subr.bf16.mxu0 %v18538_v28  ;;  %v21573_v6 = vld [vmem:[#allocation31_spill] sm:$0xff] }
 0x302   : > { %v18541_v4 = vpack.c.bf16 %v3570_v49, %v3569_v41  ;;  %14003 = vmatprep.subr.bf16.mxu1 %v18297_v45  ;;  %v18558_v45 = vld [vmem:[%s21457_s6 + $0x2c8] sm:$0xff]  }
 0x303   : > { %v13701_v39 = vpop.f32.mrb[12].mxu1  ;;  %4277 = vmatmul.mubr.bf16.vlgmr.msra.gmra.mrb[76].mxu0 %v21572_v33 }
 0x304   : > { %v13702_v59 = vpop.f32.mrb[13].mxu1  ;;  %13884 = vmatpush3.bf16.msra.mxu0 %v18548_v42  ;;  %4362 = vmatprep.mubr.bf16.mxu0 %v21573_v6 }
 0x305   : > { %v18552_v34 = vadd.f32 %v13702_v59, %v13701_v39  ;;  %v13704_v58 = vpop.f32.mrb[14].mxu1  ;;  %14004 = vmatpush3.bf16.msra.mxu1 %v18309_v9  ;;  %13885 = vmatprep.subr.bf16.mxu0 %v18558_v45  ;;  %v18567_v39 = vld [vmem:[%s21457_s6 + $0x288] sm:$0xff]   ;;  %v18574_v9 = vld [vmem:[%s21457_s6 + $0x2d0] sm:$0xff]  }
 0x306   : > { %v13705_v41 = vpop.f32.mrb[15].mxu1  ;;  %14005 = vmatprep.subr.bf16.mxu1 %v18321_v36  ;;  %v18581_v36 = vld [vmem:[%s21457_s6 + $0x290] sm:$0xff]   ;;  %v18625_v59 = vld [vmem:[%s21457_s6 + $0x2a8] sm:$0xff]  }
 0x307   : > { %v18562_v49 = vadd.f32 %v13705_v41, %v13704_v58  ;;  %v18632_v41 = vld [vmem:[%s21457_s6 + $0x2f0] sm:$0xff]  }
 0x308   : > { %13886 = vmatpush3.bf16.msra.mxu0 %v18567_v39 }
 0x309   : > { %14006 = vmatpush3.bf16.msra.mxu1 %v18339_v30  ;;  %13887 = vmatprep.subr.bf16.mxu0 %v18574_v9  ;;  %v18588_v30 = vld [vmem:[%s21457_s6 + $0x2d8] sm:$0xff]  }
 0x30a   : > { %14007 = vmatprep.subr.bf16.mxu1 %v18351_v54  ;;  %v18595_v54 = vld [vmem:[%s21457_s6 + $0x298] sm:$0xff]  }
 0x30c   : > { %13888 = vmatpush3.bf16.msra.mxu0 %v18581_v36 }
 0x30d   : > { %14008 = vmatpush3.bf16.msra.mxu1 %v18363_v38  ;;  %13889 = vmatprep.subr.bf16.mxu0 %v18588_v30  ;;  %v18604_v38 = vld [vmem:[%s21457_s6 + $0x2e0] sm:$0xff]  }
 0x30e   : > { %14037 = vmatprep.subr.bf16.mxu1 %v18375_v52  ;;  %v18611_v52 = vld [vmem:[%s21457_s6 + $0x2a0] sm:$0xff]  }
 0x310   : > { %13890 = vmatpush3.bf16.msra.mxu0 %v18595_v54  ;;  %4672 = vmatmul.mubr.bf16.vlgmr.msra.gmra.mrb[40].mxu1 %v17102_v12  ;;  %v18618_v12 = vld [vmem:[%s21457_s6 + $0x2e8] sm:$0xff]  }
 0x311   : > { %14038 = vmatpush3.bf16.msra.mxu1 %v18388_v46  ;;  %4755 = vmatprep.mubr.bf16.mxu1 %v17321_v24 }
 0x312   : > { %13891 = vmatprep.subr.bf16.mxu0 %v18604_v38  ;;  %14039 = vmatprep.subr.bf16.mxu1 %v18403_v1 }
 0x314   : > { %13892 = vmatpush3.bf16.msra.mxu0 %v18611_v52 }
 0x315   : > { %14040 = vmatpush3.bf16.msra.mxu1 %v18418_v14  ;;  %13893 = vmatprep.subr.bf16.mxu0 %v18618_v12  ;;  %v4471_v14 = vld [vmem:[#allocation2 + $0x38] sm:$0xf] }
 0x316   : > { %v13591_v24 = vpop.f32.mrb[52].mxu0  ;;  %14041 = vmatprep.subr.bf16.mxu1 %v18430_v23  ;;  %v4475_v11 = vpack.c.bf16 %v4471_v14, %v4471_v14 }
 0x317   : > { %v13592_v46 = vpop.f32.mrb[53].mxu0 }
 0x318   : > { %v13593_v1 = vadd.f32 %v13592_v46, %v13591_v24  ;;  %v13594_v33 = vpop.f32.mrb[54].mxu0  ;;  %13894 = vmatpush3.bf16.msra.mxu0 %v18625_v59  ;;  %v4469_v46 = vld [vmem:[#allocation2 + $0x18] sm:$0xf0] }
 0x319   : > { %v13595_v58 = vpop.f32.mrb[55].mxu0  ;;  %14042 = vmatpush3.bf16.msra.mxu1 %v18442_v55  ;;  %13895 = vmatprep.subr.bf16.mxu0 %v18632_v41  ;;  %v4473_v2 = vpack.c.bf16 %v15952_v63, %v4469_v46  ;;  %v18645_v55 = vld [vmem:[%s21457_s6 + $0x2b0] sm:$0xff]  }
 0x31a   : > { %v18636_v23 = vadd.f32 %v18222_v47, %v13593_v1  ;;  %v13596_v24 = vadd.f32 %v13595_v58, %v13594_v33  ;;  %14043 = vmatprep.subr.bf16.mxu1 %v18454_v0  ;;  %v18652_v47 = vld [vmem:[%s21457_s6 + $0x2f8] sm:$0xff]  }
 0x31b   : > { %v4483_v63 = vrot.slane %v4473_v2, 2  ;;  %v18659_v0 = vld [vmem:[%s21457_s6 + $0x2b8] sm:$0xff]  }
 0x31c   : > { %v18640_v44 = vadd.f32 %v18232_v43, %v13596_v24  ;;  %13896 = vmatpush3.bf16.msra.mxu0 %v18645_v55  ;;  %v4484_v43 = vrot.slane %v4475_v11, 2  ;;  %v18696_v24 = vld [vmem:[%s21457_s6 + $0x388] sm:$0xff]  }
 0x31d   : > { %14044 = vmatpush3.bf16.msra.mxu1 %v18464_v7  ;;  %13897 = vmatprep.subr.bf16.mxu0 %v18652_v47  ;;  %v18666_v7 = vld [vmem:[%s21457_s6 + $0x3c0] sm:$0xff]  }
 0x31e   : > { %14045 = vmatprep.subr.bf16.mxu1 %v18473_v26  ;;  %v18672_v11 = vsel %vm682_vm0, %v4483_v63, %v4484_v43  ;;  %v18754_v43 = vld [vmem:[%s21457_s6 + $0x3a8] sm:$0xff]  }
 0x320   : > { %13898 = vmatpush3.bf16.msra.mxu0 %v18659_v0 }
 0x321   : > { %14046 = vmatpush3.bf16.msra.mxu1 %v18480_v22  ;;  %13927 = vmatprep.subr.bf16.mxu0 %v18666_v7  ;;  %v18677_v22 = vld [vmem:[%s21457_s6 + $0x380] sm:$0xff]  }
 0x322   : > { %14047 = vmatprep.subr.bf16.mxu1 %v18487_v29  ;;  %v18687_v29 = vld [vmem:[%s21457_s6 + $0x3c8] sm:$0xff]  }
 0x323   : > { %v13745_v2 = vpop.f32.mrb[16].mxu1  ;;  %4363 = vmatmul.mubr.bf16.vlgmr.msra.gmra.mrb[80].mxu0 %v17620_v5 }
 0x324   : > { %v13746_v26 = vpop.f32.mrb[17].mxu1  ;;  %13928 = vmatpush3.bf16.msra.mxu0 %v18677_v22  ;;  %4520 = vmatprep.mubr.bf16.mxu0 %v18672_v11 }
 0x325   : > { %v18681_v1 = vadd.f32 %v13746_v26, %v13745_v2  ;;  %v13748_v33 = vpop.f32.mrb[18].mxu1  ;;  %14048 = vmatpush3.bf16.msra.mxu1 %v18494_v50  ;;  %13929 = vmatprep.subr.bf16.mxu0 %v18687_v29  ;;  %v18703_v50 = vld [vmem:[%s21457_s6 + $0x3d0] sm:$0xff]  }
 0x326   : > { %v13749_v14 = vpop.f32.mrb[19].mxu1  ;;  %14049 = vmatprep.subr.bf16.mxu1 %v18506_v16  ;;  %v18710_v16 = vld [vmem:[%s21457_s6 + $0x390] sm:$0xff]  }
 0x327   : > { %v18691_v58 = vadd.f32 %v13749_v14, %v13748_v33  ;;  %v18761_v2 = vld [vmem:[%s21457_s6 + $0x3f0] sm:$0xff]   ;;  %v15969_v14 = vld [vmem:[#allocation2 + $0x20] sm:$0xff] }
 0x328   : > { %13930 = vmatpush3.bf16.msra.mxu0 %v18696_v24 }
 0x329   : > { %14050 = vmatpush3.bf16.msra.mxu1 %v18516_v57  ;;  %13931 = vmatprep.subr.bf16.mxu0 %v18703_v50  ;;  %v18717_v57 = vld [vmem:[%s21457_s6 + $0x3d8] sm:$0xff]  }
 0x32a   : > { %14051 = vmatprep.subr.bf16.mxu1 %v18523_v25  ;;  %v18724_v25 = vld [vmem:[%s21457_s6 + $0x398] sm:$0xff]  }
 0x32c   : > { %13932 = vmatpush3.bf16.msra.mxu0 %v18710_v16 }
 0x32d   : > { %14052 = vmatpush3.bf16.msra.mxu1 %v18531_v31  ;;  %13933 = vmatprep.subr.bf16.mxu0 %v18717_v57  ;;  %v18733_v31 = vld [vmem:[%s21457_s6 + $0x3e0] sm:$0xff]  }
 0x32e   : > { %14081 = vmatprep.subr.bf16.mxu1 %v18538_v28  ;;  %v18740_v28 = vld [vmem:[%s21457_s6 + $0x3a0] sm:$0xff]  }
 0x330   : > { %13934 = vmatpush3.bf16.msra.mxu0 %v18724_v25  ;;  %4756 = vmatmul.mubr.bf16.vlgmr.msra.gmra.mrb[44].mxu1 %v17474_v10  ;;  %v18747_v10 = vld [vmem:[%s21457_s6 + $0x3e8] sm:$0xff]  }
 0x331   : > { %14082 = vmatpush3.bf16.msra.mxu1 %v18548_v42  ;;  %4841 = vmatprep.mubr.bf16.mxu1 %v16780_v56 }
 0x332   : > { %13935 = vmatprep.subr.bf16.mxu0 %v18733_v31  ;;  %14083 = vmatprep.subr.bf16.mxu1 %v18558_v45  ;;  %v4470_v45 = vld [vmem:[#allocation2 + $0x30] sm:$0xf] }
 0x334   : > { %13936 = vmatpush3.bf16.msra.mxu0 %v18740_v28 }
 0x335   : > { %14084 = vmatpush3.bf16.msra.mxu1 %v18567_v39  ;;  %13937 = vmatprep.subr.bf16.mxu0 %v18747_v10 }
 0x336   : > { %v13635_v56 = vpop.f32.mrb[56].mxu0  ;;  %14085 = vmatprep.subr.bf16.mxu1 %v18574_v9  ;;  %v4468_v9 = vld [vmem:[#allocation2 + $0x10] sm:$0xf0] }
 0x337   : > { %v13636_v42 = vpop.f32.mrb[57].mxu0 }
 0x338   : > { %v13637_v46 = vadd.f32 %v13636_v42, %v13635_v56  ;;  %v13638_v63 = vpop.f32.mrb[58].mxu0  ;;  %13938 = vmatpush3.bf16.msra.mxu0 %v18754_v43  ;;  %v4472_v56 = vpack.c.bf16 %v15969_v14, %v4468_v9  ;;  %v4474_v42 = vpack.c.bf16 %v4470_v45, %v4470_v45 }
 0x339   : > { %v13639_v39 = vpop.f32.mrb[59].mxu0  ;;  %14086 = vmatpush3.bf16.msra.mxu1 %v18581_v36  ;;  %13939 = vmatprep.subr.bf16.mxu0 %v18761_v2  ;;  %v18770_v36 = vld [vmem:[%s21457_s6 + $0x3b0] sm:$0xff]  }
 0x33a   : > { %v3763_v26 = vadd.f32 %v13637_v46, %v18636_v23  ;;  %v13640_v33 = vadd.f32 %v13639_v39, %v13638_v63  ;;  %14087 = vmatprep.subr.bf16.mxu1 %v18588_v30  ;;  %v18780_v30 = vld [vmem:[%s21457_s6 + $0x3f8] sm:$0xff]   ;;  %v4481_v23 = vrot.slane %v4474_v42, 2  ;;  %v15974_v46 = vld [vmem:[%s21457_s6 + $0x80] sm:$0xff]  }
 0x33c   : > { %v3764_v27 = vadd.f32 %v13640_v33, %v18640_v44  ;;  %13940 = vmatpush3.bf16.msra.mxu0 %v18770_v36  ;;  %v18774_v8 = vadd.f32 %v18392_v21, %v3763_v26  ;;  %v4480_v44 = vrot.slane %v4472_v56, 2  ;;  %v18788_v21 = vld [vmem:[%s21457_s6 + $0x3b8] sm:$0xff]   ;;  %v15976_v26 = vld [vmem:[%s21457_s6 + $0x88] sm:$0xff]  }
 0x33d   : > { %14088 = vmatpush3.bf16.msra.mxu1 %v18595_v54  ;;  %13941 = vmatprep.subr.bf16.mxu0 %v18780_v30  ;;  %v15973_v54 = vld [vmem:[%s21457_s6 + $0xc0] sm:$0xff]  }
 0x33e   : > { %14089 = vmatprep.subr.bf16.mxu1 %v18604_v38  ;;  %v3807_v45 = vadd.f32 %v18412_v62, %v3764_v27  ;;  %v18796_v38 = vsel %vm682_vm0, %v4480_v44, %v4481_v23  ;;  %v15986_v44 = vld [vmem:[%s21457_s6 + $0xb0] sm:$0xff]  }
 0x340   : > { %13942 = vmatpush3.bf16.msra.mxu0 %v18788_v21 }
 0x341   : > { %14090 = vmatpush3.bf16.msra.mxu1 %v18611_v52  ;;  %13971 = vmatprep.subr.bf16.mxu0 %v15973_v54 }
 0x342   : > { %14091 = vmatprep.subr.bf16.mxu1 %v18618_v12  ;;  %v15975_v12 = vld [vmem:[%s21457_s6 + $0xc8] sm:$0xff]  }
 0x343   : > { %v13789_v27 = vpop.f32.mrb[20].mxu1  ;;  %4521 = vmatmul.mubr.bf16.vlgmr.msra.gmra.mrb[84].mxu0 %v18796_v38 }
 0x344   : > { %v13790_v62 = vpop.f32.mrb[21].mxu1  ;;  %13972 = vmatpush3.bf16.msra.mxu0 %v15974_v46  ;;  %4630 = vmatprep.mubr.bf16.mxu0 %v17105_v13  ;;  %v15977_v13 = vld [vmem:[%s21457_s6 + $0xd0] sm:$0xff]  }
 0x345   : > { %v18804_v52 = vadd.f32 %v13790_v62, %v13789_v27  ;;  %v13792_v63 = vpop.f32.mrb[22].mxu1  ;;  %14092 = vmatpush3.bf16.msra.mxu1 %v18625_v59  ;;  %13973 = vmatprep.subr.bf16.mxu0 %v15975_v12  ;;  %v15978_v59 = vld [vmem:[%s21457_s6 + $0x90] sm:$0xff]   ;;  %v15992_v62 = vld [vmem:[%s21457_s6 + $0x108] sm:$0xff]   ;;  %v15996_v12 = vld [vmem:[%s21457_s6 + $0x118] sm:$0xff]  }
 0x346   : > { %v13793_v39 = vpop.f32.mrb[23].mxu1  ;;  %14093 = vmatprep.subr.bf16.mxu1 %v18632_v41  ;;  %v15979_v41 = vld [vmem:[%s21457_s6 + $0xd8] sm:$0xff]   ;;  %v15994_v46 = vld [vmem:[%s21457_s6 + $0x110] sm:$0xff]  }
 0x347   : > { %v18811_v9 = vadd.f32 %v13793_v39, %v13792_v63  ;;  %v14870_v63 = vld [vmem:[%s21459_s8 + $0x94] ss:$8 sps:$4 sm:$0xff]   ;;  %v14868_v39 = vld [vmem:[%s21459_s8 + $0x90] ss:$8 sps:$4 sm:$0xff]  }
 0x348   : > { %13974 = vmatpush3.bf16.msra.mxu0 %v15976_v26  ;;  %v14873_v26 = vld [vmem:[%s21459_s8 + $0xa4] ss:$8 sps:$4 sm:$0xff]  }
 0x349   : > { %14094 = vmatpush3.bf16.msra.mxu1 %v18645_v55  ;;  %13975 = vmatprep.subr.bf16.mxu0 %v15977_v13  ;;  %v15980_v55 = vld [vmem:[%s21457_s6 + $0x98] sm:$0xff]   ;;  %v21575_v13 = vmov 0  }
 0x34a   : > { %14095 = vmatprep.subr.bf16.mxu1 %v18652_v47  ;;  %v15981_v47 = vld [vmem:[%s21457_s6 + $0xe0] sm:$0xff]  }
 0x34c   : > { %13976 = vmatpush3.bf16.msra.mxu0 %v15978_v59  ;;  %v15999_v59 = vld [vmem:[%s21457_s6 + $0x168] sm:$0xff]  }
 0x34d   : > { %14096 = vmatpush3.bf16.msra.mxu1 %v18659_v0  ;;  %13977 = vmatprep.subr.bf16.mxu0 %v15979_v41  ;;  %v15982_v0 = vld [vmem:[%s21457_s6 + $0xa0] sm:$0xff]  }
 0x34e   : > { %14125 = vmatprep.subr.bf16.mxu1 %v18666_v7  ;;  %v14871_v41 = vld [vmem:[%s21459_s8 + $0xa0] ss:$8 sps:$4 sm:$0xff]  }
 0x350   : > { %13978 = vmatpush3.bf16.msra.mxu0 %v15980_v55  ;;  %4842 = vmatmul.mubr.bf16.vlgmr.msra.gmra.mrb[48].mxu1 %v21563_v20  ;;  %v15983_v20 = vld [vmem:[%s21457_s6 + $0xe8] sm:$0xff]  }
 0x351   : > { %14126 = vmatpush3.bf16.msra.mxu1 %v18677_v22  ;;  %4927 = vmatprep.mubr.bf16.mxu1 %v18271_v53 }
 0x352   : > { %13979 = vmatprep.subr.bf16.mxu0 %v15981_v47  ;;  %14127 = vmatprep.subr.bf16.mxu1 %v18687_v29  ;;  %v15984_v29 = vld [vmem:[%s21457_s6 + $0xa8] sm:$0xff]   ;;  %v14876_v47 = vld [vmem:[%s21459_s8 + $0xb4] ss:$8 sps:$4 sm:$0xff]  }
 0x354   : > { %13980 = vmatpush3.bf16.msra.mxu0 %v15982_v0 }
 0x355   : > { %14128 = vmatpush3.bf16.msra.mxu1 %v18696_v24  ;;  %13981 = vmatprep.subr.bf16.mxu0 %v15983_v20  ;;  %v15985_v24 = vld [vmem:[%s21457_s6 + $0xf0] sm:$0xff]  }
 0x356   : > { %v13679_v53 = vpop.f32.mrb[60].mxu0  ;;  %14129 = vmatprep.subr.bf16.mxu1 %v18703_v50 }
 0x357   : > { %v13680_v7 = vpop.f32.mrb[61].mxu0 }
 0x358   : > { %v13681_v22 = vadd.f32 %v13680_v7, %v13679_v53  ;;  %v13682_v33 = vpop.f32.mrb[62].mxu0  ;;  %13982 = vmatpush3.bf16.msra.mxu0 %v15984_v29  ;;  %v16000_v7 = vld [vmem:[%s21457_s6 + $0x128] sm:$0xff]   ;;  %v14874_v29 = vld [vmem:[%s21459_s8 + $0xb0] ss:$8 sps:$4 sm:$0xff]  }
 0x359   : > { %v13683_v14 = vpop.f32.mrb[63].mxu0  ;;  %14130 = vmatpush3.bf16.msra.mxu1 %v18710_v16  ;;  %13983 = vmatprep.subr.bf16.mxu0 %v15985_v24  ;;  %v15987_v16 = vld [vmem:[%s21457_s6 + $0xf8] sm:$0xff]  }
 0x35a   : > { %v3849_v56 = vadd.f32 %v13681_v22, %v18774_v8  ;;  %v13684_v42 = vadd.f32 %v13683_v14, %v13682_v33  ;;  %14131 = vmatprep.subr.bf16.mxu1 %v18717_v57  ;;  %v15988_v57 = vld [vmem:[%s21457_s6 + $0xb8] sm:$0xff]   ;;  %v16001_v33 = vld [vmem:[%s21457_s6 + $0x170] sm:$0xff]  }
 0x35c   : > { %v3850_v50 = vadd.f32 %v13684_v42, %v3807_v45  ;;  %13984 = vmatpush3.bf16.msra.mxu0 %v15986_v44  ;;  %v18860_v23 = vadd.f32 %v18552_v34, %v3849_v56  ;;  %v15989_v34 = vld [vmem:[%s21457_s6 + $0x140] sm:$0xff]   ;;  %v21574_v45 = vld [vmem:[#allocation32_spill] sm:$0xff] }
 0x35d   : > { %14132 = vmatpush3.bf16.msra.mxu1 %v18724_v25  ;;  %13985 = vmatprep.subr.bf16.mxu0 %v15987_v16  ;;  %v14879_v56 = vld [vmem:[%s21459_s8 + $0xc4] ss:$8 sps:$4 sm:$0xff]   ;;  %v14877_v16 = vld [vmem:[%s21459_s8 + $0xc0] ss:$8 sps:$4 sm:$0xff]  }
 0x35e   : > { %14133 = vmatprep.subr.bf16.mxu1 %v18733_v31  ;;  %v18868_v8 = vadd.f32 %v18562_v49, %v3850_v50  ;;  %v15990_v49 = vld [vmem:[%s21457_s6 + $0x100] sm:$0xff]   ;;  %v16002_v50 = vld [vmem:[%s21457_s6 + $0x130] sm:$0xff]  }
 0x360   : > { %13986 = vmatpush3.bf16.msra.mxu0 %v15988_v57 }
 0x361   : > { %14134 = vmatpush3.bf16.msra.mxu1 %v18740_v28  ;;  %14015 = vmatprep.subr.bf16.mxu0 %v15989_v34  ;;  %v16005_v34 = vld [vmem:[%s21457_s6 + $0x240] sm:$0xff]  }
 0x362   : > { %14135 = vmatprep.subr.bf16.mxu1 %v18747_v10  ;;  %v15991_v10 = vld [vmem:[%s21457_s6 + $0x148] sm:$0xff]  }
 0x363   : > { %v13833_v25 = vpop.f32.mrb[24].mxu1  ;;  %4631 = vmatmul.mubr.bf16.vlgmr.msra.gmra.mrb[88].mxu0 %v17209_v48 }
 0x364   : > { %v13834_v31 = vpop.f32.mrb[25].mxu1  ;;  %14016 = vmatpush3.bf16.msra.mxu0 %v15990_v49  ;;  %4712 = vmatprep.mubr.bf16.mxu0 %v21574_v45  ;;  %v21576_v49 = vld [vmem:[#allocation37_spill] sm:$0xff] }
 0x365   : > { %v18883_v54 = vadd.f32 %v13834_v31, %v13833_v25  ;;  %v13836_v28 = vpop.f32.mrb[26].mxu1  ;;  %14136 = vmatpush3.bf16.msra.mxu1 %v18754_v43  ;;  %14017 = vmatprep.subr.bf16.mxu0 %v15991_v10  ;;  %v15993_v43 = vld [vmem:[%s21457_s6 + $0x150] sm:$0xff]  }
 0x366   : > { %v13837_v27 = vpop.f32.mrb[27].mxu1  ;;  %14137 = vmatprep.subr.bf16.mxu1 %v18761_v2  ;;  %v14867_v2 = vld [vmem:[%s21459_s8 + $0x84] ss:$8 sps:$4 sm:$0xff]   ;;  %v14880_v25 = vld [vmem:[%s21459_s8 + $0xd0] ss:$8 sps:$4 sm:$0xff]  }
 0x367   : > { %v18890_v48 = vadd.f32 %v13837_v27, %v13836_v28  ;;  %v16006_v28 = vld [vmem:[%s21457_s6 + $0x200] sm:$0xff]  }
 0x368   : > { %14018 = vmatpush3.bf16.msra.mxu0 %v15992_v62  ;;  %v16007_v62 = vld [vmem:[%s21457_s6 + $0x248] sm:$0xff]  }
 0x369   : > { %14138 = vmatpush3.bf16.msra.mxu1 %v18770_v36  ;;  %14019 = vmatprep.subr.bf16.mxu0 %v15993_v43  ;;  %v15995_v36 = vld [vmem:[%s21457_s6 + $0x158] sm:$0xff]   ;;  %v14883_v43 = vld [vmem:[%s21459_s8 + $0xe0] ss:$8 sps:$4 sm:$0xff]  }
 0x36a   : > { %14139 = vmatprep.subr.bf16.mxu1 %v18780_v30  ;;  %v14865_v30 = vld [vmem:[%s21459_s8 + $0x80] ss:$8 sps:$4 sm:$0xff]  }
 0x36c   : > { %14020 = vmatpush3.bf16.msra.mxu0 %v15994_v46  ;;  %v14888_v46 = vld [vmem:[%s21459_s8 + $0xf4] ss:$8 sps:$4 sm:$0xff]  }
 0x36d   : > { %14140 = vmatpush3.bf16.msra.mxu1 %v18788_v21  ;;  %14021 = vmatprep.subr.bf16.mxu0 %v15995_v36  ;;  %v15997_v21 = vld [vmem:[%s21457_s6 + $0x160] sm:$0xff]   ;;  %v16008_v36 = vld [vmem:[%s21457_s6 + $0x208] sm:$0xff]  }
 0x36e   : > { %5150 = vmatprep.subr.bf16.mxu1 %v14867_v2 }
 0x370   : > { %14022 = vmatpush3.bf16.msra.mxu0 %v15996_v12  ;;  %4928 = vmatmul.mubr.bf16.vlgmr.msra.gmra.mrb[52].mxu1 %v18459_v32  ;;  %v15998_v32 = vld [vmem:[%s21457_s6 + $0x120] sm:$0xff]  }
 0x371   : > { %14023 = vmatprep.subr.bf16.mxu0 %v15997_v21  ;;  %5151 = vmatpush1.bf16.msra.mxu1 %v14865_v30  ;;  %v16009_v30 = vld [vmem:[%s21457_s6 + $0x250] sm:$0xff]   ;;  %v14891_v12 = vld [vmem:[%s21459_s8 + $0x4] ss:$8 sps:$4 sm:$0xff]  }
 0x372   : > { %5152 = vmatprep.subr.bf16.mxu1 %v14870_v63  ;;  %5182 = vmatprep.mubr.bf16.mxu1 %v21575_v13  ;;  %v14886_v63 = vld [vmem:[%s21459_s8 + $0xf0] ss:$8 sps:$4 sm:$0xff]  }
 0x373   : > { %v16010_v21 = vld [vmem:[%s21457_s6 + $0x210] sm:$0xff]  }
 0x374   : > { %14024 = vmatpush3.bf16.msra.mxu0 %v15998_v32  ;;  %v16013_v32 = vld [vmem:[%s21457_s6 + $0x260] sm:$0xff]  }
 0x375   : > { %14025 = vmatprep.subr.bf16.mxu0 %v15999_v59  ;;  %5153 = vmatpush1.bf16.msra.mxu1 %v14868_v39  ;;  %v16011_v39 = vld [vmem:[%s21457_s6 + $0x258] sm:$0xff]   ;;  %v16014_v59 = vld [vmem:[%s21457_s6 + $0x220] sm:$0xff]  }
 0x376   : > { %v13723_v55 = vpop.f32.mrb[64].mxu0  ;;  %5154 = vmatprep.subr.bf16.mxu1 %v14873_v26  ;;  %v16012_v26 = vld [vmem:[%s21457_s6 + $0x218] sm:$0xff]  }
 0x377   : > { %v13724_v0 = vpop.f32.mrb[65].mxu0 }
 0x378   : > { %v13725_v20 = vadd.f32 %v13724_v0, %v13723_v55  ;;  %v13726_v53 = vpop.f32.mrb[66].mxu0  ;;  %14026 = vmatpush3.bf16.msra.mxu0 %v16000_v7 }
 0x379   : > { %v13727_v22 = vpop.f32.mrb[67].mxu0  ;;  %14027 = vmatprep.subr.bf16.mxu0 %v16001_v33  ;;  %5155 = vmatpush1.bf16.msra.mxu1 %v14871_v41  ;;  %v16015_v41 = vld [vmem:[%s21457_s6 + $0x268] sm:$0xff]  }
 0x37a   : > { %v3985_v14 = vadd.f32 %v13725_v20, %v18860_v23  ;;  %v13728_v24 = vadd.f32 %v13727_v22, %v13726_v53  ;;  %5156 = vmatprep.subr.bf16.mxu1 %v14876_v47  ;;  %v16003_v23 = vld [vmem:[%s21457_s6 + $0x178] sm:$0xff]   ;;  %v16016_v53 = vld [vmem:[%s21457_s6 + $0x228] sm:$0xff]   ;;  %v16017_v22 = vld [vmem:[%s21457_s6 + $0x270] sm:$0xff]  }
 0x37c   : > { %v3986_v42 = vadd.f32 %v13728_v24, %v18868_v8  ;;  %14028 = vmatpush3.bf16.msra.mxu0 %v16002_v50  ;;  %v18960_v44 = vadd.f32 %v18681_v1, %v3985_v14  ;;  %v14882_v8 = vld [vmem:[%s21459_s8 + $0xd4] ss:$8 sps:$4 sm:$0xff]  }
 0x37d   : > { %14029 = vmatprep.subr.bf16.mxu0 %v16003_v23  ;;  %5157 = vmatpush1.bf16.msra.mxu1 %v14874_v29  ;;  %v16004_v1 = vld [vmem:[%s21457_s6 + $0x138] sm:$0xff]  }
 0x37e   : > { %5158 = vmatprep.subr.bf16.mxu1 %v14879_v56  ;;  %v4029_v57 = vadd.f32 %v18691_v58, %v3986_v42  ;;  %v14885_v58 = vld [vmem:[%s21459_s8 + $0xe4] ss:$8 sps:$4 sm:$0xff]   ;;  %v16018_v56 = vld [vmem:[%s21457_s6 + $0x230] sm:$0xff]   ;;  %v16019_v42 = vld [vmem:[%s21457_s6 + $0x278] sm:$0xff]  }
 0x380   : > { %14030 = vmatpush3.bf16.msra.mxu0 %v16004_v1  ;;  %v14889_v1 = vld [vmem:[%s21459_s8] ss:$8 sps:$4 sm:$0xff]  }
 0x381   : > { %14059 = vmatprep.subr.bf16.mxu0 %v16005_v34  ;;  %5159 = vmatpush1.bf16.msra.mxu1 %v14877_v16 }
 0x382   : > { %5160 = vmatprep.subr.bf16.mxu1 %v14882_v8  ;;  %v16021_v8 = vld [vmem:[%s21457_s6 + $0x340] sm:$0xff]  }
 0x383   : > { %v13877_v31 = vpop.f32.mrb[28].mxu1  ;;  %4713 = vmatmul.mubr.bf16.vlgmr.msra.gmra.mrb[92].mxu0 %v21576_v49 }
 0x384   : > { %v13878_v45 = vpop.f32.mrb[29].mxu1  ;;  %14060 = vmatpush3.bf16.msra.mxu0 %v16006_v28  ;;  %4798 = vmatprep.mubr.bf16.mxu0 %v21573_v6 }
 0x385   : > { %v18989_v10 = vadd.f32 %v13878_v45, %v13877_v31  ;;  %v13880_v27 = vpop.f32.mrb[30].mxu1  ;;  %14061 = vmatprep.subr.bf16.mxu0 %v16007_v62  ;;  %5161 = vmatpush1.bf16.msra.mxu1 %v14880_v25  ;;  %v14894_v25 = vld [vmem:[%s21459_s8 + $0x14] ss:$8 sps:$4 sm:$0xff]   ;;  %v16022_v31 = vld [vmem:[%s21457_s6 + $0x300] sm:$0xff]  }
 0x386   : > { %v13881_v2 = vpop.f32.mrb[31].mxu1  ;;  %5162 = vmatprep.subr.bf16.mxu1 %v14885_v58 }
 0x387   : > { %v19000_v6 = vadd.f32 %v13881_v2, %v13880_v27  ;;  %v14892_v27 = vld [vmem:[%s21459_s8 + $0x10] ss:$8 sps:$4 sm:$0xff]  }
 0x388   : > { %14062 = vmatpush3.bf16.msra.mxu0 %v16008_v36  ;;  %v16025_v2 = vld [vmem:[%s21457_s6 + $0x350] sm:$0xff]  }
 0x389   : > { %14063 = vmatprep.subr.bf16.mxu0 %v16009_v30  ;;  %5163 = vmatpush1.bf16.msra.mxu1 %v14883_v43  ;;  %v16024_v43 = vld [vmem:[%s21457_s6 + $0x308] sm:$0xff]   ;;  %v14900_v36 = vld [vmem:[%s21459_s8 + $0x34] ss:$8 sps:$4 sm:$0xff]  }
 0x38a   : > { %5164 = vmatprep.subr.bf16.mxu1 %v14888_v46  ;;  %v14895_v46 = vld [vmem:[%s21459_s8 + $0x20] ss:$8 sps:$4 sm:$0xff]   ;;  %v4941_v30 = vld [vmem:[#allocation2 + $0x38] sm:$0x1f] }
 0x38c   : > { %14064 = vmatpush3.bf16.msra.mxu0 %v16010_v21  ;;  %v14898_v21 = vld [vmem:[%s21459_s8 + $0x30] ss:$8 sps:$4 sm:$0xff]  }
 0x38d   : > { %14065 = vmatprep.subr.bf16.mxu0 %v16011_v39  ;;  %5165 = vmatpush1.bf16.msra.mxu1 %v14886_v63  ;;  %v16026_v63 = vld [vmem:[%s21457_s6 + $0x310] sm:$0xff]   ;;  %v4939_v39 = vld [vmem:[#allocation2 + $0x18] sm:$0xe0] }
 0x38e   : > { %5273 = vmatprep.subr.bf16.mxu1 %v14891_v12  ;;  %v16027_v12 = vld [vmem:[%s21457_s6 + $0x358] sm:$0xff]  }
 0x390   : > { %14066 = vmatpush3.bf16.msra.mxu0 %v16012_v26  ;;  %v4947_v26 = vmul.f32 %v4941_v30, %v16512_v40 }
 0x391   : > { %14067 = vmatprep.subr.bf16.mxu0 %v16013_v32  ;;  %v14903_v32 = vld [vmem:[%s21459_s8 + $0x44] ss:$8 sps:$4 sm:$0xff]  }
 0x394   : > { %14068 = vmatpush3.bf16.msra.mxu0 %v16014_v59  ;;  %v16028_v59 = vld [vmem:[%s21457_s6 + $0x318] sm:$0xff]  }
 0x395   : > { %14069 = vmatprep.subr.bf16.mxu0 %v16015_v41  ;;  %v16029_v41 = vld [vmem:[%s21457_s6 + $0x360] sm:$0xff]  }
 0x396   : > { %v13767_v55 = vpop.f32.mrb[68].mxu0 }
 0x397   : > { %v13768_v47 = vpop.f32.mrb[69].mxu0 }
 0x398   : > { %v13769_v0 = vadd.f32 %v13768_v47, %v13767_v55  ;;  %v13770_v20 = vpop.f32.mrb[70].mxu0  ;;  %14070 = vmatpush3.bf16.msra.mxu0 %v16016_v53  ;;  %v4943_v55 = vmul.f32 %v4939_v39, %v16507_v35  ;;  %v14901_v47 = vld [vmem:[%s21459_s8 + $0x40] ss:$8 sps:$4 sm:$0xff]  }
 0x399   : > { %v13771_v7 = vpop.f32.mrb[71].mxu0  ;;  %14071 = vmatprep.subr.bf16.mxu0 %v16017_v22  ;;  %v21577_v53 = vld [vmem:[#allocation24_spill] sm:$0xff]  ;;  %v16030_v22 = vld [vmem:[%s21457_s6 + $0x320] sm:$0xff]  }
 0x39a   : > { %v4113_v33 = vadd.f32 %v13769_v0, %v18960_v44  ;;  %v13772_v29 = vadd.f32 %v13771_v7, %v13770_v20  ;;  %v16020_v44 = vld [vmem:[%s21457_s6 + $0x238] sm:$0xff]   ;;  %v4951_v0 = vpack.c.bf16 %v4947_v26, %v4947_v26  ;;  %v4949_v7 = vpack.c.bf16 %v21577_v53, %v4943_v55 }
 0x39b   : > { %v14906_v20 = vld [vmem:[%s21459_s8 + $0x54] ss:$8 sps:$4 sm:$0xff]  }
 0x39c   : > { %v4115_v14 = vadd.f32 %v18500_v18, %v4113_v33  ;;  %v4114_v24 = vadd.f32 %v13772_v29, %v4029_v57  ;;  %14072 = vmatpush3.bf16.msra.mxu0 %v16018_v56  ;;  %v16031_v33 = vld [vmem:[%s21457_s6 + $0x368] sm:$0xff]  }
 0x39d   : > { %14073 = vmatprep.subr.bf16.mxu0 %v16019_v42  ;;  %v14909_v42 = vld [vmem:[%s21459_s8 + $0x64] ss:$8 sps:$4 sm:$0xff]  }
 0x39e   : > { %v4116_v50 = vadd.f32 %v18500_v18, %v4114_v24  ;;  %v4117_v23 = vmax.f32 %v4115_v14, 0.0  ;;  %v14904_v14 = vld [vmem:[%s21459_s8 + $0x50] ss:$8 sps:$4 sm:$0xff]   ;;  %v4978_v24 = vshrl.u32 %v4951_v0, 16 }
 0x3a0   : > { %v4118_v16 = vmax.f32 %v4116_v50, 0.0  ;;  %14074 = vmatpush3.bf16.msra.mxu0 %v16020_v44  ;;  %v4970_v50 = vshrl.u32 %v4949_v7, 16 }
 0x3a1   : > { %14103 = vmatprep.subr.bf16.mxu0 %v16021_v8 }
 0x3a2   : > { %v5052_v57 = vpack.c.bf16 %v4118_v16, %v4117_v23  ;;  %v4973_v23 = vshll.u32 %v4949_v7, 16  ;;  %v4981_v16 = vshll.u32 %v4951_v0, 16  ;;  %v4940_v7 = vld [vmem:[#allocation2 + $0x30] sm:$0x1f] }
 0x3a3   : > { %v13921_v34 = vpop.f32.mrb[32].mxu1  ;;  %4799 = vmatmul.mubr.bf16.vlgmr.msra.gmra.mrb[96].mxu0 %v17620_v5  ;;  %v16023_v5 = vld [vmem:[%s21457_s6 + $0x348] sm:$0xff]  }
 0x3a4   : > { %v13922_v58 = vpop.f32.mrb[33].mxu1  ;;  %14104 = vmatpush3.bf16.msra.mxu0 %v16022_v31  ;;  %4884 = vmatprep.mubr.bf16.mxu0 %v18672_v11  ;;  %v14897_v11 = vld [vmem:[%s21459_s8 + $0x24] ss:$8 sps:$4 sm:$0xff]   ;;  %v14907_v31 = vld [vmem:[%s21459_s8 + $0x60] ss:$8 sps:$4 sm:$0xff]  }
 0x3a5   : > { %v19064_v49 = vadd.f32 %v13922_v58, %v13921_v34  ;;  %5183 = vmatmul.mubr.bf16.vlgmr.msra.gmra.mrb[56].mxu1 %v5052_v57  ;;  %v13924_v45 = vpop.f32.mrb[34].mxu1  ;;  %14105 = vmatprep.subr.bf16.mxu0 %v16023_v5  ;;  %v16032_v57 = vld [vmem:[%s21457_s6 + $0x328] sm:$0xff]   ;;  %v16033_v34 = vld [vmem:[%s21457_s6 + $0x370] sm:$0xff]   ;;  %v4972_v5 = vrot.slane %v4970_v50, 2 }
 0x3a6   : > { %5274 = vmatpush1.bf16.msra.mxu1 %v14889_v1  ;;  %v13925_v28 = vpop.f32.mrb[35].mxu1  ;;  %5305 = vmatprep.mubr.bf16.mxu1 %v21575_v13 }
 0x3a7   : > { %v19073_v62 = vadd.f32 %v13925_v28, %v13924_v45  ;;  %5275 = vmatprep.subr.bf16.mxu1 %v14894_v25  ;;  %v14912_v45 = vld [vmem:[%s21459_s8 + $0x74] ss:$8 sps:$4 sm:$0xff]   ;;  %v4975_v28 = vrot.slane %v4973_v23, 3 }
 0x3a8   : > { %14106 = vmatpush3.bf16.msra.mxu0 %v16024_v43 }
 0x3a9   : > { %14107 = vmatprep.subr.bf16.mxu0 %v16025_v2  ;;  %v4976_v30 = vor.u32 %v4975_v28, %v4972_v5 }
 0x3aa   : > { %5276 = vmatpush1.bf16.msra.mxu1 %v14892_v27  ;;  %v4980_v27 = vrot.slane %v4978_v24, 2 }
 0x3ab   : > { %5277 = vmatprep.subr.bf16.mxu1 %v14897_v11  ;;  %v4983_v11 = vrot.slane %v4981_v16, 3  ;;  %v14928_v16 = vld [vmem:[%s21459_s8 + $0x150] ss:$8 sps:$4 sm:$0xff]  }
 0x3ac   : > { %14108 = vmatpush3.bf16.msra.mxu0 %v16026_v63 }
 0x3ad   : > { %14109 = vmatprep.subr.bf16.mxu0 %v16027_v12  ;;  %v4984_v63 = vor.u32 %v4983_v11, %v4980_v27  ;;  %v16036_v12 = vld [vmem:[%s21457_s6 + $0x338] sm:$0xff]   ;;  %v14931_v27 = vld [vmem:[%s21459_s8 + $0x160] ss:$8 sps:$4 sm:$0xff]  }
 0x3ae   : > { %5278 = vmatpush1.bf16.msra.mxu1 %v14895_v46  ;;  %v16035_v46 = vld [vmem:[%s21457_s6 + $0x378] sm:$0xff]  }
 0x3af   : > { %5279 = vmatprep.subr.bf16.mxu1 %v14900_v36  ;;  %v14910_v36 = vld [vmem:[%s21459_s8 + $0x70] ss:$8 sps:$4 sm:$0xff]   ;;  %v4985_v26 = vsel %vm3685_vm9, %v4976_v30, %v4984_v63  ;;  %v14936_v11 = vld [vmem:[%s21459_s8 + $0x174] ss:$8 sps:$4 sm:$0xff]  }
 0x3b0   : > { %14110 = vmatpush3.bf16.msra.mxu0 %v16028_v59 }
 0x3b1   : > { %14111 = vmatprep.subr.bf16.mxu0 %v16029_v41  ;;  %v16038_v41 = vld [vmem:[%s21457_s6 + $0x400] sm:$0xff]  }
 0x3b2   : > { %5280 = vmatpush1.bf16.msra.mxu1 %v14898_v21  ;;  %v16037_v21 = vld [vmem:[%s21457_s6 + $0x440] sm:$0xff]  }
 0x3b3   : > { %5281 = vmatprep.subr.bf16.mxu1 %v14903_v32  ;;  %v14918_v32 = vld [vmem:[%s21459_s8 + $0x114] ss:$8 sps:$4 sm:$0xff]  }
 0x3b4   : > { %14112 = vmatpush3.bf16.msra.mxu0 %v16030_v22  ;;  %v14919_v22 = vld [vmem:[%s21459_s8 + $0x120] ss:$8 sps:$4 sm:$0xff]  }
 0x3b5   : > { %14113 = vmatprep.subr.bf16.mxu0 %v16031_v33  ;;  %v14924_v33 = vld [vmem:[%s21459_s8 + $0x134] ss:$8 sps:$4 sm:$0xff]  }
 0x3b6   : > { %5282 = vmatpush1.bf16.msra.mxu1 %v14901_v47  ;;  %v13811_v29 = vpop.f32.mrb[72].mxu0 }
 0x3b7   : > { %v13812_v56 = vpop.f32.mrb[73].mxu0  ;;  %5283 = vmatprep.subr.bf16.mxu1 %v14906_v20  ;;  %v14916_v20 = vld [vmem:[%s21459_s8 + $0x110] ss:$8 sps:$4 sm:$0xff]  }
 0x3b8   : > { %v13813_v44 = vadd.f32 %v13812_v56, %v13811_v29  ;;  %v13814_v8 = vpop.f32.mrb[74].mxu0  ;;  %14114 = vmatpush3.bf16.msra.mxu0 %v16032_v57  ;;  %v4938_v29 = vld [vmem:[#allocation2 + $0x10] sm:$0xe0] }
 0x3b9   : > { %v13815_v1 = vpop.f32.mrb[75].mxu0  ;;  %14115 = vmatprep.subr.bf16.mxu0 %v16033_v34  ;;  %v4942_v24 = vmul.f32 %v4938_v29, %v16507_v35  ;;  %v21580_v34 = vld [vmem:[#allocation34_spill] sm:$0xff] }
 0x3ba   : > { %v4195_v25 = vadd.f32 %v13813_v44, %v18804_v52  ;;  %5284 = vmatpush1.bf16.msra.mxu1 %v14904_v14  ;;  %v13816_v58 = vadd.f32 %v13815_v1, %v13814_v8  ;;  %v16034_v52 = vld [vmem:[%s21457_s6 + $0x330] sm:$0xff]   ;;  %v14927_v14 = vld [vmem:[%s21459_s8 + $0x144] ss:$8 sps:$4 sm:$0xff]  }
 0x3bb   : > { %5285 = vmatprep.subr.bf16.mxu1 %v14909_v42  ;;  %v14930_v42 = vld [vmem:[%s21459_s8 + $0x154] ss:$8 sps:$4 sm:$0xff]   ;;  %v14933_v8 = vld [vmem:[%s21459_s8 + $0x164] ss:$8 sps:$4 sm:$0xff]  }
 0x3bc   : > { %v4198_v43 = vadd.f32 %v13816_v58, %v18811_v9  ;;  %14116 = vmatpush3.bf16.msra.mxu0 %v16034_v52  ;;  %v19147_v2 = vadd.f32 %v18883_v54, %v4195_v25  ;;  %v14915_v54 = vld [vmem:[%s21459_s8 + $0x104] ss:$8 sps:$4 sm:$0xff]   ;;  %v21579_v1 = vld [vmem:[#allocation33_spill] sm:$0xff] }
 0x3bd   : > { %14117 = vmatprep.subr.bf16.mxu0 %v16035_v46  ;;  %v21581_v52 = vld [vmem:[#allocation35_spill] sm:$0xff] }
 0x3be   : > { %5286 = vmatpush1.bf16.msra.mxu1 %v14907_v31  ;;  %v19156_v9 = vadd.f32 %v18890_v48, %v4198_v43  ;;  %v14913_v48 = vld [vmem:[%s21459_s8 + $0x100] ss:$8 sps:$4 sm:$0xff]  }
 0x3bf   : > { %5287 = vmatprep.subr.bf16.mxu1 %v14912_v45 }
 0x3c0   : > { %14118 = vmatpush3.bf16.msra.mxu0 %v16036_v12  ;;  %v21583_v12 = vld [vmem:[#allocation26_spill] sm:$0xff] }
 0x3c1   : > { %14147 = vmatprep.subr.bf16.mxu0 %v16037_v21 }
 0x3c2   : > { %5288 = vmatpush1.bf16.msra.mxu1 %v14910_v36 }
 0x3c3   : > { %v13965_v39 = vpop.f32.mrb[36].mxu1  ;;  %4885 = vmatmul.mubr.bf16.vlgmr.msra.gmra.mrb[100].mxu0 %v18796_v38  ;;  %5414 = vmatprep.subr.bf16.mxu1 %v14915_v54  ;;  %v16039_v38 = vld [vmem:[%s21457_s6 + $0x448] sm:$0xff]   ;;  %v14934_v54 = vld [vmem:[%s21459_s8 + $0x170] ss:$8 sps:$4 sm:$0xff]  }
 0x3c4   : > { %v13966_v59 = vpop.f32.mrb[37].mxu1  ;;  %14148 = vmatpush3.bf16.msra.mxu0 %v16038_v41  ;;  %5020 = vmatprep.mubr.bf16.mxu0 %v4985_v26 }
 0x3c5   : > { %5306 = vmatmul.mubr.bf16.vlgmr.msra.gmra.mrb[56].mxu1 %v18541_v4  ;;  %v19179_v55 = vadd.f32 %v13966_v59, %v13965_v39  ;;  %v13968_v47 = vpop.f32.mrb[38].mxu1  ;;  %14149 = vmatprep.subr.bf16.mxu0 %v16039_v38  ;;  %v14921_v4 = vld [vmem:[%s21459_s8 + $0x124] ss:$8 sps:$4 sm:$0xff]  }
 0x3c6   : > { %v13969_v0 = vpop.f32.mrb[39].mxu1  ;;  %5415 = vmatpush1.bf16.msra.mxu1 %v14913_v48  ;;  %5446 = vmatprep.mubr.bf16.mxu1 %v21575_v13 }
 0x3c7   : > { %v19188_v53 = vadd.f32 %v13969_v0, %v13968_v47  ;;  %5416 = vmatprep.subr.bf16.mxu1 %v14918_v32 }
 0x3c8   : > { %14150 = vmatpush3.bf16.msra.mxu0 %v18291_v19  ;;  %v4946_v19 = vmul.f32 %v4940_v7, %v16512_v40  ;;  %v14925_v40 = vld [vmem:[%s21459_s8 + $0x140] ss:$8 sps:$4 sm:$0xff]  }
 0x3c9   : > { %14151 = vmatprep.subr.bf16.mxu0 %v18303_v51  ;;  %v14922_v51 = vld [vmem:[%s21459_s8 + $0x130] ss:$8 sps:$4 sm:$0xff]  }
 0x3ca   : > { %5417 = vmatpush1.bf16.msra.mxu1 %v14916_v20 }
 0x3cb   : > { %5418 = vmatprep.subr.bf16.mxu1 %v14921_v4 }
 0x3cc   : > { %14152 = vmatpush3.bf16.msra.mxu0 %v18315_v17  ;;  %v4950_v17 = vpack.c.bf16 %v4946_v19, %v4946_v19 }
 0x3cd   : > { %14153 = vmatprep.subr.bf16.mxu0 %v18330_v37  ;;  %v21578_v37 = vld [vmem:[#allocation25_spill] sm:$0xff] }
 0x3ce   : > { %5419 = vmatpush1.bf16.msra.mxu1 %v14919_v22  ;;  %v4948_v56 = vpack.c.bf16 %v21578_v37, %v4942_v24  ;;  %v4961_v35 = vshrl.u32 %v4950_v17, 16 }
 0x3cf   : > { %5420 = vmatprep.subr.bf16.mxu1 %v14924_v33 }
 0x3d0   : > { %14154 = vmatpush3.bf16.msra.mxu0 %v18345_v61  ;;  %v4964_v61 = vshll.u32 %v4950_v17, 16  ;;  %v4953_v50 = vshrl.u32 %v4948_v56, 16  ;;  %v4956_v23 = vshll.u32 %v4948_v56, 16  ;;  %v4963_v25 = vrot.slane %v4961_v35, 2 }
 0x3d1   : > { %14155 = vmatprep.subr.bf16.mxu0 %v18357_v60 }
 0x3d2   : > { %5421 = vmatpush1.bf16.msra.mxu1 %v14922_v51  ;;  %v4966_v58 = vrot.slane %v4964_v61, 3  ;;  %v4955_v5 = vrot.slane %v4953_v50, 2  ;;  %v4958_v28 = vrot.slane %v4956_v23, 3 }
 0x3d3   : > { %5422 = vmatprep.subr.bf16.mxu1 %v14927_v14 }
 0x3d4   : > { %14156 = vmatpush3.bf16.msra.mxu0 %v18369_v15  ;;  %v4959_v36 = vor.u32 %v4958_v28, %v4955_v5  ;;  %v4967_v30 = vor.u32 %v4966_v58, %v4963_v25  ;;  %v14948_v5 = vld [vmem:[%s21459_s8 + $0x1b4] ss:$8 sps:$4 sm:$0xff]   ;;  %v14946_v28 = vld [vmem:[%s21459_s8 + $0x1b0] ss:$8 sps:$4 sm:$0xff]  }
 0x3d5   : > { %14157 = vmatprep.subr.bf16.mxu0 %v18381_v3 }
 0x3d6   : > { %v13855_v60 = vpop.f32.mrb[76].mxu0  ;;  %5423 = vmatpush1.bf16.msra.mxu1 %v14925_v40 }
 0x3d7   : > { %v13856_v44 = vpop.f32.mrb[77].mxu0  ;;  %5424 = vmatprep.subr.bf16.mxu1 %v14930_v42 }
 0x3d8   : > { %v13857_v57 = vadd.f32 %v13856_v44, %v13855_v60  ;;  %v13858_v15 = vpop.f32.mrb[78].mxu0  ;;  %14158 = vmatpush3.bf16.msra.mxu0 %v21579_v1 }
 0x3d9   : > { %v13859_v3 = vpop.f32.mrb[79].mxu0  ;;  %14159 = vmatprep.subr.bf16.mxu0 %v21580_v34 }
 0x3da   : > { %v4285_v31 = vadd.f32 %v13857_v57, %v19147_v2  ;;  %v13860_v45 = vadd.f32 %v13859_v3, %v13858_v15  ;;  %5425 = vmatpush1.bf16.msra.mxu1 %v14928_v16  ;;  %v21582_v2 = vld [vmem:[#allocation36_spill] sm:$0xff]  ;;  %v14942_v3 = vld [vmem:[%s21459_s8 + $0x194] ss:$8 sps:$4 sm:$0xff]  }
 0x3db   : > { %5426 = vmatprep.subr.bf16.mxu1 %v14933_v8  ;;  %v14937_v15 = vld [vmem:[%s21459_s8 + $0x180] ss:$8 sps:$4 sm:$0xff]  }
 0x3dc   : > { %v4286_v43 = vadd.f32 %v13860_v45, %v19156_v9  ;;  %14160 = vmatpush3.bf16.msra.mxu0 %v21581_v52  ;;  %v4328_v46 = vadd.f32 %v18989_v10, %v4285_v31  ;;  %v4968_v9 = vsel %vm3685_vm9, %v4959_v36, %v4967_v30  ;;  %v14945_v31 = vld [vmem:[%s21459_s8 + $0x1a4] ss:$8 sps:$4 sm:$0xff]   ;;  %v14943_v45 = vld [vmem:[%s21459_s8 + $0x1a0] ss:$8 sps:$4 sm:$0xff]  }
 0x3dd   : > { %14161 = vmatprep.subr.bf16.mxu0 %v21582_v2 }
 0x3de   : > { %v4329_v63 = vadd.f32 %v19000_v6, %v4286_v43  ;;  %5427 = vmatpush1.bf16.msra.mxu1 %v14931_v27  ;;  %v14951_v27 = vld [vmem:[%s21459_s8 + $0x1c4] ss:$8 sps:$4 sm:$0xff]  }
 0x3df   : > { %5428 = vmatprep.subr.bf16.mxu1 %v14936_v11  ;;  %v14949_v11 = vld [vmem:[%s21459_s8 + $0x1c0] ss:$8 sps:$4 sm:$0xff]  }
 0x3e0   : > { %14162 = vmatpush3.bf16.msra.mxu0 %v21583_v12  ;;  %v14952_v12 = vld [vmem:[%s21459_s8 + $0x1d0] ss:$8 sps:$4 sm:$0xff]  }
 0x3e2   : > { %5429 = vmatpush1.bf16.msra.mxu1 %v14934_v54 }
 0x3e3   : > { %v14009_v21 = vpop.f32.mrb[40].mxu1  ;;  %5021 = vmatmul.mubr.bf16.vlgmr.msra.gmra.mrb[104].mxu0 %v4968_v9  ;;  %v14954_v9 = vld [vmem:[%s21459_s8 + $0x1d4] ss:$8 sps:$4 sm:$0xff]  }
 0x3e4   : > { %v14010_v10 = vpop.f32.mrb[41].mxu1 }
 0x3e5   : > { %v19247_v48 = vadd.f32 %v14010_v10, %v14009_v21  ;;  %v14012_v39 = vpop.f32.mrb[42].mxu1  ;;  %v14955_v21 = vld [vmem:[%s21459_s8 + $0x1e0] ss:$8 sps:$4 sm:$0xff]   ;;  %v14957_v10 = vld [vmem:[%s21459_s8 + $0x1e4] ss:$8 sps:$4 sm:$0xff]  }
 0x3e6   : > { %v14013_v26 = vpop.f32.mrb[43].mxu1 }
 0x3e7   : > { %v19249_v32 = vadd.f32 %v14013_v26, %v14012_v39  ;;  %v14960_v39 = vld [vmem:[%s21459_s8 + $0x1f4] ss:$8 sps:$4 sm:$0xff]  }
 0x3f6   : > { %v13899_v6 = vpop.f32.mrb[80].mxu0 }
 0x3f7   : > { %v13900_v59 = vpop.f32.mrb[81].mxu0 }
 0x3f8   : > { %v13901_v41 = vadd.f32 %v13900_v59, %v13899_v6  ;;  %v13902_v47 = vpop.f32.mrb[82].mxu0  ;;  %v14963_v6 = vld [vmem:[%s21461_s10 + $0x104] ss:$8 sps:$4 sm:$0xff]  }
 0x3f9   : > { %v13903_v38 = vpop.f32.mrb[83].mxu0  ;;  %5911 = vmatprep.subr.bf16.mxu0 %v14963_v6 }
 0x3fa   : > { %v4371_v0 = vadd.f32 %v13901_v41, %v4328_v46  ;;  %v13904_v20 = vadd.f32 %v13903_v38, %v13902_v47  ;;  %v14958_v47 = vld [vmem:[%s21459_s8 + $0x1f0] ss:$8 sps:$4 sm:$0xff]   ;;  %v14966_v38 = vld [vmem:[%s21461_s10 + $0x114] ss:$8 sps:$4 sm:$0xff]  }
 0x3fc   : > { %v4372_v4 = vadd.f32 %v13904_v20, %v4329_v63  ;;  %v4466_v7 = vadd.f32 %v19064_v49, %v4371_v0  ;;  %v14988_v20 = vld [vmem:[%s21463_s12 + $0xc0] sm:$0xff]  }
 0x3fe   : > { %v4467_v22 = vadd.f32 %v19073_v62, %v4372_v4  ;;  %v14939_v62 = vld [vmem:[%s21459_s8 + $0x184] ss:$8 sps:$4 sm:$0xff]  }
 0x3ff   : > { %5559 = vmatprep.subr.bf16.mxu1 %v14939_v62 }
 0x403   : > { %v14053_v33 = vpop.f32.mrb[44].mxu1 }
 0x404   : > { %v14054_v29 = vpop.f32.mrb[45].mxu1 }
 0x405   : > { %v19253_v19 = vadd.f32 %v14054_v29, %v14053_v33  ;;  %v14056_v51 = vpop.f32.mrb[46].mxu1  ;;  %v14967_v33 = vld [vmem:[%s21461_s10 + $0x120] ss:$8 sps:$4 sm:$0xff]   ;;  %v14972_v29 = vld [vmem:[%s21461_s10 + $0x134] ss:$8 sps:$4 sm:$0xff]  }
 0x406   : > { %v14057_v14 = vpop.f32.mrb[47].mxu1 }
 0x407   : > { %v19255_v24 = vadd.f32 %v14057_v14, %v14056_v51  ;;  %v14970_v51 = vld [vmem:[%s21461_s10 + $0x130] ss:$8 sps:$4 sm:$0xff]   ;;  %v14975_v14 = vld [vmem:[%s21461_s10 + $0x144] ss:$8 sps:$4 sm:$0xff]  }
 0x416   : > { %v13943_v17 = vpop.f32.mrb[84].mxu0 }
 0x417   : > { %v13944_v37 = vpop.f32.mrb[85].mxu0 }
 0x418   : > { %v13945_v56 = vadd.f32 %v13944_v37, %v13943_v17  ;;  %v13946_v40 = vpop.f32.mrb[86].mxu0  ;;  %v14973_v17 = vld [vmem:[%s21461_s10 + $0x140] ss:$8 sps:$4 sm:$0xff]   ;;  %v14978_v37 = vld [vmem:[%s21461_s10 + $0x154] ss:$8 sps:$4 sm:$0xff]  }
 0x419   : > { %v13947_v42 = vpop.f32.mrb[87].mxu0 }
 0x41a   : > { %v4529_v35 = vadd.f32 %v13945_v56, %v4466_v7  ;;  %v13948_v61 = vadd.f32 %v13947_v42, %v13946_v40  ;;  %v14964_v7 = vld [vmem:[%s21461_s10 + $0x110] ss:$8 sps:$4 sm:$0xff]  }
 0x41b   : > { %v14976_v42 = vld [vmem:[%s21461_s10 + $0x150] ss:$8 sps:$4 sm:$0xff]  }
 0x41c   : > { %v4592_v60 = vadd.f32 %v19179_v55, %v4529_v35  ;;  %v4530_v49 = vadd.f32 %v13948_v61, %v4467_v22  ;;  %v14969_v22 = vld [vmem:[%s21461_s10 + $0x124] ss:$8 sps:$4 sm:$0xff]  }
 0x41e   : > { %v4594_v50 = vadd.f32 %v18500_v18, %v4592_v60  ;;  %v4593_v23 = vadd.f32 %v19188_v53, %v4530_v49  ;;  %v14981_v60 = vld [vmem:[%s21461_s10 + $0x164] ss:$8 sps:$4 sm:$0xff]  }
 0x420   : > { %v4595_v16 = vadd.f32 %v18500_v18, %v4593_v23  ;;  %v4596_v44 = vmax.f32 %v4594_v50, 0.0  ;;  %v14940_v18 = vld [vmem:[%s21459_s8 + $0x190] ss:$8 sps:$4 sm:$0xff]   ;;  %v14979_v23 = vld [vmem:[%s21461_s10 + $0x160] ss:$8 sps:$4 sm:$0xff]  }
 0x422   : > { %v4597_v8 = vmax.f32 %v4595_v16, 0.0 }
 0x423   : > { %v14097_v57 = vpop.f32.mrb[48].mxu1 }
 0x424   : > { %v14098_v55 = vpop.f32.mrb[49].mxu1  ;;  %v5316_v1 = vpack.c.bf16 %v4597_v8, %v4596_v44  ;;  %v14984_v8 = vld [vmem:[%s21461_s10 + $0x174] ss:$8 sps:$4 sm:$0xff]  }
 0x425   : > { %v19270_v34 = vadd.f32 %v14098_v55, %v14097_v57  ;;  %v14100_v25 = vpop.f32.mrb[50].mxu1  ;;  %v14987_v55 = vld [vmem:[%s21461_s10 + $0x184] ss:$8 sps:$4 sm:$0xff]  }
 0x426   : > { %v14101_v53 = vpop.f32.mrb[51].mxu1  ;;  %5447 = vmatmul.mubr.bf16.vlgmr.msra.gmra.mrb[56].mxu1 %v5316_v1  ;;  %v14990_v1 = vld [vmem:[%s21461_s10 + $0x190] ss:$8 sps:$4 sm:$0xff]  }
 0x427   : > { %v19272_v58 = vadd.f32 %v14101_v53, %v14100_v25  ;;  %5560 = vmatpush1.bf16.msra.mxu1 %v14937_v15  ;;  %5591 = vmatprep.mubr.bf16.mxu1 %v21575_v13  ;;  %v14982_v15 = vld [vmem:[%s21461_s10 + $0x170] ss:$8 sps:$4 sm:$0xff]   ;;  %v14995_v25 = vld [vmem:[%s21461_s10 + $0x1a0] ss:$8 sps:$4 sm:$0xff]  }
 0x428   : > { %5561 = vmatprep.subr.bf16.mxu1 %v14942_v3  ;;  %v14997_v3 = vld [vmem:[%s21461_s10 + $0x1a4] ss:$8 sps:$4 sm:$0xff]  }
 0x42b   : > { %5562 = vmatpush1.bf16.msra.mxu1 %v14940_v18 }
 0x42c   : > { %5563 = vmatprep.subr.bf16.mxu1 %v14945_v31 }
 0x42f   : > { %5564 = vmatpush1.bf16.msra.mxu1 %v14943_v45 }
 0x430   : > { %5565 = vmatprep.subr.bf16.mxu1 %v14948_v5 }
 0x433   : > { %5566 = vmatpush1.bf16.msra.mxu1 %v14946_v28 }
 0x434   : > { %5567 = vmatprep.subr.bf16.mxu1 %v14951_v27 }
 0x436   : > { %v13987_v43 = vpop.f32.mrb[88].mxu0 }
 0x437   : > { %v13988_v52 = vpop.f32.mrb[89].mxu0  ;;  %5568 = vmatpush1.bf16.msra.mxu1 %v14949_v11 }
 0x438   : > { %v13989_v46 = vadd.f32 %v13988_v52, %v13987_v43  ;;  %v13990_v2 = vpop.f32.mrb[90].mxu0  ;;  %5569 = vmatprep.subr.bf16.mxu1 %v14954_v9 }
 0x439   : > { %v13991_v36 = vpop.f32.mrb[91].mxu0 }
 0x43a   : > { %v4674_v30 = vadd.f32 %v19247_v48, %v13989_v46  ;;  %v13992_v63 = vadd.f32 %v13991_v36, %v13990_v2 }
 0x43b   : > { %5570 = vmatpush1.bf16.msra.mxu1 %v14952_v12 }
 0x43c   : > { %v4677_v54 = vadd.f32 %v19249_v32, %v13992_v63  ;;  %5571 = vmatprep.subr.bf16.mxu1 %v14957_v10  ;;  %v14961_v32 = vld [vmem:[%s21461_s10 + $0x100] ss:$8 sps:$4 sm:$0xff]  }
 0x43d   : > { %5912 = vmatpush1.bf16.msra.mxu0 %v14961_v32 }
 0x43e   : > { %5913 = vmatprep.subr.bf16.mxu0 %v14966_v38 }
 0x43f   : > { %5572 = vmatpush1.bf16.msra.mxu1 %v14955_v21 }
 0x440   : > { %5573 = vmatprep.subr.bf16.mxu1 %v14960_v39 }
 0x441   : > { %5914 = vmatpush1.bf16.msra.mxu0 %v14964_v7 }
 0x442   : > { %5915 = vmatprep.subr.bf16.mxu0 %v14969_v22  ;;  %v14993_v22 = vld [vmem:[%s21463_s12 + $0xc8] sm:$0xff]  }
 0x443   : > { %v14141_v48 = vpop.f32.mrb[52].mxu1  ;;  %5574 = vmatpush1.bf16.msra.mxu1 %v14958_v47 }
 0x444   : > { %v14142_v26 = vpop.f32.mrb[53].mxu1  ;;  %14169 = vmatprep.subr.bf16.mxu1 %v14988_v20 }
 0x445   : > { %v19319_v59 = vadd.f32 %v14142_v26, %v14141_v48  ;;  %v14144_v41 = vpop.f32.mrb[54].mxu1  ;;  %5916 = vmatpush1.bf16.msra.mxu0 %v14967_v33  ;;  %v14994_v33 = vld [vmem:[%s21463_s12 + $0x88] sm:$0xff]  }
 0x446   : > { %v14145_v0 = vpop.f32.mrb[55].mxu1  ;;  %5917 = vmatprep.subr.bf16.mxu0 %v14972_v29  ;;  %v14998_v29 = vld [vmem:[%s21463_s12 + $0xd0] sm:$0xff]  }
 0x447   : > { %v19330_v4 = vadd.f32 %v14145_v0, %v14144_v41 }
 0x449   : > { %5918 = vmatpush1.bf16.msra.mxu0 %v14970_v51  ;;  %v14999_v51 = vld [vmem:[%s21463_s12 + $0x90] sm:$0xff]  }
 0x44a   : > { %5919 = vmatprep.subr.bf16.mxu0 %v14975_v14  ;;  %v15000_v14 = vld [vmem:[%s21461_s10 + $0x1b0] ss:$8 sps:$4 sm:$0xff]  }
 0x44d   : > { %5920 = vmatpush1.bf16.msra.mxu0 %v14973_v17  ;;  %v15002_v17 = vld [vmem:[%s21461_s10 + $0x1b4] ss:$8 sps:$4 sm:$0xff]  }
 0x44e   : > { %5921 = vmatprep.subr.bf16.mxu0 %v14978_v37  ;;  %v15003_v37 = vld [vmem:[%s21463_s12 + $0xd8] sm:$0xff]  }
 0x451   : > { %5922 = vmatpush1.bf16.msra.mxu0 %v14976_v42  ;;  %v15008_v42 = vld [vmem:[%s21463_s12 + $0xe0] sm:$0xff]  }
 0x452   : > { %5923 = vmatprep.subr.bf16.mxu0 %v14981_v60  ;;  %v15012_v60 = vld [vmem:[%s21461_s10 + $0x1d4] ss:$8 sps:$4 sm:$0xff]  }
 0x455   : > { %5924 = vmatpush1.bf16.msra.mxu0 %v14979_v23  ;;  %v15017_v23 = vld [vmem:[%s21461_s10 + $0x1e4] ss:$8 sps:$4 sm:$0xff]  }
 0x456   : > { %v14031_v56 = vpop.f32.mrb[92].mxu0  ;;  %5925 = vmatprep.subr.bf16.mxu0 %v14984_v8  ;;  %v15019_v8 = vld [vmem:[%s21463_s12 + $0xb0] sm:$0xff]  }
 0x457   : > { %v14032_v40 = vpop.f32.mrb[93].mxu0 }
 0x458   : > { %v14033_v35 = vadd.f32 %v14032_v40, %v14031_v56  ;;  %v14034_v61 = vpop.f32.mrb[94].mxu0  ;;  %v15004_v56 = vld [vmem:[%s21463_s12 + $0x98] sm:$0xff]   ;;  %v15007_v40 = vld [vmem:[%s21461_s10 + $0x1c4] ss:$8 sps:$4 sm:$0xff]  }
 0x459   : > { %v14035_v49 = vpop.f32.mrb[95].mxu0  ;;  %5926 = vmatpush1.bf16.msra.mxu0 %v14982_v15  ;;  %v15023_v15 = vld [vmem:[%s21463_s12 + $0xf8] sm:$0xff]  }
 0x45a   : > { %v4721_v62 = vadd.f32 %v14033_v35, %v4674_v30  ;;  %v14036_v50 = vadd.f32 %v14035_v49, %v14034_v61  ;;  %5927 = vmatprep.subr.bf16.mxu0 %v14987_v55  ;;  %v15005_v35 = vld [vmem:[%s21461_s10 + $0x1c0] ss:$8 sps:$4 sm:$0xff]   ;;  %v15020_v55 = vld [vmem:[%s21461_s10 + $0x1f0] ss:$8 sps:$4 sm:$0xff]  }
 0x45b   : > { %v15009_v61 = vld [vmem:[%s21463_s12 + $0xa0] sm:$0xff]   ;;  %v15013_v49 = vld [vmem:[%s21463_s12 + $0xe8] sm:$0xff]  }
 0x45c   : > { %v4722_v16 = vadd.f32 %v14036_v50, %v4677_v54  ;;  %v4764_v44 = vadd.f32 %v19253_v19, %v4721_v62  ;;  %v14985_v19 = vld [vmem:[%s21461_s10 + $0x180] ss:$8 sps:$4 sm:$0xff]   ;;  %v15010_v62 = vld [vmem:[%s21461_s10 + $0x1d0] ss:$8 sps:$4 sm:$0xff]  }
 0x45d   : > { %5928 = vmatpush1.bf16.msra.mxu0 %v14985_v19  ;;  %v15014_v50 = vld [vmem:[%s21463_s12 + $0xa8] sm:$0xff]   ;;  %v15024_v19 = vld [vmem:[%s21463_s12 + $0xb8] sm:$0xff]  }
 0x45e   : > { %v4765_v57 = vadd.f32 %v19255_v24, %v4722_v16  ;;  %v14992_v24 = vld [vmem:[%s21461_s10 + $0x194] ss:$8 sps:$4 sm:$0xff]  }
 0x45f   : > { %5929 = vmatprep.subr.bf16.mxu0 %v14992_v24  ;;  %v15018_v16 = vld [vmem:[%s21463_s12 + $0xf0] sm:$0xff]   ;;  %v15027_v24 = vld [vmem:[%s21461_s10 + $0x4] ss:$8 sps:$4 sm:$0xff]  }
 0x461   : > { %5930 = vmatpush1.bf16.msra.mxu0 %v14990_v1  ;;  %v15028_v1 = vld [vmem:[%s21463_s12 + $0x40] sm:$0xff]  }
 0x462   : > { %5931 = vmatprep.subr.bf16.mxu0 %v14997_v3  ;;  %v1756_v3 = vld [vmem:[%s21456_s5] sm:$0x3] }
 0x465   : > { %5932 = vmatpush1.bf16.msra.mxu0 %v14995_v25  ;;  %v5606_v25 = vld [vmem:[%s21460_s9] sm:$0x3] }
 0x466   : > { %5933 = vmatprep.subr.bf16.mxu0 %v15002_v17 }
 0x469   : > { %5934 = vmatpush1.bf16.msra.mxu0 %v15000_v14 }
 0x46a   : > { %5935 = vmatprep.subr.bf16.mxu0 %v15007_v40 }
 0x46d   : > { %5936 = vmatpush1.bf16.msra.mxu0 %v15005_v35 }
 0x46e   : > { %5937 = vmatprep.subr.bf16.mxu0 %v15012_v60 }
 0x471   : > { %5938 = vmatpush1.bf16.msra.mxu0 %v15010_v62  ;;  %v5635_v62 = vld [vmem:[#allocation3 + $0x8] sm:$0xf8] }
 0x472   : > { %5939 = vmatprep.subr.bf16.mxu0 %v15017_v23 }
 0x476   : > { %v14075_v53 = vpop.f32.mrb[96].mxu0 }
 0x477   : > { %v14076_v18 = vpop.f32.mrb[97].mxu0 }
 0x478   : > { %v14077_v31 = vadd.f32 %v14076_v18, %v14075_v53  ;;  %v14078_v45 = vpop.f32.mrb[98].mxu0  ;;  %v21584_v53 = vld [vmem:[#allocation22_spill] sm:$0xff] }
 0x479   : > { %v14079_v5 = vpop.f32.mrb[99].mxu0  ;;  %v1761_v18 = vrot.slane %v1756_v3, %v21584_v53 }
 0x47a   : > { %v4807_v28 = vadd.f32 %v14077_v31, %v4764_v44  ;;  %v14080_v27 = vadd.f32 %v14079_v5, %v14078_v45  ;;  %v15015_v44 = vld [vmem:[%s21461_s10 + $0x1e0] ss:$8 sps:$4 sm:$0xff]   ;;  %v5611_v5 = vrot.slane %v5606_v25, %v21584_v53 }
 0x47b   : > { %5940 = vmatpush1.bf16.msra.mxu0 %v15015_v44  ;;  %v21585_v31 = vld [vmem:[#allocation23_spill] sm:$0xff] }
 0x47c   : > { %v4808_v11 = vadd.f32 %v14080_v27, %v4765_v57  ;;  %v4850_v43 = vadd.f32 %v19270_v34, %v4807_v28  ;;  %v15022_v57 = vld [vmem:[%s21461_s10 + $0x1f4] ss:$8 sps:$4 sm:$0xff]   ;;  %v1765_v45 = vrot.slane %v1756_v3, %v21585_v31  ;;  %v5615_v28 = vrot.slane %v5606_v25, %v21585_v31 }
 0x47d   : > { %5941 = vmatprep.subr.bf16.mxu0 %v15022_v57  ;;  %v21586_v27 = vld [vmem:[#allocation38_spill] sm:$0xff]  ;;  %v5699_v57 = vld [vmem:[#allocation3 + $0x8] sm:$0xf0] }
 0x47e   : > { %v4851_v52 = vadd.f32 %v19272_v58, %v4808_v11  ;;  %v16040_v58 = vld [vmem:[%s21458_s7] ss:$0 sm:$0xff]  ;;  %v1768_v11 = vadd.f32 %v1761_v18, %v21586_v27 }
 0x47f   : > { %5942 = vmatpush1.bf16.msra.mxu0 %v15020_v55  ;;  %v5698_v55 = vld [vmem:[#allocation3] sm:$0xf0] }
 0x480   : > { %6150 = vmatprep.subr.bf16.mxu0 %v15027_v24 }
 0x496   : > { %v14119_v46 = vpop.f32.mrb[100].mxu0 }
 0x497   : > { %v14120_v2 = vpop.f32.mrb[101].mxu0 }
 0x498   : > { %v14121_v36 = vadd.f32 %v14120_v2, %v14119_v46  ;;  %v14122_v30 = vpop.f32.mrb[102].mxu0  ;;  %v21588_v2 = vld [vmem:[#allocation16_spill] sm:$0xff] }
 0x499   : > { %v14123_v63 = vpop.f32.mrb[103].mxu0 }
 0x49a   : > { %v4893_v54 = vadd.f32 %v14121_v36, %v4850_v43  ;;  %v14124_v12 = vadd.f32 %v14123_v63, %v14122_v30  ;;  %v21587_v43 = vld [vmem:[#allocation39_spill] sm:$0xff]  ;;  %v19492_v36 = vrot.slane %v21588_v2, 5 }
 0x49b   : > { %v21589_v30 = vld [vmem:[#allocation15_spill] sm:$0xff] }
 0x49c   : > { %v4894_v9 = vadd.f32 %v14124_v12, %v4851_v52  ;;  %v4936_v21 = vadd.f32 %v19319_v59, %v4893_v54  ;;  %v14989_v59 = vld [vmem:[%s21463_s12 + $0x80] sm:$0xff]   ;;  %v1769_v52 = vadd.f32 %v1765_v45, %v21587_v43  ;;  %v19495_v63 = vrot.slane %v21589_v30, 5  ;;  %v21590_v54 = vld [vmem:[#allocation40_spill] sm:$0xff] }
 0x49d   : > { %v1770_v12 = vadd.f32 %v1761_v18, %v21590_v54  ;;  %v15029_v54 = vld [vmem:[%s21463_s12] sm:$0xff]  }
 0x49e   : > { %v4937_v10 = vadd.f32 %v19330_v4, %v4894_v9 }
 0x4b6   : > { %v14163_v48 = vpop.f32.mrb[104].mxu0 }
 0x4b7   : > { %v14164_v39 = vpop.f32.mrb[105].mxu0 }
 0x4b8   : > { %v14165_v26 = vadd.f32 %v14164_v39, %v14163_v48  ;;  %v14166_v32 = vpop.f32.mrb[106].mxu0  ;;  %v21592_v39 = vld [vmem:[#allocation17_spill] sm:$0xff] }
 0x4b9   : > { %v14167_v6 = vpop.f32.mrb[107].mxu0 }
 0x4ba   : > { %v5029_v34 = vadd.f32 %v14165_v26, %v4936_v21  ;;  %v14168_v41 = vadd.f32 %v14167_v6, %v14166_v32  ;;  %v19502_v26 = vrot.slane %v21592_v39, 3  ;;  %v21593_v32 = vld [vmem:[#allocation41_spill] sm:$0xff] }
 0x4bb   : > { %v1771_v6 = vadd.f32 %v1765_v45, %v21593_v32 }
 0x4bc   : > { %v5031_v47 = vadd.f32 %v16040_v58, %v5029_v34  ;;  %v5030_v38 = vadd.f32 %v14168_v41, %v4937_v10  ;;  %v21591_v10 = vld [vmem:[#allocation18_spill] sm:$0xff] }
 0x4bd   : > { %v19499_v48 = vrot.slane %v21591_v10, 3  ;;  %v15033_v10 = vld [vmem:[%s21463_s12 + $0x48] sm:$0xff]  }
 0x4be   : > { %v5032_v0 = vadd.f32 %v16040_v58, %v5030_v38  ;;  %v5033_v20 = vmax.f32 %v5031_v47, 0.0  ;;  %v19506_v58 = vrot.slane %v21589_v30, 1  ;;  %v1772_v47 = vmax.f32 %v1768_v11, 0.0 }
 0x4bf   : > { %v19521_v17 = vsel %vm3668_vm3, %v19499_v48, %v19502_v26 }
 0x4c0   : > { %v5034_v7 = vmax.f32 %v5032_v0, 0.0 }
 0x4c2   : > { %v5461_v4 = vpack.c.bf16 %v5034_v7, %v5033_v20  ;;  %v19509_v7 = vrot.slane %v21588_v2, 1  ;;  %v15025_v2 = vld [vmem:[%s21461_s10] ss:$8 sps:$4 sm:$0xff]  }
 0x4c4   : > { %5592 = vmatmul.mubr.bf16.vlgmr.msra.gmra.mrb[56].mxu1 %v5461_v4  ;;  %v6505_v60 = vsel %vm2406_vm5, %v19509_v7, %v19506_v58 }
 0x4c5   : > { %14170 = vmatpush3.bf16.msra.mxu1 %v14989_v59  ;;  %v1773_v59 = vmax.f32 %v1769_v52, 0.0 }
 0x4c6   : > { %14171 = vmatprep.subr.bf16.mxu1 %v14993_v22 }
 0x4c9   : > { %14172 = vmatpush3.bf16.msra.mxu1 %v14994_v33  ;;  %v19514_v33 = vsel %vm1792_vm4, %v19492_v36, %v19495_v63 }
 0x4ca   : > { %14173 = vmatprep.subr.bf16.mxu1 %v14998_v29  ;;  %v1774_v29 = vmax.f32 %v1770_v12, 0.0 }
 0x4cd   : > { %14174 = vmatpush3.bf16.msra.mxu1 %v14999_v51 }
 0x4ce   : > { %14175 = vmatprep.subr.bf16.mxu1 %v15003_v37  ;;  %v1775_v37 = vmax.f32 %v1771_v6, 0.0 }
 0x4d1   : > { %14176 = vmatpush3.bf16.msra.mxu1 %v15004_v56 }
 0x4d2   : > { %14177 = vmatprep.subr.bf16.mxu1 %v15008_v42 }
 0x4d5   : > { %14178 = vmatpush3.bf16.msra.mxu1 %v15009_v61 }
 0x4d6   : > { %14179 = vmatprep.subr.bf16.mxu1 %v15013_v49 }
 0x4d9   : > { %14180 = vmatpush3.bf16.msra.mxu1 %v15014_v50 }
 0x4da   : > { %14181 = vmatprep.subr.bf16.mxu1 %v15018_v16 }
 0x4dd   : > { %14182 = vmatpush3.bf16.msra.mxu1 %v15019_v8  ;;  %v5657_v8 = vmul.f32 %v19492_v36, %v5635_v62 }
 0x4de   : > { %14183 = vmatprep.subr.bf16.mxu1 %v15023_v15 }
 0x4e1   : > { %14184 = vmatpush3.bf16.msra.mxu1 %v15024_v19 }
 0x4e2   : > { %14191 = vmatprep.subr.bf16.mxu1 %v15028_v1 }
 0x597   : > { %v5593_v46 = vpop.f32.mrb[56].mxu1 }
 0x598   : > { %v5618_v9 = vadd.f32 %v5611_v5, %v5593_v46  ;;  %v5595_v21 = vpop.f32.mrb[57].mxu1 }
 0x599   : > { %v5619_v34 = vadd.f32 %v5615_v28, %v5595_v21  ;;  %v5597_v41 = vpop.f32.mrb[58].mxu1  ;;  %v15032_v21 = vld [vmem:[%s21461_s10 + $0x14] ss:$8 sps:$4 sm:$0xff]  }
 0x59a   : > { %v5622_v38 = vmax.f32 %v5618_v9, 0.0  ;;  %v5620_v0 = vadd.f32 %v5611_v5, %v5597_v41  ;;  %v5599_v20 = vpop.f32.mrb[59].mxu1 }
 0x59b   : > { %v5623_v4 = vmax.f32 %v5619_v34, 0.0  ;;  %v5621_v22 = vadd.f32 %v5615_v28, %v5599_v20 }
 0x59c   : > { %v19516_v51 = vadd.f32 %v5622_v38, %v1772_v47  ;;  %v5624_v14 = vmax.f32 %v5620_v0, 0.0  ;;  %v15030_v38 = vld [vmem:[%s21461_s10 + $0x10] ss:$8 sps:$4 sm:$0xff]   ;;  %v15034_v0 = vld [vmem:[%s21463_s12 + $0x8] sm:$0xff]  }
 0x59d   : > { %v19523_v56 = vadd.f32 %v5623_v4, %v1773_v59  ;;  %v5625_v40 = vmax.f32 %v5621_v22, 0.0  ;;  %v15037_v4 = vld [vmem:[%s21461_s10 + $0x24] ss:$8 sps:$4 sm:$0xff]   ;;  %v15038_v22 = vld [vmem:[%s21463_s12 + $0x50] sm:$0xff]  }
 0x59e   : > { %5630 = vst [vmem:[#allocation3 + $0x10] sm:$0xff] %v19516_v51  ;;  %v5628_v42 = vadd.f32 %v5624_v14, %v1774_v29  ;;  %v19528_v35 = vmul.f32 %v19514_v33, %v19516_v51  ;;  %v19532_v61 = vmul.f32 %v19521_v17, %v19516_v51  ;;  %v19548_v44 = vmul.f32 %v6505_v60, %v19516_v51 }
 0x59f   : > { %5631 = vst [vmem:[#allocation3 + $0x18] sm:$0xff] %v19523_v56  ;;  %v5629_v49 = vadd.f32 %v5625_v40, %v1775_v37  ;;  %v5659_v50 = vmul.f32 %v19514_v33, %v19523_v56  ;;  %v19542_v23 = vmul.f32 %v19521_v17, %v19523_v56  ;;  %v19545_v16 = vmul.f32 %v6505_v60, %v19523_v56  ;;  %v15035_v40 = vld [vmem:[%s21461_s10 + $0x20] ss:$8 sps:$4 sm:$0xff]   ;;  %v15042_v60 = vld [vmem:[%s21461_s10 + $0x34] ss:$8 sps:$4 sm:$0xff]  }
 0x5a0   : > { %5632 = vst [vmem:[#allocation3 + $0x20] sm:$0xff] %v5628_v42  ;;  %v5703_v19 = vpack.c.bf16 %v19523_v56, %v5699_v57  ;;  %v5702_v3 = vpack.c.bf16 %v19516_v51, %v5698_v55  ;;  %v15039_v42 = vld [vmem:[%s21463_s12 + $0x10] sm:$0xff]  }
 0x5a1   : > { %5633 = vst [vmem:[#allocation3 + $0x28] sm:$0xff] %v5629_v49  ;;  %v5663_v15 = vpack.c.bf16 %v5659_v50, %v5657_v8  ;;  %v15043_v49 = vld [vmem:[%s21463_s12 + $0x58] sm:$0xff]   ;;  %v21594_v8 = vld [vmem:[#allocation20_spill] sm:$0xff] }
 0x5a2   : > { %v5746_v43 = vrot.slane %v5703_v19, 2  ;;  %v5743_v30 = vrot.slane %v5702_v3, 2 }
 0x5a3   : > { %v5972_v45 = vshrl.u32 %v5663_v15, 16  ;;  %v5975_v27 = vshll.u32 %v5663_v15, 16  ;;  %v21595_v15 = vld [vmem:[#allocation21_spill] sm:$0xff] }
 0x5a5   : > { %v5974_v12 = vrot.slane %v5972_v45, 1  ;;  %v5977_v39 = vrot.slane %v5975_v27, 2  ;;  %v7039_v50 = vld [vmem:[#allocation3 + $0x10] sm:$0xfe]  ;;  %v15047_v45 = vld [vmem:[%s21461_s10 + $0x44] ss:$8 sps:$4 sm:$0xff]  }
 0x5a6   : > { %v7040_v37 = vld [vmem:[#allocation3 + $0x18] sm:$0xfe] }
 0x5a7   : > { %v5700_v24 = vld [vmem:[#allocation3 + $0x20] sm:$0xf]  ;;  %v5978_v20 = vor.u32 %v5977_v39, %v5974_v12  ;;  %v7052_v57 = vmul.f32 %v21594_v8, %v7040_v37  ;;  %v6194_v12 = vld [vmem:[#allocation3 + $0x8] sm:$0xe0] }
 0x5a8   : > { %v5701_v1 = vld [vmem:[#allocation3 + $0x28] sm:$0xf]  ;;  %v5704_v25 = vpack.c.bf16 %v5700_v24, %v5700_v24  ;;  %v19595_v62 = vld [vmem:[#allocation3 + $0x20] sm:$0xff]  ;;  %v15040_v24 = vld [vmem:[%s21461_s10 + $0x30] ss:$8 sps:$4 sm:$0xff]  }
 0x5a9   : > { %v5639_v18 = vld [vmem:[#allocation3 + $0x28] sm:$0x7]  ;;  %v5705_v5 = vpack.c.bf16 %v5701_v1, %v5701_v1  ;;  %v5638_v19 = vld [vmem:[#allocation3 + $0x20] sm:$0x7]  ;;  %v15044_v1 = vld [vmem:[%s21463_s12 + $0x18] sm:$0xff]  }
 0x5aa   : > { %v5661_v28 = vmul.f32 %v19495_v63, %v5639_v18  ;;  %v5744_v11 = vrot.slane %v5704_v25, 2  ;;  %v19581_v14 = vld [vmem:[#allocation3 + $0x28] sm:$0xff]  ;;  %v7051_v25 = vmul.f32 %v21594_v8, %v7039_v50  ;;  %v7053_v18 = vmul.f32 %v21595_v15, %v19595_v62 }
 0x5ab   : > { %v5747_v52 = vrot.slane %v5705_v5, 2  ;;  %v7054_v55 = vmul.f32 %v21595_v15, %v19581_v14  ;;  %v15048_v5 = vld [vmem:[%s21463_s12 + $0x60] sm:$0xff]   ;;  %v5660_v27 = vmul.f32 %v19495_v63, %v5638_v19  ;;  %v15054_v39 = vld [vmem:[%s21463_s12 + $0x28] sm:$0xff]   ;;  %v15064_v15 = vld [vmem:[%s21463_s12 + $0x38] sm:$0xff]  }
 0x5ac   : > { %v5665_v46 = vpack.c.bf16 %v5661_v28, %v5661_v28  ;;  %v5745_v34 = vsel %vm682_vm0, %v5743_v30, %v5744_v11  ;;  %v6196_v28 = vld [vmem:[#allocation3 + $0x28] sm:$0x1f]  ;;  %v19618_v11 = vpack.c.bf16 %v7053_v18, %v7051_v25  ;;  %v15052_v30 = vld [vmem:[%s21461_s10 + $0x54] ss:$8 sps:$4 sm:$0xff]   ;;  %v15068_v18 = vld [vmem:[%s21463_s12 + $0x140] sm:$0xff]  }
 0x5ad   : > { %v5748_v9 = vsel %vm682_vm0, %v5746_v43, %v5747_v52  ;;  %v19606_v3 = vpack.c.bf16 %v7054_v55, %v7052_v57  ;;  %v5634_v43 = vld [vmem:[#allocation3] sm:$0xf8]  ;;  %v15060_v57 = vld [vmem:[%s21461_s10 + $0x70] ss:$8 sps:$4 sm:$0xff]  }
 0x5ae   : > { %v5980_v32 = vshrl.u32 %v5665_v46, 16  ;;  %v5983_v6 = vshll.u32 %v5665_v46, 16  ;;  %5943 = vmatprep.mubr.bf16.mxu0 %v5748_v9  ;;  %8380 = vmatprep.mubr.bf16.mxu1 %v5748_v9  ;;  %v15045_v52 = vld [vmem:[%s21461_s10 + $0x40] ss:$8 sps:$4 sm:$0xff]   ;;  %v5656_v9 = vmul.f32 %v19492_v36, %v5634_v43  ;;  %v15067_v25 = vld [vmem:[%s21461_s10 + $0x84] ss:$8 sps:$4 sm:$0xff]  }
 0x5af   : > { %5944 = vmatmul.mubr.bf16.vlgmr.msra.gmra.mrb[108].mxu0 %v5745_v34  ;;  %8381 = vmatmul.mubr.bf16.vlgmr.msra.gmra.mrb[60].mxu1 %v5745_v34  ;;  %v15049_v46 = vld [vmem:[%s21463_s12 + $0x20] sm:$0xff]  }
 0x5b0   : > { %v5982_v41 = vrot.slane %v5980_v32, 1  ;;  %v5985_v47 = vrot.slane %v5983_v6, 2  ;;  %6151 = vmatpush1.bf16.msra.mxu0 %v15025_v2  ;;  %14192 = vmatpush3.bf16.msra.mxu1 %v15029_v54  ;;  %v6218_v2 = vmul.f32 %v19502_v26, %v6196_v28  ;;  %v15053_v54 = vld [vmem:[%s21463_s12 + $0x68] sm:$0xff]   ;;  %v5662_v32 = vpack.c.bf16 %v19528_v35, %v5656_v9 }
 0x5b1   : > { %6152 = vmatprep.subr.bf16.mxu0 %v15032_v21  ;;  %14193 = vmatprep.subr.bf16.mxu1 %v15033_v10  ;;  %v5664_v21 = vpack.c.bf16 %v5660_v27, %v5660_v27  ;;  %v15050_v10 = vld [vmem:[%s21461_s10 + $0x50] ss:$8 sps:$4 sm:$0xff]   ;;  %v6214_v6 = vmul.f32 %v19499_v48, %v6194_v12  ;;  %v15065_v27 = vld [vmem:[%s21461_s10 + $0x80] ss:$8 sps:$4 sm:$0xff]  }
 0x5b2   : > { %v5986_v59 = vor.u32 %v5985_v47, %v5982_v41  ;;  %v6222_v34 = vpack.c.bf16 %v6218_v2, %v6218_v2  ;;  %v15057_v41 = vld [vmem:[%s21461_s10 + $0x64] ss:$8 sps:$4 sm:$0xff]   ;;  %v15058_v47 = vld [vmem:[%s21463_s12 + $0x70] sm:$0xff]   ;;  %v5958_v37 = vshll.u32 %v5662_v32, 16 }
 0x5b3   : > { %v6220_v35 = vpack.c.bf16 %v19542_v23, %v6214_v6  ;;  %v15063_v23 = vld [vmem:[%s21463_s12 + $0x78] sm:$0xff]   ;;  %v15073_v12 = vld [vmem:[%s21463_s12 + $0x148] sm:$0xff]  }
 0x5b4   : > { %v5987_v29 = vsel %vm2034_vm6, %v5978_v20, %v5986_v59  ;;  %6153 = vmatpush1.bf16.msra.mxu0 %v15030_v38  ;;  %14194 = vmatpush3.bf16.msra.mxu1 %v15034_v0  ;;  %v19650_v38 = vmul.f32 %v19581_v14, %v19521_v17  ;;  %v5963_v0 = vshrl.u32 %v5664_v21, 16  ;;  %v5966_v20 = vshll.u32 %v5664_v21, 16  ;;  %v15072_v2 = vld [vmem:[%s21461_s10 + $0x94] ss:$8 sps:$4 sm:$0xff]   ;;  %v15070_v21 = vld [vmem:[%s21461_s10 + $0x90] ss:$8 sps:$4 sm:$0xff]  }
 0x5b5   : > { %6182 = vmatprep.mubr.bf16.mxu0 %v5987_v29  ;;  %8517 = vmatprep.mubr.bf16.mxu1 %v5987_v29  ;;  %v19655_v59 = vmul.f32 %v19595_v62, %v19521_v17  ;;  %v5955_v29 = vshrl.u32 %v5662_v32, 16  ;;  %v15062_v17 = vld [vmem:[%s21461_s10 + $0x74] ss:$8 sps:$4 sm:$0xff]   ;;  %v6274_v50 = vshrl.u32 %v6220_v35, 16  ;;  %v6277_v8 = vshll.u32 %v6220_v35, 16 }
 0x5b6   : > { %6154 = vmatprep.subr.bf16.mxu0 %v15037_v4  ;;  %14195 = vmatprep.subr.bf16.mxu1 %v15038_v22  ;;  %v15055_v4 = vld [vmem:[%s21461_s10 + $0x60] ss:$8 sps:$4 sm:$0xff]   ;;  %v15059_v22 = vld [vmem:[%s21463_s12 + $0x30] sm:$0xff]   ;;  %v5960_v19 = vrot.slane %v5958_v37, 2  ;;  %v15084_v35 = vld [vmem:[%s21463_s12 + $0x118] sm:$0xff]  }
 0x5b7   : > { %v5957_v55 = vrot.slane %v5955_v29, 1  ;;  %v6279_v28 = vrot.slane %v6277_v8, 3  ;;  %v15078_v32 = vld [vmem:[%s21463_s12 + $0x150] sm:$0xff]   ;;  %v15075_v6 = vld [vmem:[%s21461_s10 + $0xa0] ss:$8 sps:$4 sm:$0xff]  }
 0x5b8   : > { %6155 = vmatpush1.bf16.msra.mxu0 %v15035_v40  ;;  %14196 = vmatpush3.bf16.msra.mxu1 %v15039_v42  ;;  %v6282_v40 = vshrl.u32 %v6222_v34, 16  ;;  %v6285_v42 = vshll.u32 %v6222_v34, 16  ;;  %v15079_v34 = vld [vmem:[%s21463_s12 + $0x110] sm:$0xff]   ;;  %v6502_v29 = vld [vmem:[#allocation3 + $0x28] sm:$0x7f] }
 0x5b9   : > { %6156 = vmatprep.subr.bf16.mxu0 %v15042_v60  ;;  %14197 = vmatprep.subr.bf16.mxu1 %v15043_v49  ;;  %v5965_v60 = vrot.slane %v5963_v0, 1  ;;  %v5968_v49 = vrot.slane %v5966_v20, 2  ;;  %v5961_v43 = vor.u32 %v5960_v19, %v5957_v55  ;;  %v6195_v0 = vld [vmem:[#allocation3 + $0x20] sm:$0x1f]  ;;  %v15080_v20 = vld [vmem:[%s21461_s10 + $0xb0] ss:$8 sps:$4 sm:$0xff]  }
 0x5ba   : > { %v6217_v37 = vmul.f32 %v19502_v26, %v6195_v0  ;;  %v15090_v55 = vld [vmem:[%s21461_s10 + $0xd0] ss:$8 sps:$4 sm:$0xff]   ;;  %v15094_v19 = vld [vmem:[%s21463_s12 + $0x128] sm:$0xff]  }
 0x5bc   : > { %6157 = vmatpush1.bf16.msra.mxu0 %v15040_v24  ;;  %14198 = vmatpush3.bf16.msra.mxu1 %v15044_v1  ;;  %v6284_v24 = vrot.slane %v6282_v40, 2  ;;  %v6287_v1 = vrot.slane %v6285_v42, 3  ;;  %v6193_v40 = vld [vmem:[#allocation3] sm:$0xe0]  ;;  %v15085_v42 = vld [vmem:[%s21461_s10 + $0xc0] ss:$8 sps:$4 sm:$0xff]  }
 0x5bd   : > { %6158 = vmatprep.subr.bf16.mxu0 %v15047_v45  ;;  %14199 = vmatprep.subr.bf16.mxu1 %v15048_v5  ;;  %v5969_v45 = vor.u32 %v5968_v49, %v5965_v60  ;;  %v6276_v5 = vrot.slane %v6274_v50, 2  ;;  %v6500_v60 = vld [vmem:[#allocation3 + $0x8] sm:$0x80]  ;;  %v15092_v49 = vld [vmem:[%s21461_s10 + $0xd4] ss:$8 sps:$4 sm:$0xff]   ;;  %v6213_v8 = vmul.f32 %v19499_v48, %v6193_v40 }
 0x5be   : > { %v15093_v50 = vld [vmem:[%s21463_s12 + $0x168] sm:$0xff]  }
 0x5c0   : > { %6159 = vmatpush1.bf16.msra.mxu0 %v15045_v52  ;;  %14200 = vmatpush3.bf16.msra.mxu1 %v15049_v46  ;;  %v15069_v52 = vld [vmem:[%s21463_s12 + $0x100] sm:$0xff]   ;;  %v6288_v46 = vor.u32 %v6287_v1, %v6284_v24  ;;  %v6219_v24 = vpack.c.bf16 %v19532_v61, %v6213_v8  ;;  %v15099_v61 = vld [vmem:[%s21463_s12 + $0x130] sm:$0xff]  }
 0x5c1   : > { %6160 = vmatprep.subr.bf16.mxu0 %v15052_v30  ;;  %14201 = vmatprep.subr.bf16.mxu1 %v15053_v54  ;;  %v19691_v30 = vsel %vm2034_vm6, %v5961_v43, %v5969_v45  ;;  %v6280_v54 = vor.u32 %v6279_v28, %v6276_v5 }
 0x5c2   : > { %v6257_v43 = vshrl.u32 %v6219_v24, 16 }
 0x5c3   : > { %v19698_v9 = vsel %vm3685_vm9, %v6280_v54, %v6288_v46  ;;  %v15103_v54 = vld [vmem:[%s21463_s12 + $0x178] sm:$0xff]  }
 0x5c4   : > { %6161 = vmatpush1.bf16.msra.mxu0 %v15050_v10  ;;  %14202 = vmatpush3.bf16.msra.mxu1 %v15054_v39  ;;  %v15074_v10 = vld [vmem:[%s21463_s12 + $0x108] sm:$0xff]  }
 0x5c5   : > { %6162 = vmatprep.subr.bf16.mxu0 %v15057_v41  ;;  %14203 = vmatprep.subr.bf16.mxu1 %v15058_v47  ;;  %v15077_v39 = vld [vmem:[%s21461_s10 + $0xa4] ss:$8 sps:$4 sm:$0xff]   ;;  %v15082_v41 = vld [vmem:[%s21461_s10 + $0xb4] ss:$8 sps:$4 sm:$0xff]  }
 0x5c6   : > { %v15083_v47 = vld [vmem:[%s21463_s12 + $0x158] sm:$0xff]  }
 0x5c8   : > { %6163 = vmatpush1.bf16.msra.mxu0 %v15055_v4  ;;  %14204 = vmatpush3.bf16.msra.mxu1 %v15059_v22  ;;  %v15087_v4 = vld [vmem:[%s21461_s10 + $0xc4] ss:$8 sps:$4 sm:$0xff]  }
 0x5c9   : > { %6164 = vmatprep.subr.bf16.mxu0 %v15062_v17  ;;  %14205 = vmatprep.subr.bf16.mxu1 %v15063_v23  ;;  %v15088_v22 = vld [vmem:[%s21463_s12 + $0x160] sm:$0xff]   ;;  %v6514_v23 = vmul.f32 %v19506_v58, %v6502_v29 }
 0x5ca   : > { %v15089_v17 = vld [vmem:[%s21463_s12 + $0x120] sm:$0xff]  }
 0x5cb   : > { %v6518_v1 = vpack.c.bf16 %v6514_v23, %v6514_v23 }
 0x5cc   : > { %6165 = vmatpush1.bf16.msra.mxu0 %v15060_v57  ;;  %14206 = vmatpush3.bf16.msra.mxu1 %v15064_v15  ;;  %v6221_v57 = vpack.c.bf16 %v6217_v37, %v6217_v37  ;;  %v6510_v15 = vmul.f32 %v19509_v7, %v6500_v60  ;;  %v15105_v37 = vld [vmem:[%s21461_s10 + $0x200] ss:$8 sps:$4 sm:$0xff]  }
 0x5cd   : > { %6166 = vmatprep.subr.bf16.mxu0 %v15067_v25  ;;  %14213 = vmatprep.subr.bf16.mxu1 %v15068_v18  ;;  %v15097_v25 = vld [vmem:[%s21461_s10 + $0xe4] ss:$8 sps:$4 sm:$0xff]   ;;  %v15098_v18 = vld [vmem:[%s21463_s12 + $0x170] sm:$0xff]   ;;  %v6578_v46 = vshrl.u32 %v6518_v1, 16 }
 0x5ce   : > { %v6265_v45 = vshrl.u32 %v6221_v57, 16  ;;  %v6268_v5 = vshll.u32 %v6221_v57, 16  ;;  %v6516_v28 = vpack.c.bf16 %v19545_v16, %v6510_v15  ;;  %v15102_v16 = vld [vmem:[%s21461_s10 + $0xf4] ss:$8 sps:$4 sm:$0xff]   ;;  %v15110_v57 = vld [vmem:[%s21461_s10 + $0x210] ss:$8 sps:$4 sm:$0xff]  }
 0x5cf   : > { %8518 = vmatmul.mubr.bf16.vlgmr.msra.gmra.mrb[64].mxu1 %v19691_v30  ;;  %v15114_v15 = vld [vmem:[%s21463_s12 + $0x188] sm:$0xff]  }
 0x5d0   : > { %6167 = vmatpush1.bf16.msra.mxu0 %v15065_v27  ;;  %14214 = vmatpush3.bf16.msra.mxu1 %v15069_v52  ;;  %v15095_v27 = vld [vmem:[%s21461_s10 + $0xe0] ss:$8 sps:$4 sm:$0xff]   ;;  %v6260_v52 = vshll.u32 %v6219_v24, 16  ;;  %v15122_v24 = vld [vmem:[%s21461_s10 + $0x234] ss:$8 sps:$4 sm:$0xff]  }
 0x5d1   : > { %8687 = vmatprep.mubr.bf16.mxu1 %v19698_v9  ;;  %6168 = vmatprep.subr.bf16.mxu0 %v15072_v2  ;;  %v6581_v2 = vshll.u32 %v6518_v1, 16  ;;  %v15123_v1 = vld [vmem:[%s21463_s12 + $0x1d8] sm:$0xff]  }
 0x5d2   : > { %14215 = vmatprep.subr.bf16.mxu1 %v15073_v12  ;;  %v6267_v12 = vrot.slane %v6265_v45, 2  ;;  %v15124_v45 = vld [vmem:[%s21463_s12 + $0x198] sm:$0xff]  }
 0x5d3   : > { %v6583_v0 = vrot.slane %v6581_v2, 4 }
 0x5d4   : > { %6169 = vmatpush1.bf16.msra.mxu0 %v15070_v21  ;;  %14216 = vmatpush3.bf16.msra.mxu1 %v15074_v10  ;;  %v6270_v21 = vrot.slane %v6268_v5, 3  ;;  %v6570_v10 = vshrl.u32 %v6516_v28, 16  ;;  %v15127_v5 = vld [vmem:[%s21461_s10 + $0x244] ss:$8 sps:$4 sm:$0xff]  }
 0x5d5   : > { %6170 = vmatprep.subr.bf16.mxu0 %v15077_v39  ;;  %14217 = vmatprep.subr.bf16.mxu1 %v15078_v32  ;;  %v6573_v39 = vshll.u32 %v6516_v28, 16  ;;  %v15100_v32 = vld [vmem:[%s21461_s10 + $0xf0] ss:$8 sps:$4 sm:$0xff]   ;;  %v15128_v28 = vld [vmem:[%s21463_s12 + $0x1e0] sm:$0xff]  }
 0x5d7   : > { %v6575_v29 = vrot.slane %v6573_v39, 4 }
 0x5d8   : > { %6171 = vmatpush1.bf16.msra.mxu0 %v15075_v6  ;;  %14218 = vmatpush3.bf16.msra.mxu1 %v15079_v34  ;;  %v15104_v6 = vld [vmem:[%s21463_s12 + $0x138] sm:$0xff]   ;;  %v6259_v34 = vrot.slane %v6257_v43, 2  ;;  %v15125_v43 = vld [vmem:[%s21461_s10 + $0x240] ss:$8 sps:$4 sm:$0xff]  }
 0x5d9   : > { %6172 = vmatprep.subr.bf16.mxu0 %v15082_v41  ;;  %14219 = vmatprep.subr.bf16.mxu1 %v15083_v47  ;;  %v6262_v41 = vrot.slane %v6260_v52, 3  ;;  %v6580_v47 = vrot.slane %v6578_v46, 3  ;;  %v15129_v52 = vld [vmem:[%s21463_s12 + $0x1a0] sm:$0xff]   ;;  %v15132_v46 = vld [vmem:[%s21461_s10 + $0x254] ss:$8 sps:$4 sm:$0xff]  }
 0x5db   : > { %v6263_v40 = vor.u32 %v6262_v41, %v6259_v34  ;;  %v15139_v34 = vld [vmem:[%s21463_s12 + $0x1b0] sm:$0xff]  }
 0x5dc   : > { %6173 = vmatpush1.bf16.msra.mxu0 %v15080_v20  ;;  %14220 = vmatpush3.bf16.msra.mxu1 %v15084_v35  ;;  %v15107_v20 = vld [vmem:[%s21461_s10 + $0x204] ss:$8 sps:$4 sm:$0xff]  }
 0x5dd   : > { %6174 = vmatprep.subr.bf16.mxu0 %v15087_v4  ;;  %14221 = vmatprep.subr.bf16.mxu1 %v15088_v22  ;;  %v15108_v35 = vld [vmem:[%s21463_s12 + $0x1c0] sm:$0xff]   ;;  %v6271_v4 = vor.u32 %v6270_v21, %v6267_v12  ;;  %v6572_v22 = vrot.slane %v6570_v10, 3  ;;  %v15134_v12 = vld [vmem:[%s21463_s12 + $0x1a8] sm:$0xff]  }
 0x5de   : > { %v15137_v21 = vld [vmem:[%s21461_s10 + $0x264] ss:$8 sps:$4 sm:$0xff]  }
 0x5df   : > { %v19798_v23 = vsel %vm3685_vm9, %v6263_v40, %v6271_v4  ;;  %v6576_v60 = vor.u32 %v6575_v29, %v6572_v22  ;;  %v15140_v4 = vld [vmem:[%s21461_s10 + $0x270] ss:$8 sps:$4 sm:$0xff]   ;;  %v15147_v29 = vld [vmem:[%s21461_s10 + $0x284] ss:$8 sps:$4 sm:$0xff]  }
 0x5e0   : > { %6175 = vmatpush1.bf16.msra.mxu0 %v15085_v42  ;;  %14222 = vmatpush3.bf16.msra.mxu1 %v15089_v17  ;;  %v6584_v42 = vor.u32 %v6583_v0, %v6580_v47  ;;  %v15109_v17 = vld [vmem:[%s21463_s12 + $0x180] sm:$0xff]   ;;  %v15143_v0 = vld [vmem:[%s21463_s12 + $0x1f8] sm:$0xff]  }
 0x5e1   : > { %6176 = vmatprep.subr.bf16.mxu0 %v15092_v49  ;;  %14223 = vmatprep.subr.bf16.mxu1 %v15093_v50  ;;  %v15112_v49 = vld [vmem:[%s21461_s10 + $0x214] ss:$8 sps:$4 sm:$0xff]   ;;  %v15113_v50 = vld [vmem:[%s21463_s12 + $0x1c8] sm:$0xff]  }
 0x5e2   : > { %v19810_v8 = vsel %vm2456_vm8, %v6576_v60, %v6584_v42  ;;  %v15144_v22 = vld [vmem:[%s21463_s12 + $0x1b8] sm:$0xff]   ;;  %v15148_v42 = vld [vmem:[%s21463_s12 + $0x240] sm:$0xff]  }
 0x5e3   : > { %v15145_v60 = vld [vmem:[%s21461_s10 + $0x280] ss:$8 sps:$4 sm:$0xff]  }
 0x5e4   : > { %6177 = vmatpush1.bf16.msra.mxu0 %v15090_v55  ;;  %14224 = vmatpush3.bf16.msra.mxu1 %v15094_v19  ;;  %v15115_v55 = vld [vmem:[%s21461_s10 + $0x220] ss:$8 sps:$4 sm:$0xff]   ;;  %v15119_v19 = vld [vmem:[%s21463_s12 + $0x190] sm:$0xff]  }
 0x5e5   : > { %6178 = vmatprep.subr.bf16.mxu0 %v15097_v25  ;;  %14225 = vmatprep.subr.bf16.mxu1 %v15098_v18  ;;  %v15120_v25 = vld [vmem:[%s21461_s10 + $0x230] ss:$8 sps:$4 sm:$0xff]   ;;  %v6501_v18 = vld [vmem:[#allocation3 + $0x20] sm:$0x7f] }
 0x5e8   : > { %6179 = vmatpush1.bf16.msra.mxu0 %v15095_v27  ;;  %14226 = vmatpush3.bf16.msra.mxu1 %v15099_v61  ;;  %v6513_v27 = vmul.f32 %v19506_v58, %v6501_v18  ;;  %v6499_v61 = vld [vmem:[#allocation3] sm:$0x80]  ;;  %v15133_v58 = vld [vmem:[%s21463_s12 + $0x1e8] sm:$0xff]   ;;  %v15162_v18 = vld [vmem:[%s21461_s10 + $0x2b4] ss:$8 sps:$4 sm:$0xff]  }
 0x5e9   : > { %6180 = vmatprep.subr.bf16.mxu0 %v15102_v16  ;;  %14227 = vmatprep.subr.bf16.mxu1 %v15103_v54  ;;  %v6509_v2 = vmul.f32 %v19509_v7, %v6499_v61  ;;  %v15130_v54 = vld [vmem:[%s21461_s10 + $0x250] ss:$8 sps:$4 sm:$0xff]   ;;  %v15168_v61 = vld [vmem:[%s21463_s12 + $0x260] sm:$0xff]  }
 0x5ea   : > { %v6517_v16 = vpack.c.bf16 %v6513_v27, %v6513_v27  ;;  %v15138_v7 = vld [vmem:[%s21463_s12 + $0x1f0] sm:$0xff]   ;;  %v15167_v27 = vld [vmem:[%s21461_s10 + $0x2c4] ss:$8 sps:$4 sm:$0xff]  }
 0x5eb   : > { %v6515_v10 = vpack.c.bf16 %v19548_v44, %v6509_v2  ;;  %v15142_v44 = vld [vmem:[%s21461_s10 + $0x274] ss:$8 sps:$4 sm:$0xff]   ;;  %v7044_v2 = vld [vmem:[#allocation3 + $0x38] sm:$0x1] }
 0x5ec   : > { %6181 = vmatpush1.bf16.msra.mxu0 %v15100_v32  ;;  %14228 = vmatpush3.bf16.msra.mxu1 %v15104_v6  ;;  %v6561_v39 = vshrl.u32 %v6517_v16, 16  ;;  %v6564_v32 = vshll.u32 %v6517_v16, 16  ;;  %v15135_v6 = vld [vmem:[%s21461_s10 + $0x260] ss:$8 sps:$4 sm:$0xff]   ;;  %v15170_v16 = vld [vmem:[%s21461_s10 + $0x2d0] ss:$8 sps:$4 sm:$0xff]  }
 0x5ed   : > { %6452 = vmatprep.subr.bf16.mxu0 %v15107_v20  ;;  %14235 = vmatprep.subr.bf16.mxu1 %v15108_v35  ;;  %v6553_v41 = vshrl.u32 %v6515_v10, 16  ;;  %v6556_v47 = vshll.u32 %v6515_v10, 16  ;;  %v21596_v10 = vld [vmem:[#allocation19_spill] sm:$0xff] }
 0x5ee   : > { %v6563_v20 = vrot.slane %v6561_v39, 3  ;;  %v6566_v35 = vrot.slane %v6564_v32, 4  ;;  %v15175_v39 = vld [vmem:[%s21461_s10 + $0x2e0] ss:$8 sps:$4 sm:$0xff]   ;;  %v15179_v32 = vld [vmem:[%s21463_s12 + $0x230] sm:$0xff]  }
 0x5ef   : > { %6183 = vmatmul.mubr.bf16.vlgmr.msra.gmra.mrb[108].mxu0 %v19691_v30  ;;  %8688 = vmatmul.mubr.bf16.vlgmr.msra.gmra.mrb[68].mxu1 %v19798_v23  ;;  %v15117_v30 = vld [vmem:[%s21461_s10 + $0x224] ss:$8 sps:$4 sm:$0xff]   ;;  %v6558_v40 = vrot.slane %v6556_v47, 4  ;;  %v15180_v47 = vld [vmem:[%s21461_s10 + $0x2f0] ss:$8 sps:$4 sm:$0xff]  }
 0x5f0   : > { %6453 = vmatpush1.bf16.msra.mxu0 %v15105_v37  ;;  %6484 = vmatprep.mubr.bf16.mxu0 %v19698_v9  ;;  %v15118_v9 = vld [vmem:[%s21463_s12 + $0x1d0] sm:$0xff]   ;;  %v6555_v37 = vrot.slane %v6553_v41, 3 }
 0x5f1   : > { %14236 = vmatpush3.bf16.msra.mxu1 %v15109_v17  ;;  %8859 = vmatprep.mubr.bf16.mxu1 %v19810_v8  ;;  %v6567_v17 = vor.u32 %v6566_v35, %v6563_v20  ;;  %v15187_v20 = vld [vmem:[%s21461_s10 + $0x304] ss:$8 sps:$4 sm:$0xff]  }
 0x5f2   : > { %6454 = vmatprep.subr.bf16.mxu0 %v15112_v49  ;;  %14237 = vmatprep.subr.bf16.mxu1 %v15113_v50  ;;  %v6559_v49 = vor.u32 %v6558_v40, %v6555_v37  ;;  %v15149_v50 = vld [vmem:[%s21463_s12 + $0x200] sm:$0xff]  }
 0x5f3   : > { %v15185_v37 = vld [vmem:[%s21461_s10 + $0x300] ss:$8 sps:$4 sm:$0xff]  }
 0x5f4   : > { %6455 = vmatpush1.bf16.msra.mxu0 %v15110_v57  ;;  %v15152_v57 = vld [vmem:[%s21461_s10 + $0x294] ss:$8 sps:$4 sm:$0xff]   ;;  %v15189_v40 = vld [vmem:[%s21463_s12 + $0x280] sm:$0xff]  }
 0x5f5   : > { %14238 = vmatpush3.bf16.msra.mxu1 %v15114_v15  ;;  %6456 = vmatprep.subr.bf16.mxu0 %v15117_v30  ;;  %v15153_v15 = vld [vmem:[%s21463_s12 + $0x248] sm:$0xff]   ;;  %v19913_v30 = vsel %vm2456_vm8, %v6559_v49, %v6567_v17  ;;  %v20016_v17 = vpack.c.bf16 %v19595_v62, %v19516_v51  ;;  %v15190_v51 = vld [vmem:[%s21461_s10 + $0x310] ss:$8 sps:$4 sm:$0xff]  }
 0x5f6   : > { %14239 = vmatprep.subr.bf16.mxu1 %v15118_v9  ;;  %v19917_v9 = vpack.c.bf16 %v19581_v14, %v19523_v56  ;;  %v15158_v56 = vld [vmem:[%s21463_s12 + $0x250] sm:$0xff]   ;;  %v15193_v49 = vld [vmem:[%s21463_s12 + $0x2c8] sm:$0xff]  }
 0x5f8   : > { %6457 = vmatpush1.bf16.msra.mxu0 %v15115_v55  ;;  %v15150_v55 = vld [vmem:[%s21461_s10 + $0x290] ss:$8 sps:$4 sm:$0xff]  }
 0x5f9   : > { %14240 = vmatpush3.bf16.msra.mxu1 %v15119_v19  ;;  %6458 = vmatprep.subr.bf16.mxu0 %v15122_v24  ;;  %v15154_v19 = vld [vmem:[%s21463_s12 + $0x208] sm:$0xff]  }
 0x5fa   : > { %14241 = vmatprep.subr.bf16.mxu1 %v15123_v1  ;;  %v15157_v24 = vld [vmem:[%s21461_s10 + $0x2a4] ss:$8 sps:$4 sm:$0xff]   ;;  %v15155_v1 = vld [vmem:[%s21461_s10 + $0x2a0] ss:$8 sps:$4 sm:$0xff]  }
 0x5fc   : > { %6459 = vmatpush1.bf16.msra.mxu0 %v15120_v25  ;;  %v15159_v25 = vld [vmem:[%s21463_s12 + $0x210] sm:$0xff]  }
 0x5fd   : > { %14242 = vmatpush3.bf16.msra.mxu1 %v15124_v45  ;;  %6460 = vmatprep.subr.bf16.mxu0 %v15127_v5  ;;  %v15163_v45 = vld [vmem:[%s21463_s12 + $0x258] sm:$0xff]  }
 0x5fe   : > { %14243 = vmatprep.subr.bf16.mxu1 %v15128_v28  ;;  %v15160_v5 = vld [vmem:[%s21461_s10 + $0x2b0] ss:$8 sps:$4 sm:$0xff]  }
 0x5ff   : > { %v15164_v28 = vld [vmem:[%s21463_s12 + $0x218] sm:$0xff]  }
 0x600   : > { %6461 = vmatpush1.bf16.msra.mxu0 %v15125_v43  ;;  %v15165_v43 = vld [vmem:[%s21461_s10 + $0x2c0] ss:$8 sps:$4 sm:$0xff]  }
 0x601   : > { %14244 = vmatpush3.bf16.msra.mxu1 %v15129_v52  ;;  %6462 = vmatprep.subr.bf16.mxu0 %v15132_v46  ;;  %v15169_v52 = vld [vmem:[%s21463_s12 + $0x220] sm:$0xff]   ;;  %v15172_v46 = vld [vmem:[%s21461_s10 + $0x2d4] ss:$8 sps:$4 sm:$0xff]  }
 0x602   : > { %14245 = vmatprep.subr.bf16.mxu1 %v15133_v58  ;;  %v15173_v58 = vld [vmem:[%s21463_s12 + $0x268] sm:$0xff]  }
 0x604   : > { %6463 = vmatpush1.bf16.msra.mxu0 %v15130_v54  ;;  %v15174_v54 = vld [vmem:[%s21463_s12 + $0x228] sm:$0xff]  }
 0x605   : > { %14246 = vmatpush3.bf16.msra.mxu1 %v15134_v12  ;;  %6464 = vmatprep.subr.bf16.mxu0 %v15137_v21  ;;  %v15177_v12 = vld [vmem:[%s21461_s10 + $0x2e4] ss:$8 sps:$4 sm:$0xff]   ;;  %v15178_v21 = vld [vmem:[%s21463_s12 + $0x270] sm:$0xff]  }
 0x606   : > { %14247 = vmatprep.subr.bf16.mxu1 %v15138_v7  ;;  %v7056_v7 = vmul.f32 %v21596_v10, %v7044_v2  ;;  %v15210_v2 = vld [vmem:[%s21461_s10 + $0x350] ss:$8 sps:$4 sm:$0xff]  }
 0x608   : > { %6465 = vmatpush1.bf16.msra.mxu0 %v15135_v6  ;;  %v15182_v6 = vld [vmem:[%s21461_s10 + $0x2f4] ss:$8 sps:$4 sm:$0xff]   ;;  %v7060_v41 = vpack.c.bf16 %v7056_v7, %v7056_v7 }
 0x609   : > { %14248 = vmatpush3.bf16.msra.mxu1 %v15139_v34  ;;  %6466 = vmatprep.subr.bf16.mxu0 %v15142_v44  ;;  %v7109_v34 = vshll.u32 %v19606_v3, 16  ;;  %v15183_v44 = vld [vmem:[%s21463_s12 + $0x278] sm:$0xff]   ;;  %v15218_v7 = vld [vmem:[%s21463_s12 + $0x2f0] sm:$0xff]  }
 0x60a   : > { %14249 = vmatprep.subr.bf16.mxu1 %v15143_v0  ;;  %v15184_v0 = vld [vmem:[%s21463_s12 + $0x238] sm:$0xff]  }
 0x60b   : > { %v7111_v35 = vrot.slane %v7109_v34, 1 }
 0x60c   : > { %6467 = vmatpush1.bf16.msra.mxu0 %v15140_v4  ;;  %v15188_v4 = vld [vmem:[%s21463_s12 + $0x2c0] sm:$0xff]  }
 0x60d   : > { %14250 = vmatpush3.bf16.msra.mxu1 %v15144_v22  ;;  %6468 = vmatprep.subr.bf16.mxu0 %v15147_v29  ;;  %v7107_v22 = vshrl.u32 %v19606_v3, 16  ;;  %v7114_v29 = vshll.u32 %v7060_v41, 16  ;;  %v15192_v3 = vld [vmem:[%s21461_s10 + $0x314] ss:$8 sps:$4 sm:$0xff]  }
 0x60e   : > { %14257 = vmatprep.subr.bf16.mxu1 %v15148_v42  ;;  %v15219_v41 = vld [vmem:[%s21463_s12 + $0x2b0] sm:$0xff]  }
 0x60f   : > { %v7112_v42 = vor.u32 %v7111_v35, %v7107_v22  ;;  %v15220_v22 = vld [vmem:[%s21461_s10 + $0x370] ss:$8 sps:$4 sm:$0xff]  }
 0x610   : > { %8860 = vmatmul.mubr.bf16.vlgmr.msra.gmra.mrb[72].mxu1 %v19913_v30  ;;  %6469 = vmatpush1.bf16.msra.mxu0 %v15145_v60  ;;  %v7116_v60 = vrot.slane %v7114_v29, 1 }
 0x611   : > { %14258 = vmatpush3.bf16.msra.mxu1 %v15149_v50  ;;  %9031 = vmatprep.mubr.bf16.mxu1 %v19917_v9 }
 0x612   : > { %6470 = vmatprep.subr.bf16.mxu0 %v15152_v57  ;;  %14259 = vmatprep.subr.bf16.mxu1 %v15153_v15  ;;  %v20031_v50 = vsel %vm3874_vm7, %v7112_v42, %v7116_v60  ;;  %v15197_v57 = vld [vmem:[%s21461_s10 + $0x324] ss:$8 sps:$4 sm:$0xff]   ;;  %v15198_v15 = vld [vmem:[%s21463_s12 + $0x2d0] sm:$0xff]   ;;  %v15224_v42 = vld [vmem:[%s21463_s12 + $0x2b8] sm:$0xff]   ;;  %v7095_v60 = vshrl.u32 %v19618_v11, 16 }
 0x614   : > { %6471 = vmatpush1.bf16.msra.mxu0 %v15150_v55  ;;  %v15199_v55 = vld [vmem:[%s21463_s12 + $0x290] sm:$0xff]  }
 0x615   : > { %14260 = vmatpush3.bf16.msra.mxu1 %v15154_v19  ;;  %6472 = vmatprep.subr.bf16.mxu0 %v15157_v24  ;;  %v15202_v19 = vld [vmem:[%s21461_s10 + $0x334] ss:$8 sps:$4 sm:$0xff]  }
 0x616   : > { %14261 = vmatprep.subr.bf16.mxu1 %v15158_v56  ;;  %v15203_v24 = vld [vmem:[%s21463_s12 + $0x2d8] sm:$0xff]  }
 0x617   : > { %v15200_v56 = vld [vmem:[%s21461_s10 + $0x330] ss:$8 sps:$4 sm:$0xff]  }
 0x618   : > { %6473 = vmatpush1.bf16.msra.mxu0 %v15155_v1  ;;  %v15204_v1 = vld [vmem:[%s21463_s12 + $0x298] sm:$0xff]  }
 0x619   : > { %14262 = vmatpush3.bf16.msra.mxu1 %v15159_v25  ;;  %6474 = vmatprep.subr.bf16.mxu0 %v15162_v18  ;;  %v15207_v25 = vld [vmem:[%s21461_s10 + $0x344] ss:$8 sps:$4 sm:$0xff]  }
 0x61a   : > { %14263 = vmatprep.subr.bf16.mxu1 %v15163_v45  ;;  %v15208_v18 = vld [vmem:[%s21463_s12 + $0x2e0] sm:$0xff]   ;;  %v7328_v45 = vld [vmem:[#allocation3 + $0x18] sm:$0xf8] }
 0x61c   : > { %6475 = vmatpush1.bf16.msra.mxu0 %v15160_v5  ;;  %v7330_v5 = vld [vmem:[#allocation3 + $0x38] sm:$0x7] }
 0x61d   : > { %14264 = vmatpush3.bf16.msra.mxu1 %v15164_v28  ;;  %6476 = vmatprep.subr.bf16.mxu0 %v15167_v27  ;;  %v15205_v28 = vld [vmem:[%s21461_s10 + $0x340] ss:$8 sps:$4 sm:$0xff]   ;;  %v7334_v27 = vmul.f32 %v19581_v14, %v19514_v33  ;;  %v7336_v14 = vmul.f32 %v7330_v5, %v19495_v63  ;;  %v15237_v5 = vld [vmem:[%s21461_s10 + $0x3a4] ss:$8 sps:$4 sm:$0xff]  }
 0x61e   : > { %14265 = vmatprep.subr.bf16.mxu1 %v15168_v61  ;;  %v15209_v61 = vld [vmem:[%s21463_s12 + $0x2a0] sm:$0xff]  }
 0x620   : > { %6477 = vmatpush1.bf16.msra.mxu0 %v15165_v43  ;;  %v15212_v43 = vld [vmem:[%s21461_s10 + $0x354] ss:$8 sps:$4 sm:$0xff]  }
 0x621   : > { %14266 = vmatpush3.bf16.msra.mxu1 %v15169_v52  ;;  %6478 = vmatprep.subr.bf16.mxu0 %v15172_v46  ;;  %v7043_v52 = vld [vmem:[#allocation3 + $0x30] sm:$0x1]  ;;  %v15213_v46 = vld [vmem:[%s21463_s12 + $0x2e8] sm:$0xff]  }
 0x622   : > { %14267 = vmatprep.subr.bf16.mxu1 %v15173_v58  ;;  %v7332_v58 = vmul.f32 %v7328_v45, %v19492_v36  ;;  %v15234_v45 = vld [vmem:[%s21463_s12 + $0x308] sm:$0xff]  }
 0x624   : > { %6479 = vmatpush1.bf16.msra.mxu0 %v15170_v16  ;;  %v7338_v16 = vpack.c.bf16 %v7334_v27, %v7332_v58  ;;  %v15235_v27 = vld [vmem:[%s21461_s10 + $0x3a0] ss:$8 sps:$4 sm:$0xff]   ;;  %v15244_v58 = vld [vmem:[%s21463_s12 + $0x318] sm:$0xff]  }
 0x625   : > { %14268 = vmatpush3.bf16.msra.mxu1 %v15174_v54  ;;  %6480 = vmatprep.subr.bf16.mxu0 %v15177_v12  ;;  %v7055_v54 = vmul.f32 %v21596_v10, %v7043_v52  ;;  %v15214_v12 = vld [vmem:[%s21463_s12 + $0x2a8] sm:$0xff]   ;;  %v15243_v52 = vld [vmem:[%s21463_s12 + $0x358] sm:$0xff]  }
 0x626   : > { %14269 = vmatprep.subr.bf16.mxu1 %v15178_v21  ;;  %v15217_v21 = vld [vmem:[%s21461_s10 + $0x364] ss:$8 sps:$4 sm:$0xff]   ;;  %v15215_v10 = vld [vmem:[%s21461_s10 + $0x360] ss:$8 sps:$4 sm:$0xff]   ;;  %v7395_v34 = vshll.u32 %v7338_v16, 16 }
 0x628   : > { %6481 = vmatpush1.bf16.msra.mxu0 %v15175_v39  ;;  %v7340_v39 = vpack.c.bf16 %v7336_v14, %v7336_v14  ;;  %v15247_v14 = vld [vmem:[%s21461_s10 + $0x3c4] ss:$8 sps:$4 sm:$0xff]  }
 0x629   : > { %14270 = vmatpush3.bf16.msra.mxu1 %v15179_v32  ;;  %6482 = vmatprep.subr.bf16.mxu0 %v15182_v6  ;;  %v7097_v32 = vshll.u32 %v19618_v11, 16  ;;  %v7392_v6 = vshrl.u32 %v7338_v16, 16  ;;  %v15229_v11 = vld [vmem:[%s21463_s12 + $0x300] sm:$0xff]   ;;  %v7327_v16 = vld [vmem:[#allocation3 + $0x10] sm:$0xf8] }
 0x62a   : > { %14271 = vmatprep.subr.bf16.mxu1 %v15183_v44  ;;  %v7059_v44 = vpack.c.bf16 %v7055_v54, %v7055_v54  ;;  %v7403_v35 = vshll.u32 %v7340_v39, 16  ;;  %v7329_v54 = vld [vmem:[#allocation3 + $0x30] sm:$0x7] }
 0x62b   : > { %v7394_v29 = vrot.slane %v7392_v6, 1  ;;  %v15250_v6 = vld [vmem:[%s21461_s10 + $0x3d0] ss:$8 sps:$4 sm:$0xff]  }
 0x62c   : > { %6483 = vmatpush1.bf16.msra.mxu0 %v15180_v47  ;;  %v15222_v47 = vld [vmem:[%s21461_s10 + $0x374] ss:$8 sps:$4 sm:$0xff]  }
 0x62d   : > { %14272 = vmatpush3.bf16.msra.mxu1 %v15184_v0  ;;  %6748 = vmatprep.subr.bf16.mxu0 %v15187_v20  ;;  %v15223_v0 = vld [vmem:[%s21463_s12 + $0x2f8] sm:$0xff]   ;;  %v7400_v20 = vshrl.u32 %v7340_v39, 16 }
 0x62e   : > { %14279 = vmatprep.subr.bf16.mxu1 %v15188_v4  ;;  %v7099_v4 = vrot.slane %v7097_v32, 1  ;;  %v15252_v39 = vld [vmem:[%s21461_s10 + $0x3d4] ss:$8 sps:$4 sm:$0xff]   ;;  %v7331_v32 = vmul.f32 %v7327_v16, %v19492_v36  ;;  %v15257_v36 = vld [vmem:[%s21461_s10 + $0x3e4] ss:$8 sps:$4 sm:$0xff]  }
 0x62f   : > { %6485 = vmatmul.mubr.bf16.vlgmr.msra.gmra.mrb[108].mxu0 %v19798_v23  ;;  %v15194_v23 = vld [vmem:[%s21463_s12 + $0x288] sm:$0xff]   ;;  %v15283_v16 = vld [vmem:[%s21463_s12 + $0x3d8] sm:$0xff]  }
 0x630   : > { %9032 = vmatmul.mubr.bf16.vlgmr.msra.gmra.mrb[76].mxu1 %v20016_v17  ;;  %6749 = vmatpush1.bf16.msra.mxu0 %v15185_v37  ;;  %v7397_v37 = vrot.slane %v7395_v34, 2  ;;  %v15254_v34 = vld [vmem:[%s21463_s12 + $0x328] sm:$0xff]  }
 0x631   : > { %6780 = vmatprep.mubr.bf16.mxu0 %v19810_v8  ;;  %14280 = vmatpush3.bf16.msra.mxu1 %v15189_v40  ;;  %v15195_v8 = vld [vmem:[%s21461_s10 + $0x320] ss:$8 sps:$4 sm:$0xff]   ;;  %v7102_v40 = vshll.u32 %v7059_v44, 16  ;;  %v15258_v44 = vld [vmem:[%s21463_s12 + $0x370] sm:$0xff]  }
 0x632   : > { %9203 = vmatprep.mubr.bf16.mxu1 %v20031_v50  ;;  %6750 = vmatprep.subr.bf16.mxu0 %v15192_v3  ;;  %v15227_v3 = vld [vmem:[%s21461_s10 + $0x384] ss:$8 sps:$4 sm:$0xff]  }
 0x633   : > { %14281 = vmatprep.subr.bf16.mxu1 %v15193_v49  ;;  %v15228_v49 = vld [vmem:[%s21463_s12 + $0x340] sm:$0xff]  }
 0x634   : > { %6751 = vmatpush1.bf16.msra.mxu0 %v15190_v51  ;;  %v7402_v51 = vrot.slane %v7400_v20, 1  ;;  %v15259_v20 = vld [vmem:[%s21463_s12 + $0x330] sm:$0xff]  }
 0x635   : > { %14282 = vmatpush3.bf16.msra.mxu1 %v15194_v23  ;;  %6752 = vmatprep.subr.bf16.mxu0 %v15197_v57  ;;  %v7405_v23 = vrot.slane %v7403_v35, 2  ;;  %v7100_v57 = vor.u32 %v7099_v4, %v7095_v60  ;;  %v15262_v35 = vld [vmem:[%s21461_s10 + $0x3f4] ss:$8 sps:$4 sm:$0xff]  }
 0x636   : > { %14283 = vmatprep.subr.bf16.mxu1 %v15198_v15  ;;  %v15225_v15 = vld [vmem:[%s21461_s10 + $0x380] ss:$8 sps:$4 sm:$0xff]   ;;  %v7618_v60 = vld [vmem:[#allocation3 + $0x18] sm:$0xf0] }
 0x638   : > { %6753 = vmatpush1.bf16.msra.mxu0 %v15195_v8  ;;  %v7398_v8 = vor.u32 %v7397_v37, %v7394_v29  ;;  %v15263_v29 = vld [vmem:[%s21463_s12 + $0x378] sm:$0xff]  }
 0x639   : > { %14284 = vmatpush3.bf16.msra.mxu1 %v15199_v55  ;;  %6754 = vmatprep.subr.bf16.mxu0 %v15202_v19  ;;  %v7104_v55 = vrot.slane %v7102_v40, 1  ;;  %v7406_v19 = vor.u32 %v7405_v23, %v7402_v51  ;;  %v7620_v37 = vld [vmem:[#allocation3 + $0x38] sm:$0xf]  ;;  %v15267_v51 = vld [vmem:[%s21461_s10 + $0x404] ss:$8 sps:$4 sm:$0xff]  }
 0x63a   : > { %14285 = vmatprep.subr.bf16.mxu1 %v15203_v24  ;;  %v15232_v24 = vld [vmem:[%s21461_s10 + $0x394] ss:$8 sps:$4 sm:$0xff]  }
 0x63c   : > { %6755 = vmatpush1.bf16.msra.mxu0 %v15200_v56  ;;  %v15233_v56 = vld [vmem:[%s21463_s12 + $0x348] sm:$0xff]  }
 0x63d   : > { %14286 = vmatpush3.bf16.msra.mxu1 %v15204_v1  ;;  %6756 = vmatprep.subr.bf16.mxu0 %v15207_v25  ;;  %v20135_v1 = vsel %vm3874_vm7, %v7100_v57, %v7104_v55  ;;  %v20139_v25 = vsel %vm2034_vm6, %v7398_v8, %v7406_v19  ;;  %v7624_v55 = vpack.c.bf16 %v7620_v37, %v7620_v37  ;;  %v15295_v37 = vld [vmem:[%s21461_s10 + $0x460] ss:$8 sps:$4 sm:$0xff]  }
 0x63e   : > { %14287 = vmatprep.subr.bf16.mxu1 %v15208_v18  ;;  %v15230_v18 = vld [vmem:[%s21461_s10 + $0x390] ss:$8 sps:$4 sm:$0xff]  }
 0x640   : > { %6757 = vmatpush1.bf16.msra.mxu0 %v15205_v28  ;;  %v15238_v28 = vld [vmem:[%s21463_s12 + $0x350] sm:$0xff]  }
 0x641   : > { %14288 = vmatpush3.bf16.msra.mxu1 %v15209_v61  ;;  %6758 = vmatprep.subr.bf16.mxu0 %v15212_v43  ;;  %v15239_v61 = vld [vmem:[%s21463_s12 + $0x310] sm:$0xff]  }
 0x642   : > { %14289 = vmatprep.subr.bf16.mxu1 %v15213_v46  ;;  %v15242_v43 = vld [vmem:[%s21461_s10 + $0x3b4] ss:$8 sps:$4 sm:$0xff]   ;;  %v15240_v46 = vld [vmem:[%s21461_s10 + $0x3b0] ss:$8 sps:$4 sm:$0xff]  }
 0x644   : > { %6759 = vmatpush1.bf16.msra.mxu0 %v15210_v2  ;;  %v15248_v2 = vld [vmem:[%s21463_s12 + $0x360] sm:$0xff]  }
 0x645   : > { %14290 = vmatpush3.bf16.msra.mxu1 %v15214_v12  ;;  %6760 = vmatprep.subr.bf16.mxu0 %v15217_v21  ;;  %v7333_v12 = vmul.f32 %v19595_v62, %v19514_v33  ;;  %v15245_v21 = vld [vmem:[%s21461_s10 + $0x3c0] ss:$8 sps:$4 sm:$0xff]  }
 0x646   : > { %14291 = vmatprep.subr.bf16.mxu1 %v15218_v7  ;;  %v15249_v7 = vld [vmem:[%s21463_s12 + $0x320] sm:$0xff]   ;;  %v15253_v33 = vld [vmem:[%s21463_s12 + $0x368] sm:$0xff]  }
 0x647   : > { %v7337_v62 = vpack.c.bf16 %v7333_v12, %v7331_v32  ;;  %v15284_v12 = vld [vmem:[%s21463_s12 + $0x398] sm:$0xff]  }
 0x648   : > { %6761 = vmatpush1.bf16.msra.mxu0 %v15215_v10  ;;  %v7335_v10 = vmul.f32 %v7329_v54, %v19495_v63  ;;  %v15280_v54 = vld [vmem:[%s21461_s10 + $0x430] ss:$8 sps:$4 sm:$0xff]  }
 0x649   : > { %14292 = vmatpush3.bf16.msra.mxu1 %v15219_v41  ;;  %6762 = vmatprep.subr.bf16.mxu0 %v15222_v47  ;;  %v7375_v41 = vshrl.u32 %v7337_v62, 16  ;;  %v7378_v47 = vshll.u32 %v7337_v62, 16  ;;  %v7880_v32 = vld [vmem:[#allocation3 + $0x38] sm:$0x1f] }
 0x64a   : > { %14293 = vmatprep.subr.bf16.mxu1 %v15223_v0  ;;  %v7339_v63 = vpack.c.bf16 %v7335_v10, %v7335_v10  ;;  %v15255_v0 = vld [vmem:[%s21461_s10 + $0x3e0] ss:$8 sps:$4 sm:$0xff]   ;;  %v15292_v62 = vld [vmem:[%s21461_s10 + $0x454] ss:$8 sps:$4 sm:$0xff]  }
 0x64b   : > { %v7377_v40 = vrot.slane %v7375_v41, 1  ;;  %v15285_v10 = vld [vmem:[%s21461_s10 + $0x440] ss:$8 sps:$4 sm:$0xff]  }
 0x64c   : > { %6763 = vmatpush1.bf16.msra.mxu0 %v15220_v22  ;;  %v7383_v4 = vshrl.u32 %v7339_v63, 16  ;;  %v7386_v22 = vshll.u32 %v7339_v63, 16  ;;  %v15290_v63 = vld [vmem:[%s21461_s10 + $0x450] ss:$8 sps:$4 sm:$0xff]   ;;  %v15294_v41 = vld [vmem:[%s21463_s12 + $0x3a8] sm:$0xff]  }
 0x64d   : > { %14294 = vmatpush3.bf16.msra.mxu1 %v15224_v42  ;;  %6764 = vmatprep.subr.bf16.mxu0 %v15227_v3  ;;  %v7380_v42 = vrot.slane %v7378_v47, 2  ;;  %v15260_v3 = vld [vmem:[%s21461_s10 + $0x3f0] ss:$8 sps:$4 sm:$0xff]   ;;  %v15297_v47 = vld [vmem:[%s21461_s10 + $0x464] ss:$8 sps:$4 sm:$0xff]  }
 0x64e   : > { %14301 = vmatprep.subr.bf16.mxu1 %v15228_v49  ;;  %v15264_v49 = vld [vmem:[%s21463_s12 + $0x338] sm:$0xff]   ;;  %v7385_v23 = vrot.slane %v7383_v4, 1  ;;  %v7388_v57 = vrot.slane %v7386_v22, 2  ;;  %v7619_v22 = vld [vmem:[#allocation3 + $0x30] sm:$0xf] }
 0x64f   : > { %v7381_v19 = vor.u32 %v7380_v42, %v7377_v40 }
 0x650   : > { %9204 = vmatmul.mubr.bf16.vlgmr.msra.gmra.mrb[80].mxu1 %v20135_v1  ;;  %6765 = vmatpush1.bf16.msra.mxu0 %v15225_v15  ;;  %v16041_v15 = vld [vmem:[#allocation3 + $0x28] sm:$0xff] }
 0x651   : > { %14302 = vmatpush3.bf16.msra.mxu1 %v15229_v11  ;;  %9375 = vmatprep.mubr.bf16.mxu1 %v20139_v25  ;;  %v7622_v8 = vpack.c.bf16 %v16041_v15, %v7618_v60  ;;  %v15268_v11 = vld [vmem:[%s21463_s12 + $0x3c0] sm:$0xff]   ;;  %v15299_v60 = vld [vmem:[%s21463_s12 + $0x3b0] sm:$0xff]  }
 0x652   : > { %6766 = vmatprep.subr.bf16.mxu0 %v15232_v24  ;;  %14303 = vmatprep.subr.bf16.mxu1 %v15233_v56  ;;  %v15265_v24 = vld [vmem:[%s21461_s10 + $0x400] ss:$8 sps:$4 sm:$0xff]   ;;  %v7389_v56 = vor.u32 %v7388_v57, %v7385_v23  ;;  %v15303_v23 = vld [vmem:[%s21463_s12 + $0x3f8] sm:$0xff]   ;;  %v7617_v57 = vld [vmem:[#allocation3 + $0x10] sm:$0xf0] }
 0x654   : > { %6767 = vmatpush1.bf16.msra.mxu0 %v15230_v18  ;;  %v15269_v18 = vld [vmem:[%s21463_s12 + $0x380] sm:$0xff]  }
 0x655   : > { %14304 = vmatpush3.bf16.msra.mxu1 %v15234_v45  ;;  %6768 = vmatprep.subr.bf16.mxu0 %v15237_v5  ;;  %v7665_v45 = vrot.slane %v7622_v8, 2  ;;  %v7666_v5 = vrot.slane %v7624_v55, 2  ;;  %v16042_v55 = vld [vmem:[#allocation3 + $0x20] sm:$0xff] }
 0x656   : > { %14305 = vmatprep.subr.bf16.mxu1 %v15238_v28  ;;  %v15272_v28 = vld [vmem:[%s21461_s10 + $0x414] ss:$8 sps:$4 sm:$0xff]  }
 0x658   : > { %6769 = vmatpush1.bf16.msra.mxu0 %v15235_v27  ;;  %v20241_v27 = vsel %vm2034_vm6, %v7381_v19, %v7389_v56  ;;  %v7623_v19 = vpack.c.bf16 %v7619_v22, %v7619_v22 }
 0x659   : > { %14306 = vmatpush3.bf16.msra.mxu1 %v15239_v61  ;;  %6770 = vmatprep.subr.bf16.mxu0 %v15242_v43  ;;  %v15273_v61 = vld [vmem:[%s21463_s12 + $0x3c8] sm:$0xff]   ;;  %v15270_v43 = vld [vmem:[%s21461_s10 + $0x410] ss:$8 sps:$4 sm:$0xff]  }
 0x65a   : > { %14307 = vmatprep.subr.bf16.mxu1 %v15243_v52  ;;  %v20252_v52 = vsel %vm682_vm0, %v7665_v45, %v7666_v5  ;;  %v15304_v45 = vld [vmem:[%s21463_s12 + $0x3b8] sm:$0xff]   ;;  %v15307_v5 = vld [vmem:[%s21461_s10 + $0x484] ss:$8 sps:$4 sm:$0xff]  }
 0x65c   : > { %6771 = vmatpush1.bf16.msra.mxu0 %v15240_v46  ;;  %v15277_v46 = vld [vmem:[%s21461_s10 + $0x424] ss:$8 sps:$4 sm:$0xff]  }
 0x65d   : > { %14308 = vmatpush3.bf16.msra.mxu1 %v15244_v58  ;;  %6772 = vmatprep.subr.bf16.mxu0 %v15247_v14  ;;  %v15278_v58 = vld [vmem:[%s21463_s12 + $0x3d0] sm:$0xff]  }
 0x65e   : > { %14309 = vmatprep.subr.bf16.mxu1 %v15248_v2  ;;  %v15279_v14 = vld [vmem:[%s21463_s12 + $0x390] sm:$0xff]  }
 0x65f   : > { %v15282_v2 = vld [vmem:[%s21461_s10 + $0x434] ss:$8 sps:$4 sm:$0xff]  }
 0x660   : > { %6773 = vmatpush1.bf16.msra.mxu0 %v15245_v21  ;;  %v15287_v21 = vld [vmem:[%s21461_s10 + $0x444] ss:$8 sps:$4 sm:$0xff]  }
 0x661   : > { %14310 = vmatpush3.bf16.msra.mxu1 %v15249_v7  ;;  %6774 = vmatprep.subr.bf16.mxu0 %v15252_v39  ;;  %v15288_v7 = vld [vmem:[%s21463_s12 + $0x3e0] sm:$0xff]   ;;  %v7878_v39 = vld [vmem:[#allocation3 + $0x18] sm:$0xe0] }
 0x662   : > { %14311 = vmatprep.subr.bf16.mxu1 %v15253_v33  ;;  %v15289_v33 = vld [vmem:[%s21463_s12 + $0x3a0] sm:$0xff]  }
 0x664   : > { %6775 = vmatpush1.bf16.msra.mxu0 %v15250_v6  ;;  %v15293_v6 = vld [vmem:[%s21463_s12 + $0x3e8] sm:$0xff]  }
 0x665   : > { %14312 = vmatpush3.bf16.msra.mxu1 %v15254_v34  ;;  %6776 = vmatprep.subr.bf16.mxu0 %v15257_v36  ;;  %v7882_v34 = vmul.f32 %v7878_v39, %v19499_v48  ;;  %v7886_v36 = vmul.f32 %v7880_v32, %v19502_v26  ;;  %v15314_v39 = vld [vmem:[%s21463_s12 + $0x408] sm:$0xff]  }
 0x666   : > { %14313 = vmatprep.subr.bf16.mxu1 %v15258_v44  ;;  %v15317_v32 = vld [vmem:[%s21461_s10 + $0x4a4] ss:$8 sps:$4 sm:$0xff]  }
 0x667   : > { %v7888_v44 = vpack.c.bf16 %v19650_v38, %v7882_v34  ;;  %v15323_v34 = vld [vmem:[%s21463_s12 + $0x458] sm:$0xff]  }
 0x668   : > { %6777 = vmatpush1.bf16.msra.mxu0 %v15255_v0 }
 0x669   : > { %14314 = vmatpush3.bf16.msra.mxu1 %v15259_v20  ;;  %6778 = vmatprep.subr.bf16.mxu0 %v15262_v35  ;;  %v15298_v20 = vld [vmem:[%s21463_s12 + $0x3f0] sm:$0xff]   ;;  %v7890_v35 = vpack.c.bf16 %v7886_v36, %v7886_v36  ;;  %v7942_v40 = vshrl.u32 %v7888_v44, 16  ;;  %v7945_v42 = vshll.u32 %v7888_v44, 16  ;;  %v15327_v44 = vld [vmem:[%s21461_s10 + $0x4c4] ss:$8 sps:$4 sm:$0xff]  }
 0x66a   : > { %14315 = vmatprep.subr.bf16.mxu1 %v15263_v29  ;;  %v15320_v36 = vld [vmem:[%s21461_s10 + $0x4b0] ss:$8 sps:$4 sm:$0xff]  }
 0x66b   : > { %v7950_v15 = vshrl.u32 %v7890_v35, 16  ;;  %v7953_v8 = vshll.u32 %v7890_v35, 16  ;;  %v7944_v56 = vrot.slane %v7942_v40, 2  ;;  %v15329_v35 = vld [vmem:[%s21463_s12 + $0x420] sm:$0xff]  }
 0x66c   : > { %6779 = vmatpush1.bf16.msra.mxu0 %v15260_v3 }
 0x66d   : > { %14316 = vmatpush3.bf16.msra.mxu1 %v15264_v49  ;;  %6992 = vmatprep.subr.bf16.mxu0 %v15267_v51  ;;  %v15302_v49 = vld [vmem:[%s21461_s10 + $0x474] ss:$8 sps:$4 sm:$0xff]  }
 0x66e   : > { %14323 = vmatprep.subr.bf16.mxu1 %v15268_v11  ;;  %v7621_v11 = vpack.c.bf16 %v16042_v55, %v7617_v57  ;;  %v15335_v55 = vld [vmem:[%s21461_s10 + $0x4e0] ss:$8 sps:$4 sm:$0xff]  }
 0x66f   : > { %6781 = vmatmul.mubr.bf16.vlgmr.msra.gmra.mrb[108].mxu0 %v19913_v30  ;;  %v15274_v30 = vld [vmem:[%s21463_s12 + $0x388] sm:$0xff]  }
 0x670   : > { %9376 = vmatmul.mubr.bf16.vlgmr.msra.gmra.mrb[84].mxu1 %v20241_v27  ;;  %6993 = vmatpush1.bf16.msra.mxu0 %v15265_v24  ;;  %v15300_v24 = vld [vmem:[%s21461_s10 + $0x470] ss:$8 sps:$4 sm:$0xff]  }
 0x671   : > { %7024 = vmatprep.mubr.bf16.mxu0 %v19917_v9  ;;  %14324 = vmatpush3.bf16.msra.mxu1 %v15269_v18  ;;  %v15275_v9 = vld [vmem:[%s21461_s10 + $0x420] ss:$8 sps:$4 sm:$0xff]   ;;  %v7947_v18 = vrot.slane %v7945_v42, 3  ;;  %v15330_v42 = vld [vmem:[%s21461_s10 + $0x4d0] ss:$8 sps:$4 sm:$0xff]  }
 0x672   : > { %9547 = vmatprep.mubr.bf16.mxu1 %v20252_v52  ;;  %6994 = vmatprep.subr.bf16.mxu0 %v15272_v28  ;;  %v15308_v28 = vld [vmem:[%s21463_s12 + $0x440] sm:$0xff]  }
 0x673   : > { %14325 = vmatprep.subr.bf16.mxu1 %v15273_v61  ;;  %v7952_v61 = vrot.slane %v7950_v15, 2 }
 0x674   : > { %6995 = vmatpush1.bf16.msra.mxu0 %v15270_v43  ;;  %v7955_v43 = vrot.slane %v7953_v8, 3 }
 0x675   : > { %14326 = vmatpush3.bf16.msra.mxu1 %v15274_v30  ;;  %6996 = vmatprep.subr.bf16.mxu0 %v15277_v46  ;;  %v7662_v30 = vrot.slane %v7621_v11, 2  ;;  %v7663_v46 = vrot.slane %v7623_v19, 2  ;;  %v15339_v19 = vld [vmem:[%s21463_s12 + $0x430] sm:$0xff]  }
 0x676   : > { %14327 = vmatprep.subr.bf16.mxu1 %v15278_v58  ;;  %v15305_v58 = vld [vmem:[%s21461_s10 + $0x480] ss:$8 sps:$4 sm:$0xff]  }
 0x678   : > { %6997 = vmatpush1.bf16.msra.mxu0 %v15275_v9  ;;  %v7948_v9 = vor.u32 %v7947_v18, %v7944_v56 }
 0x679   : > { %14328 = vmatpush3.bf16.msra.mxu1 %v15279_v14  ;;  %6998 = vmatprep.subr.bf16.mxu0 %v15282_v2  ;;  %v15309_v14 = vld [vmem:[%s21463_s12 + $0x400] sm:$0xff]   ;;  %v7956_v2 = vor.u32 %v7955_v43, %v7952_v61 }
 0x67a   : > { %14329 = vmatprep.subr.bf16.mxu1 %v15283_v16  ;;  %v15312_v16 = vld [vmem:[%s21461_s10 + $0x494] ss:$8 sps:$4 sm:$0xff]  }
 0x67c   : > { %6999 = vmatpush1.bf16.msra.mxu0 %v15280_v54  ;;  %v15313_v54 = vld [vmem:[%s21463_s12 + $0x448] sm:$0xff]  }
 0x67d   : > { %14330 = vmatpush3.bf16.msra.mxu1 %v15284_v12  ;;  %7000 = vmatprep.subr.bf16.mxu0 %v15287_v21  ;;  %v20356_v12 = vsel %vm682_vm0, %v7662_v30, %v7663_v46  ;;  %v20360_v21 = vsel %vm3685_vm9, %v7948_v9, %v7956_v2  ;;  %v15340_v46 = vld [vmem:[%s21461_s10 + $0x4f0] ss:$8 sps:$4 sm:$0xff]  }
 0x67e   : > { %14331 = vmatprep.subr.bf16.mxu1 %v15288_v7  ;;  %v15310_v7 = vld [vmem:[%s21461_s10 + $0x490] ss:$8 sps:$4 sm:$0xff]  }
 0x680   : > { %7001 = vmatpush1.bf16.msra.mxu0 %v15285_v10  ;;  %v15318_v10 = vld [vmem:[%s21463_s12 + $0x450] sm:$0xff]  }
 0x681   : > { %14332 = vmatpush3.bf16.msra.mxu1 %v15289_v33  ;;  %7002 = vmatprep.subr.bf16.mxu0 %v15292_v62  ;;  %v15315_v33 = vld [vmem:[%s21461_s10 + $0x4a0] ss:$8 sps:$4 sm:$0xff]   ;;  %v15319_v62 = vld [vmem:[%s21463_s12 + $0x410] sm:$0xff]  }
 0x682   : > { %v14185_v0 = vpop.f32.mrb[60].mxu1  ;;  %14333 = vmatprep.subr.bf16.mxu1 %v15293_v6  ;;  %v15322_v6 = vld [vmem:[%s21461_s10 + $0x4b4] ss:$8 sps:$4 sm:$0xff]  }
 0x683   : > { %v14186_v4 = vpop.f32.mrb[61].mxu1 }
 0x684   : > { %7003 = vmatpush1.bf16.msra.mxu0 %v15290_v63  ;;  %v20315_v38 = vadd.f32 %v14186_v4, %v14185_v0  ;;  %v14188_v29 = vpop.f32.mrb[62].mxu1  ;;  %v15324_v63 = vld [vmem:[%s21463_s12 + $0x418] sm:$0xff]   ;;  %v7879_v0 = vld [vmem:[#allocation3 + $0x30] sm:$0x1f] }
 0x685   : > { %14334 = vmatpush3.bf16.msra.mxu1 %v15294_v41  ;;  %v14189_v3 = vpop.f32.mrb[63].mxu1  ;;  %7004 = vmatprep.subr.bf16.mxu0 %v15297_v47  ;;  %v15328_v41 = vld [vmem:[%s21463_s12 + $0x460] sm:$0xff]   ;;  %v7877_v47 = vld [vmem:[#allocation3 + $0x10] sm:$0xe0] }
 0x686   : > { %v20326_v51 = vadd.f32 %v14189_v3, %v14188_v29  ;;  %14335 = vmatprep.subr.bf16.mxu1 %v15298_v20  ;;  %v15325_v20 = vld [vmem:[%s21461_s10 + $0x4c0] ss:$8 sps:$4 sm:$0xff]   ;;  %v15332_v4 = vld [vmem:[%s21461_s10 + $0x4d4] ss:$8 sps:$4 sm:$0xff]   ;;  %v7881_v22 = vmul.f32 %v7877_v47, %v19499_v48  ;;  %v7885_v29 = vmul.f32 %v7879_v0, %v19502_v26  ;;  %v15337_v26 = vld [vmem:[%s21461_s10 + $0x4e4] ss:$8 sps:$4 sm:$0xff]  }
 0x687   : > { %v15334_v48 = vld [vmem:[%s21463_s12 + $0x428] sm:$0xff]  }
 0x688   : > { %7005 = vmatpush1.bf16.msra.mxu0 %v15295_v37  ;;  %v15333_v37 = vld [vmem:[%s21463_s12 + $0x468] sm:$0xff]   ;;  %v7887_v40 = vpack.c.bf16 %v19655_v59, %v7881_v22  ;;  %v7889_v3 = vpack.c.bf16 %v7885_v29, %v7885_v29  ;;  %v15338_v59 = vld [vmem:[%s21463_s12 + $0x470] sm:$0xff]  }
 0x689   : > { %14336 = vmatpush3.bf16.msra.mxu1 %v15299_v60  ;;  %7006 = vmatprep.subr.bf16.mxu0 %v15302_v49  ;;  %v15363_v0 = vld [vmem:[%s21461_s10 + $0x560] ss:$8 sps:$4 sm:$0xff]  }
 0x68a   : > { %14337 = vmatprep.subr.bf16.mxu1 %v15303_v23  ;;  %v7925_v23 = vshrl.u32 %v7887_v40, 16  ;;  %v7928_v57 = vshll.u32 %v7887_v40, 16  ;;  %v7933_v56 = vshrl.u32 %v7889_v3, 16  ;;  %v7936_v18 = vshll.u32 %v7889_v3, 16  ;;  %v15371_v40 = vld [vmem:[%s21461_s10 + $0x584] ss:$8 sps:$4 sm:$0xff]  }
 0x68b   : > { %v15377_v3 = vld [vmem:[%s21461_s10 + $0x5a4] ss:$8 sps:$4 sm:$0xff]  }
 0x68c   : > { %7007 = vmatpush1.bf16.msra.mxu0 %v15300_v24  ;;  %v15342_v24 = vld [vmem:[%s21461_s10 + $0x4f4] ss:$8 sps:$4 sm:$0xff]   ;;  %v7927_v61 = vrot.slane %v7925_v23, 2  ;;  %v7930_v43 = vrot.slane %v7928_v57, 3  ;;  %v7935_v9 = vrot.slane %v7933_v56, 2 }
 0x68d   : > { %14338 = vmatpush3.bf16.msra.mxu1 %v15304_v45  ;;  %7008 = vmatprep.subr.bf16.mxu0 %v15307_v5  ;;  %v15383_v23 = vld [vmem:[%s21461_s10 + $0x5c4] ss:$8 sps:$4 sm:$0xff]   ;;  %v15381_v57 = vld [vmem:[%s21461_s10 + $0x5c0] ss:$8 sps:$4 sm:$0xff]  }
 0x68e   : > { %14345 = vmatprep.subr.bf16.mxu1 %v15308_v28  ;;  %v15343_v28 = vld [vmem:[%s21463_s12 + $0x478] sm:$0xff]   ;;  %v7931_v2 = vor.u32 %v7930_v43, %v7927_v61 }
 0x68f   : > { %v15390_v43 = vld [vmem:[%s21461_s10 + $0x5f0] ss:$8 sps:$4 sm:$0xff]  }
 0x690   : > { %9548 = vmatmul.mubr.bf16.vlgmr.msra.gmra.mrb[88].mxu1 %v20356_v12  ;;  %7009 = vmatpush1.bf16.msra.mxu0 %v15305_v58  ;;  %v15347_v58 = vld [vmem:[%s21461_s10 + $0x504] ss:$8 sps:$4 sm:$0xff]  }
 0x691   : > { %14346 = vmatpush3.bf16.msra.mxu1 %v15309_v14  ;;  %9719 = vmatprep.mubr.bf16.mxu1 %v20360_v21  ;;  %v7938_v14 = vrot.slane %v7936_v18, 3 }
 0x692   : > { %7010 = vmatprep.subr.bf16.mxu0 %v15312_v16  ;;  %14347 = vmatprep.subr.bf16.mxu1 %v15313_v54  ;;  %v15350_v54 = vld [vmem:[%s21461_s10 + $0x514] ss:$8 sps:$4 sm:$0xff]  }
 0x693   : > { %v7939_v16 = vor.u32 %v7938_v14, %v7935_v9  ;;  %v15396_v9 = vld [vmem:[%s21461_s10 + $0x610] ss:$8 sps:$4 sm:$0xff]   ;;  %v15401_v14 = vld [vmem:[%s21461_s10 + $0x624] ss:$8 sps:$4 sm:$0xff]  }
 0x694   : > { %7011 = vmatpush1.bf16.msra.mxu0 %v15310_v7 }
 0x695   : > { %14348 = vmatpush3.bf16.msra.mxu1 %v15314_v39  ;;  %7012 = vmatprep.subr.bf16.mxu0 %v15317_v32  ;;  %v20457_v7 = vsel %vm3685_vm9, %v7931_v2, %v7939_v16  ;;  %v15348_v39 = vld [vmem:[%s21461_s10 + $0x510] ss:$8 sps:$4 sm:$0xff]   ;;  %v15353_v32 = vld [vmem:[%s21461_s10 + $0x524] ss:$8 sps:$4 sm:$0xff]   ;;  %v15399_v2 = vld [vmem:[%s21461_s10 + $0x620] ss:$8 sps:$4 sm:$0xff]  }
 0x696   : > { %14349 = vmatprep.subr.bf16.mxu1 %v15318_v10  ;;  %v15356_v10 = vld [vmem:[%s21461_s10 + $0x534] ss:$8 sps:$4 sm:$0xff]   ;;  %v15402_v16 = vld [vmem:[%s21461_s10 + $0x630] ss:$8 sps:$4 sm:$0xff]  }
 0x698   : > { %7013 = vmatpush1.bf16.msra.mxu0 %v15315_v33  ;;  %v15359_v33 = vld [vmem:[%s21461_s10 + $0x544] ss:$8 sps:$4 sm:$0xff]  }
 0x699   : > { %14350 = vmatpush3.bf16.msra.mxu1 %v15319_v62  ;;  %7014 = vmatprep.subr.bf16.mxu0 %v15322_v6  ;;  %v15357_v62 = vld [vmem:[%s21461_s10 + $0x540] ss:$8 sps:$4 sm:$0xff]   ;;  %v15362_v6 = vld [vmem:[%s21461_s10 + $0x554] ss:$8 sps:$4 sm:$0xff]  }
 0x69a   : > { %14351 = vmatprep.subr.bf16.mxu1 %v15323_v34  ;;  %v15360_v34 = vld [vmem:[%s21461_s10 + $0x550] ss:$8 sps:$4 sm:$0xff]  }
 0x69c   : > { %7015 = vmatpush1.bf16.msra.mxu0 %v15320_v36  ;;  %v15365_v36 = vld [vmem:[%s21461_s10 + $0x564] ss:$8 sps:$4 sm:$0xff]  }
 0x69d   : > { %14352 = vmatpush3.bf16.msra.mxu1 %v15324_v63  ;;  %7016 = vmatprep.subr.bf16.mxu0 %v15327_v44 }
 0x69e   : > { %14353 = vmatprep.subr.bf16.mxu1 %v15328_v41 }
 0x6a0   : > { %7017 = vmatpush1.bf16.msra.mxu0 %v15325_v20 }
 0x6a1   : > { %14354 = vmatpush3.bf16.msra.mxu1 %v15329_v35  ;;  %7018 = vmatprep.subr.bf16.mxu0 %v15332_v4  ;;  %v15368_v35 = vld [vmem:[%s21461_s10 + $0x574] ss:$8 sps:$4 sm:$0xff]  }
 0x6a2   : > { %v14207_v60 = vpop.f32.mrb[64].mxu1  ;;  %14355 = vmatprep.subr.bf16.mxu1 %v15333_v37  ;;  %v15366_v37 = vld [vmem:[%s21461_s10 + $0x570] ss:$8 sps:$4 sm:$0xff]  }
 0x6a3   : > { %v14208_v49 = vpop.f32.mrb[65].mxu1 }
 0x6a4   : > { %v14209_v15 = vadd.f32 %v14208_v49, %v14207_v60  ;;  %7019 = vmatpush1.bf16.msra.mxu0 %v15330_v42  ;;  %v14210_v8 = vpop.f32.mrb[66].mxu1  ;;  %v15369_v42 = vld [vmem:[%s21461_s10 + $0x580] ss:$8 sps:$4 sm:$0xff]   ;;  %v15378_v49 = vld [vmem:[%s21461_s10 + $0x5b0] ss:$8 sps:$4 sm:$0xff]  }
 0x6a5   : > { %14356 = vmatpush3.bf16.msra.mxu1 %v15334_v48  ;;  %v14211_v11 = vpop.f32.mrb[67].mxu1  ;;  %7020 = vmatprep.subr.bf16.mxu0 %v15337_v26  ;;  %v15374_v48 = vld [vmem:[%s21461_s10 + $0x594] ss:$8 sps:$4 sm:$0xff]   ;;  %v15372_v26 = vld [vmem:[%s21461_s10 + $0x590] ss:$8 sps:$4 sm:$0xff]  }
 0x6a6   : > { %v8520_v45 = vadd.f32 %v14209_v15, %v20315_v38  ;;  %v14212_v5 = vadd.f32 %v14211_v11, %v14210_v8  ;;  %14357 = vmatprep.subr.bf16.mxu1 %v15338_v59  ;;  %v15344_v38 = vld [vmem:[%s21463_s12 + $0x438] sm:$0xff]   ;;  %v15375_v60 = vld [vmem:[%s21461_s10 + $0x5a0] ss:$8 sps:$4 sm:$0xff]  }
 0x6a7   : > { %v15380_v59 = vld [vmem:[%s21461_s10 + $0x5b4] ss:$8 sps:$4 sm:$0xff]   ;;  %v15384_v8 = vld [vmem:[%s21461_s10 + $0x5d0] ss:$8 sps:$4 sm:$0xff]  }
 0x6a8   : > { %v8523_v30 = vadd.f32 %v14212_v5, %v20326_v51  ;;  %7021 = vmatpush1.bf16.msra.mxu0 %v15335_v55  ;;  %v15345_v51 = vld [vmem:[%s21461_s10 + $0x500] ss:$8 sps:$4 sm:$0xff]   ;;  %v15386_v15 = vld [vmem:[%s21461_s10 + $0x5d4] ss:$8 sps:$4 sm:$0xff]   ;;  %v15389_v55 = vld [vmem:[%s21461_s10 + $0x5e4] ss:$8 sps:$4 sm:$0xff]  }
 0x6a9   : > { %14358 = vmatpush3.bf16.msra.mxu1 %v15339_v19  ;;  %7022 = vmatprep.subr.bf16.mxu0 %v15342_v24  ;;  %v15387_v24 = vld [vmem:[%s21461_s10 + $0x5e0] ss:$8 sps:$4 sm:$0xff]  }
 0x6aa   : > { %14359 = vmatprep.subr.bf16.mxu1 %v15343_v28 }
 0x6ac   : > { %7023 = vmatpush1.bf16.msra.mxu0 %v15340_v46  ;;  %v15395_v46 = vld [vmem:[%s21461_s10 + $0x604] ss:$8 sps:$4 sm:$0xff]  }
 0x6ad   : > { %14360 = vmatpush3.bf16.msra.mxu1 %v15344_v38  ;;  %7280 = vmatprep.subr.bf16.mxu0 %v15347_v58  ;;  %v15393_v38 = vld [vmem:[%s21461_s10 + $0x600] ss:$8 sps:$4 sm:$0xff]   ;;  %v15398_v58 = vld [vmem:[%s21461_s10 + $0x614] ss:$8 sps:$4 sm:$0xff]  }
 0x6af   : > { %7025 = vmatmul.mubr.bf16.vlgmr.msra.gmra.mrb[108].mxu0 %v20016_v17  ;;  %v15351_v17 = vld [vmem:[%s21461_s10 + $0x520] ss:$8 sps:$4 sm:$0xff]  }
 0x6b0   : > { %9720 = vmatmul.mubr.bf16.vlgmr.msra.gmra.mrb[92].mxu1 %v20457_v7  ;;  %7281 = vmatpush1.bf16.msra.mxu0 %v15345_v51  ;;  %v15500_v51 = vld [vmem:[%s21465_s14 + $0x84] ss:$8 sps:$4 sm:$0xff]  }
 0x6b1   : > { %7312 = vmatprep.mubr.bf16.mxu0 %v20031_v50  ;;  %7282 = vmatprep.subr.bf16.mxu0 %v15350_v54  ;;  %v15354_v50 = vld [vmem:[%s21461_s10 + $0x530] ss:$8 sps:$4 sm:$0xff]   ;;  %v15407_v54 = vld [vmem:[%s21461_s10 + $0x644] ss:$8 sps:$4 sm:$0xff]  }
 0x6b2   : > { %9908 = vmatprep.mubr.bf16.mxu1 %v21575_v13  ;;  %9876 = vmatprep.subr.bf16.mxu1 %v15500_v51 }
 0x6b4   : > { %7283 = vmatpush1.bf16.msra.mxu0 %v15348_v39  ;;  %v15504_v39 = vld [vmem:[%s21465_s14 + $0x90] ss:$8 sps:$4 sm:$0xff]  }
 0x6b5   : > { %7284 = vmatprep.subr.bf16.mxu0 %v15353_v32  ;;  %v15506_v32 = vld [vmem:[%s21465_s14 + $0x94] ss:$8 sps:$4 sm:$0xff]  }
 0x6b8   : > { %7285 = vmatpush1.bf16.msra.mxu0 %v15351_v17  ;;  %v15405_v17 = vld [vmem:[%s21461_s10 + $0x640] ss:$8 sps:$4 sm:$0xff]  }
 0x6b9   : > { %7286 = vmatprep.subr.bf16.mxu0 %v15356_v10  ;;  %v15410_v10 = vld [vmem:[%s21461_s10 + $0x654] ss:$8 sps:$4 sm:$0xff]  }
 0x6bc   : > { %7287 = vmatpush1.bf16.msra.mxu0 %v15354_v50  ;;  %v15510_v50 = vld [vmem:[%s21465_s14 + $0xa0] ss:$8 sps:$4 sm:$0xff]  }
 0x6bd   : > { %7288 = vmatprep.subr.bf16.mxu0 %v15359_v33  ;;  %v15512_v33 = vld [vmem:[%s21465_s14 + $0xa4] ss:$8 sps:$4 sm:$0xff]  }
 0x6c0   : > { %7289 = vmatpush1.bf16.msra.mxu0 %v15357_v62  ;;  %v15408_v62 = vld [vmem:[%s21461_s10 + $0x650] ss:$8 sps:$4 sm:$0xff]  }
 0x6c1   : > { %7290 = vmatprep.subr.bf16.mxu0 %v15362_v6  ;;  %v15413_v6 = vld [vmem:[%s21461_s10 + $0x664] ss:$8 sps:$4 sm:$0xff]  }
 0x6c2   : > { %v14229_v63 = vpop.f32.mrb[68].mxu1 }
 0x6c3   : > { %v14230_v44 = vpop.f32.mrb[69].mxu1 }
 0x6c4   : > { %v14231_v41 = vadd.f32 %v14230_v44, %v14229_v63  ;;  %7291 = vmatpush1.bf16.msra.mxu0 %v15360_v34  ;;  %v14232_v47 = vpop.f32.mrb[70].mxu1  ;;  %v15411_v63 = vld [vmem:[%s21461_s10 + $0x660] ss:$8 sps:$4 sm:$0xff]  }
 0x6c5   : > { %v14233_v20 = vpop.f32.mrb[71].mxu1  ;;  %7292 = vmatprep.subr.bf16.mxu0 %v15365_v36 }
 0x6c6   : > { %v8696_v4 = vadd.f32 %v14231_v41, %v8520_v45  ;;  %v14234_v22 = vadd.f32 %v14233_v20, %v14232_v47  ;;  %v15392_v45 = vld [vmem:[%s21461_s10 + $0x5f4] ss:$8 sps:$4 sm:$0xff]  }
 0x6c7   : > { %v15416_v47 = vld [vmem:[%s21461_s10 + $0x674] ss:$8 sps:$4 sm:$0xff]  }
 0x6c8   : > { %v8697_v29 = vadd.f32 %v14234_v22, %v8523_v30  ;;  %7293 = vmatpush1.bf16.msra.mxu0 %v15363_v0 }
 0x6c9   : > { %7294 = vmatprep.subr.bf16.mxu0 %v15368_v35 }
 0x6cc   : > { %7295 = vmatpush1.bf16.msra.mxu0 %v15366_v37  ;;  %v15417_v37 = vld [vmem:[%s21461_s10 + $0x680] ss:$8 sps:$4 sm:$0xff]  }
 0x6cd   : > { %7296 = vmatprep.subr.bf16.mxu0 %v15371_v40  ;;  %v15422_v40 = vld [vmem:[%s21461_s10 + $0x694] ss:$8 sps:$4 sm:$0xff]  }
 0x6d0   : > { %7297 = vmatpush1.bf16.msra.mxu0 %v15369_v42  ;;  %v15516_v42 = vld [vmem:[%s21465_s14 + $0xb0] ss:$8 sps:$4 sm:$0xff]  }
 0x6d1   : > { %7298 = vmatprep.subr.bf16.mxu0 %v15374_v48  ;;  %v15518_v48 = vld [vmem:[%s21465_s14 + $0xb4] ss:$8 sps:$4 sm:$0xff]  }
 0x6d4   : > { %7299 = vmatpush1.bf16.msra.mxu0 %v15372_v26  ;;  %v15420_v26 = vld [vmem:[%s21461_s10 + $0x690] ss:$8 sps:$4 sm:$0xff]  }
 0x6d5   : > { %7300 = vmatprep.subr.bf16.mxu0 %v15377_v3  ;;  %v15522_v3 = vld [vmem:[%s21465_s14 + $0xc0] ss:$8 sps:$4 sm:$0xff]  }
 0x6d8   : > { %7301 = vmatpush1.bf16.msra.mxu0 %v15375_v60  ;;  %v15524_v60 = vld [vmem:[%s21465_s14 + $0xc4] ss:$8 sps:$4 sm:$0xff]  }
 0x6d9   : > { %7302 = vmatprep.subr.bf16.mxu0 %v15380_v59  ;;  %v15425_v59 = vld [vmem:[%s21461_s10 + $0x6a4] ss:$8 sps:$4 sm:$0xff]  }
 0x6dc   : > { %7303 = vmatpush1.bf16.msra.mxu0 %v15378_v49  ;;  %v15530_v49 = vld [vmem:[%s21465_s14 + $0xd4] ss:$8 sps:$4 sm:$0xff]  }
 0x6dd   : > { %7304 = vmatprep.subr.bf16.mxu0 %v15383_v23  ;;  %v15423_v23 = vld [vmem:[%s21461_s10 + $0x6a0] ss:$8 sps:$4 sm:$0xff]  }
 0x6e0   : > { %7305 = vmatpush1.bf16.msra.mxu0 %v15381_v57  ;;  %v15528_v57 = vld [vmem:[%s21465_s14 + $0xd0] ss:$8 sps:$4 sm:$0xff]  }
 0x6e1   : > { %7306 = vmatprep.subr.bf16.mxu0 %v15386_v15  ;;  %v15428_v15 = vld [vmem:[%s21461_s10 + $0x6b4] ss:$8 sps:$4 sm:$0xff]  }
 0x6e3   : > { %v14251_v11 = vpop.f32.mrb[72].mxu1 }
 0x6e4   : > { %v14252_v19 = vpop.f32.mrb[73].mxu1  ;;  %7307 = vmatpush1.bf16.msra.mxu0 %v15384_v8  ;;  %v15536_v8 = vld [vmem:[%s21465_s14 + $0xe4] ss:$8 sps:$4 sm:$0xff]  }
 0x6e5   : > { %v14253_v56 = vadd.f32 %v14252_v19, %v14251_v11  ;;  %v14254_v18 = vpop.f32.mrb[74].mxu1  ;;  %7308 = vmatprep.subr.bf16.mxu0 %v15389_v55  ;;  %v15426_v55 = vld [vmem:[%s21461_s10 + $0x6b0] ss:$8 sps:$4 sm:$0xff]   ;;  %v15534_v11 = vld [vmem:[%s21465_s14 + $0xe0] ss:$8 sps:$4 sm:$0xff]  }
 0x6e6   : > { %v14255_v5 = vpop.f32.mrb[75].mxu1  ;;  %v15431_v19 = vld [vmem:[%s21461_s10 + $0x6c4] ss:$8 sps:$4 sm:$0xff]  }
 0x6e7   : > { %v8868_v28 = vadd.f32 %v14253_v56, %v8696_v4  ;;  %v14256_v61 = vadd.f32 %v14255_v5, %v14254_v18  ;;  %v15414_v4 = vld [vmem:[%s21461_s10 + $0x670] ss:$8 sps:$4 sm:$0xff]   ;;  %v15429_v56 = vld [vmem:[%s21461_s10 + $0x6c0] ss:$8 sps:$4 sm:$0xff]   ;;  %v15548_v5 = vld [vmem:[%s21465_s14 + $0x4] ss:$8 sps:$4 sm:$0xff]  }
 0x6e8   : > { %7309 = vmatpush1.bf16.msra.mxu0 %v15387_v24  ;;  %v15542_v24 = vld [vmem:[%s21465_s14 + $0xf4] ss:$8 sps:$4 sm:$0xff]   ;;  %v15540_v18 = vld [vmem:[%s21465_s14 + $0xf0] ss:$8 sps:$4 sm:$0xff]  }
 0x6e9   : > { %v8869_v30 = vadd.f32 %v14256_v61, %v8697_v29  ;;  %7310 = vmatprep.subr.bf16.mxu0 %v15392_v45  ;;  %v15419_v29 = vld [vmem:[%s21461_s10 + $0x684] ss:$8 sps:$4 sm:$0xff]   ;;  %v15434_v45 = vld [vmem:[%s21461_s10 + $0x6d4] ss:$8 sps:$4 sm:$0xff]  }
 0x6ea   : > { %v15437_v61 = vld [vmem:[%s21461_s10 + $0x6e4] ss:$8 sps:$4 sm:$0xff]  }
 0x6ec   : > { %7311 = vmatpush1.bf16.msra.mxu0 %v15390_v43 }
 0x6ed   : > { %7570 = vmatprep.subr.bf16.mxu0 %v15395_v46  ;;  %v15435_v46 = vld [vmem:[%s21461_s10 + $0x6e0] ss:$8 sps:$4 sm:$0xff]  }
 0x6ef   : > { %7313 = vmatmul.mubr.bf16.vlgmr.msra.gmra.mrb[108].mxu0 %v20135_v1  ;;  %v15404_v1 = vld [vmem:[%s21461_s10 + $0x634] ss:$8 sps:$4 sm:$0xff]  }
 0x6f0   : > { %7571 = vmatpush1.bf16.msra.mxu0 %v15393_v38  ;;  %7602 = vmatprep.mubr.bf16.mxu0 %v20139_v25  ;;  %v15498_v25 = vld [vmem:[%s21465_s14 + $0x80] ss:$8 sps:$4 sm:$0xff]  }
 0x6f1   : > { %7572 = vmatprep.subr.bf16.mxu0 %v15398_v58  ;;  %9877 = vmatpush1.bf16.msra.mxu1 %v15498_v25  ;;  %v15438_v25 = vld [vmem:[%s21461_s10 + $0x6f0] ss:$8 sps:$4 sm:$0xff]  }
 0x6f2   : > { %9878 = vmatprep.subr.bf16.mxu1 %v15506_v32  ;;  %v15444_v32 = vld [vmem:[%s21461_s10 + $0x710] ss:$8 sps:$4 sm:$0xff]  }
 0x6f4   : > { %7573 = vmatpush1.bf16.msra.mxu0 %v15396_v9  ;;  %v15440_v9 = vld [vmem:[%s21461_s10 + $0x6f4] ss:$8 sps:$4 sm:$0xff]  }
 0x6f5   : > { %7574 = vmatprep.subr.bf16.mxu0 %v15401_v14  ;;  %9879 = vmatpush1.bf16.msra.mxu1 %v15504_v39  ;;  %v15446_v39 = vld [vmem:[%s21461_s10 + $0x714] ss:$8 sps:$4 sm:$0xff]  }
 0x6f6   : > { %9880 = vmatprep.subr.bf16.mxu1 %v15512_v33  ;;  %v15453_v33 = vld [vmem:[%s21461_s10 + $0x740] ss:$8 sps:$4 sm:$0xff]  }
 0x6f8   : > { %7575 = vmatpush1.bf16.msra.mxu0 %v15399_v2 }
 0x6f9   : > { %7576 = vmatprep.subr.bf16.mxu0 %v15404_v1  ;;  %9881 = vmatpush1.bf16.msra.mxu1 %v15510_v50  ;;  %v15455_v50 = vld [vmem:[%s21461_s10 + $0x744] ss:$8 sps:$4 sm:$0xff]  }
 0x6fa   : > { %9882 = vmatprep.subr.bf16.mxu1 %v15518_v48  ;;  %v15468_v48 = vld [vmem:[%s21461_s10 + $0x790] ss:$8 sps:$4 sm:$0xff]  }
 0x6fc   : > { %7577 = vmatpush1.bf16.msra.mxu0 %v15402_v16  ;;  %v15443_v16 = vld [vmem:[%s21461_s10 + $0x704] ss:$8 sps:$4 sm:$0xff]  }
 0x6fd   : > { %7578 = vmatprep.subr.bf16.mxu0 %v15407_v54  ;;  %9883 = vmatpush1.bf16.msra.mxu1 %v15516_v42  ;;  %v15441_v54 = vld [vmem:[%s21461_s10 + $0x700] ss:$8 sps:$4 sm:$0xff]   ;;  %v15470_v42 = vld [vmem:[%s21461_s10 + $0x794] ss:$8 sps:$4 sm:$0xff]  }
 0x6fe   : > { %9884 = vmatprep.subr.bf16.mxu1 %v15524_v60  ;;  %v15476_v60 = vld [vmem:[%s21461_s10 + $0x7b4] ss:$8 sps:$4 sm:$0xff]  }
 0x700   : > { %7579 = vmatpush1.bf16.msra.mxu0 %v15405_v17  ;;  %v15449_v17 = vld [vmem:[%s21461_s10 + $0x724] ss:$8 sps:$4 sm:$0xff]  }
 0x701   : > { %7580 = vmatprep.subr.bf16.mxu0 %v15410_v10  ;;  %9885 = vmatpush1.bf16.msra.mxu1 %v15522_v3  ;;  %v15447_v10 = vld [vmem:[%s21461_s10 + $0x720] ss:$8 sps:$4 sm:$0xff]  }
 0x702   : > { %9886 = vmatprep.subr.bf16.mxu1 %v15530_v49  ;;  %v15471_v3 = vld [vmem:[%s21461_s10 + $0x7a0] ss:$8 sps:$4 sm:$0xff]   ;;  %v15479_v49 = vld [vmem:[%s21461_s10 + $0x7c4] ss:$8 sps:$4 sm:$0xff]  }
 0x703   : > { %v14273_v34 = vpop.f32.mrb[76].mxu1 }
 0x704   : > { %v14274_v36 = vpop.f32.mrb[77].mxu1  ;;  %7581 = vmatpush1.bf16.msra.mxu0 %v15408_v62  ;;  %v15458_v62 = vld [vmem:[%s21461_s10 + $0x754] ss:$8 sps:$4 sm:$0xff]  }
 0x705   : > { %v14275_v44 = vadd.f32 %v14274_v36, %v14273_v34  ;;  %v14276_v41 = vpop.f32.mrb[78].mxu1  ;;  %7582 = vmatprep.subr.bf16.mxu0 %v15413_v6  ;;  %9887 = vmatpush1.bf16.msra.mxu1 %v15528_v57  ;;  %v15456_v6 = vld [vmem:[%s21461_s10 + $0x750] ss:$8 sps:$4 sm:$0xff]   ;;  %v15461_v34 = vld [vmem:[%s21461_s10 + $0x764] ss:$8 sps:$4 sm:$0xff]  }
 0x706   : > { %v14277_v0 = vpop.f32.mrb[79].mxu1  ;;  %9888 = vmatprep.subr.bf16.mxu1 %v15536_v8  ;;  %v15482_v57 = vld [vmem:[%s21461_s10 + $0x7d4] ss:$8 sps:$4 sm:$0xff]   ;;  %v15485_v8 = vld [vmem:[%s21461_s10 + $0x7e4] ss:$8 sps:$4 sm:$0xff]  }
 0x707   : > { %v9040_v20 = vadd.f32 %v14275_v44, %v8868_v28  ;;  %v14278_v35 = vadd.f32 %v14277_v0, %v14276_v41  ;;  %v15432_v28 = vld [vmem:[%s21461_s10 + $0x6d0] ss:$8 sps:$4 sm:$0xff]   ;;  %v15459_v44 = vld [vmem:[%s21461_s10 + $0x760] ss:$8 sps:$4 sm:$0xff]   ;;  %v15464_v0 = vld [vmem:[%s21461_s10 + $0x774] ss:$8 sps:$4 sm:$0xff]  }
 0x708   : > { %7583 = vmatpush1.bf16.msra.mxu0 %v15411_v63 }
 0x709   : > { %v9041_v22 = vadd.f32 %v14278_v35, %v8869_v30  ;;  %7584 = vmatprep.subr.bf16.mxu0 %v15416_v47  ;;  %9889 = vmatpush1.bf16.msra.mxu1 %v15534_v11 }
 0x70a   : > { %9890 = vmatprep.subr.bf16.mxu1 %v15542_v24 }
 0x70c   : > { %7585 = vmatpush1.bf16.msra.mxu0 %v15414_v4 }
 0x70d   : > { %7586 = vmatprep.subr.bf16.mxu0 %v15419_v29  ;;  %9891 = vmatpush1.bf16.msra.mxu1 %v15540_v18  ;;  %v15488_v18 = vld [vmem:[%s21461_s10 + $0x7f4] ss:$8 sps:$4 sm:$0xff]  }
 0x70e   : > { %9999 = vmatprep.subr.bf16.mxu1 %v15548_v5 }
 0x710   : > { %7587 = vmatpush1.bf16.msra.mxu0 %v15417_v37  ;;  %v15467_v37 = vld [vmem:[%s21461_s10 + $0x784] ss:$8 sps:$4 sm:$0xff]  }
 0x711   : > { %7588 = vmatprep.subr.bf16.mxu0 %v15422_v40  ;;  %v15465_v40 = vld [vmem:[%s21461_s10 + $0x780] ss:$8 sps:$4 sm:$0xff]  }
 0x714   : > { %7589 = vmatpush1.bf16.msra.mxu0 %v15420_v26  ;;  %v15473_v26 = vld [vmem:[%s21461_s10 + $0x7a4] ss:$8 sps:$4 sm:$0xff]  }
 0x715   : > { %7590 = vmatprep.subr.bf16.mxu0 %v15425_v59  ;;  %v15474_v59 = vld [vmem:[%s21461_s10 + $0x7b0] ss:$8 sps:$4 sm:$0xff]  }
 0x718   : > { %7591 = vmatpush1.bf16.msra.mxu0 %v15423_v23  ;;  %v15477_v23 = vld [vmem:[%s21461_s10 + $0x7c0] ss:$8 sps:$4 sm:$0xff]  }
 0x719   : > { %7592 = vmatprep.subr.bf16.mxu0 %v15428_v15  ;;  %v15480_v15 = vld [vmem:[%s21461_s10 + $0x7d0] ss:$8 sps:$4 sm:$0xff]  }
 0x71c   : > { %7593 = vmatpush1.bf16.msra.mxu0 %v15426_v55 }
 0x71d   : > { %7594 = vmatprep.subr.bf16.mxu0 %v15431_v19  ;;  %v15483_v19 = vld [vmem:[%s21461_s10 + $0x7e0] ss:$8 sps:$4 sm:$0xff]  }
 0x720   : > { %7595 = vmatpush1.bf16.msra.mxu0 %v15429_v56 }
 0x721   : > { %7596 = vmatprep.subr.bf16.mxu0 %v15434_v45 }
 0x723   : > { %v14295_v43 = vpop.f32.mrb[80].mxu1 }
 0x724   : > { %v14296_v30 = vpop.f32.mrb[81].mxu1  ;;  %7597 = vmatpush1.bf16.msra.mxu0 %v15432_v28 }
 0x725   : > { %v14297_v38 = vadd.f32 %v14296_v30, %v14295_v43  ;;  %v14298_v58 = vpop.f32.mrb[82].mxu1  ;;  %7598 = vmatprep.subr.bf16.mxu0 %v15437_v61  ;;  %v15486_v61 = vld [vmem:[%s21461_s10 + $0x7f0] ss:$8 sps:$4 sm:$0xff]   ;;  %v15491_v30 = vld [vmem:[%s21461_s10 + $0x804] ss:$8 sps:$4 sm:$0xff]  }
 0x726   : > { %v14299_v14 = vpop.f32.mrb[83].mxu1 }
 0x727   : > { %v9212_v2 = vadd.f32 %v14297_v38, %v9040_v20  ;;  %v14300_v1 = vadd.f32 %v14299_v14, %v14298_v58  ;;  %v15494_v38 = vld [vmem:[%s21461_s10 + $0x814] ss:$8 sps:$4 sm:$0xff]   ;;  %v15492_v58 = vld [vmem:[%s21461_s10 + $0x810] ss:$8 sps:$4 sm:$0xff]   ;;  %v15495_v14 = vld [vmem:[%s21461_s10 + $0x820] ss:$8 sps:$4 sm:$0xff]  }
 0x728   : > { %7599 = vmatpush1.bf16.msra.mxu0 %v15435_v46  ;;  %v15489_v46 = vld [vmem:[%s21461_s10 + $0x800] ss:$8 sps:$4 sm:$0xff]  }
 0x729   : > { %v9213_v51 = vadd.f32 %v14300_v1, %v9041_v22  ;;  %7600 = vmatprep.subr.bf16.mxu0 %v15440_v9  ;;  %v15462_v22 = vld [vmem:[%s21461_s10 + $0x770] ss:$8 sps:$4 sm:$0xff]   ;;  %v15497_v9 = vld [vmem:[%s21461_s10 + $0x824] ss:$8 sps:$4 sm:$0xff]   ;;  %v15507_v1 = vld [vmem:[%s21461_s10 + $0x840] ss:$8 sps:$4 sm:$0xff]  }
 0x72c   : > { %7601 = vmatpush1.bf16.msra.mxu0 %v15438_v25  ;;  %v15515_v25 = vld [vmem:[%s21461_s10 + $0x854] ss:$8 sps:$4 sm:$0xff]  }
 0x72d   : > { %7830 = vmatprep.subr.bf16.mxu0 %v15443_v16  ;;  %v15521_v16 = vld [vmem:[%s21461_s10 + $0x864] ss:$8 sps:$4 sm:$0xff]  }
 0x72f   : > { %7603 = vmatmul.mubr.bf16.vlgmr.msra.gmra.mrb[108].mxu0 %v20241_v27  ;;  %v15452_v27 = vld [vmem:[%s21461_s10 + $0x734] ss:$8 sps:$4 sm:$0xff]  }
 0x730   : > { %7831 = vmatpush1.bf16.msra.mxu0 %v15441_v54  ;;  %7862 = vmatprep.mubr.bf16.mxu0 %v20252_v52  ;;  %v15450_v52 = vld [vmem:[%s21461_s10 + $0x730] ss:$8 sps:$4 sm:$0xff]  }
 0x731   : > { %7832 = vmatprep.subr.bf16.mxu0 %v15446_v39 }
 0x734   : > { %7833 = vmatpush1.bf16.msra.mxu0 %v15444_v32  ;;  %v15519_v32 = vld [vmem:[%s21461_s10 + $0x860] ss:$8 sps:$4 sm:$0xff]  }
 0x735   : > { %7834 = vmatprep.subr.bf16.mxu0 %v15449_v17 }
 0x738   : > { %7835 = vmatpush1.bf16.msra.mxu0 %v15447_v10 }
 0x739   : > { %7836 = vmatprep.subr.bf16.mxu0 %v15452_v27  ;;  %v15527_v27 = vld [vmem:[%s21461_s10 + $0x874] ss:$8 sps:$4 sm:$0xff]  }
 0x73c   : > { %7837 = vmatpush1.bf16.msra.mxu0 %v15450_v52  ;;  %v13078_v52 = vld [vmem:[%s21464_s13] ss:$0 sm:$0xff] }
 0x73d   : > { %7838 = vmatprep.subr.bf16.mxu0 %v15455_v50 }
 0x740   : > { %7839 = vmatpush1.bf16.msra.mxu0 %v15453_v33 }
 0x741   : > { %7840 = vmatprep.subr.bf16.mxu0 %v15458_v62 }
 0x743   : > { %v14317_v36 = vpop.f32.mrb[84].mxu1 }
 0x744   : > { %v14318_v63 = vpop.f32.mrb[85].mxu1  ;;  %7841 = vmatpush1.bf16.msra.mxu0 %v15456_v6  ;;  %v15525_v6 = vld [vmem:[%s21461_s10 + $0x870] ss:$8 sps:$4 sm:$0xff]  }
 0x745   : > { %v14319_v41 = vadd.f32 %v14318_v63, %v14317_v36  ;;  %v14320_v47 = vpop.f32.mrb[86].mxu1  ;;  %7842 = vmatprep.subr.bf16.mxu0 %v15461_v34  ;;  %v15533_v63 = vld [vmem:[%s21461_s10 + $0x884] ss:$8 sps:$4 sm:$0xff]  }
 0x746   : > { %v14321_v20 = vpop.f32.mrb[87].mxu1 }
 0x747   : > { %v9384_v35 = vadd.f32 %v14319_v41, %v9212_v2  ;;  %v14322_v4 = vadd.f32 %v14321_v20, %v14320_v47  ;;  %v15509_v2 = vld [vmem:[%s21461_s10 + $0x844] ss:$8 sps:$4 sm:$0xff]   ;;  %v15531_v47 = vld [vmem:[%s21461_s10 + $0x880] ss:$8 sps:$4 sm:$0xff]   ;;  %v15539_v20 = vld [vmem:[%s21461_s10 + $0x894] ss:$8 sps:$4 sm:$0xff]  }
 0x748   : > { %7843 = vmatpush1.bf16.msra.mxu0 %v15459_v44 }
 0x749   : > { %v9385_v29 = vadd.f32 %v14322_v4, %v9213_v51  ;;  %7844 = vmatprep.subr.bf16.mxu0 %v15464_v0  ;;  %v15513_v51 = vld [vmem:[%s21461_s10 + $0x850] ss:$8 sps:$4 sm:$0xff]  }
 0x74a   : > { %v15537_v4 = vld [vmem:[%s21461_s10 + $0x890] ss:$8 sps:$4 sm:$0xff]  }
 0x74c   : > { %7845 = vmatpush1.bf16.msra.mxu0 %v15462_v22  ;;  %v20863_v22 = vpop.permute.xlu0 %9749 }
 0x74d   : > { %7846 = vmatprep.subr.bf16.mxu0 %v15467_v37  ;;  %v15545_v37 = vld [vmem:[%s21461_s10 + $0x8a4] ss:$8 sps:$4 sm:$0xff]  }
 0x750   : > { %7847 = vmatpush1.bf16.msra.mxu0 %v15465_v40  ;;  %v15543_v40 = vld [vmem:[%s21461_s10 + $0x8a0] ss:$8 sps:$4 sm:$0xff]  }
 0x751   : > { %7848 = vmatprep.subr.bf16.mxu0 %v15470_v42  ;;  %v15546_v42 = vld [vmem:[%s21465_s14] ss:$8 sps:$4 sm:$0xff]  }
 0x754   : > { %7849 = vmatpush1.bf16.msra.mxu0 %v15468_v48  ;;  %v15551_v48 = vld [vmem:[%s21461_s10 + $0x8b4] ss:$8 sps:$4 sm:$0xff]  }
 0x755   : > { %7850 = vmatprep.subr.bf16.mxu0 %v15473_v26 }
 0x758   : > { %7851 = vmatpush1.bf16.msra.mxu0 %v15471_v3 }
 0x759   : > { %7852 = vmatprep.subr.bf16.mxu0 %v15476_v60 }
 0x75c   : > { %7853 = vmatpush1.bf16.msra.mxu0 %v15474_v59  ;;  %v20883_v59 = vpop.permute.xlu0 %10048 }
 0x75d   : > { %7854 = vmatprep.subr.bf16.mxu0 %v15479_v49 }
 0x760   : > { %7855 = vmatpush1.bf16.msra.mxu0 %v15477_v23 }
 0x761   : > { %7856 = vmatprep.subr.bf16.mxu0 %v15482_v57  ;;  %v15554_v57 = vld [vmem:[%s21465_s14 + $0x14] ss:$8 sps:$4 sm:$0xff]  }
 0x763   : > { %v14339_v55 = vpop.f32.mrb[88].mxu1 }
 0x764   : > { %v14340_v11 = vpop.f32.mrb[89].mxu1  ;;  %7857 = vmatpush1.bf16.msra.mxu0 %v15480_v15 }
 0x765   : > { %v14341_v24 = vadd.f32 %v14340_v11, %v14339_v55  ;;  %v14342_v56 = vpop.f32.mrb[90].mxu1  ;;  %7858 = vmatprep.subr.bf16.mxu0 %v15485_v8  ;;  %v15549_v55 = vld [vmem:[%s21461_s10 + $0x8b0] ss:$8 sps:$4 sm:$0xff]  }
 0x766   : > { %v14343_v45 = vpop.f32.mrb[91].mxu1 }
 0x767   : > { %v9556_v5 = vadd.f32 %v14341_v24, %v9384_v35  ;;  %v14344_v28 = vadd.f32 %v14343_v45, %v14342_v56  ;;  %v15552_v45 = vld [vmem:[%s21465_s14 + $0x10] ss:$8 sps:$4 sm:$0xff]  }
 0x768   : > { %7859 = vmatpush1.bf16.msra.mxu0 %v15483_v19 }
 0x769   : > { %v9557_v43 = vadd.f32 %v14344_v28, %v9385_v29  ;;  %7860 = vmatprep.subr.bf16.mxu0 %v15488_v18  ;;  %v20865_v29 = vpop.permute.xlu1 %9754  ;;  %v15557_v18 = vld [vmem:[%s21461_s10 + $0x8c4] ss:$8 sps:$4 sm:$0xff]  }
 0x76a   : > { %v15560_v28 = vld [vmem:[%s21465_s14 + $0x24] ss:$8 sps:$4 sm:$0xff]  }
 0x76c   : > { %7861 = vmatpush1.bf16.msra.mxu0 %v15486_v61 }
 0x76d   : > { %8120 = vmatprep.subr.bf16.mxu0 %v15491_v30  ;;  %v20885_v49 = vpop.permute.xlu1 %10053  ;;  %v15563_v30 = vld [vmem:[%s21461_s10 + $0x8d4] ss:$8 sps:$4 sm:$0xff]  }
 0x76f   : > { %7863 = vmatmul.mubr.bf16.vlgmr.msra.gmra.mrb[108].mxu0 %v20356_v12  ;;  %v15503_v12 = vld [vmem:[%s21461_s10 + $0x834] ss:$8 sps:$4 sm:$0xff]  }
 0x770   : > { %8121 = vmatpush1.bf16.msra.mxu0 %v15489_v46  ;;  %8152 = vmatprep.mubr.bf16.mxu0 %v20360_v21  ;;  %v15501_v21 = vld [vmem:[%s21461_s10 + $0x830] ss:$8 sps:$4 sm:$0xff]  }
 0x771   : > { %8122 = vmatprep.subr.bf16.mxu0 %v15494_v38  ;;  %v15558_v38 = vld [vmem:[%s21465_s14 + $0x20] ss:$8 sps:$4 sm:$0xff]  }
 0x774   : > { %8123 = vmatpush1.bf16.msra.mxu0 %v15492_v58  ;;  %v15566_v58 = vld [vmem:[%s21465_s14 + $0x34] ss:$8 sps:$4 sm:$0xff]  }
 0x775   : > { %8124 = vmatprep.subr.bf16.mxu0 %v15497_v9  ;;  %v15561_v9 = vld [vmem:[%s21461_s10 + $0x8d0] ss:$8 sps:$4 sm:$0xff]  }
 0x778   : > { %8125 = vmatpush1.bf16.msra.mxu0 %v15495_v14  ;;  %v15569_v14 = vld [vmem:[%s21461_s10 + $0x8e4] ss:$8 sps:$4 sm:$0xff]  }
 0x779   : > { %8126 = vmatprep.subr.bf16.mxu0 %v15503_v12  ;;  %v15564_v12 = vld [vmem:[%s21465_s14 + $0x30] ss:$8 sps:$4 sm:$0xff]  }
 0x77c   : > { %8127 = vmatpush1.bf16.msra.mxu0 %v15501_v21  ;;  %v15572_v21 = vld [vmem:[%s21465_s14 + $0x44] ss:$8 sps:$4 sm:$0xff]  }
 0x77d   : > { %8128 = vmatprep.subr.bf16.mxu0 %v15509_v2  ;;  %v15567_v2 = vld [vmem:[%s21461_s10 + $0x8e0] ss:$8 sps:$4 sm:$0xff]  }
 0x780   : > { %8129 = vmatpush1.bf16.msra.mxu0 %v15507_v1  ;;  %v15575_v1 = vld [vmem:[%s21461_s10 + $0x8f4] ss:$8 sps:$4 sm:$0xff]  }
 0x781   : > { %8130 = vmatprep.subr.bf16.mxu0 %v15515_v25  ;;  %v15570_v25 = vld [vmem:[%s21465_s14 + $0x40] ss:$8 sps:$4 sm:$0xff]  }
 0x783   : > { %v14361_v54 = vpop.f32.mrb[92].mxu1 }
 0x784   : > { %v14362_v39 = vpop.f32.mrb[93].mxu1  ;;  %8131 = vmatpush1.bf16.msra.mxu0 %v15513_v51  ;;  %v15578_v51 = vld [vmem:[%s21465_s14 + $0x54] ss:$8 sps:$4 sm:$0xff]  }
 0x785   : > { %v14363_v17 = vadd.f32 %v14362_v39, %v14361_v54  ;;  %v14364_v10 = vpop.f32.mrb[94].mxu1  ;;  %8132 = vmatprep.subr.bf16.mxu0 %v15521_v16  ;;  %v15573_v16 = vld [vmem:[%s21461_s10 + $0x8f0] ss:$8 sps:$4 sm:$0xff]   ;;  %v15581_v39 = vld [vmem:[%s21465_s14 + $0x64] ss:$8 sps:$4 sm:$0xff]  }
 0x786   : > { %v14365_v50 = vpop.f32.mrb[95].mxu1  ;;  %v15576_v54 = vld [vmem:[%s21465_s14 + $0x50] ss:$8 sps:$4 sm:$0xff]  }
 0x787   : > { %v9728_v33 = vadd.f32 %v14363_v17, %v9556_v5  ;;  %v14366_v62 = vadd.f32 %v14365_v50, %v14364_v10  ;;  %v15584_v17 = vld [vmem:[%s21465_s14 + $0x74] ss:$8 sps:$4 sm:$0xff]  }
 0x788   : > { %8133 = vmatpush1.bf16.msra.mxu0 %v15519_v32  ;;  %v15579_v32 = vld [vmem:[%s21465_s14 + $0x60] ss:$8 sps:$4 sm:$0xff]  }
 0x789   : > { %v9737_v34 = vadd.f32 %v13078_v52, %v9728_v33  ;;  %v9729_v36 = vadd.f32 %v14366_v62, %v9557_v43  ;;  %8134 = vmatprep.subr.bf16.mxu0 %v15527_v27  ;;  %v15555_v43 = vld [vmem:[%s21461_s10 + $0x8c0] ss:$8 sps:$4 sm:$0xff]   ;;  %v15582_v27 = vld [vmem:[%s21465_s14 + $0x70] ss:$8 sps:$4 sm:$0xff]  }
 0x78a   : > { %v15585_v62 = vld [vmem:[%s21465_s14 + $0x100] ss:$8 sps:$4 sm:$0xff]  }
 0x78b   : > { %v9739_v44 = vmax.f32 %v9737_v34, 0.0  ;;  %v9738_v41 = vadd.f32 %v13078_v52, %v9729_v36  ;;  %v15590_v34 = vld [vmem:[%s21465_s14 + $0x114] ss:$8 sps:$4 sm:$0xff]   ;;  %v15588_v36 = vld [vmem:[%s21465_s14 + $0x110] ss:$8 sps:$4 sm:$0xff]  }
 0x78c   : > { %8135 = vmatpush1.bf16.msra.mxu0 %v15525_v6 }
 0x78d   : > { %9741 = vst [vmem:[#allocation4 + $0x8] sm:$0xff] %v9739_v44  ;;  %v9740_v0 = vmax.f32 %v9738_v41, 0.0  ;;  %8136 = vmatprep.subr.bf16.mxu0 %v15533_v63  ;;  %v15593_v63 = vld [vmem:[%s21465_s14 + $0x124] ss:$8 sps:$4 sm:$0xff]   ;;  %v15596_v41 = vld [vmem:[%s21465_s14 + $0x134] ss:$8 sps:$4 sm:$0xff]  }
 0x78f   : > { %9742 = vst [vmem:[#allocation4 + $0x10] sm:$0xff] %v9740_v0  ;;  %v20858_v35 = vpack.c.bf16 %v9740_v0, %v9739_v44  ;;  %v15591_v44 = vld [vmem:[%s21465_s14 + $0x120] ss:$8 sps:$4 sm:$0xff]   ;;  %v15599_v0 = vld [vmem:[%s21465_s14 + $0x144] ss:$8 sps:$4 sm:$0xff]  }
 0x790   : > { %8137 = vmatpush1.bf16.msra.mxu0 %v15531_v47  ;;  %v15594_v47 = vld [vmem:[%s21465_s14 + $0x130] ss:$8 sps:$4 sm:$0xff]  }
 0x791   : > { %8138 = vmatprep.subr.bf16.mxu0 %v15539_v20  ;;  %v15597_v20 = vld [vmem:[%s21465_s14 + $0x140] ss:$8 sps:$4 sm:$0xff]  }
 0x794   : > { %8139 = vmatpush1.bf16.msra.mxu0 %v15537_v4  ;;  %v9776_v26 = vld [vmem:[#allocation4 + $0x4] sm:$0xff]  ;;  %v15602_v4 = vld [vmem:[%s21465_s14 + $0x154] ss:$8 sps:$4 sm:$0xff]  }
 0x795   : > { %8140 = vmatprep.subr.bf16.mxu0 %v15545_v37  ;;  %v9743_v52 = vld [vmem:[#allocation4 + $0x3] sm:$0xff]  ;;  %v15600_v37 = vld [vmem:[%s21465_s14 + $0x150] ss:$8 sps:$4 sm:$0xff]  }
 0x796   : > { %v20879_v3 = vld [vmem:[#allocation4 + $0xc] sm:$0xff]  ;;  %v10945_v24 = vld [vmem:[#allocation4 + $0x15] sm:$0xff]  ;;  %v9757_v33 = vmul.f32 %v20863_v22, %v9743_v52  ;;  %v15639_v52 = vld [vmem:[%s21465_s14 + $0x220] ss:$8 sps:$4 sm:$0xff]  }
 0x797   : > { %v20881_v60 = vld [vmem:[#allocation4 + $0xd] sm:$0xff]  ;;  %v9778_v23 = vpack.c.bf16 %v20879_v3, %v9776_v26  ;;  %v20917_v61 = vmul.f32 %v10945_v24, %v20885_v49 }
 0x798   : > { %v10499_v15 = vld [vmem:[#allocation4 + $0x9] sm:$0xff]  ;;  %v10500_v8 = vld [vmem:[#allocation4 + $0x11] sm:$0xff]  ;;  %8141 = vmatpush1.bf16.msra.mxu0 %v15543_v40  ;;  %v20902_v56 = vmul.f32 %v20883_v59, %v20881_v60 }
 0x799   : > { %v20895_v11 = vmul.f32 %v10499_v15, %v20883_v59  ;;  %v20898_v19 = vmul.f32 %v10500_v8, %v20885_v49  ;;  %9909 = vmatmul.mubr.bf16.vlgmr.msra.gmra.mrb[96].mxu1 %v9778_v23  ;;  %8142 = vmatprep.subr.bf16.mxu0 %v15551_v48  ;;  %v20973_v10 = vld [vmem:[#allocation4 + $0xb] sm:$0xff]  ;;  %v15608_v48 = vld [vmem:[%s21465_s14 + $0x174] ss:$8 sps:$4 sm:$0xff]  }
 0x79a   : > { %10000 = vmatpush1.bf16.msra.mxu1 %v15546_v42  ;;  %10031 = vmatprep.mubr.bf16.mxu1 %v21575_v13  ;;  %v10948_v46 = vpack.c.bf16 %v20917_v61, %v20902_v56  ;;  %v9758_v50 = vmul.f32 %v20865_v29, %v20973_v10  ;;  %v15605_v40 = vld [vmem:[%s21465_s14 + $0x164] ss:$8 sps:$4 sm:$0xff]   ;;  %v15603_v42 = vld [vmem:[%s21465_s14 + $0x160] ss:$8 sps:$4 sm:$0xff]   ;;  %v15606_v26 = vld [vmem:[%s21465_s14 + $0x170] ss:$8 sps:$4 sm:$0xff]  }
 0x79b   : > { %v10503_v5 = vpack.c.bf16 %v20898_v19, %v20895_v11  ;;  %10001 = vmatprep.subr.bf16.mxu1 %v15554_v57  ;;  %v10042_v23 = vld [vmem:[#allocation4 + $0x5] sm:$0xff]  ;;  %v10057_v57 = vmul.f32 %v20885_v49, %v20881_v60  ;;  %v15612_v60 = vld [vmem:[%s21465_s14 + $0x190] ss:$8 sps:$4 sm:$0xff]   ;;  %v15692_v11 = vld [vmem:[%s21465_s14 + $0x334] ss:$8 sps:$4 sm:$0xff]  }
 0x79c   : > { %8143 = vmatpush1.bf16.msra.mxu0 %v15549_v55  ;;  %v9759_v6 = vpack.c.bf16 %v9758_v50, %v9757_v33  ;;  %v15611_v15 = vld [vmem:[%s21465_s14 + $0x184] ss:$8 sps:$4 sm:$0xff]   ;;  %v10056_v8 = vmul.f32 %v20883_v59, %v10042_v23  ;;  %v15609_v55 = vld [vmem:[%s21465_s14 + $0x180] ss:$8 sps:$4 sm:$0xff]   ;;  %v15644_v50 = vld [vmem:[%s21465_s14 + $0x234] ss:$8 sps:$4 sm:$0xff]  }
 0x79d   : > { %8144 = vmatprep.subr.bf16.mxu0 %v15557_v18  ;;  %v15614_v18 = vld [vmem:[%s21465_s14 + $0x194] ss:$8 sps:$4 sm:$0xff]   ;;  %v15617_v59 = vld [vmem:[%s21465_s14 + $0x1a4] ss:$8 sps:$4 sm:$0xff]   ;;  %v15615_v49 = vld [vmem:[%s21465_s14 + $0x1a0] ss:$8 sps:$4 sm:$0xff]  }
 0x79e   : > { %10002 = vmatpush1.bf16.msra.mxu1 %v15552_v45  ;;  %v10058_v24 = vpack.c.bf16 %v10057_v57, %v10056_v8  ;;  %v15620_v45 = vld [vmem:[%s21465_s14 + $0x1b4] ss:$8 sps:$4 sm:$0xff]   ;;  %v15647_v33 = vld [vmem:[%s21465_s14 + $0x244] ss:$8 sps:$4 sm:$0xff]   ;;  %v15663_v23 = vld [vmem:[%s21465_s14 + $0x2a0] ss:$8 sps:$4 sm:$0xff]  }
 0x79f   : > { %10003 = vmatprep.subr.bf16.mxu1 %v15560_v28  ;;  %v15618_v28 = vld [vmem:[%s21465_s14 + $0x1b0] ss:$8 sps:$4 sm:$0xff]   ;;  %v15668_v57 = vld [vmem:[%s21465_s14 + $0x2b4] ss:$8 sps:$4 sm:$0xff]  }
 0x7a0   : > { %8145 = vmatpush1.bf16.msra.mxu0 %v15555_v43  ;;  %v15623_v43 = vld [vmem:[%s21465_s14 + $0x1c4] ss:$8 sps:$4 sm:$0xff]   ;;  %v15759_v8 = vld [vmem:[%s21467_s16 + $0x58] sm:$0xff]  }
 0x7a1   : > { %8146 = vmatprep.subr.bf16.mxu0 %v15563_v30  ;;  %v15621_v30 = vld [vmem:[%s21465_s14 + $0x1c0] ss:$8 sps:$4 sm:$0xff]   ;;  %v15690_v19 = vld [vmem:[%s21465_s14 + $0x330] ss:$8 sps:$4 sm:$0xff]  }
 0x7a2   : > { %10004 = vmatpush1.bf16.msra.mxu1 %v15558_v38  ;;  %v15626_v38 = vld [vmem:[%s21465_s14 + $0x1d4] ss:$8 sps:$4 sm:$0xff]  }
 0x7a3   : > { %10005 = vmatprep.subr.bf16.mxu1 %v15566_v58  ;;  %v15624_v58 = vld [vmem:[%s21465_s14 + $0x1d0] ss:$8 sps:$4 sm:$0xff]  }
 0x7a4   : > { %8147 = vmatpush1.bf16.msra.mxu0 %v15561_v9  ;;  %v15629_v9 = vld [vmem:[%s21465_s14 + $0x1e4] ss:$8 sps:$4 sm:$0xff]   ;;  %v15767_v56 = vld [vmem:[%s21467_s16 + $0x78] sm:$0xff]  }
 0x7a5   : > { %8148 = vmatprep.subr.bf16.mxu0 %v15569_v14  ;;  %v15627_v14 = vld [vmem:[%s21465_s14 + $0x1e0] ss:$8 sps:$4 sm:$0xff]   ;;  %v15768_v61 = vld [vmem:[%s21467_s16 + $0x38] sm:$0xff]  }
 0x7a6   : > { %10006 = vmatpush1.bf16.msra.mxu1 %v15564_v12  ;;  %v15632_v12 = vld [vmem:[%s21465_s14 + $0x1f4] ss:$8 sps:$4 sm:$0xff]  }
 0x7a7   : > { %10007 = vmatprep.subr.bf16.mxu1 %v15572_v21  ;;  %v10204_v21 = vld [vmem:[#allocation4 + $0xf] sm:$0xff] }
 0x7a8   : > { %8149 = vmatpush1.bf16.msra.mxu0 %v15567_v2  ;;  %v15630_v2 = vld [vmem:[%s21465_s14 + $0x1f0] ss:$8 sps:$4 sm:$0xff]  }
 0x7a9   : > { %8150 = vmatprep.subr.bf16.mxu0 %v15575_v1  ;;  %v10203_v1 = vld [vmem:[#allocation4 + $0x7] sm:$0xff] }
 0x7aa   : > { %10008 = vmatpush1.bf16.msra.mxu1 %v15570_v25  ;;  %v10206_v25 = vmul.f32 %v10204_v21, %v20865_v29  ;;  %v15684_v21 = vld [vmem:[%s21465_s14 + $0x310] ss:$8 sps:$4 sm:$0xff]  }
 0x7ab   : > { %10009 = vmatprep.subr.bf16.mxu1 %v15578_v51  ;;  %v15635_v51 = vld [vmem:[%s21465_s14 + $0x204] ss:$8 sps:$4 sm:$0xff]  }
 0x7ac   : > { %8151 = vmatpush1.bf16.msra.mxu0 %v15573_v16  ;;  %v10205_v16 = vmul.f32 %v10203_v1, %v20863_v22  ;;  %v15687_v1 = vld [vmem:[%s21465_s14 + $0x320] ss:$8 sps:$4 sm:$0xff]  }
 0x7ae   : > { %10010 = vmatpush1.bf16.msra.mxu1 %v15576_v54  ;;  %v15633_v54 = vld [vmem:[%s21465_s14 + $0x200] ss:$8 sps:$4 sm:$0xff]  }
 0x7af   : > { %8153 = vmatmul.mubr.bf16.vlgmr.msra.gmra.mrb[108].mxu0 %v20457_v7  ;;  %10011 = vmatprep.subr.bf16.mxu1 %v15581_v39  ;;  %v15587_v7 = vld [vmem:[%s21465_s14 + $0x104] ss:$8 sps:$4 sm:$0xff]   ;;  %v10207_v39 = vpack.c.bf16 %v10206_v25, %v10205_v16  ;;  %v15693_v25 = vld [vmem:[%s21465_s14 + $0x340] ss:$8 sps:$4 sm:$0xff]   ;;  %v15696_v16 = vld [vmem:[%s21465_s14 + $0x350] ss:$8 sps:$4 sm:$0xff]  }
 0x7b2   : > { %10012 = vmatpush1.bf16.msra.mxu1 %v15579_v32  ;;  %v15638_v32 = vld [vmem:[%s21465_s14 + $0x214] ss:$8 sps:$4 sm:$0xff]  }
 0x7b3   : > { %10013 = vmatprep.subr.bf16.mxu1 %v15584_v17  ;;  %v15636_v17 = vld [vmem:[%s21465_s14 + $0x210] ss:$8 sps:$4 sm:$0xff]  }
 0x7b6   : > { %10014 = vmatpush1.bf16.msra.mxu1 %v15582_v27  ;;  %v15641_v27 = vld [vmem:[%s21465_s14 + $0x224] ss:$8 sps:$4 sm:$0xff]  }
 0x7b7   : > { %10156 = vmatprep.subr.bf16.mxu1 %v15587_v7  ;;  %v15642_v7 = vld [vmem:[%s21465_s14 + $0x230] ss:$8 sps:$4 sm:$0xff]  }
 0x7b9   : > { %10032 = vmatmul.mubr.bf16.vlgmr.msra.gmra.mrb[96].mxu1 %v9759_v6  ;;  %v15650_v6 = vld [vmem:[%s21465_s14 + $0x254] ss:$8 sps:$4 sm:$0xff]  }
 0x7ba   : > { %10157 = vmatpush1.bf16.msra.mxu1 %v15585_v62  ;;  %10188 = vmatprep.mubr.bf16.mxu1 %v21575_v13  ;;  %v15645_v62 = vld [vmem:[%s21465_s14 + $0x240] ss:$8 sps:$4 sm:$0xff]  }
 0x7bb   : > { %10158 = vmatprep.subr.bf16.mxu1 %v15590_v34  ;;  %v15648_v34 = vld [vmem:[%s21465_s14 + $0x250] ss:$8 sps:$4 sm:$0xff]  }
 0x7be   : > { %10159 = vmatpush1.bf16.msra.mxu1 %v15588_v36  ;;  %v15653_v36 = vld [vmem:[%s21465_s14 + $0x264] ss:$8 sps:$4 sm:$0xff]  }
 0x7bf   : > { %10160 = vmatprep.subr.bf16.mxu1 %v15593_v63  ;;  %v15651_v63 = vld [vmem:[%s21465_s14 + $0x260] ss:$8 sps:$4 sm:$0xff]  }
 0x7c2   : > { %10161 = vmatpush1.bf16.msra.mxu1 %v15591_v44  ;;  %v15656_v44 = vld [vmem:[%s21465_s14 + $0x274] ss:$8 sps:$4 sm:$0xff]  }
 0x7c3   : > { %10162 = vmatprep.subr.bf16.mxu1 %v15596_v41  ;;  %v15654_v41 = vld [vmem:[%s21465_s14 + $0x270] ss:$8 sps:$4 sm:$0xff]  }
 0x7c6   : > { %10163 = vmatpush1.bf16.msra.mxu1 %v15594_v47  ;;  %v15659_v47 = vld [vmem:[%s21465_s14 + $0x284] ss:$8 sps:$4 sm:$0xff]  }
 0x7c7   : > { %10164 = vmatprep.subr.bf16.mxu1 %v15599_v0  ;;  %v15657_v0 = vld [vmem:[%s21465_s14 + $0x280] ss:$8 sps:$4 sm:$0xff]  }
 0x7ca   : > { %10165 = vmatpush1.bf16.msra.mxu1 %v15597_v20  ;;  %v15662_v20 = vld [vmem:[%s21465_s14 + $0x294] ss:$8 sps:$4 sm:$0xff]  }
 0x7cb   : > { %10166 = vmatprep.subr.bf16.mxu1 %v15602_v4  ;;  %v15753_v4 = vld [vmem:[%s21467_s16 + $0x40] sm:$0xff]  }
 0x7cc   : > { %14367 = vmatprep.subr.bf16.mxu0 %v15753_v4  ;;  %v15728_v4 = vld [vmem:[%s21465_s14 + $0x3f4] ss:$8 sps:$4 sm:$0xff]  }
 0x7ce   : > { %10167 = vmatpush1.bf16.msra.mxu1 %v15600_v37  ;;  %v15754_v37 = vld [vmem:[%s21467_s16] sm:$0xff]  }
 0x7cf   : > { %10168 = vmatprep.subr.bf16.mxu1 %v15605_v40  ;;  %v15755_v40 = vld [vmem:[%s21467_s16 + $0x48] sm:$0xff]   ;;  %14368 = vmatpush3.bf16.msra.mxu0 %v15754_v37  ;;  %v15726_v37 = vld [vmem:[%s21465_s14 + $0x3f0] ss:$8 sps:$4 sm:$0xff]  }
 0x7d0   : > { %14369 = vmatprep.subr.bf16.mxu0 %v15755_v40  ;;  %v15731_v40 = vld [vmem:[%s21465_s14 + $0x404] ss:$8 sps:$4 sm:$0xff]  }
 0x7d2   : > { %10169 = vmatpush1.bf16.msra.mxu1 %v15603_v42  ;;  %v15660_v42 = vld [vmem:[%s21465_s14 + $0x290] ss:$8 sps:$4 sm:$0xff]  }
 0x7d3   : > { %10170 = vmatprep.subr.bf16.mxu1 %v15608_v48  ;;  %v15756_v48 = vld [vmem:[%s21467_s16 + $0x8] sm:$0xff]  }
 0x7d4   : > { %14370 = vmatpush3.bf16.msra.mxu0 %v15756_v48 }
 0x7d6   : > { %10171 = vmatpush1.bf16.msra.mxu1 %v15606_v26  ;;  %v15757_v26 = vld [vmem:[%s21467_s16 + $0x50] sm:$0xff]  }
 0x7d7   : > { %10305 = vmatprep.subr.bf16.mxu1 %v15611_v15  ;;  %v15758_v15 = vld [vmem:[%s21467_s16 + $0x10] sm:$0xff]   ;;  %14371 = vmatprep.subr.bf16.mxu0 %v15757_v26 }
 0x7d8   : > { %14372 = vmatpush3.bf16.msra.mxu0 %v15758_v15  ;;  %v15734_v26 = vld [vmem:[%s21465_s14 + $0x414] ss:$8 sps:$4 sm:$0xff]  }
 0x7d9   : > { %10189 = vmatmul.mubr.bf16.vlgmr.msra.gmra.mrb[96].mxu1 %v10058_v24  ;;  %v15671_v24 = vld [vmem:[%s21465_s14 + $0x2c4] ss:$8 sps:$4 sm:$0xff]   ;;  %14373 = vmatprep.subr.bf16.mxu0 %v15759_v8  ;;  %v15740_v15 = vld [vmem:[%s21465_s14 + $0x434] ss:$8 sps:$4 sm:$0xff]  }
 0x7da   : > { %10306 = vmatpush1.bf16.msra.mxu1 %v15609_v55  ;;  %10337 = vmatprep.mubr.bf16.mxu1 %v21575_v13  ;;  %v15666_v55 = vld [vmem:[%s21465_s14 + $0x2b0] ss:$8 sps:$4 sm:$0xff]  }
 0x7db   : > { %10307 = vmatprep.subr.bf16.mxu1 %v15614_v18  ;;  %v15760_v18 = vld [vmem:[%s21467_s16 + $0x18] sm:$0xff]  }
 0x7dc   : > { %14374 = vmatpush3.bf16.msra.mxu0 %v15760_v18 }
 0x7de   : > { %10308 = vmatpush1.bf16.msra.mxu1 %v15612_v60  ;;  %v15761_v60 = vld [vmem:[%s21467_s16 + $0x60] sm:$0xff]  }
 0x7df   : > { %10309 = vmatprep.subr.bf16.mxu1 %v15617_v59  ;;  %v15669_v59 = vld [vmem:[%s21465_s14 + $0x2c0] ss:$8 sps:$4 sm:$0xff]   ;;  %14375 = vmatprep.subr.bf16.mxu0 %v15761_v60 }
 0x7e2   : > { %10310 = vmatpush1.bf16.msra.mxu1 %v15615_v49  ;;  %v15674_v49 = vld [vmem:[%s21465_s14 + $0x2d4] ss:$8 sps:$4 sm:$0xff]  }
 0x7e3   : > { %10311 = vmatprep.subr.bf16.mxu1 %v15620_v45  ;;  %v15762_v45 = vld [vmem:[%s21467_s16 + $0x20] sm:$0xff]  }
 0x7e4   : > { %14376 = vmatpush3.bf16.msra.mxu0 %v15762_v45  ;;  %v15744_v45 = vld [vmem:[%s21465_s14 + $0x450] ss:$8 sps:$4 sm:$0xff]  }
 0x7e6   : > { %10312 = vmatpush1.bf16.msra.mxu1 %v15618_v28  ;;  %v15672_v28 = vld [vmem:[%s21465_s14 + $0x2d0] ss:$8 sps:$4 sm:$0xff]  }
 0x7e7   : > { %10313 = vmatprep.subr.bf16.mxu1 %v15623_v43  ;;  %v15677_v43 = vld [vmem:[%s21465_s14 + $0x2e4] ss:$8 sps:$4 sm:$0xff]  }
 0x7ea   : > { %10314 = vmatpush1.bf16.msra.mxu1 %v15621_v30  ;;  %v15675_v30 = vld [vmem:[%s21465_s14 + $0x2e0] ss:$8 sps:$4 sm:$0xff]  }
 0x7eb   : > { %10315 = vmatprep.subr.bf16.mxu1 %v15626_v38  ;;  %v15680_v38 = vld [vmem:[%s21465_s14 + $0x2f4] ss:$8 sps:$4 sm:$0xff]  }
 0x7ee   : > { %10316 = vmatpush1.bf16.msra.mxu1 %v15624_v58  ;;  %v15678_v58 = vld [vmem:[%s21465_s14 + $0x2f0] ss:$8 sps:$4 sm:$0xff]  }
 0x7ef   : > { %10317 = vmatprep.subr.bf16.mxu1 %v15629_v9  ;;  %v15683_v9 = vld [vmem:[%s21465_s14 + $0x304] ss:$8 sps:$4 sm:$0xff]  }
 0x7f2   : > { %10318 = vmatpush1.bf16.msra.mxu1 %v15627_v14  ;;  %v15681_v14 = vld [vmem:[%s21465_s14 + $0x300] ss:$8 sps:$4 sm:$0xff]  }
 0x7f3   : > { %10319 = vmatprep.subr.bf16.mxu1 %v15632_v12  ;;  %v15686_v12 = vld [vmem:[%s21465_s14 + $0x314] ss:$8 sps:$4 sm:$0xff]  }
 0x7f6   : > { %10320 = vmatpush1.bf16.msra.mxu1 %v15630_v2  ;;  %v15689_v2 = vld [vmem:[%s21465_s14 + $0x324] ss:$8 sps:$4 sm:$0xff]  }
 0x7f7   : > { %10452 = vmatprep.subr.bf16.mxu1 %v15635_v51  ;;  %v15698_v51 = vld [vmem:[%s21465_s14 + $0x354] ss:$8 sps:$4 sm:$0xff]  }
 0x7f9   : > { %10338 = vmatmul.mubr.bf16.vlgmr.msra.gmra.mrb[96].mxu1 %v10207_v39  ;;  %v15699_v39 = vld [vmem:[%s21465_s14 + $0x360] ss:$8 sps:$4 sm:$0xff]  }
 0x7fa   : > { %10453 = vmatpush1.bf16.msra.mxu1 %v15633_v54  ;;  %10484 = vmatprep.mubr.bf16.mxu1 %v21575_v13  ;;  %v15701_v54 = vld [vmem:[%s21465_s14 + $0x364] ss:$8 sps:$4 sm:$0xff]  }
 0x7fb   : > { %10454 = vmatprep.subr.bf16.mxu1 %v15638_v32  ;;  %v15704_v32 = vld [vmem:[%s21465_s14 + $0x374] ss:$8 sps:$4 sm:$0xff]  }
 0x7fe   : > { %10455 = vmatpush1.bf16.msra.mxu1 %v15636_v17  ;;  %v10649_v17 = vld [vmem:[#allocation4 + $0x13] sm:$0xff] }
 0x7ff   : > { %10456 = vmatprep.subr.bf16.mxu1 %v15641_v27  ;;  %v15702_v27 = vld [vmem:[%s21465_s14 + $0x370] ss:$8 sps:$4 sm:$0xff]  }
 0x802   : > { %10457 = vmatpush1.bf16.msra.mxu1 %v15639_v52  ;;  %v10650_v52 = vmul.f32 %v20863_v22, %v20973_v10  ;;  %v15708_v22 = vld [vmem:[%s21465_s14 + $0x390] ss:$8 sps:$4 sm:$0xff]   ;;  %v15711_v10 = vld [vmem:[%s21465_s14 + $0x3a0] ss:$8 sps:$4 sm:$0xff]  }
 0x803   : > { %10458 = vmatprep.subr.bf16.mxu1 %v15644_v50  ;;  %v10651_v50 = vmul.f32 %v10649_v17, %v20865_v29  ;;  %v15713_v29 = vld [vmem:[%s21465_s14 + $0x3a4] ss:$8 sps:$4 sm:$0xff]  }
 0x806   : > { %10459 = vmatpush1.bf16.msra.mxu1 %v15642_v7  ;;  %v15707_v7 = vld [vmem:[%s21465_s14 + $0x384] ss:$8 sps:$4 sm:$0xff]  }
 0x807   : > { %10460 = vmatprep.subr.bf16.mxu1 %v15647_v33  ;;  %v15705_v33 = vld [vmem:[%s21465_s14 + $0x380] ss:$8 sps:$4 sm:$0xff]  }
 0x80a   : > { %10461 = vmatpush1.bf16.msra.mxu1 %v15645_v62  ;;  %v10652_v62 = vpack.c.bf16 %v10651_v50, %v10650_v52 }
 0x80b   : > { %10462 = vmatprep.subr.bf16.mxu1 %v15650_v6  ;;  %v15710_v6 = vld [vmem:[%s21465_s14 + $0x394] ss:$8 sps:$4 sm:$0xff]  }
 0x80e   : > { %10463 = vmatpush1.bf16.msra.mxu1 %v15648_v34  ;;  %v15716_v34 = vld [vmem:[%s21465_s14 + $0x3b4] ss:$8 sps:$4 sm:$0xff]  }
 0x80f   : > { %10464 = vmatprep.subr.bf16.mxu1 %v15653_v36  ;;  %v15714_v36 = vld [vmem:[%s21465_s14 + $0x3b0] ss:$8 sps:$4 sm:$0xff]  }
 0x812   : > { %10465 = vmatpush1.bf16.msra.mxu1 %v15651_v63  ;;  %v15719_v63 = vld [vmem:[%s21465_s14 + $0x3c4] ss:$8 sps:$4 sm:$0xff]  }
 0x813   : > { %10466 = vmatprep.subr.bf16.mxu1 %v15656_v44  ;;  %v15717_v44 = vld [vmem:[%s21465_s14 + $0x3c0] ss:$8 sps:$4 sm:$0xff]  }
 0x816   : > { %10467 = vmatpush1.bf16.msra.mxu1 %v15654_v41  ;;  %v15722_v41 = vld [vmem:[%s21465_s14 + $0x3d4] ss:$8 sps:$4 sm:$0xff]  }
 0x817   : > { %10601 = vmatprep.subr.bf16.mxu1 %v15659_v47  ;;  %v15720_v47 = vld [vmem:[%s21465_s14 + $0x3d0] ss:$8 sps:$4 sm:$0xff]  }
 0x819   : > { %10485 = vmatmul.mubr.bf16.vlgmr.msra.gmra.mrb[96].mxu1 %v20858_v35  ;;  %v15665_v35 = vld [vmem:[%s21465_s14 + $0x2a4] ss:$8 sps:$4 sm:$0xff]  }
 0x81a   : > { %10602 = vmatpush1.bf16.msra.mxu1 %v15657_v0  ;;  %10633 = vmatprep.mubr.bf16.mxu1 %v21575_v13  ;;  %v15725_v0 = vld [vmem:[%s21465_s14 + $0x3e4] ss:$8 sps:$4 sm:$0xff]  }
 0x81b   : > { %10603 = vmatprep.subr.bf16.mxu1 %v15662_v20  ;;  %v15723_v20 = vld [vmem:[%s21465_s14 + $0x3e0] ss:$8 sps:$4 sm:$0xff]  }
 0x81e   : > { %10604 = vmatpush1.bf16.msra.mxu1 %v15660_v42  ;;  %v10798_v42 = vld [vmem:[#allocation4 + $0x14] sm:$0xff] }
 0x81f   : > { %10605 = vmatprep.subr.bf16.mxu1 %v15665_v35  ;;  %v15729_v35 = vld [vmem:[%s21465_s14 + $0x400] ss:$8 sps:$4 sm:$0xff]   ;;  %v10799_v48 = vpack.c.bf16 %v10798_v42, %v20879_v3 }
 0x820   : > { %v15735_v3 = vld [vmem:[%s21465_s14 + $0x420] ss:$8 sps:$4 sm:$0xff]  }
 0x822   : > { %10606 = vmatpush1.bf16.msra.mxu1 %v15663_v23  ;;  %v15732_v23 = vld [vmem:[%s21465_s14 + $0x410] ss:$8 sps:$4 sm:$0xff]  }
 0x823   : > { %10607 = vmatprep.subr.bf16.mxu1 %v15668_v57  ;;  %v15737_v57 = vld [vmem:[%s21465_s14 + $0x424] ss:$8 sps:$4 sm:$0xff]  }
 0x826   : > { %10608 = vmatpush1.bf16.msra.mxu1 %v15666_v55 }
 0x827   : > { %10609 = vmatprep.subr.bf16.mxu1 %v15671_v24  ;;  %v15743_v24 = vld [vmem:[%s21465_s14 + $0x444] ss:$8 sps:$4 sm:$0xff]  }
 0x82a   : > { %10610 = vmatpush1.bf16.msra.mxu1 %v15669_v59  ;;  %v15741_v59 = vld [vmem:[%s21465_s14 + $0x440] ss:$8 sps:$4 sm:$0xff]  }
 0x82b   : > { %10611 = vmatprep.subr.bf16.mxu1 %v15674_v49  ;;  %v15746_v49 = vld [vmem:[%s21465_s14 + $0x454] ss:$8 sps:$4 sm:$0xff]  }
 0x82e   : > { %10612 = vmatpush1.bf16.msra.mxu1 %v15672_v28  ;;  %v15749_v28 = vld [vmem:[%s21465_s14 + $0x464] ss:$8 sps:$4 sm:$0xff]  }
 0x82f   : > { %10613 = vmatprep.subr.bf16.mxu1 %v15677_v43  ;;  %v15747_v43 = vld [vmem:[%s21465_s14 + $0x460] ss:$8 sps:$4 sm:$0xff]  }
 0x832   : > { %10614 = vmatpush1.bf16.msra.mxu1 %v15675_v30  ;;  %v15752_v30 = vld [vmem:[%s21465_s14 + $0x474] ss:$8 sps:$4 sm:$0xff]  }
 0x833   : > { %10615 = vmatprep.subr.bf16.mxu1 %v15680_v38  ;;  %v15750_v38 = vld [vmem:[%s21465_s14 + $0x470] ss:$8 sps:$4 sm:$0xff]  }
 0x836   : > { %10616 = vmatpush1.bf16.msra.mxu1 %v15678_v58  ;;  %v15763_v58 = vld [vmem:[%s21467_s16 + $0x68] sm:$0xff]  }
 0x837   : > { %10750 = vmatprep.subr.bf16.mxu1 %v15683_v9  ;;  %14377 = vmatprep.subr.bf16.mxu0 %v15763_v58  ;;  %v15764_v9 = vld [vmem:[%s21467_s16 + $0x28] sm:$0xff]  }
 0x838   : > { %14378 = vmatpush3.bf16.msra.mxu0 %v15764_v9 }
 0x839   : > { %10634 = vmatmul.mubr.bf16.vlgmr.msra.gmra.mrb[96].mxu1 %v10503_v5  ;;  %v15695_v5 = vld [vmem:[%s21465_s14 + $0x344] ss:$8 sps:$4 sm:$0xff]  }
 0x83a   : > { %10751 = vmatpush1.bf16.msra.mxu1 %v15681_v14  ;;  %10782 = vmatprep.mubr.bf16.mxu1 %v21575_v13  ;;  %v15765_v14 = vld [vmem:[%s21467_s16 + $0x70] sm:$0xff]  }
 0x83b   : > { %10752 = vmatprep.subr.bf16.mxu1 %v15686_v12  ;;  %v15766_v12 = vld [vmem:[%s21467_s16 + $0x30] sm:$0xff]   ;;  %14379 = vmatprep.subr.bf16.mxu0 %v15765_v14 }
 0x83c   : > { %14380 = vmatpush3.bf16.msra.mxu0 %v15766_v12 }
 0x83d   : > { %14381 = vmatprep.subr.bf16.mxu0 %v15767_v56 }
 0x83e   : > { %10753 = vmatpush1.bf16.msra.mxu1 %v15684_v21  ;;  %v11093_v21 = vld [vmem:[%s21466_s15] sm:$0x3] }
 0x83f   : > { %10754 = vmatprep.subr.bf16.mxu1 %v15689_v2 }
 0x840   : > { %14382 = vmatpush3.bf16.msra.mxu0 %v15768_v61 }
 0x842   : > { %10755 = vmatpush1.bf16.msra.mxu1 %v15687_v1 }
 0x843   : > { %10756 = vmatprep.subr.bf16.mxu1 %v15692_v11  ;;  %v11098_v11 = vrot.slane %v11093_v21, %v21584_v53 }
 0x846   : > { %10757 = vmatpush1.bf16.msra.mxu1 %v15690_v19  ;;  %v11102_v19 = vrot.slane %v11093_v21, %v21585_v31 }
 0x847   : > { %10758 = vmatprep.subr.bf16.mxu1 %v15695_v5 }
 0x84a   : > { %10759 = vmatpush1.bf16.msra.mxu1 %v15693_v25 }
 0x84b   : > { %10760 = vmatprep.subr.bf16.mxu1 %v15698_v51 }
 0x84e   : > { %10761 = vmatpush1.bf16.msra.mxu1 %v15696_v16 }
 0x84f   : > { %10762 = vmatprep.subr.bf16.mxu1 %v15701_v54 }
 0x852   : > { %10763 = vmatpush1.bf16.msra.mxu1 %v15699_v39 }
 0x853   : > { %10764 = vmatprep.subr.bf16.mxu1 %v15704_v32 }
 0x856   : > { %10765 = vmatpush1.bf16.msra.mxu1 %v15702_v27 }
 0x857   : > { %10897 = vmatprep.subr.bf16.mxu1 %v15707_v7 }
 0x859   : > { %10783 = vmatmul.mubr.bf16.vlgmr.msra.gmra.mrb[96].mxu1 %v10652_v62 }
 0x85a   : > { %10898 = vmatpush1.bf16.msra.mxu1 %v15705_v33  ;;  %10929 = vmatprep.mubr.bf16.mxu1 %v21575_v13 }
 0x85b   : > { %10899 = vmatprep.subr.bf16.mxu1 %v15710_v6 }
 0x85e   : > { %10900 = vmatpush1.bf16.msra.mxu1 %v15708_v22 }
 0x85f   : > { %10901 = vmatprep.subr.bf16.mxu1 %v15713_v29 }
 0x862   : > { %10902 = vmatpush1.bf16.msra.mxu1 %v15711_v10 }
 0x863   : > { %10903 = vmatprep.subr.bf16.mxu1 %v15716_v34 }
 0x866   : > { %10904 = vmatpush1.bf16.msra.mxu1 %v15714_v36 }
 0x867   : > { %10905 = vmatprep.subr.bf16.mxu1 %v15719_v63 }
 0x86a   : > { %10906 = vmatpush1.bf16.msra.mxu1 %v15717_v44 }
 0x86b   : > { %10907 = vmatprep.subr.bf16.mxu1 %v15722_v41 }
 0x86e   : > { %10908 = vmatpush1.bf16.msra.mxu1 %v15720_v47 }
 0x86f   : > { %10909 = vmatprep.subr.bf16.mxu1 %v15725_v0 }
 0x872   : > { %10910 = vmatpush1.bf16.msra.mxu1 %v15723_v20  ;;  %v13353_v20 = vld [vmem:[%s21468_s17] ss:$0 sm:$0xff] }
 0x873   : > { %10911 = vmatprep.subr.bf16.mxu1 %v15728_v4 }
 0x876   : > { %10912 = vmatpush1.bf16.msra.mxu1 %v15726_v37 }
 0x877   : > { %11046 = vmatprep.subr.bf16.mxu1 %v15731_v40 }
 0x879   : > { %10930 = vmatmul.mubr.bf16.vlgmr.msra.gmra.mrb[96].mxu1 %v10799_v48 }
 0x87a   : > { %11047 = vmatpush1.bf16.msra.mxu1 %v15729_v35  ;;  %11078 = vmatprep.mubr.bf16.mxu1 %v21575_v13  ;;  %v15738_v13 = vld [vmem:[%s21465_s14 + $0x430] ss:$8 sps:$4 sm:$0xff]  }
 0x87b   : > { %11048 = vmatprep.subr.bf16.mxu1 %v15734_v26 }
 0x87e   : > { %11049 = vmatpush1.bf16.msra.mxu1 %v15732_v23 }
 0x87f   : > { %11050 = vmatprep.subr.bf16.mxu1 %v15737_v57 }
 0x882   : > { %11051 = vmatpush1.bf16.msra.mxu1 %v15735_v3  ;;  %v8154_v8 = vpop.f32.mrb[108].mxu0 }
 0x883   : > { %v8156_v55 = vpop.f32.mrb[109].mxu0  ;;  %11052 = vmatprep.subr.bf16.mxu1 %v15740_v15 }
 0x884   : > { %v8158_v18 = vpop.f32.mrb[110].mxu0 }
 0x885   : > { %v8160_v60 = vpop.f32.mrb[111].mxu0 }
 0x886   : > { %11053 = vmatpush1.bf16.msra.mxu1 %v15738_v13 }
 0x887   : > { %11054 = vmatprep.subr.bf16.mxu1 %v15743_v24 }
 0x88a   : > { %11055 = vmatpush1.bf16.msra.mxu1 %v15741_v59 }
 0x88b   : > { %11056 = vmatprep.subr.bf16.mxu1 %v15746_v49 }
 0x88e   : > { %11057 = vmatpush1.bf16.msra.mxu1 %v15744_v45 }
 0x88f   : > { %11058 = vmatprep.subr.bf16.mxu1 %v15749_v28 }
 0x892   : > { %11059 = vmatpush1.bf16.msra.mxu1 %v15747_v43 }
 0x893   : > { %11060 = vmatprep.subr.bf16.mxu1 %v15752_v30 }
 0x896   : > { %11061 = vmatpush1.bf16.msra.mxu1 %v15750_v38 }
 0x899   : > { %11079 = vmatmul.mubr.bf16.vlgmr.msra.gmra.mrb[96].mxu1 %v10948_v46  ;;  %v8167_v46 = vld [vmem:[%s21462_s11] sm:$0x3] }
 0x89a   : > { %v8172_v2 = vrot.slane %v8167_v46, %v21584_v53  ;;  %v8176_v1 = vrot.slane %v8167_v46, %v21585_v31 }
 0x89c   : > { %v8179_v5 = vadd.f32 %v8172_v2, %v8154_v8  ;;  %v8180_v25 = vadd.f32 %v8176_v1, %v8156_v55  ;;  %v8181_v16 = vadd.f32 %v8172_v2, %v8158_v18  ;;  %v8182_v32 = vadd.f32 %v8176_v1, %v8160_v60 }
 0x89e   : > { %v8183_v52 = vmax.f32 %v8179_v5, 0.0  ;;  %v8184_v62 = vmax.f32 %v8180_v25, 0.0  ;;  %v8185_v53 = vmax.f32 %v8181_v16, 0.0  ;;  %v8186_v10 = vmax.f32 %v8182_v32, 0.0 }
 0x96c   : > { %v11080_v51 = vpop.f32.mrb[96].mxu1 }
 0x96d   : > { %v11105_v54 = vadd.f32 %v11098_v11, %v11080_v51  ;;  %v11082_v39 = vpop.f32.mrb[97].mxu1 }
 0x96e   : > { %v11106_v17 = vadd.f32 %v11102_v19, %v11082_v39  ;;  %v11084_v27 = vpop.f32.mrb[98].mxu1 }
 0x96f   : > { %v11109_v50 = vmax.f32 %v11105_v54, 0.0  ;;  %v11107_v7 = vadd.f32 %v11098_v11, %v11084_v27  ;;  %v11086_v33 = vpop.f32.mrb[99].mxu1 }
 0x970   : > { %v11110_v6 = vmax.f32 %v11106_v17, 0.0  ;;  %v11108_v22 = vadd.f32 %v11102_v19, %v11086_v33 }
 0x971   : > { %v11113_v29 = vadd.f32 %v11109_v50, %v8183_v52  ;;  %v11111_v31 = vmax.f32 %v11107_v7, 0.0 }
 0x972   : > { %v11114_v34 = vadd.f32 %v11110_v6, %v8184_v62  ;;  %v11112_v36 = vmax.f32 %v11108_v22, 0.0 }
 0x973   : > { %v11115_v63 = vadd.f32 %v11111_v31, %v8185_v53 }
 0x974   : > { %v11116_v44 = vadd.f32 %v11112_v36, %v8186_v10 }
 0x975   : > { %v11117_v41 = vpack.c.bf16 %v11115_v63, %v11113_v29 }
 0x976   : > { %v11118_v47 = vpack.c.bf16 %v11116_v44, %v11114_v34 }
 0x978   : > { %11286 = vmatprep.mubr.bf16.mxu0 %v11118_v47 }
 0x979   : > { %11287 = vmatmul.mubr.bf16.vlgmr.msra.gmra.mrb[112].mxu0 %v11117_v41 }
 0xa4c   : > { %v14383_v0 = vpop.f32.mrb[112].mxu0 }
 0xa4d   : > { %v14384_v4 = vpop.f32.mrb[113].mxu0 }
 0xa4e   : > { %v14385_v37 = vadd.f32 %v14384_v4, %v14383_v0  ;;  %v14386_v40 = vpop.f32.mrb[114].mxu0 }
 0xa4f   : > { %v14387_v42 = vpop.f32.mrb[115].mxu0 }
 0xa50   : > { %v11289_v35 = vadd.f32 %v14385_v37, %v13353_v20  ;;  %v14388_v48 = vadd.f32 %v14387_v42, %v14386_v40 }
 0xa52   : > { %v11295_v26 = vmax.f32 %v11289_v35, 0.0  ;;  %v11292_v23 = vadd.f32 %v14388_v48, %v13353_v20 }
 0xa54   : > { %11297 = vst [vmem:[%s568_s27] sm:$0xff] %v11295_v26  ;;  %v11296_v57 = vmax.f32 %v11292_v23, 0.0 }
 0xa56   : > { %11298 = vst [vmem:[%s568_s27 + $0x8] sm:$0xff] %v11296_v57 }
 0xa57   : > { %16056 = shalt.err (!%p16053_p3)
}
 0xa58   : > { %s16057_s25 = scalar_lea.hbm %s21408_s21, 256  ;;  %s16061_s2 = scalar_lea.hbm %s21598_s23, 512 }
 0xa59   : > { %p16058_p4 = scmp.ne.s32.totalorder %s21408_s21, %s16057_s25  ;;  %p16062_p9 = scmp.lt.u32.totalorder %s21408_s21, %s21598_s23 }
 0xa5a   : > { %p16063_p10 = scmp.lt.u32.totalorder %s16061_s2, %s16057_s25  ;;  %p16065_p12 = scmp.lt.u32.totalorder %s16057_s25, %s21408_s21 }
 0xa5b   : > { %p16059_p7 = pnand %p16058_p4, %p16245_p5 }
 0xa5c   : > { %p16064_p11 = por %p16063_p10, %p16062_p9 }
 0xa5d   : > { %p16060_p8 = pneg %p16059_p7 }
 0xa5e   : > { %p16066_p13 = por %p16065_p12, %p16064_p11 }
 0xa60   : > { %p16067_p0 = pnand %p16066_p13, %p16060_p8 }
 0xa62   : > { %16070 = shalt.err (!%p16067_p0)
}
 0xa63   : > { %s16110_s20 = smov 128   ;;  %s16111_s19 = smov 8  }
 0xa64   : > { %14477 = dma.vmem_to_hbm [thread:$0]  (%p16245_p5), %s21403_s18, 256, %s21408_s21, %s21410_s24, %s16110_s20, %s16110_s20, %s16111_s19  }
 0xa65 PF: > { %s21599_s22 = sld [smem:[#allocation10_spill]]  ;;  %s21600_s27 = sld [smem:[#allocation8_spill]] }
 0xa6b   : > { %p14483_p1 = scmp.ge.s32.totalorder %s21599_s22, 2  ;;  %s11328_s29 = sand.u32 1, %s21600_s27  }
 0xa6c   : > { %s11329_s25 = scalar_lea.sflag [#allocation6], %s11328_s29 }
 0xa6d   : > { %p14480_p2 = pnand %p14483_p1, %p16249_p6 }
 0xa6f   : > { %16088 = dma.done.wait (!%p14480_p2), %s11329_s25, 256  }
 0xa70   : > { %16090 = vsyncadd (!%p14480_p2), %s11329_s25, 4294967040  ;;  %s21602_s30 = sld [smem:[#allocation11_spill]]  ;;  %s21603_s2 = sld [smem:[#allocation9_spill]] }
 0xa71   : > { %s21604_s29 = sld [smem:[#allocation12_spill]]  ;;  %s21605_s27 = smov %s16097_s28 }
 0xa76   : > { %p28_p3 = scmp.ge.s32.totalorder %s21602_s30, 4   ;;  %s21606_s28 = smov %s21603_s2 }
 0xa78   :  { %30 = sbr.rel (!%p28_p3) target bundleno = 8 (0x8), region = 169 }
 0xa7f   :  { %11334 = vsyncpa [#allocation6], 1 }
 0xa80   :  { %11336 = vsyncpa [#allocation6 + $0x1], 1 }

</bundles_post_ra>
